<compile_context>
chip_gen: v7x
topology: tpu7x:2x2x1
jax: 0.10.0
libtpu: 0.0.40
codegen_flags: <defaults>
</compile_context>

<pallas_src>
import functools

import jax
import jax.numpy as jnp
from jax.experimental import pallas as pl
from jax.experimental.pallas import tpu as pltpu


# ---------------------------------------------------------------------------
# small helpers
# ---------------------------------------------------------------------------
_TILE_M = 1024        # target rows per M tile (fits VMEM with double buffering
                      # on v5e / v6e / v7x at the channel counts used here)


def _round_up(x, m):
    return (x + m - 1) // m * m


def _cp(c):
    """Pad a channel count up to a lane multiple (128) for dense stores."""
    return _round_up(c, 128)


def _m_tiles(m):
    """Return (tile_m, m_padded); tile_m is a multiple of 16 (bf16 sublanes)."""
    if m <= _TILE_M:
        t = _round_up(m, 16)
        return t, t
    return _TILE_M, _round_up(m, _TILE_M)


def _vmem_limit(*buf_bytes):
    need = 2 * sum(buf_bytes) + (4 << 20)      # double buffering + headroom
    return int(min(max(need, 32 << 20), 56 << 20))


# ---------------------------------------------------------------------------
# Pallas kernel 1: (TILE_M, K) @ (K, Cp) matmul with fused BN-stat partials
# ---------------------------------------------------------------------------
def _matmul_stats_kernel(x_ref, w_ref, o_ref, st_ref):
    acc = jnp.dot(x_ref[...], w_ref[...], preferred_element_type=jnp.float32)
    o_ref[...] = acc
    s = jnp.sum(acc, axis=0, keepdims=True)            # (1, Cp)
    q = jnp.sum(acc * acc, axis=0, keepdims=True)      # (1, Cp)
    row = jax.lax.broadcasted_iota(jnp.int32, (8, acc.shape[1]), 0)
    st_ref[0] = jnp.where(row == 0, s, jnp.where(row == 1, q, 0.0))


# ---------------------------------------------------------------------------
# Pallas kernel 2: matmul + bias (+ ReLU)  -- used by the final conv
# ---------------------------------------------------------------------------
def _matmul_bias_kernel(x_ref, w_ref, b_ref, o_ref, *, apply_relu):
    acc = jnp.dot(x_ref[...], w_ref[...], preferred_element_type=jnp.float32)
    acc = acc + b_ref[...]
    if apply_relu:
        acc = jnp.maximum(acc, 0.0)
    o_ref[...] = acc.astype(o_ref.dtype)


# ---------------------------------------------------------------------------
# Pallas kernel 3: tiled BN apply  y = x*scale + shift (+ residual) (+ ReLU)
#                  output emitted in o_ref.dtype (bf16 activations)
# ---------------------------------------------------------------------------
def _affine_kernel(x_ref, s_ref, b_ref, o_ref, *, apply_relu):
    y = x_ref[...].astype(jnp.float32) * s_ref[...] + b_ref[...]
    if apply_relu:
        y = jnp.maximum(y, 0.0)
    o_ref[...] = y.astype(o_ref.dtype)


def _affine_res_kernel(x_ref, s_ref, b_ref, r_ref, o_ref, *, apply_relu):
    y = (x_ref[...].astype(jnp.float32) * s_ref[...] + b_ref[...]
         + r_ref[...].astype(jnp.float32))
    if apply_relu:
        y = jnp.maximum(y, 0.0)
    o_ref[...] = y.astype(o_ref.dtype)


# ---------------------------------------------------------------------------
# pallas_call wrappers
# ---------------------------------------------------------------------------
def matmul_stats(patches, w):
    """patches: (M, K) bf16, w: (K, Cp) bf16 ->
       (conv (M_pad, Cp) f32, sum (1, Cp) f32, sumsq (1, Cp) f32)."""
    m, k = patches.shape
    cp = w.shape[1]
    tile_m, m_pad = _m_tiles(m)
    if m_pad != m:
        patches = jnp.pad(patches, ((0, m_pad - m), (0, 0)))
    nt = m_pad // tile_m
    vmem = _vmem_limit(tile_m * k * 2, k * cp * 2, tile_m * cp * 4, 8 * cp * 4)
    out, stats = pl.pallas_call(
        _matmul_stats_kernel,
        out_shape=(jax.ShapeDtypeStruct((m_pad, cp), jnp.float32),
                   jax.ShapeDtypeStruct((nt, 8, cp), jnp.float32)),
        grid=(nt,),
        in_specs=[
            pl.BlockSpec((tile_m, k), lambda i: (i, 0)),
            pl.BlockSpec((k, cp), lambda i: (0, 0)),     # weights stay resident
        ],
        out_specs=(
            pl.BlockSpec((tile_m, cp), lambda i: (i, 0)),
            pl.BlockSpec((1, 8, cp), lambda i: (i, 0, 0)),
        ),
        compiler_params=pltpu.CompilerParams(
            dimension_semantics=("parallel",),
            vmem_limit_bytes=vmem),
    )(patches, w)
    tot = jnp.sum(stats, axis=0)        # (8, Cp): rows 0/1 hold sum / sumsq
    return out, tot[0:1], tot[1:2]


def matmul_bias_act(patches, w, bias, *, apply_relu):
    m, k = patches.shape
    cp = w.shape[1]
    tile_m, m_pad = _m_tiles(m)
    if m_pad != m:
        patches = jnp.pad(patches, ((0, m_pad - m), (0, 0)))
    nt = m_pad // tile_m
    vmem = _vmem_limit(tile_m * k * 2, k * cp * 2, cp * 4, tile_m * cp * 4)
    out = pl.pallas_call(
        functools.partial(_matmul_bias_kernel, apply_relu=apply_relu),
        out_shape=jax.ShapeDtypeStruct((m_pad, cp), jnp.float32),
        grid=(nt,),
        in_specs=[
            pl.BlockSpec((tile_m, k), lambda i: (i, 0)),
            pl.BlockSpec((k, cp), lambda i: (0, 0)),
            pl.BlockSpec((1, cp), lambda i: (0, 0)),
        ],
        out_specs=pl.BlockSpec((tile_m, cp), lambda i: (i, 0)),
        compiler_params=pltpu.CompilerParams(
            dimension_semantics=("parallel",),
            vmem_limit_bytes=vmem),
    )(patches, w, bias)
    return out[:m]


def bn_apply(x2d, scale, shift, residual=None, apply_relu=True,
             out_dtype=jnp.bfloat16):
    """x2d: (M, Cp) f32; scale/shift: (1, Cp) f32; residual optional (M, Cp).
       Returns (M, Cp) in out_dtype (bf16 activations by default)."""
    m, cp = x2d.shape
    tile_m, m_pad = _m_tiles(m)
    if m_pad != m:
        x2d = jnp.pad(x2d, ((0, m_pad - m), (0, 0)))
        if residual is not None:
            residual = jnp.pad(residual, ((0, m_pad - m), (0, 0)))
    nt = m_pad // tile_m
    out_bytes = jnp.dtype(out_dtype).itemsize
    vmem = _vmem_limit(tile_m * cp * 4, cp * 4, cp * 4,
                       tile_m * cp * 2, tile_m * cp * out_bytes)
    tile_spec = pl.BlockSpec((tile_m, cp), lambda i: (i, 0))
    vec_spec = pl.BlockSpec((1, cp), lambda i: (0, 0))
    if residual is None:
        kern = functools.partial(_affine_kernel, apply_relu=apply_relu)
        args = (x2d, scale, shift)
        in_specs = [tile_spec, vec_spec, vec_spec]
    else:
        kern = functools.partial(_affine_res_kernel, apply_relu=apply_relu)
        args = (x2d, scale, shift, residual)
        in_specs = [tile_spec, vec_spec, vec_spec, tile_spec]
    out = pl.pallas_call(
        kern,
        out_shape=jax.ShapeDtypeStruct((m_pad, cp), out_dtype),
        grid=(nt,),
        in_specs=in_specs,
        out_specs=tile_spec,
        compiler_params=pltpu.CompilerParams(
            dimension_semantics=("parallel",),
            vmem_limit_bytes=vmem),
    )(*args)
    return out[:m]


# ---------------------------------------------------------------------------
# layer glue (padding, im2col, BN scale/shift) — pure JAX indexing
# ---------------------------------------------------------------------------
def _bn_scale_shift(total_sum, total_sq, count, gamma, beta, eps=1e-5):
    mean = total_sum / count
    var = jnp.maximum(total_sq / count - mean * mean, 0.0)   # biased, as torch
    inv = jax.lax.rsqrt(var + eps)
    scale = gamma * inv
    shift = beta - mean * scale
    return scale, shift


def _im2col_3x3(x_pad, stride, ho, wo):
    """x_pad: (N, Hp, Wp, C) -> (N*ho*wo, 9*C), tap-major / channel-minor."""
    n = x_pad.shape[0]
    cols = []
    for ky in range(3):
        for kx in range(3):
            cols.append(x_pad[:, ky:ky + stride * (ho - 1) + 1:stride,
                                 kx:kx + stride * (wo - 1) + 1:stride, :])
    patches = jnp.concatenate(cols, axis=-1)
    return patches.reshape(n * ho * wo, patches.shape[-1])


def conv3x3_bn_act(x, w, gamma, beta, *, stride, pad_mode,
                   apply_relu=True, residual=None):
    """Pad -> Conv3x3 (no bias) -> BatchNorm(batch stats) (+res) (+ReLU)."""
    n, h, w_sp, _ = x.shape
    xb = x.astype(jnp.bfloat16)
    mode = 'reflect' if pad_mode == 'reflect' else 'constant'
    xp = jnp.pad(xb, ((0, 0), (1, 1), (1, 1), (0, 0)), mode=mode)
    ho = (h + 2 - 3) // stride + 1
    wo = (w_sp + 2 - 3) // stride + 1
    m = n * ho * wo
    patches = _im2col_3x3(xp, stride, ho, wo)
    conv, s, q = matmul_stats(patches, w)
    cp = conv.shape[1]
    scale, shift = _bn_scale_shift(s, q, m, gamma, beta)
    res2 = None if residual is None else residual.reshape(m, cp)
    y = bn_apply(conv[:m], scale, shift, residual=res2, apply_relu=apply_relu)
    return y.reshape(n, ho, wo, cp)


def resnet_block(x, w1, g1, b1, w2, g2, b2):
    h = conv3x3_bn_act(x, w1, g1, b1, stride=1, pad_mode='reflect',
                       apply_relu=True)
    return conv3x3_bn_act(h, w2, g2, b2, stride=1, pad_mode='reflect',
                          apply_relu=False, residual=x)


# 4-phase decomposition of ConvTranspose2d(k=3, s=2, p=1, output_padding=1):
# output parity (oy%2, ox%2) selects which input neighbours / kernel taps apply.
_PHASE_TAPS = (((0, 0),),
               ((0, 0), (0, 1)),
               ((0, 0), (1, 0)),
               ((0, 0), (0, 1), (1, 0), (1, 1)))


def conv_transpose3x3_bn_relu(x, w_phases, gamma, beta):
    n, h, w_sp, _ = x.shape
    cp = w_phases[0].shape[1]
    xb = x.astype(jnp.bfloat16)
    xp = jnp.pad(xb, ((0, 0), (0, 1), (0, 1), (0, 0)))   # bottom/right halo
    m = n * h * w_sp
    convs, s_tot, q_tot = [], 0.0, 0.0
    for taps, wp in zip(_PHASE_TAPS, w_phases):
        cols = [xp[:, dy:dy + h, dx:dx + w_sp, :] for (dy, dx) in taps]
        patches = jnp.concatenate(cols, axis=-1).reshape(m, -1)
        conv, s, q = matmul_stats(patches, wp)
        convs.append(conv[:m])
        s_tot = s_tot + s
        q_tot = q_tot + q
    count = n * (2 * h) * (2 * w_sp)                     # full output pixels
    scale, shift = _bn_scale_shift(s_tot, q_tot, count, gamma, beta)
    # BN is per-channel -> apply per parity phase, interleave in bf16.
    outs = [bn_apply(c, scale, shift, apply_relu=True).reshape(n, h, w_sp, cp)
            for c in convs]
    row_e = jnp.stack([outs[0], outs[1]], axis=3).reshape(n, h, 2 * w_sp, cp)
    row_o = jnp.stack([outs[2], outs[3]], axis=3).reshape(n, h, 2 * w_sp, cp)
    y = jnp.stack([row_e, row_o], axis=2).reshape(n, 2 * h, 2 * w_sp, cp)
    return y


def final_conv_relu(x, w, bias):
    n, h, w_sp, _ = x.shape
    xb = x.astype(jnp.bfloat16)
    xp = jnp.pad(xb, ((0, 0), (1, 1), (1, 1), (0, 0)), mode='reflect')
    patches = _im2col_3x3(xp, 1, h, w_sp)
    out = matmul_bias_act(patches, w, bias, apply_relu=True)
    return out.reshape(n, h, w_sp, -1)


# ---------------------------------------------------------------------------
# parameter packing / deterministic synthetic init (PyTorch module shapes;
# norm_layer = BatchNorm2d => use_bias=False everywhere except the final conv)
# ---------------------------------------------------------------------------
def _pack_conv_w(w_oihw, cin_pad, cout_pad):
    """Conv2d weight (Cout, Cin, 3, 3) -> (9*cin_pad, cout_pad) bf16."""
    cout, cin = w_oihw.shape[0], w_oihw.shape[1]
    w = jnp.transpose(w_oihw, (2, 3, 1, 0))                   # (3,3,Cin,Cout)
    w = jnp.pad(w, ((0, 0), (0, 0), (0, cin_pad - cin), (0, cout_pad - cout)))
    return w.reshape(9 * cin_pad, cout_pad).astype(jnp.bfloat16)


def _pack_convT_w(w_iohw, cin_pad, cout_pad):
    """ConvTranspose2d weight (Cin, Cout, 3, 3) -> 4 per-parity packed mats."""
    cin, cout = w_iohw.shape[0], w_iohw.shape[1]
    w = jnp.pad(w_iohw, ((0, cin_pad - cin), (0, cout_pad - cout),
                         (0, 0), (0, 0)))

    def g(ky, kx):
        return w[:, :, ky, kx]                                # (cin_pad, cout_pad)

    phases = (
        (g(1, 1),),
        (g(1, 2), g(1, 0)),
        (g(2, 1), g(0, 1)),
        (g(2, 2), g(2, 0), g(0, 2), g(0, 0)),
    )
    packed = []
    for taps in phases:
        wt = jnp.stack(taps, axis=0)                          # (T, cin, cout)
        packed.append(wt.reshape(-1, cout_pad).astype(jnp.bfloat16))
    return packed


def init_params(key, input_nc, output_nc, ngf, n_blocks):
    keys = iter(jax.random.split(key, 64))
    p = {}

    def bn_params(c):
        cpad = _cp(c)
        return (jnp.ones((1, cpad), jnp.float32),
                jnp.zeros((1, cpad), jnp.float32))

    def conv_w(k, cin, cout, cin_pad):
        w = jax.random.normal(k, (cout, cin, 3, 3), jnp.float32) * 0.05
        return _pack_conv_w(w, cin_pad, _cp(cout))

    # stem consumes the raw (un-padded) input channels
    p['stem_w'] = conv_w(next(keys), input_nc, ngf, input_nc)
    p['stem_g'], p['stem_b'] = bn_params(ngf)
    ch = ngf
    for i in range(2):
        p[f'down{i}_w'] = conv_w(next(keys), ch, ch * 2, _cp(ch))
        p[f'down{i}_g'], p[f'down{i}_b'] = bn_params(ch * 2)
        ch *= 2
    for i in range(n_blocks):
        p[f'blk{i}_w1'] = conv_w(next(keys), ch, ch, _cp(ch))
        p[f'blk{i}_g1'], p[f'blk{i}_b1'] = bn_params(ch)
        p[f'blk{i}_w2'] = conv_w(next(keys), ch, ch, _cp(ch))
        p[f'blk{i}_g2'], p[f'blk{i}_b2'] = bn_params(ch)
    for i in range(2):
        wt = jax.random.normal(next(keys), (ch, ch // 2, 3, 3), jnp.float32) * 0.05
        p[f'up{i}_w'] = _pack_convT_w(wt, _cp(ch), _cp(ch // 2))
        p[f'up{i}_g'], p[f'up{i}_b'] = bn_params(ch // 2)
        ch //= 2
    p['out_w'] = conv_w(next(keys), ngf, output_nc, _cp(ngf))
    ob = jax.random.normal(next(keys), (1, output_nc), jnp.float32) * 0.05
    p['out_b'] = jnp.pad(ob, ((0, 0), (0, _cp(output_nc) - output_nc)))
    return p


# ---------------------------------------------------------------------------
# full forward pass
# ---------------------------------------------------------------------------
def resnet_generator_forward(x_nchw, p, *, n_blocks, output_nc):
    x = jnp.transpose(x_nchw, (0, 2, 3, 1)).astype(jnp.float32)   # NHWC

    # stem: ReflectionPad(1) -> Conv3x3 -> BN -> ReLU
    x = conv3x3_bn_act(x, p['stem_w'], p['stem_g'], p['stem_b'],
                       stride=1, pad_mode='reflect')

    # 2x downsampling: Conv3x3(stride=2, zero pad 1) -> BN -> ReLU
    for i in range(2):
        x = conv3x3_bn_act(x, p[f'down{i}_w'], p[f'down{i}_g'], p[f'down{i}_b'],
                           stride=2, pad_mode='zero')

    # Resnet blocks: (reflect pad, conv, BN, ReLU) x2 + residual add
    # TODO(synk): nn.Dropout (use_dropout=True) path not implemented; module
    # default is use_dropout=False, which this forward matches.
    for i in range(n_blocks):
        x = resnet_block(x, p[f'blk{i}_w1'], p[f'blk{i}_g1'], p[f'blk{i}_b1'],
                         p[f'blk{i}_w2'], p[f'blk{i}_g2'], p[f'blk{i}_b2'])

    # 2x upsampling: ConvTranspose2d(s=2, p=1, output_padding=1) -> BN -> ReLU
    for i in range(2):
        x = conv_transpose3x3_bn_relu(x, p[f'up{i}_w'], p[f'up{i}_g'],
                                      p[f'up{i}_b'])

    # final: ReflectionPad(1) -> Conv3x3 (bias=True) -> ReLU
    y = final_conv_relu(x, p['out_w'], p['out_b'])
    y = y[..., :output_nc]
    return jnp.transpose(y, (0, 3, 1, 2))                         # NCHW


# ---------------------------------------------------------------------------
if __name__ == "__main__":
    INPUT_NC, OUTPUT_NC, NGF, N_BLOCKS = 3, 3, 8, 2
    N, H, W = 2, 16, 16

    key = jax.random.PRNGKey(0)
    kx_, kp_ = jax.random.split(key)
    x = jax.random.normal(kx_, (N, INPUT_NC, H, W), jnp.float32)
    params = init_params(kp_, INPUT_NC, OUTPUT_NC, NGF, N_BLOCKS)

    fwd = jax.jit(functools.partial(resnet_generator_forward,
                                    n_blocks=N_BLOCKS, output_nc=OUTPUT_NC))
    out = jax.block_until_ready(fwd(x, params))

    assert out.shape == (N, OUTPUT_NC, H, W), out.shape
    assert bool(jnp.all(jnp.isfinite(out)))
    assert bool(jnp.all(out >= 0.0))       # final ReLU
    print("KERNEL_OK")
</pallas_src>

<mosaic_0001>
module attributes {stable_mosaic.version = 11 : i64} {
  func.func @_affine_kernel(%arg0: i32, %arg1: memref<512x128xf32, #tpu.memory_space<vmem>>, %arg2: memref<1x128xf32, #tpu.memory_space<vmem>>, %arg3: memref<1x128xf32, #tpu.memory_space<vmem>>, %arg4: memref<512x128xbf16, #tpu.memory_space<vmem>>) attributes {dimension_semantics = [#tpu.dimension_semantics<parallel>], iteration_bounds = array<i64: 1>, scalar_prefetch = 0 : i64, scratch_operands = 0 : i64, tpu.core_type = #tpu.core_type<tc>, window_params = [{transform_indices = @transform_0, window_bounds = array<i64: 512, 128>}, {pipeline_mode = #tpu.pipeline_mode<synchronous>, transform_indices = @transform_1, window_bounds = array<i64: 1, 128>}, {pipeline_mode = #tpu.pipeline_mode<synchronous>, transform_indices = @transform_2, window_bounds = array<i64: 1, 128>}, {transform_indices = @transform_3, window_bounds = array<i64: 512, 128>}]} {
    %c0 = arith.constant 0 : index
    %c0_0 = arith.constant 0 : index
    %0 = vector.load %arg1[%c0, %c0_0] : memref<512x128xf32, #tpu.memory_space<vmem>>, vector<512x128xf32>
    %c0_1 = arith.constant 0 : index
    %c0_2 = arith.constant 0 : index
    %1 = vector.load %arg2[%c0_1, %c0_2] : memref<1x128xf32, #tpu.memory_space<vmem>>, vector<1x128xf32>
    %2 = vector.broadcast %1 : vector<1x128xf32> to vector<512x128xf32>
    %3 = arith.mulf %0, %2 : vector<512x128xf32>
    %c0_3 = arith.constant 0 : index
    %c0_4 = arith.constant 0 : index
    %4 = vector.load %arg3[%c0_3, %c0_4] : memref<1x128xf32, #tpu.memory_space<vmem>>, vector<1x128xf32>
    %5 = vector.broadcast %4 : vector<1x128xf32> to vector<512x128xf32>
    %6 = arith.addf %3, %5 : vector<512x128xf32>
    %cst = arith.constant 0.000000e+00 : f32
    %7 = vector.broadcast %cst : f32 to vector<512x128xf32>
    %8 = arith.maximumf %6, %7 : vector<512x128xf32>
    %9 = arith.truncf %8 : vector<512x128xf32> to vector<512x128xbf16>
    %c0_5 = arith.constant 0 : index
    %c0_6 = arith.constant 0 : index
    %10 = vector.load %arg4[%c0_5, %c0_6] : memref<512x128xbf16, #tpu.memory_space<vmem>>, vector<512x128xbf16>
    tpu.vector_store %arg4[%c0_5, %c0_6], %9 {strides = array<i32>} : memref<512x128xbf16, #tpu.memory_space<vmem>>, vector<512x128xbf16>,
    return
  }
  func.func @transform_0(%arg0: i32) -> (i32, i32) {
    %c0_i32 = arith.constant 0 : i32
    %c0_i32_0 = arith.constant 0 : i32
    return %arg0, %c0_i32 : i32, i32
  }
  func.func @transform_1(%arg0: i32) -> (i32, i32) {
    %c0_i32 = arith.constant 0 : i32
    %c0_i32_0 = arith.constant 0 : i32
    %c0_i32_1 = arith.constant 0 : i32
    return %c0_i32, %c0_i32_0 : i32, i32
  }
  func.func @transform_2(%arg0: i32) -> (i32, i32) {
    %c0_i32 = arith.constant 0 : i32
    %c0_i32_0 = arith.constant 0 : i32
    %c0_i32_1 = arith.constant 0 : i32
    return %c0_i32, %c0_i32_0 : i32, i32
  }
  func.func @transform_3(%arg0: i32) -> (i32, i32) {
    %c0_i32 = arith.constant 0 : i32
    %c0_i32_0 = arith.constant 0 : i32
    return %arg0, %c0_i32 : i32, i32
  }
}

module attributes {stable_mosaic.version = 11 : i64} {
  func.func @_matmul_stats_kernel(%arg0: i32, %arg1: memref<512x27xbf16, #tpu.memory_space<vmem>>, %arg2: memref<27x128xbf16, #tpu.memory_space<vmem>>, %arg3: memref<512x128xf32, #tpu.memory_space<vmem>>, %arg4: memref<1x8x128xf32, #tpu.memory_space<vmem>>) attributes {dimension_semantics = [#tpu.dimension_semantics<parallel>], iteration_bounds = array<i64: 1>, scalar_prefetch = 0 : i64, scratch_operands = 0 : i64, tpu.core_type = #tpu.core_type<tc>, window_params = [{transform_indices = @transform_0, window_bounds = array<i64: 512, 27>}, {pipeline_mode = #tpu.pipeline_mode<synchronous>, transform_indices = @transform_1, window_bounds = array<i64: 27, 128>}, {transform_indices = @transform_2, window_bounds = array<i64: 512, 128>}, {transform_indices = @transform_3, window_bounds = array<i64: 1, 8, 128>}]} {
    %c0 = arith.constant 0 : index
    %c0_0 = arith.constant 0 : index
    %0 = vector.load %arg1[%c0, %c0_0] : memref<512x27xbf16, #tpu.memory_space<vmem>>, vector<512x27xbf16>
    %c0_1 = arith.constant 0 : index
    %c0_2 = arith.constant 0 : index
    %1 = vector.load %arg2[%c0_1, %c0_2] : memref<27x128xbf16, #tpu.memory_space<vmem>>, vector<27x128xbf16>
    %cst = arith.constant dense<0.000000e+00> : vector<512x128xf32>
    %2 = tpu.matmul %0, %1, %cst {dimension_numbers = #tpu.dot_dimension_numbers<[1], [0], [0], [1], [0, 0, 1, 1], [], []>} : vector<512x27xbf16>, vector<27x128xbf16>, vector<512x128xf32> -> vector<512x128xf32>
    %c0_3 = arith.constant 0 : index
    %c0_4 = arith.constant 0 : index
    %3 = vector.load %arg3[%c0_3, %c0_4] : memref<512x128xf32, #tpu.memory_space<vmem>>, vector<512x128xf32>
    tpu.vector_store %arg3[%c0_3, %c0_4], %2 {strides = array<i32>} : memref<512x128xf32, #tpu.memory_space<vmem>>, vector<512x128xf32>,
    %cst_5 = arith.constant dense<0.000000e+00> : vector<128xf32>
    %4 = vector.multi_reduction <add>, %2, %cst_5 [0] : vector<512x128xf32> to vector<128xf32>
    %5 = vector.shape_cast %4 : vector<128xf32> to vector<1x128xf32>
    %6 = arith.mulf %2, %2 : vector<512x128xf32>
    %cst_6 = arith.constant dense<0.000000e+00> : vector<128xf32>
    %7 = vector.multi_reduction <add>, %6, %cst_6 [0] : vector<512x128xf32> to vector<128xf32>
    %8 = vector.shape_cast %7 : vector<128xf32> to vector<1x128xf32>
    %9 = tpu.iota {dimensions = array<i32: 0>} : vector<8x128xi32>
    %c0_i32 = arith.constant 0 : i32
    %10 = vector.broadcast %c0_i32 : i32 to vector<8x128xi32>
    %11 = arith.cmpi eq, %9, %10 : vector<8x128xi32>
    %c1_i32 = arith.constant 1 : i32
    %12 = vector.broadcast %c1_i32 : i32 to vector<8x128xi32>
    %13 = arith.cmpi eq, %9, %12 : vector<8x128xi32>
    %cst_7 = arith.constant 0.000000e+00 : f32
    %14 = vector.shape_cast %8 : vector<1x128xf32> to vector<1x128xf32>
    %15 = vector.broadcast %14 : vector<1x128xf32> to vector<8x128xf32>
    %16 = vector.broadcast %cst_7 : f32 to vector<8x128xf32>
    %17 = arith.select %13, %15, %16 : vector<8x128xi1>, vector<8x128xf32>
    %18 = vector.shape_cast %5 : vector<1x128xf32> to vector<1x128xf32>
    %19 = vector.broadcast %18 : vector<1x128xf32> to vector<8x128xf32>
    %20 = arith.select %11, %19, %17 : vector<8x128xi1>, vector<8x128xf32>
    %c0_8 = arith.constant 0 : index
    %c0_9 = arith.constant 0 : index
    %c0_10 = arith.constant 0 : index
    %21 = vector.load %arg4[%c0_8, %c0_9, %c0_10] : memref<1x8x128xf32, #tpu.memory_space<vmem>>, vector<1x8x128xf32>
    %22 = vector.shape_cast %21 : vector<1x8x128xf32> to vector<8x128xf32>
    %23 = vector.shape_cast %20 : vector<8x128xf32> to vector<1x8x128xf32>
    tpu.vector_store %arg4[%c0_8, %c0_9, %c0_10], %23 {strides = array<i32>} : memref<1x8x128xf32, #tpu.memory_space<vmem>>, vector<1x8x128xf32>,
    return
  }
  func.func @transform_0(%arg0: i32) -> (i32, i32) {
    %c0_i32 = arith.constant 0 : i32
    %c0_i32_0 = arith.constant 0 : i32
    return %arg0, %c0_i32 : i32, i32
  }
  func.func @transform_1(%arg0: i32) -> (i32, i32) {
    %c0_i32 = arith.constant 0 : i32
    %c0_i32_0 = arith.constant 0 : i32
    %c0_i32_1 = arith.constant 0 : i32
    return %c0_i32, %c0_i32_0 : i32, i32
  }
  func.func @transform_2(%arg0: i32) -> (i32, i32) {
    %c0_i32 = arith.constant 0 : i32
    %c0_i32_0 = arith.constant 0 : i32
    return %arg0, %c0_i32 : i32, i32
  }
  func.func @transform_3(%arg0: i32) -> (i32, i32, i32) {
    %c0_i32 = arith.constant 0 : i32
    %c0_i32_0 = arith.constant 0 : i32
    %c0_i32_1 = arith.constant 0 : i32
    return %arg0, %c0_i32, %c0_i32_0 : i32, i32, i32
  }
}

module attributes {stable_mosaic.version = 11 : i64} {
  func.func @_matmul_stats_kernel(%arg0: i32, %arg1: memref<128x1152xbf16, #tpu.memory_space<vmem>>, %arg2: memref<1152x128xbf16, #tpu.memory_space<vmem>>, %arg3: memref<128x128xf32, #tpu.memory_space<vmem>>, %arg4: memref<1x8x128xf32, #tpu.memory_space<vmem>>) attributes {dimension_semantics = [#tpu.dimension_semantics<parallel>], iteration_bounds = array<i64: 1>, scalar_prefetch = 0 : i64, scratch_operands = 0 : i64, tpu.core_type = #tpu.core_type<tc>, window_params = [{transform_indices = @transform_0, window_bounds = array<i64: 128, 1152>}, {pipeline_mode = #tpu.pipeline_mode<synchronous>, transform_indices = @transform_1, window_bounds = array<i64: 1152, 128>}, {transform_indices = @transform_2, window_bounds = array<i64: 128, 128>}, {transform_indices = @transform_3, window_bounds = array<i64: 1, 8, 128>}]} {
    %c0 = arith.constant 0 : index
    %c0_0 = arith.constant 0 : index
    %0 = vector.load %arg1[%c0, %c0_0] : memref<128x1152xbf16, #tpu.memory_space<vmem>>, vector<128x1152xbf16>
    %c0_1 = arith.constant 0 : index
    %c0_2 = arith.constant 0 : index
    %1 = vector.load %arg2[%c0_1, %c0_2] : memref<1152x128xbf16, #tpu.memory_space<vmem>>, vector<1152x128xbf16>
    %cst = arith.constant dense<0.000000e+00> : vector<128x128xf32>
    %2 = tpu.matmul %0, %1, %cst {dimension_numbers = #tpu.dot_dimension_numbers<[1], [0], [0], [1], [0, 0, 1, 1], [], []>} : vector<128x1152xbf16>, vector<1152x128xbf16>, vector<128x128xf32> -> vector<128x128xf32>
    %c0_3 = arith.constant 0 : index
    %c0_4 = arith.constant 0 : index
    %3 = vector.load %arg3[%c0_3, %c0_4] : memref<128x128xf32, #tpu.memory_space<vmem>>, vector<128x128xf32>
    tpu.vector_store %arg3[%c0_3, %c0_4], %2 {strides = array<i32>} : memref<128x128xf32, #tpu.memory_space<vmem>>, vector<128x128xf32>,
    %cst_5 = arith.constant dense<0.000000e+00> : vector<128xf32>
    %4 = vector.multi_reduction <add>, %2, %cst_5 [0] : vector<128x128xf32> to vector<128xf32>
    %5 = vector.shape_cast %4 : vector<128xf32> to vector<1x128xf32>
    %6 = arith.mulf %2, %2 : vector<128x128xf32>
    %cst_6 = arith.constant dense<0.000000e+00> : vector<128xf32>
    %7 = vector.multi_reduction <add>, %6, %cst_6 [0] : vector<128x128xf32> to vector<128xf32>
    %8 = vector.shape_cast %7 : vector<128xf32> to vector<1x128xf32>
    %9 = tpu.iota {dimensions = array<i32: 0>} : vector<8x128xi32>
    %c0_i32 = arith.constant 0 : i32
    %10 = vector.broadcast %c0_i32 : i32 to vector<8x128xi32>
    %11 = arith.cmpi eq, %9, %10 : vector<8x128xi32>
    %c1_i32 = arith.constant 1 : i32
    %12 = vector.broadcast %c1_i32 : i32 to vector<8x128xi32>
    %13 = arith.cmpi eq, %9, %12 : vector<8x128xi32>
    %cst_7 = arith.constant 0.000000e+00 : f32
    %14 = vector.shape_cast %8 : vector<1x128xf32> to vector<1x128xf32>
    %15 = vector.broadcast %14 : vector<1x128xf32> to vector<8x128xf32>
    %16 = vector.broadcast %cst_7 : f32 to vector<8x128xf32>
    %17 = arith.select %13, %15, %16 : vector<8x128xi1>, vector<8x128xf32>
    %18 = vector.shape_cast %5 : vector<1x128xf32> to vector<1x128xf32>
    %19 = vector.broadcast %18 : vector<1x128xf32> to vector<8x128xf32>
    %20 = arith.select %11, %19, %17 : vector<8x128xi1>, vector<8x128xf32>
    %c0_8 = arith.constant 0 : index
    %c0_9 = arith.constant 0 : index
    %c0_10 = arith.constant 0 : index
    %21 = vector.load %arg4[%c0_8, %c0_9, %c0_10] : memref<1x8x128xf32, #tpu.memory_space<vmem>>, vector<1x8x128xf32>
    %22 = vector.shape_cast %21 : vector<1x8x128xf32> to vector<8x128xf32>
    %23 = vector.shape_cast %20 : vector<8x128xf32> to vector<1x8x128xf32>
    tpu.vector_store %arg4[%c0_8, %c0_9, %c0_10], %23 {strides = array<i32>} : memref<1x8x128xf32, #tpu.memory_space<vmem>>, vector<1x8x128xf32>,
    return
  }
  func.func @transform_0(%arg0: i32) -> (i32, i32) {
    %c0_i32 = arith.constant 0 : i32
    %c0_i32_0 = arith.constant 0 : i32
    return %arg0, %c0_i32 : i32, i32
  }
  func.func @transform_1(%arg0: i32) -> (i32, i32) {
    %c0_i32 = arith.constant 0 : i32
    %c0_i32_0 = arith.constant 0 : i32
    %c0_i32_1 = arith.constant 0 : i32
    return %c0_i32, %c0_i32_0 : i32, i32
  }
  func.func @transform_2(%arg0: i32) -> (i32, i32) {
    %c0_i32 = arith.constant 0 : i32
    %c0_i32_0 = arith.constant 0 : i32
    return %arg0, %c0_i32 : i32, i32
  }
  func.func @transform_3(%arg0: i32) -> (i32, i32, i32) {
    %c0_i32 = arith.constant 0 : i32
    %c0_i32_0 = arith.constant 0 : i32
    %c0_i32_1 = arith.constant 0 : i32
    return %arg0, %c0_i32, %c0_i32_0 : i32, i32, i32
  }
}

module attributes {stable_mosaic.version = 11 : i64} {
  func.func @_affine_kernel(%arg0: i32, %arg1: memref<128x128xf32, #tpu.memory_space<vmem>>, %arg2: memref<1x128xf32, #tpu.memory_space<vmem>>, %arg3: memref<1x128xf32, #tpu.memory_space<vmem>>, %arg4: memref<128x128xbf16, #tpu.memory_space<vmem>>) attributes {dimension_semantics = [#tpu.dimension_semantics<parallel>], iteration_bounds = array<i64: 1>, scalar_prefetch = 0 : i64, scratch_operands = 0 : i64, tpu.core_type = #tpu.core_type<tc>, window_params = [{transform_indices = @transform_0, window_bounds = array<i64: 128, 128>}, {pipeline_mode = #tpu.pipeline_mode<synchronous>, transform_indices = @transform_1, window_bounds = array<i64: 1, 128>}, {pipeline_mode = #tpu.pipeline_mode<synchronous>, transform_indices = @transform_2, window_bounds = array<i64: 1, 128>}, {transform_indices = @transform_3, window_bounds = array<i64: 128, 128>}]} {
    %c0 = arith.constant 0 : index
    %c0_0 = arith.constant 0 : index
    %0 = vector.load %arg1[%c0, %c0_0] : memref<128x128xf32, #tpu.memory_space<vmem>>, vector<128x128xf32>
    %c0_1 = arith.constant 0 : index
    %c0_2 = arith.constant 0 : index
    %1 = vector.load %arg2[%c0_1, %c0_2] : memref<1x128xf32, #tpu.memory_space<vmem>>, vector<1x128xf32>
    %2 = vector.broadcast %1 : vector<1x128xf32> to vector<128x128xf32>
    %3 = arith.mulf %0, %2 : vector<128x128xf32>
    %c0_3 = arith.constant 0 : index
    %c0_4 = arith.constant 0 : index
    %4 = vector.load %arg3[%c0_3, %c0_4] : memref<1x128xf32, #tpu.memory_space<vmem>>, vector<1x128xf32>
    %5 = vector.broadcast %4 : vector<1x128xf32> to vector<128x128xf32>
    %6 = arith.addf %3, %5 : vector<128x128xf32>
    %cst = arith.constant 0.000000e+00 : f32
    %7 = vector.broadcast %cst : f32 to vector<128x128xf32>
    %8 = arith.maximumf %6, %7 : vector<128x128xf32>
    %9 = arith.truncf %8 : vector<128x128xf32> to vector<128x128xbf16>
    %c0_5 = arith.constant 0 : index
    %c0_6 = arith.constant 0 : index
    %10 = vector.load %arg4[%c0_5, %c0_6] : memref<128x128xbf16, #tpu.memory_space<vmem>>, vector<128x128xbf16>
    tpu.vector_store %arg4[%c0_5, %c0_6], %9 {strides = array<i32>} : memref<128x128xbf16, #tpu.memory_space<vmem>>, vector<128x128xbf16>,
    return
  }
  func.func @transform_0(%arg0: i32) -> (i32, i32) {
    %c0_i32 = arith.constant 0 : i32
    %c0_i32_0 = arith.constant 0 : i32
    return %arg0, %c0_i32 : i32, i32
  }
  func.func @transform_1(%arg0: i32) -> (i32, i32) {
    %c0_i32 = arith.constant 0 : i32
    %c0_i32_0 = arith.constant 0 : i32
    %c0_i32_1 = arith.constant 0 : i32
    return %c0_i32, %c0_i32_0 : i32, i32
  }
  func.func @transform_2(%arg0: i32) -> (i32, i32) {
    %c0_i32 = arith.constant 0 : i32
    %c0_i32_0 = arith.constant 0 : i32
    %c0_i32_1 = arith.constant 0 : i32
    return %c0_i32, %c0_i32_0 : i32, i32
  }
  func.func @transform_3(%arg0: i32) -> (i32, i32) {
    %c0_i32 = arith.constant 0 : i32
    %c0_i32_0 = arith.constant 0 : i32
    return %arg0, %c0_i32 : i32, i32
  }
}

module attributes {stable_mosaic.version = 11 : i64} {
  func.func @_affine_kernel(%arg0: i32, %arg1: memref<32x128xf32, #tpu.memory_space<vmem>>, %arg2: memref<1x128xf32, #tpu.memory_space<vmem>>, %arg3: memref<1x128xf32, #tpu.memory_space<vmem>>, %arg4: memref<32x128xbf16, #tpu.memory_space<vmem>>) attributes {dimension_semantics = [#tpu.dimension_semantics<parallel>], iteration_bounds = array<i64: 1>, scalar_prefetch = 0 : i64, scratch_operands = 0 : i64, tpu.core_type = #tpu.core_type<tc>, window_params = [{transform_indices = @transform_0, window_bounds = array<i64: 32, 128>}, {pipeline_mode = #tpu.pipeline_mode<synchronous>, transform_indices = @transform_1, window_bounds = array<i64: 1, 128>}, {pipeline_mode = #tpu.pipeline_mode<synchronous>, transform_indices = @transform_2, window_bounds = array<i64: 1, 128>}, {transform_indices = @transform_3, window_bounds = array<i64: 32, 128>}]} {
    %c0 = arith.constant 0 : index
    %c0_0 = arith.constant 0 : index
    %0 = vector.load %arg1[%c0, %c0_0] : memref<32x128xf32, #tpu.memory_space<vmem>>, vector<32x128xf32>
    %c0_1 = arith.constant 0 : index
    %c0_2 = arith.constant 0 : index
    %1 = vector.load %arg2[%c0_1, %c0_2] : memref<1x128xf32, #tpu.memory_space<vmem>>, vector<1x128xf32>
    %2 = vector.broadcast %1 : vector<1x128xf32> to vector<32x128xf32>
    %3 = arith.mulf %0, %2 : vector<32x128xf32>
    %c0_3 = arith.constant 0 : index
    %c0_4 = arith.constant 0 : index
    %4 = vector.load %arg3[%c0_3, %c0_4] : memref<1x128xf32, #tpu.memory_space<vmem>>, vector<1x128xf32>
    %5 = vector.broadcast %4 : vector<1x128xf32> to vector<32x128xf32>
    %6 = arith.addf %3, %5 : vector<32x128xf32>
    %cst = arith.constant 0.000000e+00 : f32
    %7 = vector.broadcast %cst : f32 to vector<32x128xf32>
    %8 = arith.maximumf %6, %7 : vector<32x128xf32>
    %9 = arith.truncf %8 : vector<32x128xf32> to vector<32x128xbf16>
    %c0_5 = arith.constant 0 : index
    %c0_6 = arith.constant 0 : index
    %10 = vector.load %arg4[%c0_5, %c0_6] : memref<32x128xbf16, #tpu.memory_space<vmem>>, vector<32x128xbf16>
    tpu.vector_store %arg4[%c0_5, %c0_6], %9 {strides = array<i32>} : memref<32x128xbf16, #tpu.memory_space<vmem>>, vector<32x128xbf16>,
    return
  }
  func.func @transform_0(%arg0: i32) -> (i32, i32) {
    %c0_i32 = arith.constant 0 : i32
    %c0_i32_0 = arith.constant 0 : i32
    return %arg0, %c0_i32 : i32, i32
  }
  func.func @transform_1(%arg0: i32) -> (i32, i32) {
    %c0_i32 = arith.constant 0 : i32
    %c0_i32_0 = arith.constant 0 : i32
    %c0_i32_1 = arith.constant 0 : i32
    return %c0_i32, %c0_i32_0 : i32, i32
  }
  func.func @transform_2(%arg0: i32) -> (i32, i32) {
    %c0_i32 = arith.constant 0 : i32
    %c0_i32_0 = arith.constant 0 : i32
    %c0_i32_1 = arith.constant 0 : i32
    return %c0_i32, %c0_i32_0 : i32, i32
  }
  func.func @transform_3(%arg0: i32) -> (i32, i32) {
    %c0_i32 = arith.constant 0 : i32
    %c0_i32_0 = arith.constant 0 : i32
    return %arg0, %c0_i32 : i32, i32
  }
}

module attributes {stable_mosaic.version = 11 : i64} {
  func.func @_matmul_stats_kernel(%arg0: i32, %arg1: memref<32x1152xbf16, #tpu.memory_space<vmem>>, %arg2: memref<1152x128xbf16, #tpu.memory_space<vmem>>, %arg3: memref<32x128xf32, #tpu.memory_space<vmem>>, %arg4: memref<1x8x128xf32, #tpu.memory_space<vmem>>) attributes {dimension_semantics = [#tpu.dimension_semantics<parallel>], iteration_bounds = array<i64: 1>, scalar_prefetch = 0 : i64, scratch_operands = 0 : i64, tpu.core_type = #tpu.core_type<tc>, window_params = [{transform_indices = @transform_0, window_bounds = array<i64: 32, 1152>}, {pipeline_mode = #tpu.pipeline_mode<synchronous>, transform_indices = @transform_1, window_bounds = array<i64: 1152, 128>}, {transform_indices = @transform_2, window_bounds = array<i64: 32, 128>}, {transform_indices = @transform_3, window_bounds = array<i64: 1, 8, 128>}]} {
    %c0 = arith.constant 0 : index
    %c0_0 = arith.constant 0 : index
    %0 = vector.load %arg1[%c0, %c0_0] : memref<32x1152xbf16, #tpu.memory_space<vmem>>, vector<32x1152xbf16>
    %c0_1 = arith.constant 0 : index
    %c0_2 = arith.constant 0 : index
    %1 = vector.load %arg2[%c0_1, %c0_2] : memref<1152x128xbf16, #tpu.memory_space<vmem>>, vector<1152x128xbf16>
    %cst = arith.constant dense<0.000000e+00> : vector<32x128xf32>
    %2 = tpu.matmul %0, %1, %cst {dimension_numbers = #tpu.dot_dimension_numbers<[1], [0], [0], [1], [0, 0, 1, 1], [], []>} : vector<32x1152xbf16>, vector<1152x128xbf16>, vector<32x128xf32> -> vector<32x128xf32>
    %c0_3 = arith.constant 0 : index
    %c0_4 = arith.constant 0 : index
    %3 = vector.load %arg3[%c0_3, %c0_4] : memref<32x128xf32, #tpu.memory_space<vmem>>, vector<32x128xf32>
    tpu.vector_store %arg3[%c0_3, %c0_4], %2 {strides = array<i32>} : memref<32x128xf32, #tpu.memory_space<vmem>>, vector<32x128xf32>,
    %cst_5 = arith.constant dense<0.000000e+00> : vector<128xf32>
    %4 = vector.multi_reduction <add>, %2, %cst_5 [0] : vector<32x128xf32> to vector<128xf32>
    %5 = vector.shape_cast %4 : vector<128xf32> to vector<1x128xf32>
    %6 = arith.mulf %2, %2 : vector<32x128xf32>
    %cst_6 = arith.constant dense<0.000000e+00> : vector<128xf32>
    %7 = vector.multi_reduction <add>, %6, %cst_6 [0] : vector<32x128xf32> to vector<128xf32>
    %8 = vector.shape_cast %7 : vector<128xf32> to vector<1x128xf32>
    %9 = tpu.iota {dimensions = array<i32: 0>} : vector<8x128xi32>
    %c0_i32 = arith.constant 0 : i32
    %10 = vector.broadcast %c0_i32 : i32 to vector<8x128xi32>
    %11 = arith.cmpi eq, %9, %10 : vector<8x128xi32>
    %c1_i32 = arith.constant 1 : i32
    %12 = vector.broadcast %c1_i32 : i32 to vector<8x128xi32>
    %13 = arith.cmpi eq, %9, %12 : vector<8x128xi32>
    %cst_7 = arith.constant 0.000000e+00 : f32
    %14 = vector.shape_cast %8 : vector<1x128xf32> to vector<1x128xf32>
    %15 = vector.broadcast %14 : vector<1x128xf32> to vector<8x128xf32>
    %16 = vector.broadcast %cst_7 : f32 to vector<8x128xf32>
    %17 = arith.select %13, %15, %16 : vector<8x128xi1>, vector<8x128xf32>
    %18 = vector.shape_cast %5 : vector<1x128xf32> to vector<1x128xf32>
    %19 = vector.broadcast %18 : vector<1x128xf32> to vector<8x128xf32>
    %20 = arith.select %11, %19, %17 : vector<8x128xi1>, vector<8x128xf32>
    %c0_8 = arith.constant 0 : index
    %c0_9 = arith.constant 0 : index
    %c0_10 = arith.constant 0 : index
    %21 = vector.load %arg4[%c0_8, %c0_9, %c0_10] : memref<1x8x128xf32, #tpu.memory_space<vmem>>, vector<1x8x128xf32>
    %22 = vector.shape_cast %21 : vector<1x8x128xf32> to vector<8x128xf32>
    %23 = vector.shape_cast %20 : vector<8x128xf32> to vector<1x8x128xf32>
    tpu.vector_store %arg4[%c0_8, %c0_9, %c0_10], %23 {strides = array<i32>} : memref<1x8x128xf32, #tpu.memory_space<vmem>>, vector<1x8x128xf32>,
    return
  }
  func.func @transform_0(%arg0: i32) -> (i32, i32) {
    %c0_i32 = arith.constant 0 : i32
    %c0_i32_0 = arith.constant 0 : i32
    return %arg0, %c0_i32 : i32, i32
  }
  func.func @transform_1(%arg0: i32) -> (i32, i32) {
    %c0_i32 = arith.constant 0 : i32
    %c0_i32_0 = arith.constant 0 : i32
    %c0_i32_1 = arith.constant 0 : i32
    return %c0_i32, %c0_i32_0 : i32, i32
  }
  func.func @transform_2(%arg0: i32) -> (i32, i32) {
    %c0_i32 = arith.constant 0 : i32
    %c0_i32_0 = arith.constant 0 : i32
    return %arg0, %c0_i32 : i32, i32
  }
  func.func @transform_3(%arg0: i32) -> (i32, i32, i32) {
    %c0_i32 = arith.constant 0 : i32
    %c0_i32_0 = arith.constant 0 : i32
    %c0_i32_1 = arith.constant 0 : i32
    return %arg0, %c0_i32, %c0_i32_0 : i32, i32, i32
  }
}

module attributes {stable_mosaic.version = 11 : i64} {
  func.func @_affine_res_kernel(%arg0: i32, %arg1: memref<32x128xf32, #tpu.memory_space<vmem>>, %arg2: memref<1x128xf32, #tpu.memory_space<vmem>>, %arg3: memref<1x128xf32, #tpu.memory_space<vmem>>, %arg4: memref<32x128xbf16, #tpu.memory_space<vmem>>, %arg5: memref<32x128xbf16, #tpu.memory_space<vmem>>) attributes {dimension_semantics = [#tpu.dimension_semantics<parallel>], iteration_bounds = array<i64: 1>, scalar_prefetch = 0 : i64, scratch_operands = 0 : i64, tpu.core_type = #tpu.core_type<tc>, window_params = [{transform_indices = @transform_0, window_bounds = array<i64: 32, 128>}, {pipeline_mode = #tpu.pipeline_mode<synchronous>, transform_indices = @transform_1, window_bounds = array<i64: 1, 128>}, {pipeline_mode = #tpu.pipeline_mode<synchronous>, transform_indices = @transform_2, window_bounds = array<i64: 1, 128>}, {transform_indices = @transform_3, window_bounds = array<i64: 32, 128>}, {transform_indices = @transform_4, window_bounds = array<i64: 32, 128>}]} {
    %c0 = arith.constant 0 : index
    %c0_0 = arith.constant 0 : index
    %0 = vector.load %arg1[%c0, %c0_0] : memref<32x128xf32, #tpu.memory_space<vmem>>, vector<32x128xf32>
    %c0_1 = arith.constant 0 : index
    %c0_2 = arith.constant 0 : index
    %1 = vector.load %arg2[%c0_1, %c0_2] : memref<1x128xf32, #tpu.memory_space<vmem>>, vector<1x128xf32>
    %2 = vector.broadcast %1 : vector<1x128xf32> to vector<32x128xf32>
    %3 = arith.mulf %0, %2 : vector<32x128xf32>
    %c0_3 = arith.constant 0 : index
    %c0_4 = arith.constant 0 : index
    %4 = vector.load %arg3[%c0_3, %c0_4] : memref<1x128xf32, #tpu.memory_space<vmem>>, vector<1x128xf32>
    %5 = vector.broadcast %4 : vector<1x128xf32> to vector<32x128xf32>
    %6 = arith.addf %3, %5 : vector<32x128xf32>
    %c0_5 = arith.constant 0 : index
    %c0_6 = arith.constant 0 : index
    %7 = vector.load %arg4[%c0_5, %c0_6] : memref<32x128xbf16, #tpu.memory_space<vmem>>, vector<32x128xbf16>
    %8 = arith.extf %7 : vector<32x128xbf16> to vector<32x128xf32>
    %9 = arith.addf %6, %8 : vector<32x128xf32>
    %10 = arith.truncf %9 : vector<32x128xf32> to vector<32x128xbf16>
    %c0_7 = arith.constant 0 : index
    %c0_8 = arith.constant 0 : index
    %11 = vector.load %arg5[%c0_7, %c0_8] : memref<32x128xbf16, #tpu.memory_space<vmem>>, vector<32x128xbf16>
    tpu.vector_store %arg5[%c0_7, %c0_8], %10 {strides = array<i32>} : memref<32x128xbf16, #tpu.memory_space<vmem>>, vector<32x128xbf16>,
    return
  }
  func.func @transform_0(%arg0: i32) -> (i32, i32) {
    %c0_i32 = arith.constant 0 : i32
    %c0_i32_0 = arith.constant 0 : i32
    return %arg0, %c0_i32 : i32, i32
  }
  func.func @transform_1(%arg0: i32) -> (i32, i32) {
    %c0_i32 = arith.constant 0 : i32
    %c0_i32_0 = arith.constant 0 : i32
    %c0_i32_1 = arith.constant 0 : i32
    return %c0_i32, %c0_i32_0 : i32, i32
  }
  func.func @transform_2(%arg0: i32) -> (i32, i32) {
    %c0_i32 = arith.constant 0 : i32
    %c0_i32_0 = arith.constant 0 : i32
    %c0_i32_1 = arith.constant 0 : i32
    return %c0_i32, %c0_i32_0 : i32, i32
  }
  func.func @transform_3(%arg0: i32) -> (i32, i32) {
    %c0_i32 = arith.constant 0 : i32
    %c0_i32_0 = arith.constant 0 : i32
    return %arg0, %c0_i32 : i32, i32
  }
  func.func @transform_4(%arg0: i32) -> (i32, i32) {
    %c0_i32 = arith.constant 0 : i32
    %c0_i32_0 = arith.constant 0 : i32
    return %arg0, %c0_i32 : i32, i32
  }
}

module attributes {stable_mosaic.version = 11 : i64} {
  func.func @_matmul_stats_kernel(%arg0: i32, %arg1: memref<32x256xbf16, #tpu.memory_space<vmem>>, %arg2: memref<256x128xbf16, #tpu.memory_space<vmem>>, %arg3: memref<32x128xf32, #tpu.memory_space<vmem>>, %arg4: memref<1x8x128xf32, #tpu.memory_space<vmem>>) attributes {dimension_semantics = [#tpu.dimension_semantics<parallel>], iteration_bounds = array<i64: 1>, scalar_prefetch = 0 : i64, scratch_operands = 0 : i64, tpu.core_type = #tpu.core_type<tc>, window_params = [{transform_indices = @transform_0, window_bounds = array<i64: 32, 256>}, {pipeline_mode = #tpu.pipeline_mode<synchronous>, transform_indices = @transform_1, window_bounds = array<i64: 256, 128>}, {transform_indices = @transform_2, window_bounds = array<i64: 32, 128>}, {transform_indices = @transform_3, window_bounds = array<i64: 1, 8, 128>}]} {
    %c0 = arith.constant 0 : index
    %c0_0 = arith.constant 0 : index
    %0 = vector.load %arg1[%c0, %c0_0] : memref<32x256xbf16, #tpu.memory_space<vmem>>, vector<32x256xbf16>
    %c0_1 = arith.constant 0 : index
    %c0_2 = arith.constant 0 : index
    %1 = vector.load %arg2[%c0_1, %c0_2] : memref<256x128xbf16, #tpu.memory_space<vmem>>, vector<256x128xbf16>
    %cst = arith.constant dense<0.000000e+00> : vector<32x128xf32>
    %2 = tpu.matmul %0, %1, %cst {dimension_numbers = #tpu.dot_dimension_numbers<[1], [0], [0], [1], [0, 0, 1, 1], [], []>} : vector<32x256xbf16>, vector<256x128xbf16>, vector<32x128xf32> -> vector<32x128xf32>
    %c0_3 = arith.constant 0 : index
    %c0_4 = arith.constant 0 : index
    %3 = vector.load %arg3[%c0_3, %c0_4] : memref<32x128xf32, #tpu.memory_space<vmem>>, vector<32x128xf32>
    tpu.vector_store %arg3[%c0_3, %c0_4], %2 {strides = array<i32>} : memref<32x128xf32, #tpu.memory_space<vmem>>, vector<32x128xf32>,
    %cst_5 = arith.constant dense<0.000000e+00> : vector<128xf32>
    %4 = vector.multi_reduction <add>, %2, %cst_5 [0] : vector<32x128xf32> to vector<128xf32>
    %5 = vector.shape_cast %4 : vector<128xf32> to vector<1x128xf32>
    %6 = arith.mulf %2, %2 : vector<32x128xf32>
    %cst_6 = arith.constant dense<0.000000e+00> : vector<128xf32>
    %7 = vector.multi_reduction <add>, %6, %cst_6 [0] : vector<32x128xf32> to vector<128xf32>
    %8 = vector.shape_cast %7 : vector<128xf32> to vector<1x128xf32>
    %9 = tpu.iota {dimensions = array<i32: 0>} : vector<8x128xi32>
    %c0_i32 = arith.constant 0 : i32
    %10 = vector.broadcast %c0_i32 : i32 to vector<8x128xi32>
    %11 = arith.cmpi eq, %9, %10 : vector<8x128xi32>
    %c1_i32 = arith.constant 1 : i32
    %12 = vector.broadcast %c1_i32 : i32 to vector<8x128xi32>
    %13 = arith.cmpi eq, %9, %12 : vector<8x128xi32>
    %cst_7 = arith.constant 0.000000e+00 : f32
    %14 = vector.shape_cast %8 : vector<1x128xf32> to vector<1x128xf32>
    %15 = vector.broadcast %14 : vector<1x128xf32> to vector<8x128xf32>
    %16 = vector.broadcast %cst_7 : f32 to vector<8x128xf32>
    %17 = arith.select %13, %15, %16 : vector<8x128xi1>, vector<8x128xf32>
    %18 = vector.shape_cast %5 : vector<1x128xf32> to vector<1x128xf32>
    %19 = vector.broadcast %18 : vector<1x128xf32> to vector<8x128xf32>
    %20 = arith.select %11, %19, %17 : vector<8x128xi1>, vector<8x128xf32>
    %c0_8 = arith.constant 0 : index
    %c0_9 = arith.constant 0 : index
    %c0_10 = arith.constant 0 : index
    %21 = vector.load %arg4[%c0_8, %c0_9, %c0_10] : memref<1x8x128xf32, #tpu.memory_space<vmem>>, vector<1x8x128xf32>
    %22 = vector.shape_cast %21 : vector<1x8x128xf32> to vector<8x128xf32>
    %23 = vector.shape_cast %20 : vector<8x128xf32> to vector<1x8x128xf32>
    tpu.vector_store %arg4[%c0_8, %c0_9, %c0_10], %23 {strides = array<i32>} : memref<1x8x128xf32, #tpu.memory_space<vmem>>, vector<1x8x128xf32>,
    return
  }
  func.func @transform_0(%arg0: i32) -> (i32, i32) {
    %c0_i32 = arith.constant 0 : i32
    %c0_i32_0 = arith.constant 0 : i32
    return %arg0, %c0_i32 : i32, i32
  }
  func.func @transform_1(%arg0: i32) -> (i32, i32) {
    %c0_i32 = arith.constant 0 : i32
    %c0_i32_0 = arith.constant 0 : i32
    %c0_i32_1 = arith.constant 0 : i32
    return %c0_i32, %c0_i32_0 : i32, i32
  }
  func.func @transform_2(%arg0: i32) -> (i32, i32) {
    %c0_i32 = arith.constant 0 : i32
    %c0_i32_0 = arith.constant 0 : i32
    return %arg0, %c0_i32 : i32, i32
  }
  func.func @transform_3(%arg0: i32) -> (i32, i32, i32) {
    %c0_i32 = arith.constant 0 : i32
    %c0_i32_0 = arith.constant 0 : i32
    %c0_i32_1 = arith.constant 0 : i32
    return %arg0, %c0_i32, %c0_i32_0 : i32, i32, i32
  }
}

module attributes {stable_mosaic.version = 11 : i64} {
  func.func @_matmul_stats_kernel(%arg0: i32, %arg1: memref<32x512xbf16, #tpu.memory_space<vmem>>, %arg2: memref<512x128xbf16, #tpu.memory_space<vmem>>, %arg3: memref<32x128xf32, #tpu.memory_space<vmem>>, %arg4: memref<1x8x128xf32, #tpu.memory_space<vmem>>) attributes {dimension_semantics = [#tpu.dimension_semantics<parallel>], iteration_bounds = array<i64: 1>, scalar_prefetch = 0 : i64, scratch_operands = 0 : i64, tpu.core_type = #tpu.core_type<tc>, window_params = [{transform_indices = @transform_0, window_bounds = array<i64: 32, 512>}, {pipeline_mode = #tpu.pipeline_mode<synchronous>, transform_indices = @transform_1, window_bounds = array<i64: 512, 128>}, {transform_indices = @transform_2, window_bounds = array<i64: 32, 128>}, {transform_indices = @transform_3, window_bounds = array<i64: 1, 8, 128>}]} {
    %c0 = arith.constant 0 : index
    %c0_0 = arith.constant 0 : index
    %0 = vector.load %arg1[%c0, %c0_0] : memref<32x512xbf16, #tpu.memory_space<vmem>>, vector<32x512xbf16>
    %c0_1 = arith.constant 0 : index
    %c0_2 = arith.constant 0 : index
    %1 = vector.load %arg2[%c0_1, %c0_2] : memref<512x128xbf16, #tpu.memory_space<vmem>>, vector<512x128xbf16>
    %cst = arith.constant dense<0.000000e+00> : vector<32x128xf32>
    %2 = tpu.matmul %0, %1, %cst {dimension_numbers = #tpu.dot_dimension_numbers<[1], [0], [0], [1], [0, 0, 1, 1], [], []>} : vector<32x512xbf16>, vector<512x128xbf16>, vector<32x128xf32> -> vector<32x128xf32>
    %c0_3 = arith.constant 0 : index
    %c0_4 = arith.constant 0 : index
    %3 = vector.load %arg3[%c0_3, %c0_4] : memref<32x128xf32, #tpu.memory_space<vmem>>, vector<32x128xf32>
    tpu.vector_store %arg3[%c0_3, %c0_4], %2 {strides = array<i32>} : memref<32x128xf32, #tpu.memory_space<vmem>>, vector<32x128xf32>,
    %cst_5 = arith.constant dense<0.000000e+00> : vector<128xf32>
    %4 = vector.multi_reduction <add>, %2, %cst_5 [0] : vector<32x128xf32> to vector<128xf32>
    %5 = vector.shape_cast %4 : vector<128xf32> to vector<1x128xf32>
    %6 = arith.mulf %2, %2 : vector<32x128xf32>
    %cst_6 = arith.constant dense<0.000000e+00> : vector<128xf32>
    %7 = vector.multi_reduction <add>, %6, %cst_6 [0] : vector<32x128xf32> to vector<128xf32>
    %8 = vector.shape_cast %7 : vector<128xf32> to vector<1x128xf32>
    %9 = tpu.iota {dimensions = array<i32: 0>} : vector<8x128xi32>
    %c0_i32 = arith.constant 0 : i32
    %10 = vector.broadcast %c0_i32 : i32 to vector<8x128xi32>
    %11 = arith.cmpi eq, %9, %10 : vector<8x128xi32>
    %c1_i32 = arith.constant 1 : i32
    %12 = vector.broadcast %c1_i32 : i32 to vector<8x128xi32>
    %13 = arith.cmpi eq, %9, %12 : vector<8x128xi32>
    %cst_7 = arith.constant 0.000000e+00 : f32
    %14 = vector.shape_cast %8 : vector<1x128xf32> to vector<1x128xf32>
    %15 = vector.broadcast %14 : vector<1x128xf32> to vector<8x128xf32>
    %16 = vector.broadcast %cst_7 : f32 to vector<8x128xf32>
    %17 = arith.select %13, %15, %16 : vector<8x128xi1>, vector<8x128xf32>
    %18 = vector.shape_cast %5 : vector<1x128xf32> to vector<1x128xf32>
    %19 = vector.broadcast %18 : vector<1x128xf32> to vector<8x128xf32>
    %20 = arith.select %11, %19, %17 : vector<8x128xi1>, vector<8x128xf32>
    %c0_8 = arith.constant 0 : index
    %c0_9 = arith.constant 0 : index
    %c0_10 = arith.constant 0 : index
    %21 = vector.load %arg4[%c0_8, %c0_9, %c0_10] : memref<1x8x128xf32, #tpu.memory_space<vmem>>, vector<1x8x128xf32>
    %22 = vector.shape_cast %21 : vector<1x8x128xf32> to vector<8x128xf32>
    %23 = vector.shape_cast %20 : vector<8x128xf32> to vector<1x8x128xf32>
    tpu.vector_store %arg4[%c0_8, %c0_9, %c0_10], %23 {strides = array<i32>} : memref<1x8x128xf32, #tpu.memory_space<vmem>>, vector<1x8x128xf32>,
    return
  }
  func.func @transform_0(%arg0: i32) -> (i32, i32) {
    %c0_i32 = arith.constant 0 : i32
    %c0_i32_0 = arith.constant 0 : i32
    return %arg0, %c0_i32 : i32, i32
  }
  func.func @transform_1(%arg0: i32) -> (i32, i32) {
    %c0_i32 = arith.constant 0 : i32
    %c0_i32_0 = arith.constant 0 : i32
    %c0_i32_1 = arith.constant 0 : i32
    return %c0_i32, %c0_i32_0 : i32, i32
  }
  func.func @transform_2(%arg0: i32) -> (i32, i32) {
    %c0_i32 = arith.constant 0 : i32
    %c0_i32_0 = arith.constant 0 : i32
    return %arg0, %c0_i32 : i32, i32
  }
  func.func @transform_3(%arg0: i32) -> (i32, i32, i32) {
    %c0_i32 = arith.constant 0 : i32
    %c0_i32_0 = arith.constant 0 : i32
    %c0_i32_1 = arith.constant 0 : i32
    return %arg0, %c0_i32, %c0_i32_0 : i32, i32, i32
  }
}

module attributes {stable_mosaic.version = 11 : i64} {
  func.func @_matmul_stats_kernel(%arg0: i32, %arg1: memref<32x128xbf16, #tpu.memory_space<vmem>>, %arg2: memref<128x128xbf16, #tpu.memory_space<vmem>>, %arg3: memref<32x128xf32, #tpu.memory_space<vmem>>, %arg4: memref<1x8x128xf32, #tpu.memory_space<vmem>>) attributes {dimension_semantics = [#tpu.dimension_semantics<parallel>], iteration_bounds = array<i64: 1>, scalar_prefetch = 0 : i64, scratch_operands = 0 : i64, tpu.core_type = #tpu.core_type<tc>, window_params = [{transform_indices = @transform_0, window_bounds = array<i64: 32, 128>}, {pipeline_mode = #tpu.pipeline_mode<synchronous>, transform_indices = @transform_1, window_bounds = array<i64: 128, 128>}, {transform_indices = @transform_2, window_bounds = array<i64: 32, 128>}, {transform_indices = @transform_3, window_bounds = array<i64: 1, 8, 128>}]} {
    %c0 = arith.constant 0 : index
    %c0_0 = arith.constant 0 : index
    %0 = vector.load %arg1[%c0, %c0_0] : memref<32x128xbf16, #tpu.memory_space<vmem>>, vector<32x128xbf16>
    %c0_1 = arith.constant 0 : index
    %c0_2 = arith.constant 0 : index
    %1 = vector.load %arg2[%c0_1, %c0_2] : memref<128x128xbf16, #tpu.memory_space<vmem>>, vector<128x128xbf16>
    %cst = arith.constant dense<0.000000e+00> : vector<32x128xf32>
    %2 = tpu.matmul %0, %1, %cst {dimension_numbers = #tpu.dot_dimension_numbers<[1], [0], [0], [1], [0, 0, 1, 1], [], []>} : vector<32x128xbf16>, vector<128x128xbf16>, vector<32x128xf32> -> vector<32x128xf32>
    %c0_3 = arith.constant 0 : index
    %c0_4 = arith.constant 0 : index
    %3 = vector.load %arg3[%c0_3, %c0_4] : memref<32x128xf32, #tpu.memory_space<vmem>>, vector<32x128xf32>
    tpu.vector_store %arg3[%c0_3, %c0_4], %2 {strides = array<i32>} : memref<32x128xf32, #tpu.memory_space<vmem>>, vector<32x128xf32>,
    %cst_5 = arith.constant dense<0.000000e+00> : vector<128xf32>
    %4 = vector.multi_reduction <add>, %2, %cst_5 [0] : vector<32x128xf32> to vector<128xf32>
    %5 = vector.shape_cast %4 : vector<128xf32> to vector<1x128xf32>
    %6 = arith.mulf %2, %2 : vector<32x128xf32>
    %cst_6 = arith.constant dense<0.000000e+00> : vector<128xf32>
    %7 = vector.multi_reduction <add>, %6, %cst_6 [0] : vector<32x128xf32> to vector<128xf32>
    %8 = vector.shape_cast %7 : vector<128xf32> to vector<1x128xf32>
    %9 = tpu.iota {dimensions = array<i32: 0>} : vector<8x128xi32>
    %c0_i32 = arith.constant 0 : i32
    %10 = vector.broadcast %c0_i32 : i32 to vector<8x128xi32>
    %11 = arith.cmpi eq, %9, %10 : vector<8x128xi32>
    %c1_i32 = arith.constant 1 : i32
    %12 = vector.broadcast %c1_i32 : i32 to vector<8x128xi32>
    %13 = arith.cmpi eq, %9, %12 : vector<8x128xi32>
    %cst_7 = arith.constant 0.000000e+00 : f32
    %14 = vector.shape_cast %8 : vector<1x128xf32> to vector<1x128xf32>
    %15 = vector.broadcast %14 : vector<1x128xf32> to vector<8x128xf32>
    %16 = vector.broadcast %cst_7 : f32 to vector<8x128xf32>
    %17 = arith.select %13, %15, %16 : vector<8x128xi1>, vector<8x128xf32>
    %18 = vector.shape_cast %5 : vector<1x128xf32> to vector<1x128xf32>
    %19 = vector.broadcast %18 : vector<1x128xf32> to vector<8x128xf32>
    %20 = arith.select %11, %19, %17 : vector<8x128xi1>, vector<8x128xf32>
    %c0_8 = arith.constant 0 : index
    %c0_9 = arith.constant 0 : index
    %c0_10 = arith.constant 0 : index
    %21 = vector.load %arg4[%c0_8, %c0_9, %c0_10] : memref<1x8x128xf32, #tpu.memory_space<vmem>>, vector<1x8x128xf32>
    %22 = vector.shape_cast %21 : vector<1x8x128xf32> to vector<8x128xf32>
    %23 = vector.shape_cast %20 : vector<8x128xf32> to vector<1x8x128xf32>
    tpu.vector_store %arg4[%c0_8, %c0_9, %c0_10], %23 {strides = array<i32>} : memref<1x8x128xf32, #tpu.memory_space<vmem>>, vector<1x8x128xf32>,
    return
  }
  func.func @transform_0(%arg0: i32) -> (i32, i32) {
    %c0_i32 = arith.constant 0 : i32
    %c0_i32_0 = arith.constant 0 : i32
    return %arg0, %c0_i32 : i32, i32
  }
  func.func @transform_1(%arg0: i32) -> (i32, i32) {
    %c0_i32 = arith.constant 0 : i32
    %c0_i32_0 = arith.constant 0 : i32
    %c0_i32_1 = arith.constant 0 : i32
    return %c0_i32, %c0_i32_0 : i32, i32
  }
  func.func @transform_2(%arg0: i32) -> (i32, i32) {
    %c0_i32 = arith.constant 0 : i32
    %c0_i32_0 = arith.constant 0 : i32
    return %arg0, %c0_i32 : i32, i32
  }
  func.func @transform_3(%arg0: i32) -> (i32, i32, i32) {
    %c0_i32 = arith.constant 0 : i32
    %c0_i32_0 = arith.constant 0 : i32
    %c0_i32_1 = arith.constant 0 : i32
    return %arg0, %c0_i32, %c0_i32_0 : i32, i32, i32
  }
}

module attributes {stable_mosaic.version = 11 : i64} {
  func.func @_matmul_stats_kernel(%arg0: i32, %arg1: memref<128x256xbf16, #tpu.memory_space<vmem>>, %arg2: memref<256x128xbf16, #tpu.memory_space<vmem>>, %arg3: memref<128x128xf32, #tpu.memory_space<vmem>>, %arg4: memref<1x8x128xf32, #tpu.memory_space<vmem>>) attributes {dimension_semantics = [#tpu.dimension_semantics<parallel>], iteration_bounds = array<i64: 1>, scalar_prefetch = 0 : i64, scratch_operands = 0 : i64, tpu.core_type = #tpu.core_type<tc>, window_params = [{transform_indices = @transform_0, window_bounds = array<i64: 128, 256>}, {pipeline_mode = #tpu.pipeline_mode<synchronous>, transform_indices = @transform_1, window_bounds = array<i64: 256, 128>}, {transform_indices = @transform_2, window_bounds = array<i64: 128, 128>}, {transform_indices = @transform_3, window_bounds = array<i64: 1, 8, 128>}]} {
    %c0 = arith.constant 0 : index
    %c0_0 = arith.constant 0 : index
    %0 = vector.load %arg1[%c0, %c0_0] : memref<128x256xbf16, #tpu.memory_space<vmem>>, vector<128x256xbf16>
    %c0_1 = arith.constant 0 : index
    %c0_2 = arith.constant 0 : index
    %1 = vector.load %arg2[%c0_1, %c0_2] : memref<256x128xbf16, #tpu.memory_space<vmem>>, vector<256x128xbf16>
    %cst = arith.constant dense<0.000000e+00> : vector<128x128xf32>
    %2 = tpu.matmul %0, %1, %cst {dimension_numbers = #tpu.dot_dimension_numbers<[1], [0], [0], [1], [0, 0, 1, 1], [], []>} : vector<128x256xbf16>, vector<256x128xbf16>, vector<128x128xf32> -> vector<128x128xf32>
    %c0_3 = arith.constant 0 : index
    %c0_4 = arith.constant 0 : index
    %3 = vector.load %arg3[%c0_3, %c0_4] : memref<128x128xf32, #tpu.memory_space<vmem>>, vector<128x128xf32>
    tpu.vector_store %arg3[%c0_3, %c0_4], %2 {strides = array<i32>} : memref<128x128xf32, #tpu.memory_space<vmem>>, vector<128x128xf32>,
    %cst_5 = arith.constant dense<0.000000e+00> : vector<128xf32>
    %4 = vector.multi_reduction <add>, %2, %cst_5 [0] : vector<128x128xf32> to vector<128xf32>
    %5 = vector.shape_cast %4 : vector<128xf32> to vector<1x128xf32>
    %6 = arith.mulf %2, %2 : vector<128x128xf32>
    %cst_6 = arith.constant dense<0.000000e+00> : vector<128xf32>
    %7 = vector.multi_reduction <add>, %6, %cst_6 [0] : vector<128x128xf32> to vector<128xf32>
    %8 = vector.shape_cast %7 : vector<128xf32> to vector<1x128xf32>
    %9 = tpu.iota {dimensions = array<i32: 0>} : vector<8x128xi32>
    %c0_i32 = arith.constant 0 : i32
    %10 = vector.broadcast %c0_i32 : i32 to vector<8x128xi32>
    %11 = arith.cmpi eq, %9, %10 : vector<8x128xi32>
    %c1_i32 = arith.constant 1 : i32
    %12 = vector.broadcast %c1_i32 : i32 to vector<8x128xi32>
    %13 = arith.cmpi eq, %9, %12 : vector<8x128xi32>
    %cst_7 = arith.constant 0.000000e+00 : f32
    %14 = vector.shape_cast %8 : vector<1x128xf32> to vector<1x128xf32>
    %15 = vector.broadcast %14 : vector<1x128xf32> to vector<8x128xf32>
    %16 = vector.broadcast %cst_7 : f32 to vector<8x128xf32>
    %17 = arith.select %13, %15, %16 : vector<8x128xi1>, vector<8x128xf32>
    %18 = vector.shape_cast %5 : vector<1x128xf32> to vector<1x128xf32>
    %19 = vector.broadcast %18 : vector<1x128xf32> to vector<8x128xf32>
    %20 = arith.select %11, %19, %17 : vector<8x128xi1>, vector<8x128xf32>
    %c0_8 = arith.constant 0 : index
    %c0_9 = arith.constant 0 : index
    %c0_10 = arith.constant 0 : index
    %21 = vector.load %arg4[%c0_8, %c0_9, %c0_10] : memref<1x8x128xf32, #tpu.memory_space<vmem>>, vector<1x8x128xf32>
    %22 = vector.shape_cast %21 : vector<1x8x128xf32> to vector<8x128xf32>
    %23 = vector.shape_cast %20 : vector<8x128xf32> to vector<1x8x128xf32>
    tpu.vector_store %arg4[%c0_8, %c0_9, %c0_10], %23 {strides = array<i32>} : memref<1x8x128xf32, #tpu.memory_space<vmem>>, vector<1x8x128xf32>,
    return
  }
  func.func @transform_0(%arg0: i32) -> (i32, i32) {
    %c0_i32 = arith.constant 0 : i32
    %c0_i32_0 = arith.constant 0 : i32
    return %arg0, %c0_i32 : i32, i32
  }
  func.func @transform_1(%arg0: i32) -> (i32, i32) {
    %c0_i32 = arith.constant 0 : i32
    %c0_i32_0 = arith.constant 0 : i32
    %c0_i32_1 = arith.constant 0 : i32
    return %c0_i32, %c0_i32_0 : i32, i32
  }
  func.func @transform_2(%arg0: i32) -> (i32, i32) {
    %c0_i32 = arith.constant 0 : i32
    %c0_i32_0 = arith.constant 0 : i32
    return %arg0, %c0_i32 : i32, i32
  }
  func.func @transform_3(%arg0: i32) -> (i32, i32, i32) {
    %c0_i32 = arith.constant 0 : i32
    %c0_i32_0 = arith.constant 0 : i32
    %c0_i32_1 = arith.constant 0 : i32
    return %arg0, %c0_i32, %c0_i32_0 : i32, i32, i32
  }
}

module attributes {stable_mosaic.version = 11 : i64} {
  func.func @_matmul_stats_kernel(%arg0: i32, %arg1: memref<128x512xbf16, #tpu.memory_space<vmem>>, %arg2: memref<512x128xbf16, #tpu.memory_space<vmem>>, %arg3: memref<128x128xf32, #tpu.memory_space<vmem>>, %arg4: memref<1x8x128xf32, #tpu.memory_space<vmem>>) attributes {dimension_semantics = [#tpu.dimension_semantics<parallel>], iteration_bounds = array<i64: 1>, scalar_prefetch = 0 : i64, scratch_operands = 0 : i64, tpu.core_type = #tpu.core_type<tc>, window_params = [{transform_indices = @transform_0, window_bounds = array<i64: 128, 512>}, {pipeline_mode = #tpu.pipeline_mode<synchronous>, transform_indices = @transform_1, window_bounds = array<i64: 512, 128>}, {transform_indices = @transform_2, window_bounds = array<i64: 128, 128>}, {transform_indices = @transform_3, window_bounds = array<i64: 1, 8, 128>}]} {
    %c0 = arith.constant 0 : index
    %c0_0 = arith.constant 0 : index
    %0 = vector.load %arg1[%c0, %c0_0] : memref<128x512xbf16, #tpu.memory_space<vmem>>, vector<128x512xbf16>
    %c0_1 = arith.constant 0 : index
    %c0_2 = arith.constant 0 : index
    %1 = vector.load %arg2[%c0_1, %c0_2] : memref<512x128xbf16, #tpu.memory_space<vmem>>, vector<512x128xbf16>
    %cst = arith.constant dense<0.000000e+00> : vector<128x128xf32>
    %2 = tpu.matmul %0, %1, %cst {dimension_numbers = #tpu.dot_dimension_numbers<[1], [0], [0], [1], [0, 0, 1, 1], [], []>} : vector<128x512xbf16>, vector<512x128xbf16>, vector<128x128xf32> -> vector<128x128xf32>
    %c0_3 = arith.constant 0 : index
    %c0_4 = arith.constant 0 : index
    %3 = vector.load %arg3[%c0_3, %c0_4] : memref<128x128xf32, #tpu.memory_space<vmem>>, vector<128x128xf32>
    tpu.vector_store %arg3[%c0_3, %c0_4], %2 {strides = array<i32>} : memref<128x128xf32, #tpu.memory_space<vmem>>, vector<128x128xf32>,
    %cst_5 = arith.constant dense<0.000000e+00> : vector<128xf32>
    %4 = vector.multi_reduction <add>, %2, %cst_5 [0] : vector<128x128xf32> to vector<128xf32>
    %5 = vector.shape_cast %4 : vector<128xf32> to vector<1x128xf32>
    %6 = arith.mulf %2, %2 : vector<128x128xf32>
    %cst_6 = arith.constant dense<0.000000e+00> : vector<128xf32>
    %7 = vector.multi_reduction <add>, %6, %cst_6 [0] : vector<128x128xf32> to vector<128xf32>
    %8 = vector.shape_cast %7 : vector<128xf32> to vector<1x128xf32>
    %9 = tpu.iota {dimensions = array<i32: 0>} : vector<8x128xi32>
    %c0_i32 = arith.constant 0 : i32
    %10 = vector.broadcast %c0_i32 : i32 to vector<8x128xi32>
    %11 = arith.cmpi eq, %9, %10 : vector<8x128xi32>
    %c1_i32 = arith.constant 1 : i32
    %12 = vector.broadcast %c1_i32 : i32 to vector<8x128xi32>
    %13 = arith.cmpi eq, %9, %12 : vector<8x128xi32>
    %cst_7 = arith.constant 0.000000e+00 : f32
    %14 = vector.shape_cast %8 : vector<1x128xf32> to vector<1x128xf32>
    %15 = vector.broadcast %14 : vector<1x128xf32> to vector<8x128xf32>
    %16 = vector.broadcast %cst_7 : f32 to vector<8x128xf32>
    %17 = arith.select %13, %15, %16 : vector<8x128xi1>, vector<8x128xf32>
    %18 = vector.shape_cast %5 : vector<1x128xf32> to vector<1x128xf32>
    %19 = vector.broadcast %18 : vector<1x128xf32> to vector<8x128xf32>
    %20 = arith.select %11, %19, %17 : vector<8x128xi1>, vector<8x128xf32>
    %c0_8 = arith.constant 0 : index
    %c0_9 = arith.constant 0 : index
    %c0_10 = arith.constant 0 : index
    %21 = vector.load %arg4[%c0_8, %c0_9, %c0_10] : memref<1x8x128xf32, #tpu.memory_space<vmem>>, vector<1x8x128xf32>
    %22 = vector.shape_cast %21 : vector<1x8x128xf32> to vector<8x128xf32>
    %23 = vector.shape_cast %20 : vector<8x128xf32> to vector<1x8x128xf32>
    tpu.vector_store %arg4[%c0_8, %c0_9, %c0_10], %23 {strides = array<i32>} : memref<1x8x128xf32, #tpu.memory_space<vmem>>, vector<1x8x128xf32>,
    return
  }
  func.func @transform_0(%arg0: i32) -> (i32, i32) {
    %c0_i32 = arith.constant 0 : i32
    %c0_i32_0 = arith.constant 0 : i32
    return %arg0, %c0_i32 : i32, i32
  }
  func.func @transform_1(%arg0: i32) -> (i32, i32) {
    %c0_i32 = arith.constant 0 : i32
    %c0_i32_0 = arith.constant 0 : i32
    %c0_i32_1 = arith.constant 0 : i32
    return %c0_i32, %c0_i32_0 : i32, i32
  }
  func.func @transform_2(%arg0: i32) -> (i32, i32) {
    %c0_i32 = arith.constant 0 : i32
    %c0_i32_0 = arith.constant 0 : i32
    return %arg0, %c0_i32 : i32, i32
  }
  func.func @transform_3(%arg0: i32) -> (i32, i32, i32) {
    %c0_i32 = arith.constant 0 : i32
    %c0_i32_0 = arith.constant 0 : i32
    %c0_i32_1 = arith.constant 0 : i32
    return %arg0, %c0_i32, %c0_i32_0 : i32, i32, i32
  }
}

module attributes {stable_mosaic.version = 11 : i64} {
  func.func @_matmul_stats_kernel(%arg0: i32, %arg1: memref<128x128xbf16, #tpu.memory_space<vmem>>, %arg2: memref<128x128xbf16, #tpu.memory_space<vmem>>, %arg3: memref<128x128xf32, #tpu.memory_space<vmem>>, %arg4: memref<1x8x128xf32, #tpu.memory_space<vmem>>) attributes {dimension_semantics = [#tpu.dimension_semantics<parallel>], iteration_bounds = array<i64: 1>, scalar_prefetch = 0 : i64, scratch_operands = 0 : i64, tpu.core_type = #tpu.core_type<tc>, window_params = [{transform_indices = @transform_0, window_bounds = array<i64: 128, 128>}, {pipeline_mode = #tpu.pipeline_mode<synchronous>, transform_indices = @transform_1, window_bounds = array<i64: 128, 128>}, {transform_indices = @transform_2, window_bounds = array<i64: 128, 128>}, {transform_indices = @transform_3, window_bounds = array<i64: 1, 8, 128>}]} {
    %c0 = arith.constant 0 : index
    %c0_0 = arith.constant 0 : index
    %0 = vector.load %arg1[%c0, %c0_0] : memref<128x128xbf16, #tpu.memory_space<vmem>>, vector<128x128xbf16>
    %c0_1 = arith.constant 0 : index
    %c0_2 = arith.constant 0 : index
    %1 = vector.load %arg2[%c0_1, %c0_2] : memref<128x128xbf16, #tpu.memory_space<vmem>>, vector<128x128xbf16>
    %cst = arith.constant dense<0.000000e+00> : vector<128x128xf32>
    %2 = tpu.matmul %0, %1, %cst {dimension_numbers = #tpu.dot_dimension_numbers<[1], [0], [0], [1], [0, 0, 1, 1], [], []>} : vector<128x128xbf16>, vector<128x128xbf16>, vector<128x128xf32> -> vector<128x128xf32>
    %c0_3 = arith.constant 0 : index
    %c0_4 = arith.constant 0 : index
    %3 = vector.load %arg3[%c0_3, %c0_4] : memref<128x128xf32, #tpu.memory_space<vmem>>, vector<128x128xf32>
    tpu.vector_store %arg3[%c0_3, %c0_4], %2 {strides = array<i32>} : memref<128x128xf32, #tpu.memory_space<vmem>>, vector<128x128xf32>,
    %cst_5 = arith.constant dense<0.000000e+00> : vector<128xf32>
    %4 = vector.multi_reduction <add>, %2, %cst_5 [0] : vector<128x128xf32> to vector<128xf32>
    %5 = vector.shape_cast %4 : vector<128xf32> to vector<1x128xf32>
    %6 = arith.mulf %2, %2 : vector<128x128xf32>
    %cst_6 = arith.constant dense<0.000000e+00> : vector<128xf32>
    %7 = vector.multi_reduction <add>, %6, %cst_6 [0] : vector<128x128xf32> to vector<128xf32>
    %8 = vector.shape_cast %7 : vector<128xf32> to vector<1x128xf32>
    %9 = tpu.iota {dimensions = array<i32: 0>} : vector<8x128xi32>
    %c0_i32 = arith.constant 0 : i32
    %10 = vector.broadcast %c0_i32 : i32 to vector<8x128xi32>
    %11 = arith.cmpi eq, %9, %10 : vector<8x128xi32>
    %c1_i32 = arith.constant 1 : i32
    %12 = vector.broadcast %c1_i32 : i32 to vector<8x128xi32>
    %13 = arith.cmpi eq, %9, %12 : vector<8x128xi32>
    %cst_7 = arith.constant 0.000000e+00 : f32
    %14 = vector.shape_cast %8 : vector<1x128xf32> to vector<1x128xf32>
    %15 = vector.broadcast %14 : vector<1x128xf32> to vector<8x128xf32>
    %16 = vector.broadcast %cst_7 : f32 to vector<8x128xf32>
    %17 = arith.select %13, %15, %16 : vector<8x128xi1>, vector<8x128xf32>
    %18 = vector.shape_cast %5 : vector<1x128xf32> to vector<1x128xf32>
    %19 = vector.broadcast %18 : vector<1x128xf32> to vector<8x128xf32>
    %20 = arith.select %11, %19, %17 : vector<8x128xi1>, vector<8x128xf32>
    %c0_8 = arith.constant 0 : index
    %c0_9 = arith.constant 0 : index
    %c0_10 = arith.constant 0 : index
    %21 = vector.load %arg4[%c0_8, %c0_9, %c0_10] : memref<1x8x128xf32, #tpu.memory_space<vmem>>, vector<1x8x128xf32>
    %22 = vector.shape_cast %21 : vector<1x8x128xf32> to vector<8x128xf32>
    %23 = vector.shape_cast %20 : vector<8x128xf32> to vector<1x8x128xf32>
    tpu.vector_store %arg4[%c0_8, %c0_9, %c0_10], %23 {strides = array<i32>} : memref<1x8x128xf32, #tpu.memory_space<vmem>>, vector<1x8x128xf32>,
    return
  }
  func.func @transform_0(%arg0: i32) -> (i32, i32) {
    %c0_i32 = arith.constant 0 : i32
    %c0_i32_0 = arith.constant 0 : i32
    return %arg0, %c0_i32 : i32, i32
  }
  func.func @transform_1(%arg0: i32) -> (i32, i32) {
    %c0_i32 = arith.constant 0 : i32
    %c0_i32_0 = arith.constant 0 : i32
    %c0_i32_1 = arith.constant 0 : i32
    return %c0_i32, %c0_i32_0 : i32, i32
  }
  func.func @transform_2(%arg0: i32) -> (i32, i32) {
    %c0_i32 = arith.constant 0 : i32
    %c0_i32_0 = arith.constant 0 : i32
    return %arg0, %c0_i32 : i32, i32
  }
  func.func @transform_3(%arg0: i32) -> (i32, i32, i32) {
    %c0_i32 = arith.constant 0 : i32
    %c0_i32_0 = arith.constant 0 : i32
    %c0_i32_1 = arith.constant 0 : i32
    return %arg0, %c0_i32, %c0_i32_0 : i32, i32, i32
  }
}

module attributes {stable_mosaic.version = 11 : i64} {
  func.func @_matmul_bias_kernel(%arg0: i32, %arg1: memref<512x1152xbf16, #tpu.memory_space<vmem>>, %arg2: memref<1152x128xbf16, #tpu.memory_space<vmem>>, %arg3: memref<1x128xf32, #tpu.memory_space<vmem>>, %arg4: memref<512x128xf32, #tpu.memory_space<vmem>>) attributes {dimension_semantics = [#tpu.dimension_semantics<parallel>], iteration_bounds = array<i64: 1>, scalar_prefetch = 0 : i64, scratch_operands = 0 : i64, tpu.core_type = #tpu.core_type<tc>, window_params = [{transform_indices = @transform_0, window_bounds = array<i64: 512, 1152>}, {pipeline_mode = #tpu.pipeline_mode<synchronous>, transform_indices = @transform_1, window_bounds = array<i64: 1152, 128>}, {pipeline_mode = #tpu.pipeline_mode<synchronous>, transform_indices = @transform_2, window_bounds = array<i64: 1, 128>}, {transform_indices = @transform_3, window_bounds = array<i64: 512, 128>}]} {
    %c0 = arith.constant 0 : index
    %c0_0 = arith.constant 0 : index
    %0 = vector.load %arg1[%c0, %c0_0] : memref<512x1152xbf16, #tpu.memory_space<vmem>>, vector<512x1152xbf16>
    %c0_1 = arith.constant 0 : index
    %c0_2 = arith.constant 0 : index
    %1 = vector.load %arg2[%c0_1, %c0_2] : memref<1152x128xbf16, #tpu.memory_space<vmem>>, vector<1152x128xbf16>
    %cst = arith.constant dense<0.000000e+00> : vector<512x128xf32>
    %2 = tpu.matmul %0, %1, %cst {dimension_numbers = #tpu.dot_dimension_numbers<[1], [0], [0], [1], [0, 0, 1, 1], [], []>} : vector<512x1152xbf16>, vector<1152x128xbf16>, vector<512x128xf32> -> vector<512x128xf32>
    %c0_3 = arith.constant 0 : index
    %c0_4 = arith.constant 0 : index
    %3 = vector.load %arg3[%c0_3, %c0_4] : memref<1x128xf32, #tpu.memory_space<vmem>>, vector<1x128xf32>
    %4 = vector.broadcast %3 : vector<1x128xf32> to vector<512x128xf32>
    %5 = arith.addf %2, %4 : vector<512x128xf32>
    %cst_5 = arith.constant 0.000000e+00 : f32
    %6 = vector.broadcast %cst_5 : f32 to vector<512x128xf32>
    %7 = arith.maximumf %5, %6 : vector<512x128xf32>
    %c0_6 = arith.constant 0 : index
    %c0_7 = arith.constant 0 : index
    %8 = vector.load %arg4[%c0_6, %c0_7] : memref<512x128xf32, #tpu.memory_space<vmem>>, vector<512x128xf32>
    tpu.vector_store %arg4[%c0_6, %c0_7], %7 {strides = array<i32>} : memref<512x128xf32, #tpu.memory_space<vmem>>, vector<512x128xf32>,
    return
  }
  func.func @transform_0(%arg0: i32) -> (i32, i32) {
    %c0_i32 = arith.constant 0 : i32
    %c0_i32_0 = arith.constant 0 : i32
    return %arg0, %c0_i32 : i32, i32
  }
  func.func @transform_1(%arg0: i32) -> (i32, i32) {
    %c0_i32 = arith.constant 0 : i32
    %c0_i32_0 = arith.constant 0 : i32
    %c0_i32_1 = arith.constant 0 : i32
    return %c0_i32, %c0_i32_0 : i32, i32
  }
  func.func @transform_2(%arg0: i32) -> (i32, i32) {
    %c0_i32 = arith.constant 0 : i32
    %c0_i32_0 = arith.constant 0 : i32
    %c0_i32_1 = arith.constant 0 : i32
    return %c0_i32, %c0_i32_0 : i32, i32
  }
  func.func @transform_3(%arg0: i32) -> (i32, i32) {
    %c0_i32 = arith.constant 0 : i32
    %c0_i32_0 = arith.constant 0 : i32
    return %arg0, %c0_i32 : i32, i32
  }
}

</mosaic_0001>

<bundles_post_ra>
// kernel: resnet_generator_forward.32
= control target key start
LH: loop header
LB: loop body
LE: loop exit
PB: predicated region body
PF: predicated region fallthrough
CT: control target
= control target key end

     0   :  { %s1375_s0 = inlined_call_operand.vmem [shape: f32[512,128], index: 0, kind: input, shape index: {}]   ;;  %s1376_s1 = inlined_call_operand.vmem [shape: f32[1,128], index: 1, kind: input, shape index: {}]   ;;  %s1377_s2 = inlined_call_operand.vmem [shape: f32[1,128], index: 2, kind: input, shape index: {}]   ;;  %s1378_s3 = inlined_call_operand.vmem [shape: bf16[512,128], index: 3, kind: output, shape index: {}]  }
   0x1   :  { %v14_v0 = vld [vmem:[%s1375_s0] sm:$0xff]  ;;  %v15_v1 = vld [vmem:[%s1375_s0 + $0x8] sm:$0xff]  ;;  %v16_v6 = vld [vmem:[%s1375_s0 + $0x10] sm:$0xff] }
   0x2   :  { %v958_v2 = vld [vmem:[%s1376_s1] ss:$0 sm:$0xff]  ;;  %v17_v7 = vld [vmem:[%s1375_s0 + $0x18] sm:$0xff]  ;;  %v19_v11 = vld [vmem:[%s1375_s0 + $0x28] sm:$0xff] }
   0x3   :  { %v85_v3 = vmul.f32 %v958_v2, %v14_v0  ;;  %v86_v4 = vmul.f32 %v958_v2, %v15_v1  ;;  %v965_v5 = vld [vmem:[%s1377_s2] ss:$0 sm:$0xff]  ;;  %v87_v8 = vmul.f32 %v958_v2, %v16_v6  ;;  %v88_v9 = vmul.f32 %v958_v2, %v17_v7  ;;  %v20_v12 = vld [vmem:[%s1375_s0 + $0x30] sm:$0xff]  ;;  %v21_v17 = vld [vmem:[%s1375_s0 + $0x38] sm:$0xff] }
   0x4   :  { %v18_v10 = vld [vmem:[%s1375_s0 + $0x20] sm:$0xff]  ;;  %v90_v16 = vmul.f32 %v958_v2, %v19_v11  ;;  %v91_v20 = vmul.f32 %v958_v2, %v20_v12  ;;  %v92_v21 = vmul.f32 %v958_v2, %v21_v17  ;;  %v23_v27 = vld [vmem:[%s1375_s0 + $0x48] sm:$0xff]  ;;  %v24_v32 = vld [vmem:[%s1375_s0 + $0x50] sm:$0xff] }
   0x5   :  { %v156_v13 = vadd.f32 %v965_v5, %v85_v3  ;;  %v157_v14 = vadd.f32 %v965_v5, %v86_v4  ;;  %v89_v15 = vmul.f32 %v958_v2, %v18_v10  ;;  %v158_v18 = vadd.f32 %v965_v5, %v87_v8  ;;  %v22_v22 = vld [vmem:[%s1375_s0 + $0x40] sm:$0xff]  ;;  %v25_v33 = vld [vmem:[%s1375_s0 + $0x58] sm:$0xff]  ;;  %v27_v39 = vld [vmem:[%s1375_s0 + $0x68] sm:$0xff] }
   0x6   :  { %v159_v19 = vadd.f32 %v965_v5, %v88_v9  ;;  %v161_v26 = vadd.f32 %v965_v5, %v90_v16  ;;  %v162_v30 = vadd.f32 %v965_v5, %v91_v20  ;;  %v163_v31 = vadd.f32 %v965_v5, %v92_v21  ;;  %v26_v38 = vld [vmem:[%s1375_s0 + $0x60] sm:$0xff]  ;;  %v28_v44 = vld [vmem:[%s1375_s0 + $0x70] sm:$0xff]  ;;  %v29_v49 = vld [vmem:[%s1375_s0 + $0x78] sm:$0xff] }
   0x7   :  { %v220_v23 = vmax.f32 %v156_v13, 0.0  ;;  %v221_v24 = vmax.f32 %v157_v14, 0.0  ;;  %v160_v25 = vadd.f32 %v965_v5, %v89_v15  ;;  %v222_v28 = vmax.f32 %v158_v18, 0.0  ;;  %v30_v54 = vld [vmem:[%s1375_s0 + $0x80] sm:$0xff]  ;;  %v31_v63 = vld [vmem:[%s1375_s0 + $0x88] sm:$0xff]  ;;  %v32_v6 = vld [vmem:[%s1375_s0 + $0x90] sm:$0xff] }
   0x8   :  { %v223_v29 = vmax.f32 %v159_v19, 0.0  ;;  %v225_v36 = vmax.f32 %v161_v26, 0.0  ;;  %v93_v37 = vmul.f32 %v958_v2, %v22_v22  ;;  %v226_v41 = vmax.f32 %v162_v30, 0.0  ;;  %v33_v7 = vld [vmem:[%s1375_s0 + $0x98] sm:$0xff]  ;;  %v34_v12 = vld [vmem:[%s1375_s0 + $0xa0] sm:$0xff]  ;;  %v35_v13 = vld [vmem:[%s1375_s0 + $0xa8] sm:$0xff] }
   0x9   :  { %v741_v34 = vpack.c.bf16 %v221_v24, %v220_v23  ;;  %v224_v35 = vmax.f32 %v160_v25, 0.0  ;;  %v227_v42 = vmax.f32 %v163_v31, 0.0  ;;  %v94_v43 = vmul.f32 %v958_v2, %v23_v27  ;;  %v36_v18 = vld [vmem:[%s1375_s0 + $0xb0] sm:$0xff]  ;;  %v37_v23 = vld [vmem:[%s1375_s0 + $0xb8] sm:$0xff] }
   0xa   :  { %v746_v40 = vpack.c.bf16 %v223_v29, %v222_v28  ;;  %v164_v46 = vadd.f32 %v965_v5, %v93_v37  ;;  %v95_v47 = vmul.f32 %v958_v2, %v24_v32  ;;  %v96_v48 = vmul.f32 %v958_v2, %v25_v33  ;;  %v38_v28 = vld [vmem:[%s1375_s0 + $0xc0] sm:$0xff]  ;;  %v39_v37 = vld [vmem:[%s1375_s0 + $0xc8] sm:$0xff] }
   0xb   :  { %742 = vst [vmem:[%s1378_s3] sm:$0xff] %v741_v34   ;;  %v751_v45 = vpack.c.bf16 %v225_v36, %v224_v35  ;;  %v756_v50 = vpack.c.bf16 %v227_v42, %v226_v41  ;;  %v165_v51 = vadd.f32 %v965_v5, %v94_v43  ;;  %v97_v52 = vmul.f32 %v958_v2, %v26_v38  ;;  %v40_v42 = vld [vmem:[%s1375_s0 + $0xd0] sm:$0xff]  ;;  %v41_v43 = vld [vmem:[%s1375_s0 + $0xd8] sm:$0xff] }
   0xc   :  { %898 = vst [vmem:[%s1378_s3 + $0x8] sm:$0xff] %v746_v40   ;;  %v98_v53 = vmul.f32 %v958_v2, %v27_v39  ;;  %v228_v55 = vmax.f32 %v164_v46, 0.0  ;;  %v166_v56 = vadd.f32 %v965_v5, %v95_v47  ;;  %v167_v57 = vadd.f32 %v965_v5, %v96_v48  ;;  %v42_v48 = vld [vmem:[%s1375_s0 + $0xe0] sm:$0xff] }
   0xd   :  { %899 = vst [vmem:[%s1378_s3 + $0x10] sm:$0xff] %v751_v45   ;;  %v99_v58 = vmul.f32 %v958_v2, %v28_v44  ;;  %900 = vst [vmem:[%s1378_s3 + $0x18] sm:$0xff] %v756_v50   ;;  %v229_v59 = vmax.f32 %v165_v51, 0.0  ;;  %v168_v60 = vadd.f32 %v965_v5, %v97_v52  ;;  %v100_v62 = vmul.f32 %v958_v2, %v29_v49  ;;  %v43_v49 = vld [vmem:[%s1375_s0 + $0xe8] sm:$0xff] }
   0xe   :  { %v169_v61 = vadd.f32 %v965_v5, %v98_v53  ;;  %v230_v0 = vmax.f32 %v166_v56, 0.0  ;;  %v231_v1 = vmax.f32 %v167_v57, 0.0  ;;  %v101_v4 = vmul.f32 %v958_v2, %v30_v54  ;;  %v44_v54 = vld [vmem:[%s1375_s0 + $0xf0] sm:$0xff] }
   0xf   :  { %v170_v3 = vadd.f32 %v965_v5, %v99_v58  ;;  %v761_v8 = vpack.c.bf16 %v229_v59, %v228_v55  ;;  %v232_v9 = vmax.f32 %v168_v60, 0.0  ;;  %v171_v11 = vadd.f32 %v965_v5, %v100_v62  ;;  %v45_v59 = vld [vmem:[%s1375_s0 + $0xf8] sm:$0xff] }
  0x10   :  { %v233_v10 = vmax.f32 %v169_v61, 0.0  ;;  %v766_v14 = vpack.c.bf16 %v231_v1, %v230_v0  ;;  %v102_v16 = vmul.f32 %v958_v2, %v31_v63  ;;  %v172_v17 = vadd.f32 %v965_v5, %v101_v4  ;;  %v46_v0 = vld [vmem:[%s1375_s0 + $0x100] sm:$0xff] }
  0x11   :  { %v234_v15 = vmax.f32 %v170_v3, 0.0  ;;  %901 = vst [vmem:[%s1378_s3 + $0x20] sm:$0xff] %v761_v8   ;;  %v235_v20 = vmax.f32 %v171_v11, 0.0  ;;  %v103_v21 = vmul.f32 %v958_v2, %v32_v6  ;;  %v104_v22 = vmul.f32 %v958_v2, %v33_v7  ;;  %v47_v11 = vld [vmem:[%s1375_s0 + $0x108] sm:$0xff] }
  0x12   :  { %v771_v19 = vpack.c.bf16 %v233_v10, %v232_v9  ;;  %902 = vst [vmem:[%s1378_s3 + $0x28] sm:$0xff] %v766_v14   ;;  %v173_v24 = vadd.f32 %v965_v5, %v102_v16  ;;  %v236_v25 = vmax.f32 %v172_v17, 0.0  ;;  %v105_v26 = vmul.f32 %v958_v2, %v34_v12  ;;  %v48_v16 = vld [vmem:[%s1375_s0 + $0x110] sm:$0xff]  ;;  %v49_v17 = vld [vmem:[%s1375_s0 + $0x118] sm:$0xff] }
  0x13   :  { %v106_v27 = vmul.f32 %v958_v2, %v35_v13  ;;  %v776_v29 = vpack.c.bf16 %v235_v20, %v234_v15  ;;  %v174_v30 = vadd.f32 %v965_v5, %v103_v21  ;;  %v175_v31 = vadd.f32 %v965_v5, %v104_v22  ;;  %v50_v22 = vld [vmem:[%s1375_s0 + $0x120] sm:$0xff] }
  0x14   :  { %903 = vst [vmem:[%s1378_s3 + $0x30] sm:$0xff] %v771_v19   ;;  %v107_v32 = vmul.f32 %v958_v2, %v36_v18  ;;  %v237_v33 = vmax.f32 %v173_v24, 0.0  ;;  %v176_v34 = vadd.f32 %v965_v5, %v105_v26  ;;  %v108_v36 = vmul.f32 %v958_v2, %v37_v23  ;;  %v51_v23 = vld [vmem:[%s1375_s0 + $0x128] sm:$0xff] }
  0x15   :  { %v177_v35 = vadd.f32 %v965_v5, %v106_v27  ;;  %904 = vst [vmem:[%s1378_s3 + $0x38] sm:$0xff] %v776_v29   ;;  %v238_v38 = vmax.f32 %v174_v30, 0.0  ;;  %v239_v39 = vmax.f32 %v175_v31, 0.0  ;;  %v109_v41 = vmul.f32 %v958_v2, %v38_v28  ;;  %v52_v28 = vld [vmem:[%s1375_s0 + $0x130] sm:$0xff] }
  0x16   :  { %v178_v40 = vadd.f32 %v965_v5, %v107_v32  ;;  %v781_v44 = vpack.c.bf16 %v237_v33, %v236_v25  ;;  %v240_v45 = vmax.f32 %v176_v34, 0.0  ;;  %v179_v47 = vadd.f32 %v965_v5, %v108_v36  ;;  %v53_v33 = vld [vmem:[%s1375_s0 + $0x138] sm:$0xff] }
  0x17   :  { %v241_v46 = vmax.f32 %v177_v35, 0.0  ;;  %v786_v50 = vpack.c.bf16 %v239_v39, %v238_v38  ;;  %v110_v52 = vmul.f32 %v958_v2, %v39_v37  ;;  %v180_v53 = vadd.f32 %v965_v5, %v109_v41  ;;  %v54_v38 = vld [vmem:[%s1375_s0 + $0x140] sm:$0xff] }
  0x18   :  { %v242_v51 = vmax.f32 %v178_v40, 0.0  ;;  %905 = vst [vmem:[%s1378_s3 + $0x40] sm:$0xff] %v781_v44   ;;  %v243_v56 = vmax.f32 %v179_v47, 0.0  ;;  %v111_v57 = vmul.f32 %v958_v2, %v40_v42  ;;  %v112_v58 = vmul.f32 %v958_v2, %v41_v43  ;;  %v55_v47 = vld [vmem:[%s1375_s0 + $0x148] sm:$0xff] }
  0x19   :  { %v791_v55 = vpack.c.bf16 %v241_v46, %v240_v45  ;;  %906 = vst [vmem:[%s1378_s3 + $0x48] sm:$0xff] %v786_v50   ;;  %v181_v60 = vadd.f32 %v965_v5, %v110_v52  ;;  %v244_v61 = vmax.f32 %v180_v53, 0.0  ;;  %v113_v62 = vmul.f32 %v958_v2, %v42_v48  ;;  %v56_v52 = vld [vmem:[%s1375_s0 + $0x150] sm:$0xff]  ;;  %v57_v53 = vld [vmem:[%s1375_s0 + $0x158] sm:$0xff] }
  0x1a   :  { %v114_v63 = vmul.f32 %v958_v2, %v43_v49  ;;  %v796_v1 = vpack.c.bf16 %v243_v56, %v242_v51  ;;  %v182_v3 = vadd.f32 %v965_v5, %v111_v57  ;;  %v183_v4 = vadd.f32 %v965_v5, %v112_v58  ;;  %v58_v58 = vld [vmem:[%s1375_s0 + $0x160] sm:$0xff] }
  0x1b   :  { %907 = vst [vmem:[%s1378_s3 + $0x50] sm:$0xff] %v791_v55   ;;  %v115_v6 = vmul.f32 %v958_v2, %v44_v54  ;;  %v245_v7 = vmax.f32 %v181_v60, 0.0  ;;  %v184_v8 = vadd.f32 %v965_v5, %v113_v62  ;;  %v116_v10 = vmul.f32 %v958_v2, %v45_v59  ;;  %v59_v59 = vld [vmem:[%s1375_s0 + $0x168] sm:$0xff] }
  0x1c   :  { %v185_v9 = vadd.f32 %v965_v5, %v114_v63  ;;  %908 = vst [vmem:[%s1378_s3 + $0x58] sm:$0xff] %v796_v1   ;;  %v246_v12 = vmax.f32 %v182_v3, 0.0  ;;  %v247_v13 = vmax.f32 %v183_v4, 0.0  ;;  %v117_v15 = vmul.f32 %v958_v2, %v46_v0  ;;  %v60_v0 = vld [vmem:[%s1375_s0 + $0x170] sm:$0xff] }
  0x1d   :  { %v186_v14 = vadd.f32 %v965_v5, %v115_v6  ;;  %v801_v18 = vpack.c.bf16 %v245_v7, %v244_v61  ;;  %v248_v19 = vmax.f32 %v184_v8, 0.0  ;;  %v187_v21 = vadd.f32 %v965_v5, %v116_v10  ;;  %v61_v7 = vld [vmem:[%s1375_s0 + $0x178] sm:$0xff] }
  0x1e   :  { %v249_v20 = vmax.f32 %v185_v9, 0.0  ;;  %v806_v24 = vpack.c.bf16 %v247_v13, %v246_v12  ;;  %v118_v26 = vmul.f32 %v958_v2, %v47_v11  ;;  %v188_v27 = vadd.f32 %v965_v5, %v117_v15  ;;  %v62_v12 = vld [vmem:[%s1375_s0 + $0x180] sm:$0xff] }
  0x1f   :  { %v250_v25 = vmax.f32 %v186_v14, 0.0  ;;  %909 = vst [vmem:[%s1378_s3 + $0x60] sm:$0xff] %v801_v18   ;;  %v251_v30 = vmax.f32 %v187_v21, 0.0  ;;  %v119_v31 = vmul.f32 %v958_v2, %v48_v16  ;;  %v120_v32 = vmul.f32 %v958_v2, %v49_v17  ;;  %v63_v21 = vld [vmem:[%s1375_s0 + $0x188] sm:$0xff] }
  0x20   :  { %v811_v29 = vpack.c.bf16 %v249_v20, %v248_v19  ;;  %910 = vst [vmem:[%s1378_s3 + $0x68] sm:$0xff] %v806_v24   ;;  %v189_v34 = vadd.f32 %v965_v5, %v118_v26  ;;  %v252_v35 = vmax.f32 %v188_v27, 0.0  ;;  %v121_v36 = vmul.f32 %v958_v2, %v50_v22  ;;  %v64_v26 = vld [vmem:[%s1375_s0 + $0x190] sm:$0xff]  ;;  %v65_v27 = vld [vmem:[%s1375_s0 + $0x198] sm:$0xff] }
  0x21   :  { %v122_v37 = vmul.f32 %v958_v2, %v51_v23  ;;  %v816_v39 = vpack.c.bf16 %v251_v30, %v250_v25  ;;  %v190_v40 = vadd.f32 %v965_v5, %v119_v31  ;;  %v191_v41 = vadd.f32 %v965_v5, %v120_v32  ;;  %v66_v32 = vld [vmem:[%s1375_s0 + $0x1a0] sm:$0xff] }
  0x22   :  { %911 = vst [vmem:[%s1378_s3 + $0x70] sm:$0xff] %v811_v29   ;;  %v123_v42 = vmul.f32 %v958_v2, %v52_v28  ;;  %v253_v43 = vmax.f32 %v189_v34, 0.0  ;;  %v192_v44 = vadd.f32 %v965_v5, %v121_v36  ;;  %v124_v46 = vmul.f32 %v958_v2, %v53_v33  ;;  %v67_v33 = vld [vmem:[%s1375_s0 + $0x1a8] sm:$0xff] }
  0x23   :  { %v193_v45 = vadd.f32 %v965_v5, %v122_v37  ;;  %912 = vst [vmem:[%s1378_s3 + $0x78] sm:$0xff] %v816_v39   ;;  %v254_v48 = vmax.f32 %v190_v40, 0.0  ;;  %v255_v49 = vmax.f32 %v191_v41, 0.0  ;;  %v125_v51 = vmul.f32 %v958_v2, %v54_v38  ;;  %v68_v38 = vld [vmem:[%s1375_s0 + $0x1b0] sm:$0xff] }
  0x24   :  { %v194_v50 = vadd.f32 %v965_v5, %v123_v42  ;;  %v821_v54 = vpack.c.bf16 %v253_v43, %v252_v35  ;;  %v256_v55 = vmax.f32 %v192_v44, 0.0  ;;  %v195_v57 = vadd.f32 %v965_v5, %v124_v46  ;;  %v69_v43 = vld [vmem:[%s1375_s0 + $0x1b8] sm:$0xff] }
  0x25   :  { %v257_v56 = vmax.f32 %v193_v45, 0.0  ;;  %v826_v60 = vpack.c.bf16 %v255_v49, %v254_v48  ;;  %v126_v62 = vmul.f32 %v958_v2, %v55_v47  ;;  %v196_v63 = vadd.f32 %v965_v5, %v125_v51  ;;  %v70_v48 = vld [vmem:[%s1375_s0 + $0x1c0] sm:$0xff] }
  0x26   :  { %v258_v61 = vmax.f32 %v194_v50, 0.0  ;;  %913 = vst [vmem:[%s1378_s3 + $0x80] sm:$0xff] %v821_v54   ;;  %v259_v3 = vmax.f32 %v195_v57, 0.0  ;;  %v127_v4 = vmul.f32 %v958_v2, %v56_v52  ;;  %v128_v6 = vmul.f32 %v958_v2, %v57_v53  ;;  %v71_v57 = vld [vmem:[%s1375_s0 + $0x1c8] sm:$0xff] }
  0x27   :  { %v831_v1 = vpack.c.bf16 %v257_v56, %v256_v55  ;;  %914 = vst [vmem:[%s1378_s3 + $0x88] sm:$0xff] %v826_v60   ;;  %v197_v8 = vadd.f32 %v965_v5, %v126_v62  ;;  %v260_v9 = vmax.f32 %v196_v63, 0.0  ;;  %v129_v10 = vmul.f32 %v958_v2, %v58_v58  ;;  %v72_v62 = vld [vmem:[%s1375_s0 + $0x1d0] sm:$0xff]  ;;  %v73_v63 = vld [vmem:[%s1375_s0 + $0x1d8] sm:$0xff] }
  0x28   :  { %v130_v11 = vmul.f32 %v958_v2, %v59_v59  ;;  %v836_v13 = vpack.c.bf16 %v259_v3, %v258_v61  ;;  %v198_v14 = vadd.f32 %v965_v5, %v127_v4  ;;  %v199_v15 = vadd.f32 %v965_v5, %v128_v6  ;;  %v74_v6 = vld [vmem:[%s1375_s0 + $0x1e0] sm:$0xff] }
  0x29   :  { %915 = vst [vmem:[%s1378_s3 + $0x90] sm:$0xff] %v831_v1   ;;  %v131_v16 = vmul.f32 %v958_v2, %v60_v0  ;;  %v261_v17 = vmax.f32 %v197_v8, 0.0  ;;  %v200_v18 = vadd.f32 %v965_v5, %v129_v10  ;;  %v132_v20 = vmul.f32 %v958_v2, %v61_v7  ;;  %v75_v7 = vld [vmem:[%s1375_s0 + $0x1e8] sm:$0xff] }
  0x2a   :  { %v201_v19 = vadd.f32 %v965_v5, %v130_v11  ;;  %916 = vst [vmem:[%s1378_s3 + $0x98] sm:$0xff] %v836_v13   ;;  %v262_v22 = vmax.f32 %v198_v14, 0.0  ;;  %v263_v23 = vmax.f32 %v199_v15, 0.0  ;;  %v133_v25 = vmul.f32 %v958_v2, %v62_v12  ;;  %v76_v12 = vld [vmem:[%s1375_s0 + $0x1f0] sm:$0xff] }
  0x2b   :  { %v202_v24 = vadd.f32 %v965_v5, %v131_v16  ;;  %v841_v28 = vpack.c.bf16 %v261_v17, %v260_v9  ;;  %v264_v29 = vmax.f32 %v200_v18, 0.0  ;;  %v203_v31 = vadd.f32 %v965_v5, %v132_v20  ;;  %v77_v17 = vld [vmem:[%s1375_s0 + $0x1f8] sm:$0xff] }
  0x2c   :  { %v265_v30 = vmax.f32 %v201_v19, 0.0  ;;  %v846_v34 = vpack.c.bf16 %v263_v23, %v262_v22  ;;  %v134_v36 = vmul.f32 %v958_v2, %v63_v21  ;;  %v204_v37 = vadd.f32 %v965_v5, %v133_v25 }
  0x2d   :  { %v266_v35 = vmax.f32 %v202_v24, 0.0  ;;  %917 = vst [vmem:[%s1378_s3 + $0xa0] sm:$0xff] %v841_v28   ;;  %v267_v40 = vmax.f32 %v203_v31, 0.0  ;;  %v135_v41 = vmul.f32 %v958_v2, %v64_v26  ;;  %v136_v42 = vmul.f32 %v958_v2, %v65_v27 }
  0x2e   :  { %v851_v39 = vpack.c.bf16 %v265_v30, %v264_v29  ;;  %918 = vst [vmem:[%s1378_s3 + $0xa8] sm:$0xff] %v846_v34   ;;  %v205_v44 = vadd.f32 %v965_v5, %v134_v36  ;;  %v268_v45 = vmax.f32 %v204_v37, 0.0  ;;  %v137_v46 = vmul.f32 %v958_v2, %v66_v32 }
  0x2f   :  { %v138_v47 = vmul.f32 %v958_v2, %v67_v33  ;;  %v856_v49 = vpack.c.bf16 %v267_v40, %v266_v35  ;;  %v206_v50 = vadd.f32 %v965_v5, %v135_v41  ;;  %v207_v51 = vadd.f32 %v965_v5, %v136_v42 }
  0x30   :  { %919 = vst [vmem:[%s1378_s3 + $0xb0] sm:$0xff] %v851_v39   ;;  %v139_v52 = vmul.f32 %v958_v2, %v68_v38  ;;  %v269_v53 = vmax.f32 %v205_v44, 0.0  ;;  %v208_v54 = vadd.f32 %v965_v5, %v137_v46  ;;  %v140_v56 = vmul.f32 %v958_v2, %v69_v43 }
  0x31   :  { %v209_v55 = vadd.f32 %v965_v5, %v138_v47  ;;  %920 = vst [vmem:[%s1378_s3 + $0xb8] sm:$0xff] %v856_v49   ;;  %v270_v58 = vmax.f32 %v206_v50, 0.0  ;;  %v271_v59 = vmax.f32 %v207_v51, 0.0  ;;  %v141_v61 = vmul.f32 %v958_v2, %v70_v48 }
  0x32   :  { %v210_v60 = vadd.f32 %v965_v5, %v139_v52  ;;  %v861_v0 = vpack.c.bf16 %v269_v53, %v268_v45  ;;  %v272_v1 = vmax.f32 %v208_v54, 0.0  ;;  %v211_v4 = vadd.f32 %v965_v5, %v140_v56 }
  0x33   :  { %v273_v3 = vmax.f32 %v209_v55, 0.0  ;;  %v866_v8 = vpack.c.bf16 %v271_v59, %v270_v58  ;;  %v142_v10 = vmul.f32 %v958_v2, %v71_v57  ;;  %v212_v11 = vadd.f32 %v965_v5, %v141_v61 }
  0x34   :  { %v274_v9 = vmax.f32 %v210_v60, 0.0  ;;  %921 = vst [vmem:[%s1378_s3 + $0xc0] sm:$0xff] %v861_v0   ;;  %v275_v14 = vmax.f32 %v211_v4, 0.0  ;;  %v143_v15 = vmul.f32 %v958_v2, %v72_v62  ;;  %v144_v16 = vmul.f32 %v958_v2, %v73_v63 }
  0x35   :  { %v871_v13 = vpack.c.bf16 %v273_v3, %v272_v1  ;;  %922 = vst [vmem:[%s1378_s3 + $0xc8] sm:$0xff] %v866_v8   ;;  %v213_v18 = vadd.f32 %v965_v5, %v142_v10  ;;  %v276_v19 = vmax.f32 %v212_v11, 0.0  ;;  %v145_v20 = vmul.f32 %v958_v2, %v74_v6 }
  0x36   :  { %v146_v21 = vmul.f32 %v958_v2, %v75_v7  ;;  %v876_v22 = vpack.c.bf16 %v275_v14, %v274_v9  ;;  %v214_v23 = vadd.f32 %v965_v5, %v143_v15  ;;  %v215_v24 = vadd.f32 %v965_v5, %v144_v16 }
  0x37   :  { %923 = vst [vmem:[%s1378_s3 + $0xd0] sm:$0xff] %v871_v13   ;;  %v147_v25 = vmul.f32 %v958_v2, %v76_v12  ;;  %v277_v26 = vmax.f32 %v213_v18, 0.0  ;;  %v216_v27 = vadd.f32 %v965_v5, %v145_v20  ;;  %v148_v29 = vmul.f32 %v958_v2, %v77_v17 }
  0x38   :  { %v217_v28 = vadd.f32 %v965_v5, %v146_v21  ;;  %924 = vst [vmem:[%s1378_s3 + $0xd8] sm:$0xff] %v876_v22   ;;  %v278_v30 = vmax.f32 %v214_v23, 0.0  ;;  %v279_v31 = vmax.f32 %v215_v24, 0.0 }
  0x39   :  { %v218_v32 = vadd.f32 %v965_v5, %v147_v25  ;;  %v881_v33 = vpack.c.bf16 %v277_v26, %v276_v19  ;;  %v280_v34 = vmax.f32 %v216_v27, 0.0  ;;  %v219_v36 = vadd.f32 %v965_v5, %v148_v29 }
  0x3a   :  { %v281_v35 = vmax.f32 %v217_v28, 0.0  ;;  %v886_v37 = vpack.c.bf16 %v279_v31, %v278_v30 }
  0x3b   :  { %v282_v38 = vmax.f32 %v218_v32, 0.0  ;;  %925 = vst [vmem:[%s1378_s3 + $0xe0] sm:$0xff] %v881_v33   ;;  %v283_v39 = vmax.f32 %v219_v36, 0.0 }
  0x3c   :  { %v891_v2 = vpack.c.bf16 %v281_v35, %v280_v34  ;;  %926 = vst [vmem:[%s1378_s3 + $0xe8] sm:$0xff] %v886_v37  }
  0x3d   :  { %v896_v40 = vpack.c.bf16 %v283_v39, %v282_v38 }
  0x3e   :  { %927 = vst [vmem:[%s1378_s3 + $0xf0] sm:$0xff] %v891_v2  }
  0x3f   :  { %928 = vst [vmem:[%s1378_s3 + $0xf8] sm:$0xff] %v896_v40  }

// kernel: resnet_generator_forward.31
= control target key start
LH: loop header
LB: loop body
LE: loop exit
PB: predicated region body
PF: predicated region fallthrough
CT: control target
= control target key end

     0   :  { %vm350_vm0 = vcmask 1044480   ;;  %vm351_vm1 = vcmask 1045504   ;;  %vm253_vm2 = vcmask 220160   ;;  %v1134_v1 = vmov 65535   ;;  %s1676_s1 = inlined_call_operand.vmem [shape: bf16[27,128], index: 1, kind: input, shape index: {}]   ;;  %s1677_s0 = inlined_call_operand.vmem [shape: bf16[512,27], index: 0, kind: input, shape index: {}]   ;;  %s1678_s2 = inlined_call_operand.vmem [shape: f32[512,128], index: 2, kind: output, shape index: {0}]   ;;  %s1679_s3 = inlined_call_operand.vmem [shape: f32[1,8,128], index: 3, kind: output, shape index: {1}]  }
   0x1   :  { %v1100_v0 = vld [vmem:[%s1676_s1] sm:$0xff]   ;;  %v352_v2 = vsel %vm350_vm0, 4294967295, %v1134_v1  ;;  %v1101_v3 = vld [vmem:[%s1676_s1 + $0x8] sm:$0x3f]   ;;  %v1104_v8 = vld [vmem:[%s1677_s0 + $0x10] sm:$0xff]  }
   0x2   :  { %1027 = vmatprep.subr.bf16.mxu0 %v1100_v0  ;;  %v353_v4 = vsel %vm351_vm1, %v352_v2, 0  ;;  %v1102_v5 = vld [vmem:[%s1677_s0] sm:$0xff]   ;;  %1095 = vmatprep.subr.bf16.mxu1 %v1100_v0  ;;  %v1103_v7 = vld [vmem:[%s1677_s0 + $0x8] sm:$0xff]   ;;  %v1105_v9 = vld [vmem:[%s1677_s0 + $0x18] sm:$0xff]  }
   0x3   :  { %1028 = vmatpush3.bf16.msra.mxu0 %v1100_v0  ;;  %v355_v6 = vand.u32 %v1101_v3, %v353_v4  ;;  %1097 = vmatpush3.bf16.msra.mxu1 %v1100_v0  ;;  %v1106_v10 = vld [vmem:[%s1677_s0 + $0x20] sm:$0xff]   ;;  %v1119_v12 = vld [vmem:[%s1677_s0 + $0x88] sm:$0xff]   ;;  %v1120_v13 = vld [vmem:[%s1677_s0 + $0x90] sm:$0xff]  }
   0x4   :  { %1031 = vmatprep.mubr.msk.bf16.mxu0 %vm253_vm2, %v1102_v5  ;;  %v1118_v11 = vld [vmem:[%s1677_s0 + $0x80] sm:$0xff]   ;;  %v1107_v14 = vld [vmem:[%s1677_s0 + $0x28] sm:$0xff]   ;;  %v1108_v15 = vld [vmem:[%s1677_s0 + $0x30] sm:$0xff]  }
   0x5   :  { %1029 = vmatprep.subr.bf16.mxu0 %v355_v6  ;;  %1096 = vmatprep.subr.bf16.mxu1 %v355_v6  ;;  %v1121_v16 = vld [vmem:[%s1677_s0 + $0x98] sm:$0xff]   ;;  %v1122_v17 = vld [vmem:[%s1677_s0 + $0xa0] sm:$0xff]   ;;  %v1123_v20 = vld [vmem:[%s1677_s0 + $0xa8] sm:$0xff]  }
   0x6   :  { %1063 = vmatprep.mubr.msk.bf16.mxu1 %vm253_vm2, %v1118_v11  ;;  %v1109_v18 = vld [vmem:[%s1677_s0 + $0x38] sm:$0xff]   ;;  %v1110_v19 = vld [vmem:[%s1677_s0 + $0x40] sm:$0xff]   ;;  %v1124_v21 = vld [vmem:[%s1677_s0 + $0xb0] sm:$0xff]  }
   0x7   :  { %1030 = vmatpush3.bf16.msra.mxu0 %v355_v6  ;;  %1098 = vmatpush3.bf16.msra.mxu1 %v355_v6  ;;  %v1111_v22 = vld [vmem:[%s1677_s0 + $0x48] sm:$0xff]   ;;  %v1112_v23 = vld [vmem:[%s1677_s0 + $0x50] sm:$0xff]   ;;  %v1125_v24 = vld [vmem:[%s1677_s0 + $0xb8] sm:$0xff]  }
   0x8   :  { %v1126_v25 = vld [vmem:[%s1677_s0 + $0xc0] sm:$0xff]   ;;  %v1113_v26 = vld [vmem:[%s1677_s0 + $0x58] sm:$0xff]   ;;  %v1127_v28 = vld [vmem:[%s1677_s0 + $0xc8] sm:$0xff]  }
   0x9   :  { %v1114_v27 = vld [vmem:[%s1677_s0 + $0x60] sm:$0xff]   ;;  %v1128_v29 = vld [vmem:[%s1677_s0 + $0xd0] sm:$0xff]   ;;  %v1115_v30 = vld [vmem:[%s1677_s0 + $0x68] sm:$0xff]  }
   0xa   :  { %1032 = vmatmul.mubr.msk.bf16.vlgmr.msra.gmra.mrb[0].mxu0 %vm253_vm2, %v1103_v7  ;;  %1064 = vmatmul.mubr.msk.bf16.vlgmr.msra.gmra.mrb[0].mxu1 %vm253_vm2, %v1119_v12  ;;  %v1116_v31 = vld [vmem:[%s1677_s0 + $0x70] sm:$0xff]   ;;  %v1129_v32 = vld [vmem:[%s1677_s0 + $0xd8] sm:$0xff]   ;;  %v1130_v33 = vld [vmem:[%s1677_s0 + $0xe0] sm:$0xff]  }
   0xb   :  { %1035 = vmatprep.mubr.msk.bf16.mxu0 %vm253_vm2, %v1104_v8  ;;  %1067 = vmatprep.mubr.msk.bf16.mxu1 %vm253_vm2, %v1120_v13  ;;  %v1117_v34 = vld [vmem:[%s1677_s0 + $0x78] sm:$0xff]   ;;  %v1131_v35 = vld [vmem:[%s1677_s0 + $0xe8] sm:$0xff]   ;;  %v1132_v36 = vld [vmem:[%s1677_s0 + $0xf0] sm:$0xff]  }
   0xc   :  { %v1133_v37 = vld [vmem:[%s1677_s0 + $0xf8] sm:$0xff]  }
  0x12   :  { %1036 = vmatmul.mubr.msk.bf16.gmra.mrb[4].mxu0 %vm253_vm2, %v1105_v9  ;;  %1068 = vmatmul.mubr.msk.bf16.gmra.mrb[4].mxu1 %vm253_vm2, %v1121_v16 }
  0x13   :  { %1039 = vmatprep.mubr.msk.bf16.mxu0 %vm253_vm2, %v1106_v10  ;;  %1071 = vmatprep.mubr.msk.bf16.mxu1 %vm253_vm2, %v1122_v17 }
  0x1a   :  { %1040 = vmatmul.mubr.msk.bf16.gmra.mrb[8].mxu0 %vm253_vm2, %v1107_v14  ;;  %1072 = vmatmul.mubr.msk.bf16.gmra.mrb[8].mxu1 %vm253_vm2, %v1123_v20 }
  0x1b   :  { %1043 = vmatprep.mubr.msk.bf16.mxu0 %vm253_vm2, %v1108_v15  ;;  %1075 = vmatprep.mubr.msk.bf16.mxu1 %vm253_vm2, %v1124_v21 }
  0x22   :  { %1044 = vmatmul.mubr.msk.bf16.gmra.mrb[12].mxu0 %vm253_vm2, %v1109_v18  ;;  %1076 = vmatmul.mubr.msk.bf16.gmra.mrb[12].mxu1 %vm253_vm2, %v1125_v24 }
  0x23   :  { %1047 = vmatprep.mubr.msk.bf16.mxu0 %vm253_vm2, %v1110_v19  ;;  %1079 = vmatprep.mubr.msk.bf16.mxu1 %vm253_vm2, %v1126_v25 }
  0x2a   :  { %1048 = vmatmul.mubr.msk.bf16.gmra.mrb[16].mxu0 %vm253_vm2, %v1111_v22  ;;  %1080 = vmatmul.mubr.msk.bf16.gmra.mrb[16].mxu1 %vm253_vm2, %v1127_v28 }
  0x2b   :  { %1051 = vmatprep.mubr.msk.bf16.mxu0 %vm253_vm2, %v1112_v23  ;;  %1083 = vmatprep.mubr.msk.bf16.mxu1 %vm253_vm2, %v1128_v29 }
  0x32   :  { %1052 = vmatmul.mubr.msk.bf16.gmra.mrb[20].mxu0 %vm253_vm2, %v1113_v26  ;;  %1084 = vmatmul.mubr.msk.bf16.gmra.mrb[20].mxu1 %vm253_vm2, %v1129_v32 }
  0x33   :  { %1055 = vmatprep.mubr.msk.bf16.mxu0 %vm253_vm2, %v1114_v27  ;;  %1087 = vmatprep.mubr.msk.bf16.mxu1 %vm253_vm2, %v1130_v33 }
  0x3a   :  { %1056 = vmatmul.mubr.msk.bf16.gmra.mrb[24].mxu0 %vm253_vm2, %v1115_v30  ;;  %1088 = vmatmul.mubr.msk.bf16.gmra.mrb[24].mxu1 %vm253_vm2, %v1131_v35 }
  0x3b   :  { %1059 = vmatprep.mubr.msk.bf16.mxu0 %vm253_vm2, %v1116_v31  ;;  %1091 = vmatprep.mubr.msk.bf16.mxu1 %vm253_vm2, %v1132_v36 }
  0x42   :  { %1060 = vmatmul.mubr.msk.bf16.gmra.mrb[28].mxu0 %vm253_vm2, %v1117_v34  ;;  %1092 = vmatmul.mubr.msk.bf16.gmra.mrb[28].mxu1 %vm253_vm2, %v1133_v37 }
  0xdd   :  { %v1033_v38 = vpop.f32.mrb[0].mxu0  ;;  %v1310_v58 = vpop.f32.mrb[0].mxu1 }
  0xde   :  { %648 = vst [vmem:[%s1678_s2 + $0x10] sm:$0xff] %v1033_v38  ;;  %v391_v39 = vpop.f32.mrb[1].mxu0  ;;  %v781_v45 = vmul.f32 %v1033_v38, %v1033_v38  ;;  %680 = vst [vmem:[%s1678_s2 + $0x110] sm:$0xff] %v1310_v58  ;;  %v1319_v62 = vpop.f32.mrb[1].mxu1 }
  0xdf   :  { %646 = vst [vmem:[%s1678_s2] sm:$0xff] %v391_v39  ;;  %v1034_v40 = vpop.f32.mrb[2].mxu0  ;;  %v779_v42 = vmul.f32 %v391_v39, %v391_v39  ;;  %678 = vst [vmem:[%s1678_s2 + $0x100] sm:$0xff] %v1319_v62  ;;  %v1325_v63 = vpop.f32.mrb[2].mxu1 }
  0xe0   :  { %649 = vst [vmem:[%s1678_s2 + $0x18] sm:$0xff] %v1034_v40  ;;  %v394_v41 = vpop.f32.mrb[3].mxu0  ;;  %v782_v48 = vmul.f32 %v1034_v40, %v1034_v40  ;;  %681 = vst [vmem:[%s1678_s2 + $0x118] sm:$0xff] %v1325_v63  ;;  %v1331_v3 = vpop.f32.mrb[3].mxu1 }
  0xe1   :  { %647 = vst [vmem:[%s1678_s2 + $0x8] sm:$0xff] %v394_v41  ;;  %v710_v43 = vadd.f32 %v394_v41, %v391_v39  ;;  %v780_v44 = vmul.f32 %v394_v41, %v394_v41  ;;  %679 = vst [vmem:[%s1678_s2 + $0x108] sm:$0xff] %v1331_v3 }
  0xe3   :  { %v711_v46 = vadd.f32 %v1033_v38, %v710_v43  ;;  %v843_v47 = vadd.f32 %v780_v44, %v779_v42 }
  0xe5   :  { %v844_v49 = vadd.f32 %v843_v47, %v781_v45  ;;  %v1037_v50 = vpop.f32.mrb[4].mxu0  ;;  %v712_v51 = vadd.f32 %v1034_v40, %v711_v46  ;;  %v1346_v14 = vpop.f32.mrb[4].mxu1 }
  0xe6   :  { %652 = vst [vmem:[%s1678_s2 + $0x30] sm:$0xff] %v1037_v50  ;;  %v407_v52 = vpop.f32.mrb[5].mxu0  ;;  %v785_v0 = vmul.f32 %v1037_v50, %v1037_v50  ;;  %684 = vst [vmem:[%s1678_s2 + $0x130] sm:$0xff] %v1346_v14  ;;  %v1355_v18 = vpop.f32.mrb[5].mxu1 }
  0xe7   :  { %650 = vst [vmem:[%s1678_s2 + $0x20] sm:$0xff] %v407_v52  ;;  %v713_v53 = vadd.f32 %v712_v51, %v407_v52  ;;  %v783_v54 = vmul.f32 %v407_v52, %v407_v52  ;;  %v845_v55 = vadd.f32 %v844_v49, %v782_v48  ;;  %v1038_v56 = vpop.f32.mrb[6].mxu0  ;;  %682 = vst [vmem:[%s1678_s2 + $0x120] sm:$0xff] %v1355_v18  ;;  %v1361_v19 = vpop.f32.mrb[6].mxu1 }
  0xe8   :  { %653 = vst [vmem:[%s1678_s2 + $0x38] sm:$0xff] %v1038_v56  ;;  %v410_v57 = vpop.f32.mrb[7].mxu0  ;;  %v786_v4 = vmul.f32 %v1038_v56, %v1038_v56  ;;  %685 = vst [vmem:[%s1678_s2 + $0x138] sm:$0xff] %v1361_v19  ;;  %v1367_v23 = vpop.f32.mrb[7].mxu1 }
  0xe9   :  { %v846_v59 = vadd.f32 %v845_v55, %v783_v54  ;;  %651 = vst [vmem:[%s1678_s2 + $0x28] sm:$0xff] %v410_v57  ;;  %v714_v60 = vadd.f32 %v713_v53, %v410_v57  ;;  %v784_v61 = vmul.f32 %v410_v57, %v410_v57  ;;  %683 = vst [vmem:[%s1678_s2 + $0x128] sm:$0xff] %v1367_v23 }
  0xeb   :  { %v715_v1 = vadd.f32 %v1037_v50, %v714_v60  ;;  %v847_v2 = vadd.f32 %v846_v59, %v784_v61 }
  0xed   :  { %v848_v5 = vadd.f32 %v847_v2, %v785_v0  ;;  %v1041_v6 = vpop.f32.mrb[8].mxu0  ;;  %v716_v7 = vadd.f32 %v1038_v56, %v715_v1  ;;  %v1382_v34 = vpop.f32.mrb[8].mxu1 }
  0xee   :  { %656 = vst [vmem:[%s1678_s2 + $0x50] sm:$0xff] %v1041_v6  ;;  %v423_v8 = vpop.f32.mrb[9].mxu0  ;;  %v789_v20 = vmul.f32 %v1041_v6, %v1041_v6  ;;  %688 = vst [vmem:[%s1678_s2 + $0x150] sm:$0xff] %v1382_v34  ;;  %v1391_v38 = vpop.f32.mrb[9].mxu1 }
  0xef   :  { %654 = vst [vmem:[%s1678_s2 + $0x40] sm:$0xff] %v423_v8  ;;  %v717_v9 = vadd.f32 %v716_v7, %v423_v8  ;;  %v787_v10 = vmul.f32 %v423_v8, %v423_v8  ;;  %v849_v11 = vadd.f32 %v848_v5, %v786_v4  ;;  %v1042_v12 = vpop.f32.mrb[10].mxu0  ;;  %686 = vst [vmem:[%s1678_s2 + $0x140] sm:$0xff] %v1391_v38  ;;  %v1397_v39 = vpop.f32.mrb[10].mxu1 }
  0xf0   :  { %657 = vst [vmem:[%s1678_s2 + $0x58] sm:$0xff] %v1042_v12  ;;  %v426_v13 = vpop.f32.mrb[11].mxu0  ;;  %v790_v24 = vmul.f32 %v1042_v12, %v1042_v12  ;;  %689 = vst [vmem:[%s1678_s2 + $0x158] sm:$0xff] %v1397_v39  ;;  %v1403_v43 = vpop.f32.mrb[11].mxu1 }
  0xf1   :  { %v850_v15 = vadd.f32 %v849_v11, %v787_v10  ;;  %655 = vst [vmem:[%s1678_s2 + $0x48] sm:$0xff] %v426_v13  ;;  %v718_v16 = vadd.f32 %v717_v9, %v426_v13  ;;  %v788_v17 = vmul.f32 %v426_v13, %v426_v13  ;;  %687 = vst [vmem:[%s1678_s2 + $0x148] sm:$0xff] %v1403_v43 }
  0xf3   :  { %v719_v21 = vadd.f32 %v1041_v6, %v718_v16  ;;  %v851_v22 = vadd.f32 %v850_v15, %v788_v17 }
  0xf5   :  { %v852_v25 = vadd.f32 %v851_v22, %v789_v20  ;;  %v1045_v26 = vpop.f32.mrb[12].mxu0  ;;  %v720_v27 = vadd.f32 %v1042_v12, %v719_v21  ;;  %v1418_v54 = vpop.f32.mrb[12].mxu1 }
  0xf6   :  { %660 = vst [vmem:[%s1678_s2 + $0x70] sm:$0xff] %v1045_v26  ;;  %v439_v28 = vpop.f32.mrb[13].mxu0  ;;  %v793_v40 = vmul.f32 %v1045_v26, %v1045_v26  ;;  %692 = vst [vmem:[%s1678_s2 + $0x170] sm:$0xff] %v1418_v54  ;;  %v1427_v59 = vpop.f32.mrb[13].mxu1 }
  0xf7   :  { %658 = vst [vmem:[%s1678_s2 + $0x60] sm:$0xff] %v439_v28  ;;  %v721_v29 = vadd.f32 %v720_v27, %v439_v28  ;;  %v791_v30 = vmul.f32 %v439_v28, %v439_v28  ;;  %v853_v31 = vadd.f32 %v852_v25, %v790_v24  ;;  %v1046_v32 = vpop.f32.mrb[14].mxu0  ;;  %690 = vst [vmem:[%s1678_s2 + $0x160] sm:$0xff] %v1427_v59  ;;  %v1433_v60 = vpop.f32.mrb[14].mxu1 }
  0xf8   :  { %661 = vst [vmem:[%s1678_s2 + $0x78] sm:$0xff] %v1046_v32  ;;  %v442_v33 = vpop.f32.mrb[15].mxu0  ;;  %v794_v44 = vmul.f32 %v1046_v32, %v1046_v32  ;;  %693 = vst [vmem:[%s1678_s2 + $0x178] sm:$0xff] %v1433_v60  ;;  %v1439_v2 = vpop.f32.mrb[15].mxu1 }
  0xf9   :  { %v854_v35 = vadd.f32 %v853_v31, %v791_v30  ;;  %659 = vst [vmem:[%s1678_s2 + $0x68] sm:$0xff] %v442_v33  ;;  %v722_v36 = vadd.f32 %v721_v29, %v442_v33  ;;  %v792_v37 = vmul.f32 %v442_v33, %v442_v33  ;;  %691 = vst [vmem:[%s1678_s2 + $0x168] sm:$0xff] %v1439_v2 }
  0xfb   :  { %v723_v41 = vadd.f32 %v1045_v26, %v722_v36  ;;  %v855_v42 = vadd.f32 %v854_v35, %v792_v37 }
  0xfd   :  { %v856_v45 = vadd.f32 %v855_v42, %v793_v40  ;;  %v1049_v46 = vpop.f32.mrb[16].mxu0  ;;  %v724_v47 = vadd.f32 %v1046_v32, %v723_v41  ;;  %v1454_v15 = vpop.f32.mrb[16].mxu1 }
  0xfe   :  { %664 = vst [vmem:[%s1678_s2 + $0x90] sm:$0xff] %v1049_v46  ;;  %v455_v48 = vpop.f32.mrb[17].mxu0  ;;  %v797_v61 = vmul.f32 %v1049_v46, %v1049_v46  ;;  %696 = vst [vmem:[%s1678_s2 + $0x190] sm:$0xff] %v1454_v15  ;;  %v1463_v21 = vpop.f32.mrb[17].mxu1 }
  0xff   :  { %662 = vst [vmem:[%s1678_s2 + $0x80] sm:$0xff] %v455_v48  ;;  %v725_v49 = vadd.f32 %v724_v47, %v455_v48  ;;  %v795_v50 = vmul.f32 %v455_v48, %v455_v48  ;;  %v857_v51 = vadd.f32 %v856_v45, %v794_v44  ;;  %v1050_v52 = vpop.f32.mrb[18].mxu0  ;;  %694 = vst [vmem:[%s1678_s2 + $0x180] sm:$0xff] %v1463_v21  ;;  %v1469_v22 = vpop.f32.mrb[18].mxu1 }
 0x100   :  { %665 = vst [vmem:[%s1678_s2 + $0x98] sm:$0xff] %v1050_v52  ;;  %v458_v53 = vpop.f32.mrb[19].mxu0  ;;  %v798_v4 = vmul.f32 %v1050_v52, %v1050_v52  ;;  %697 = vst [vmem:[%s1678_s2 + $0x198] sm:$0xff] %v1469_v22  ;;  %v1475_v27 = vpop.f32.mrb[19].mxu1 }
 0x101   :  { %v858_v55 = vadd.f32 %v857_v51, %v795_v50  ;;  %663 = vst [vmem:[%s1678_s2 + $0x88] sm:$0xff] %v458_v53  ;;  %v726_v56 = vadd.f32 %v725_v49, %v458_v53  ;;  %v796_v57 = vmul.f32 %v458_v53, %v458_v53  ;;  %695 = vst [vmem:[%s1678_s2 + $0x188] sm:$0xff] %v1475_v27 }
 0x103   :  { %v727_v0 = vadd.f32 %v1049_v46, %v726_v56  ;;  %v859_v1 = vadd.f32 %v858_v55, %v796_v57 }
 0x105   :  { %v860_v5 = vadd.f32 %v859_v1, %v797_v61  ;;  %v1053_v6 = vpop.f32.mrb[20].mxu0  ;;  %v728_v7 = vadd.f32 %v1050_v52, %v727_v0  ;;  %v1490_v41 = vpop.f32.mrb[20].mxu1 }
 0x106   :  { %668 = vst [vmem:[%s1678_s2 + $0xb0] sm:$0xff] %v1053_v6  ;;  %v471_v8 = vpop.f32.mrb[21].mxu0  ;;  %v801_v24 = vmul.f32 %v1053_v6, %v1053_v6  ;;  %700 = vst [vmem:[%s1678_s2 + $0x1b0] sm:$0xff] %v1490_v41  ;;  %v1499_v46 = vpop.f32.mrb[21].mxu1 }
 0x107   :  { %666 = vst [vmem:[%s1678_s2 + $0xa0] sm:$0xff] %v471_v8  ;;  %v729_v9 = vadd.f32 %v728_v7, %v471_v8  ;;  %v799_v10 = vmul.f32 %v471_v8, %v471_v8  ;;  %v861_v11 = vadd.f32 %v860_v5, %v798_v4  ;;  %v1054_v12 = vpop.f32.mrb[22].mxu0  ;;  %698 = vst [vmem:[%s1678_s2 + $0x1a0] sm:$0xff] %v1499_v46  ;;  %v1505_v47 = vpop.f32.mrb[22].mxu1 }
 0x108   :  { %669 = vst [vmem:[%s1678_s2 + $0xb8] sm:$0xff] %v1054_v12  ;;  %v474_v13 = vpop.f32.mrb[23].mxu0  ;;  %v802_v28 = vmul.f32 %v1054_v12, %v1054_v12  ;;  %701 = vst [vmem:[%s1678_s2 + $0x1b8] sm:$0xff] %v1505_v47  ;;  %v1511_v51 = vpop.f32.mrb[23].mxu1 }
 0x109   :  { %v862_v16 = vadd.f32 %v861_v11, %v799_v10  ;;  %667 = vst [vmem:[%s1678_s2 + $0xa8] sm:$0xff] %v474_v13  ;;  %v730_v17 = vadd.f32 %v729_v9, %v474_v13  ;;  %v800_v20 = vmul.f32 %v474_v13, %v474_v13  ;;  %699 = vst [vmem:[%s1678_s2 + $0x1a8] sm:$0xff] %v1511_v51 }
 0x10b   :  { %v731_v25 = vadd.f32 %v1053_v6, %v730_v17  ;;  %v863_v26 = vadd.f32 %v862_v16, %v800_v20 }
 0x10d   :  { %v864_v29 = vadd.f32 %v863_v26, %v801_v24  ;;  %v1057_v30 = vpop.f32.mrb[24].mxu0  ;;  %v732_v31 = vadd.f32 %v1054_v12, %v731_v25  ;;  %v1526_v6 = vpop.f32.mrb[24].mxu1  ;;  %v811_v26 = vmul.f32 %v1319_v62, %v1319_v62 }
 0x10e   :  { %672 = vst [vmem:[%s1678_s2 + $0xd0] sm:$0xff] %v1057_v30  ;;  %v487_v32 = vpop.f32.mrb[25].mxu0  ;;  %v805_v48 = vmul.f32 %v1057_v30, %v1057_v30  ;;  %704 = vst [vmem:[%s1678_s2 + $0x1d0] sm:$0xff] %v1526_v6  ;;  %v1535_v10 = vpop.f32.mrb[25].mxu1 }
 0x10f   :  { %670 = vst [vmem:[%s1678_s2 + $0xc0] sm:$0xff] %v487_v32  ;;  %v733_v33 = vadd.f32 %v732_v31, %v487_v32  ;;  %v803_v35 = vmul.f32 %v487_v32, %v487_v32  ;;  %v865_v36 = vadd.f32 %v864_v29, %v802_v28  ;;  %v1058_v37 = vpop.f32.mrb[26].mxu0  ;;  %702 = vst [vmem:[%s1678_s2 + $0x1c0] sm:$0xff] %v1535_v10  ;;  %v1541_v11 = vpop.f32.mrb[26].mxu1 }
 0x110   :  { %673 = vst [vmem:[%s1678_s2 + $0xd8] sm:$0xff] %v1058_v37  ;;  %v490_v40 = vpop.f32.mrb[27].mxu0  ;;  %v806_v52 = vmul.f32 %v1058_v37, %v1058_v37  ;;  %705 = vst [vmem:[%s1678_s2 + $0x1d8] sm:$0xff] %v1541_v11  ;;  %v1547_v17 = vpop.f32.mrb[27].mxu1 }
 0x111   :  { %v866_v42 = vadd.f32 %v865_v36, %v803_v35  ;;  %671 = vst [vmem:[%s1678_s2 + $0xc8] sm:$0xff] %v490_v40  ;;  %v734_v44 = vadd.f32 %v733_v33, %v490_v40  ;;  %v804_v45 = vmul.f32 %v490_v40, %v490_v40  ;;  %703 = vst [vmem:[%s1678_s2 + $0x1c8] sm:$0xff] %v1547_v17 }
 0x112   :  { %v812_v33 = vmul.f32 %v1331_v3, %v1331_v3  ;;  %v813_v36 = vmul.f32 %v1310_v58, %v1310_v58 }
 0x113   :  { %v735_v49 = vadd.f32 %v1057_v30, %v734_v44  ;;  %v867_v50 = vadd.f32 %v866_v42, %v804_v45  ;;  %v814_v42 = vmul.f32 %v1325_v63, %v1325_v63 }
 0x115   :  { %v868_v53 = vadd.f32 %v867_v50, %v805_v48  ;;  %v1061_v55 = vpop.f32.mrb[28].mxu0  ;;  %v736_v56 = vadd.f32 %v1058_v37, %v735_v49  ;;  %v1556_v30 = vpop.f32.mrb[28].mxu1 }
 0x116   :  { %676 = vst [vmem:[%s1678_s2 + $0xf0] sm:$0xff] %v1061_v55  ;;  %v503_v57 = vpop.f32.mrb[29].mxu0  ;;  %v809_v12 = vmul.f32 %v1061_v55, %v1061_v55  ;;  %708 = vst [vmem:[%s1678_s2 + $0x1f0] sm:$0xff] %v1556_v30  ;;  %v1565_v35 = vpop.f32.mrb[29].mxu1 }
 0x117   :  { %674 = vst [vmem:[%s1678_s2 + $0xe0] sm:$0xff] %v503_v57  ;;  %v737_v61 = vadd.f32 %v736_v56, %v503_v57  ;;  %v807_v0 = vmul.f32 %v503_v57, %v503_v57  ;;  %v869_v1 = vadd.f32 %v868_v53, %v806_v52  ;;  %v1062_v4 = vpop.f32.mrb[30].mxu0  ;;  %706 = vst [vmem:[%s1678_s2 + $0x1e0] sm:$0xff] %v1565_v35 }
 0x118   :  { %677 = vst [vmem:[%s1678_s2 + $0xf8] sm:$0xff] %v1062_v4  ;;  %v506_v5 = vpop.f32.mrb[31].mxu0  ;;  %v810_v20 = vmul.f32 %v1062_v4, %v1062_v4  ;;  %v816_v53 = vmul.f32 %v1367_v23, %v1367_v23 }
 0x119   :  { %v870_v7 = vadd.f32 %v869_v1, %v807_v0  ;;  %675 = vst [vmem:[%s1678_s2 + $0xe8] sm:$0xff] %v506_v5  ;;  %v738_v8 = vadd.f32 %v737_v61, %v506_v5  ;;  %v808_v9 = vmul.f32 %v506_v5, %v506_v5 }
 0x11b   :  { %v739_v13 = vadd.f32 %v1061_v55, %v738_v8  ;;  %v871_v16 = vadd.f32 %v870_v7, %v808_v9  ;;  %v817_v55 = vmul.f32 %v1346_v14, %v1346_v14  ;;  %v820_v7 = vmul.f32 %v1403_v43, %v1403_v43 }
 0x11d   :  { %v872_v24 = vadd.f32 %v871_v16, %v809_v12  ;;  %v740_v25 = vadd.f32 %v1062_v4, %v739_v13 }
 0x11f   :  { %v741_v28 = vadd.f32 %v740_v25, %v1319_v62  ;;  %v873_v29 = vadd.f32 %v872_v24, %v810_v20  ;;  %v1571_v62 = vpop.f32.mrb[30].mxu1  ;;  %v824_v25 = vmul.f32 %v1439_v2, %v1439_v2 }
 0x120   :  { %709 = vst [vmem:[%s1678_s2 + $0x1f8] sm:$0xff] %v1571_v62  ;;  %v1580_v40 = vpop.f32.mrb[31].mxu1 }
 0x121   :  { %v874_v31 = vadd.f32 %v873_v29, %v811_v26  ;;  %v742_v32 = vadd.f32 %v741_v28, %v1331_v3  ;;  %707 = vst [vmem:[%s1678_s2 + $0x1e8] sm:$0xff] %v1580_v40 }
 0x123   :  { %v743_v37 = vadd.f32 %v1310_v58, %v742_v32  ;;  %v875_v3 = vadd.f32 %v874_v31, %v812_v33  ;;  %v815_v58 = vmul.f32 %v1355_v18, %v1355_v18 }
 0x125   :  { %v876_v44 = vadd.f32 %v875_v3, %v813_v36  ;;  %v744_v45 = vadd.f32 %v1325_v63, %v743_v37  ;;  %v818_v63 = vmul.f32 %v1361_v19, %v1361_v19  ;;  %v828_v37 = vmul.f32 %v1475_v27, %v1475_v27 }
 0x127   :  { %v745_v48 = vadd.f32 %v744_v45, %v1355_v18  ;;  %v877_v49 = vadd.f32 %v876_v44, %v814_v42  ;;  %v819_v18 = vmul.f32 %v1391_v38, %v1391_v38 }
 0x129   :  { %v878_v50 = vadd.f32 %v877_v49, %v815_v58  ;;  %v746_v52 = vadd.f32 %v745_v48, %v1367_v23 }
 0x12b   :  { %v747_v56 = vadd.f32 %v1346_v14, %v746_v52  ;;  %v879_v57 = vadd.f32 %v878_v50, %v816_v53  ;;  %v821_v14 = vmul.f32 %v1382_v34, %v1382_v34  ;;  %v832_v50 = vmul.f32 %v1511_v51, %v1511_v51 }
 0x12d   :  { %v880_v61 = vadd.f32 %v879_v57, %v817_v55  ;;  %v748_v0 = vadd.f32 %v1361_v19, %v747_v56  ;;  %v822_v19 = vmul.f32 %v1397_v39, %v1397_v39 }
 0x12f   :  { %v749_v1 = vadd.f32 %v748_v0, %v1391_v38  ;;  %v881_v4 = vadd.f32 %v880_v61, %v818_v63  ;;  %v823_v38 = vmul.f32 %v1427_v59, %v1427_v59  ;;  %v836_v0 = vmul.f32 %v1547_v17, %v1547_v17 }
 0x131   :  { %v882_v5 = vadd.f32 %v881_v4, %v819_v18  ;;  %v750_v23 = vadd.f32 %v749_v1, %v1403_v43 }
 0x133   :  { %v751_v8 = vadd.f32 %v1382_v34, %v750_v23  ;;  %v883_v9 = vadd.f32 %v882_v5, %v820_v7  ;;  %v825_v34 = vmul.f32 %v1418_v54, %v1418_v54 }
 0x135   :  { %v884_v12 = vadd.f32 %v883_v9, %v821_v14  ;;  %v752_v13 = vadd.f32 %v1397_v39, %v751_v8  ;;  %v826_v39 = vmul.f32 %v1433_v60, %v1433_v60  ;;  %v840_v8 = vmul.f32 %v1580_v40, %v1580_v40 }
 0x137   :  { %v753_v16 = vadd.f32 %v752_v13, %v1427_v59  ;;  %v885_v20 = vadd.f32 %v884_v12, %v822_v19  ;;  %v827_v59 = vmul.f32 %v1463_v21, %v1463_v21 }
 0x139   :  { %v886_v24 = vadd.f32 %v885_v20, %v823_v38  ;;  %v754_v43 = vadd.f32 %v753_v16, %v1439_v2 }
 0x13b   :  { %v755_v26 = vadd.f32 %v1418_v54, %v754_v43  ;;  %v887_v28 = vadd.f32 %v886_v24, %v824_v25  ;;  %v829_v54 = vmul.f32 %v1454_v15, %v1454_v15  ;;  %v912_v24 = vlaneseq }
 0x13d   :  { %v888_v29 = vadd.f32 %v887_v28, %v825_v34  ;;  %v756_v31 = vadd.f32 %v1433_v60, %v755_v26  ;;  %v830_v60 = vmul.f32 %v1469_v22, %v1469_v22  ;;  %v913_v26 = vshrl.u32 %v912_v24, 7 }
 0x13f   :  { %v757_v32 = vadd.f32 %v756_v31, %v1463_v21  ;;  %v889_v33 = vadd.f32 %v888_v29, %v826_v39  ;;  %v831_v21 = vmul.f32 %v1499_v46, %v1499_v46  ;;  %vm915_vm3 = vcmp.eq.s32.totalorder %v913_v26, 1 }
 0x140   :  { %vm914_vm4 = vcmp.eq.s32.totalorder %v913_v26, 0 }
 0x141   :  { %v890_v36 = vadd.f32 %v889_v33, %v827_v59  ;;  %v758_v2 = vadd.f32 %v757_v32, %v1475_v27 }
 0x143   :  { %v759_v3 = vadd.f32 %v1454_v15, %v758_v2  ;;  %v891_v42 = vadd.f32 %v890_v36, %v828_v37  ;;  %v833_v15 = vmul.f32 %v1490_v41, %v1490_v41 }
 0x145   :  { %v892_v44 = vadd.f32 %v891_v42, %v829_v54  ;;  %v760_v45 = vadd.f32 %v1469_v22, %v759_v3  ;;  %v834_v22 = vmul.f32 %v1505_v47, %v1505_v47 }
 0x147   :  { %v761_v58 = vadd.f32 %v760_v45, %v1499_v46  ;;  %v893_v48 = vadd.f32 %v892_v44, %v830_v60  ;;  %v835_v46 = vmul.f32 %v1535_v10, %v1535_v10 }
 0x149   :  { %v894_v49 = vadd.f32 %v893_v48, %v831_v21  ;;  %v762_v27 = vadd.f32 %v761_v58, %v1511_v51 }
 0x14b   :  { %v763_v52 = vadd.f32 %v1490_v41, %v762_v27  ;;  %v895_v53 = vadd.f32 %v894_v49, %v832_v50  ;;  %v837_v41 = vmul.f32 %v1526_v6, %v1526_v6 }
 0x14d   :  { %v896_v55 = vadd.f32 %v895_v53, %v833_v15  ;;  %v764_v56 = vadd.f32 %v1505_v47, %v763_v52  ;;  %v838_v47 = vmul.f32 %v1541_v11, %v1541_v11 }
 0x14f   :  { %v765_v57 = vadd.f32 %v764_v56, %v1535_v10  ;;  %v897_v63 = vadd.f32 %v896_v55, %v834_v22  ;;  %v839_v10 = vmul.f32 %v1565_v35, %v1565_v35 }
 0x151   :  { %v898_v61 = vadd.f32 %v897_v63, %v835_v46  ;;  %v766_v51 = vadd.f32 %v765_v57, %v1547_v17 }
 0x153   :  { %v767_v18 = vadd.f32 %v1526_v6, %v766_v51  ;;  %v899_v1 = vadd.f32 %v898_v61, %v836_v0  ;;  %v841_v6 = vmul.f32 %v1556_v30, %v1556_v30 }
 0x155   :  { %v900_v4 = vadd.f32 %v899_v1, %v837_v41  ;;  %v768_v5 = vadd.f32 %v1541_v11, %v767_v18  ;;  %v842_v11 = vmul.f32 %v1571_v62, %v1571_v62 }
 0x157   :  { %v769_v23 = vadd.f32 %v768_v5, %v1565_v35  ;;  %v901_v7 = vadd.f32 %v900_v4, %v838_v47 }
 0x159   :  { %v902_v14 = vadd.f32 %v901_v7, %v839_v10  ;;  %v770_v17 = vadd.f32 %v769_v23, %v1580_v40 }
 0x15b   :  { %v771_v9 = vadd.f32 %v1556_v30, %v770_v17  ;;  %v903_v19 = vadd.f32 %v902_v14, %v840_v8 }
 0x15d   :  { %v772_v12 = vadd.f32 %v1571_v62, %v771_v9  ;;  %v904_v13 = vadd.f32 %v903_v19, %v841_v6 }
 0x15f   :  { %v773_v35 = vrot.slane %v772_v12, 4  ;;  %v905_v38 = vadd.f32 %v904_v13, %v842_v11 }
 0x161   :  { %v774_v16 = vadd.f32 %v773_v35, %v772_v12  ;;  %v906_v20 = vrot.slane %v905_v38, 4 }
 0x163   :  { %v775_v43 = vrot.slane %v774_v16, 2  ;;  %v907_v25 = vadd.f32 %v906_v20, %v905_v38 }
 0x165   :  { %v776_v40 = vadd.f32 %v775_v43, %v774_v16  ;;  %v908_v34 = vrot.slane %v907_v25, 2 }
 0x167   :  { %v909_v28 = vadd.f32 %v908_v34, %v907_v25  ;;  %v777_v39 = vrot.slane %v776_v40, 1 }
 0x169   :  { %v910_v30 = vrot.slane %v909_v28, 1  ;;  %v778_v31 = vadd.f32 %v777_v39, %v776_v40 }
 0x16b   :  { %v911_v29 = vadd.f32 %v910_v30, %v909_v28 }
 0x16d   :  { %v916_v59 = vsel %vm915_vm3, %v911_v29, 0.0 }
 0x16e   :  { %v917_v62 = vsel %vm914_vm4, %v778_v31, %v916_v59 }
 0x16f   :  { %918 = vst [vmem:[%s1679_s3] sm:$0xff] %v917_v62 }

// kernel: resnet_generator_forward.34
= control target key start
LH: loop header
LB: loop body
LE: loop exit
PB: predicated region body
PF: predicated region fallthrough
CT: control target
= control target key end

     0   :  { %s391_s0 = inlined_call_operand.vmem [shape: f32[128,128], index: 0, kind: input, shape index: {}]   ;;  %s392_s1 = inlined_call_operand.vmem [shape: f32[1,128], index: 1, kind: input, shape index: {}]   ;;  %s393_s2 = inlined_call_operand.vmem [shape: f32[1,128], index: 2, kind: input, shape index: {}]   ;;  %s394_s3 = inlined_call_operand.vmem [shape: bf16[128,128], index: 3, kind: output, shape index: {}]  }
   0x1   :  { %v14_v0 = vld [vmem:[%s391_s0] sm:$0xff]  ;;  %v15_v1 = vld [vmem:[%s391_s0 + $0x8] sm:$0xff]  ;;  %v16_v6 = vld [vmem:[%s391_s0 + $0x10] sm:$0xff] }
   0x2   :  { %v286_v2 = vld [vmem:[%s392_s1] ss:$0 sm:$0xff]  ;;  %v17_v7 = vld [vmem:[%s391_s0 + $0x18] sm:$0xff]  ;;  %v19_v11 = vld [vmem:[%s391_s0 + $0x28] sm:$0xff] }
   0x3   :  { %v37_v3 = vmul.f32 %v286_v2, %v14_v0  ;;  %v38_v4 = vmul.f32 %v286_v2, %v15_v1  ;;  %v293_v5 = vld [vmem:[%s393_s2] ss:$0 sm:$0xff]  ;;  %v39_v8 = vmul.f32 %v286_v2, %v16_v6  ;;  %v40_v9 = vmul.f32 %v286_v2, %v17_v7  ;;  %v20_v12 = vld [vmem:[%s391_s0 + $0x30] sm:$0xff]  ;;  %v21_v17 = vld [vmem:[%s391_s0 + $0x38] sm:$0xff] }
   0x4   :  { %v18_v10 = vld [vmem:[%s391_s0 + $0x20] sm:$0xff]  ;;  %v42_v16 = vmul.f32 %v286_v2, %v19_v11  ;;  %v43_v20 = vmul.f32 %v286_v2, %v20_v12  ;;  %v44_v21 = vmul.f32 %v286_v2, %v21_v17  ;;  %v23_v27 = vld [vmem:[%s391_s0 + $0x48] sm:$0xff]  ;;  %v24_v32 = vld [vmem:[%s391_s0 + $0x50] sm:$0xff] }
   0x5   :  { %v60_v13 = vadd.f32 %v293_v5, %v37_v3  ;;  %v61_v14 = vadd.f32 %v293_v5, %v38_v4  ;;  %v41_v15 = vmul.f32 %v286_v2, %v18_v10  ;;  %v62_v18 = vadd.f32 %v293_v5, %v39_v8  ;;  %v22_v22 = vld [vmem:[%s391_s0 + $0x40] sm:$0xff]  ;;  %v25_v33 = vld [vmem:[%s391_s0 + $0x58] sm:$0xff]  ;;  %v27_v39 = vld [vmem:[%s391_s0 + $0x68] sm:$0xff] }
   0x6   :  { %v63_v19 = vadd.f32 %v293_v5, %v40_v9  ;;  %v65_v26 = vadd.f32 %v293_v5, %v42_v16  ;;  %v66_v30 = vadd.f32 %v293_v5, %v43_v20  ;;  %v67_v31 = vadd.f32 %v293_v5, %v44_v21  ;;  %v26_v38 = vld [vmem:[%s391_s0 + $0x60] sm:$0xff]  ;;  %v28_v44 = vld [vmem:[%s391_s0 + $0x70] sm:$0xff]  ;;  %v29_v49 = vld [vmem:[%s391_s0 + $0x78] sm:$0xff] }
   0x7   :  { %v76_v23 = vmax.f32 %v60_v13, 0.0  ;;  %v77_v24 = vmax.f32 %v61_v14, 0.0  ;;  %v64_v25 = vadd.f32 %v293_v5, %v41_v15  ;;  %v78_v28 = vmax.f32 %v62_v18, 0.0 }
   0x8   :  { %v79_v29 = vmax.f32 %v63_v19, 0.0  ;;  %v81_v36 = vmax.f32 %v65_v26, 0.0  ;;  %v45_v37 = vmul.f32 %v286_v2, %v22_v22  ;;  %v82_v41 = vmax.f32 %v66_v30, 0.0 }
   0x9   :  { %v213_v34 = vpack.c.bf16 %v77_v24, %v76_v23  ;;  %v80_v35 = vmax.f32 %v64_v25, 0.0  ;;  %v83_v42 = vmax.f32 %v67_v31, 0.0  ;;  %v46_v43 = vmul.f32 %v286_v2, %v23_v27 }
   0xa   :  { %v218_v40 = vpack.c.bf16 %v79_v29, %v78_v28  ;;  %v68_v46 = vadd.f32 %v293_v5, %v45_v37  ;;  %v47_v47 = vmul.f32 %v286_v2, %v24_v32  ;;  %v48_v48 = vmul.f32 %v286_v2, %v25_v33 }
   0xb   :  { %214 = vst [vmem:[%s394_s3] sm:$0xff] %v213_v34   ;;  %v223_v45 = vpack.c.bf16 %v81_v36, %v80_v35  ;;  %v228_v50 = vpack.c.bf16 %v83_v42, %v82_v41  ;;  %v69_v51 = vadd.f32 %v293_v5, %v46_v43  ;;  %v49_v52 = vmul.f32 %v286_v2, %v26_v38 }
   0xc   :  { %250 = vst [vmem:[%s394_s3 + $0x8] sm:$0xff] %v218_v40   ;;  %v50_v53 = vmul.f32 %v286_v2, %v27_v39  ;;  %v84_v54 = vmax.f32 %v68_v46, 0.0  ;;  %v70_v55 = vadd.f32 %v293_v5, %v47_v47  ;;  %v71_v56 = vadd.f32 %v293_v5, %v48_v48 }
   0xd   :  { %251 = vst [vmem:[%s394_s3 + $0x10] sm:$0xff] %v223_v45   ;;  %v51_v57 = vmul.f32 %v286_v2, %v28_v44  ;;  %252 = vst [vmem:[%s394_s3 + $0x18] sm:$0xff] %v228_v50   ;;  %v85_v58 = vmax.f32 %v69_v51, 0.0  ;;  %v72_v59 = vadd.f32 %v293_v5, %v49_v52  ;;  %v52_v61 = vmul.f32 %v286_v2, %v29_v49 }
   0xe   :  { %v73_v60 = vadd.f32 %v293_v5, %v50_v53  ;;  %v86_v62 = vmax.f32 %v70_v55, 0.0  ;;  %v87_v63 = vmax.f32 %v71_v56, 0.0 }
   0xf   :  { %v74_v0 = vadd.f32 %v293_v5, %v51_v57  ;;  %v233_v1 = vpack.c.bf16 %v85_v58, %v84_v54  ;;  %v88_v3 = vmax.f32 %v72_v59, 0.0  ;;  %v75_v6 = vadd.f32 %v293_v5, %v52_v61 }
  0x10   :  { %v89_v4 = vmax.f32 %v73_v60, 0.0  ;;  %v238_v7 = vpack.c.bf16 %v87_v63, %v86_v62 }
  0x11   :  { %v90_v8 = vmax.f32 %v74_v0, 0.0  ;;  %253 = vst [vmem:[%s394_s3 + $0x20] sm:$0xff] %v233_v1   ;;  %v91_v10 = vmax.f32 %v75_v6, 0.0 }
  0x12   :  { %v243_v9 = vpack.c.bf16 %v89_v4, %v88_v3  ;;  %254 = vst [vmem:[%s394_s3 + $0x28] sm:$0xff] %v238_v7  }
  0x13   :  { %v248_v2 = vpack.c.bf16 %v91_v10, %v90_v8 }
  0x14   :  { %255 = vst [vmem:[%s394_s3 + $0x30] sm:$0xff] %v243_v9  }
  0x15   :  { %256 = vst [vmem:[%s394_s3 + $0x38] sm:$0xff] %v248_v2  }

// kernel: resnet_generator_forward.33
= control target key start
LH: loop header
LB: loop body
LE: loop exit
PB: predicated region body
PF: predicated region fallthrough
CT: control target
= control target key end

     0   :  { %s2845_s1 = inlined_call_operand.vmem [shape: bf16[1152,128], index: 1, kind: input, shape index: {}]   ;;  %s2846_s0 = inlined_call_operand.vmem [shape: bf16[128,1152], index: 0, kind: input, shape index: {}]   ;;  %s2847_s2 = inlined_call_operand.vmem [shape: f32[128,128], index: 2, kind: output, shape index: {0}]   ;;  %s2848_s3 = inlined_call_operand.vmem [shape: f32[1,8,128], index: 3, kind: output, shape index: {1}]  }
   0x1   :  { %v2076_v0 = vld [vmem:[%s2845_s1 + $0x40] sm:$0xff]   ;;  %v2080_v4 = vld [vmem:[%s2845_s1 + $0x48] sm:$0xff]   ;;  %v2084_v8 = vld [vmem:[%s2845_s1 + $0x50] sm:$0xff]  }
   0x2   :  { %v2077_v1 = vld [vmem:[%s2845_s1 + $0xc0] sm:$0xff]   ;;  %1756 = vmatprep.subr.bf16.mxu0 %v2076_v0  ;;  %v2081_v5 = vld [vmem:[%s2845_s1 + $0xc8] sm:$0xff]   ;;  %v2085_v9 = vld [vmem:[%s2845_s1 + $0xd0] sm:$0xff]  }
   0x3   :  { %v2078_v2 = vld [vmem:[%s2845_s1] sm:$0xff]   ;;  %1820 = vmatprep.subr.bf16.mxu1 %v2077_v1  ;;  %v2082_v6 = vld [vmem:[%s2845_s1 + $0x8] sm:$0xff]   ;;  %v2086_v10 = vld [vmem:[%s2845_s1 + $0x10] sm:$0xff]  }
   0x4   :  { %v2079_v3 = vld [vmem:[%s2845_s1 + $0x80] sm:$0xff]   ;;  %1757 = vmatpush3.bf16.msra.mxu0 %v2078_v2  ;;  %v2083_v7 = vld [vmem:[%s2845_s1 + $0x88] sm:$0xff]   ;;  %v2087_v11 = vld [vmem:[%s2845_s1 + $0x90] sm:$0xff]  }
   0x5   :  { %1821 = vmatpush3.bf16.msra.mxu1 %v2079_v3  ;;  %1758 = vmatprep.subr.bf16.mxu0 %v2080_v4  ;;  %v2088_v12 = vld [vmem:[%s2845_s1 + $0x58] sm:$0xff]   ;;  %v2092_v16 = vld [vmem:[%s2845_s1 + $0x60] sm:$0xff]   ;;  %v2096_v20 = vld [vmem:[%s2845_s1 + $0x68] sm:$0xff]  }
   0x6   :  { %1822 = vmatprep.subr.bf16.mxu1 %v2081_v5  ;;  %v2089_v13 = vld [vmem:[%s2845_s1 + $0xd8] sm:$0xff]   ;;  %v2093_v17 = vld [vmem:[%s2845_s1 + $0xe0] sm:$0xff]   ;;  %v2097_v21 = vld [vmem:[%s2845_s1 + $0xe8] sm:$0xff]  }
   0x7   :  { %v2090_v14 = vld [vmem:[%s2845_s1 + $0x18] sm:$0xff]   ;;  %v2094_v18 = vld [vmem:[%s2845_s1 + $0x20] sm:$0xff]   ;;  %v2098_v22 = vld [vmem:[%s2845_s1 + $0x28] sm:$0xff]  }
   0x8   :  { %1759 = vmatpush3.bf16.msra.mxu0 %v2082_v6  ;;  %v2091_v15 = vld [vmem:[%s2845_s1 + $0x98] sm:$0xff]   ;;  %v2095_v19 = vld [vmem:[%s2845_s1 + $0xa0] sm:$0xff]   ;;  %v2099_v23 = vld [vmem:[%s2845_s1 + $0xa8] sm:$0xff]  }
   0x9   :  { %1823 = vmatpush3.bf16.msra.mxu1 %v2083_v7  ;;  %1760 = vmatprep.subr.bf16.mxu0 %v2084_v8  ;;  %v2100_v24 = vld [vmem:[%s2845_s1 + $0x70] sm:$0xff]   ;;  %v2104_v28 = vld [vmem:[%s2845_s1 + $0x78] sm:$0xff]   ;;  %v2108_v32 = vld [vmem:[%s2846_s0] ss:$36 sps:$4 sm:$0xff]  }
   0xa   :  { %1824 = vmatprep.subr.bf16.mxu1 %v2085_v9  ;;  %v2101_v25 = vld [vmem:[%s2845_s1 + $0xf0] sm:$0xff]   ;;  %v2105_v29 = vld [vmem:[%s2845_s1 + $0xf8] sm:$0xff]   ;;  %v2110_v33 = vld [vmem:[%s2846_s0 + $0x4] ss:$36 sps:$4 sm:$0xff]  }
   0xb   :  { %v2102_v26 = vld [vmem:[%s2845_s1 + $0x30] sm:$0xff]   ;;  %v2106_v30 = vld [vmem:[%s2845_s1 + $0x38] sm:$0xff]   ;;  %v2111_v34 = vld [vmem:[%s2846_s0 + $0x8] ss:$36 sps:$4 sm:$0xff]   ;;  %1070 = vmatprep.mubr.bf16.mxu0 %v2110_v33 }
   0xc   :  { %1761 = vmatpush3.bf16.msra.mxu0 %v2086_v10  ;;  %v2103_v27 = vld [vmem:[%s2845_s1 + $0xb0] sm:$0xff]   ;;  %v2107_v31 = vld [vmem:[%s2845_s1 + $0xb8] sm:$0xff]   ;;  %v2114_v36 = vld [vmem:[%s2845_s1 + $0x140] sm:$0xff]  }
   0xd   :  { %1825 = vmatpush3.bf16.msra.mxu1 %v2087_v11  ;;  %1762 = vmatprep.subr.bf16.mxu0 %v2088_v12  ;;  %v2113_v35 = vld [vmem:[%s2846_s0 + $0xc] ss:$36 sps:$4 sm:$0xff]   ;;  %v2115_v37 = vld [vmem:[%s2845_s1 + $0x100] sm:$0xff]   ;;  %v2118_v39 = vld [vmem:[%s2846_s0 + $0x54] ss:$36 sps:$4 sm:$0xff]  }
   0xe   :  { %1826 = vmatprep.subr.bf16.mxu1 %v2089_v13  ;;  %1167 = vmatprep.mubr.bf16.mxu1 %v2113_v35  ;;  %v2116_v38 = vld [vmem:[%s2846_s0 + $0x4c] ss:$36 sps:$4 sm:$0xff]   ;;  %v2124_v44 = vld [vmem:[%s2846_s0 + $0x94] ss:$36 sps:$4 sm:$0xff]   ;;  %v2126_v45 = vld [vmem:[%s2846_s0 + $0x9c] ss:$36 sps:$4 sm:$0xff]  }
   0xf   :  { %v2120_v40 = vld [vmem:[%s2846_s0 + $0x48] ss:$36 sps:$4 sm:$0xff]   ;;  %v2121_v41 = vld [vmem:[%s2846_s0 + $0x50] ss:$36 sps:$4 sm:$0xff]   ;;  %v2131_v47 = vld [vmem:[%s2845_s1 + $0x1c0] sm:$0xff]  }
  0x10   :  { %1763 = vmatpush3.bf16.msra.mxu0 %v2090_v14  ;;  %v2122_v42 = vld [vmem:[%s2845_s1 + $0x148] sm:$0xff]   ;;  %v2130_v46 = vld [vmem:[%s2845_s1 + $0x150] sm:$0xff]   ;;  %v2133_v50 = vld [vmem:[%s2845_s1 + $0x180] sm:$0xff]  }
  0x11   :  { %1827 = vmatpush3.bf16.msra.mxu1 %v2091_v15  ;;  %1764 = vmatprep.subr.bf16.mxu0 %v2092_v16  ;;  %v2123_v43 = vld [vmem:[%s2845_s1 + $0x108] sm:$0xff]   ;;  %v2128_v48 = vld [vmem:[%s2846_s0 + $0x90] ss:$36 sps:$4 sm:$0xff]   ;;  %v2129_v51 = vld [vmem:[%s2846_s0 + $0x98] ss:$36 sps:$4 sm:$0xff]  }
  0x12   :  { %1828 = vmatprep.subr.bf16.mxu1 %v2093_v17  ;;  %v2132_v49 = vld [vmem:[%s2845_s1 + $0x110] sm:$0xff]   ;;  %v2134_v52 = vld [vmem:[%s2846_s0 + $0xdc] ss:$36 sps:$4 sm:$0xff]   ;;  %v2136_v53 = vld [vmem:[%s2846_s0 + $0xe4] ss:$36 sps:$4 sm:$0xff]  }
  0x13   :  { %v2140_v54 = vld [vmem:[%s2845_s1 + $0x158] sm:$0xff]   ;;  %v2141_v55 = vld [vmem:[%s2845_s1 + $0x1c8] sm:$0xff]   ;;  %v2139_v59 = vld [vmem:[%s2846_s0 + $0xe0] ss:$36 sps:$4 sm:$0xff]  }
  0x14   :  { %1765 = vmatpush3.bf16.msra.mxu0 %v2094_v18  ;;  %v2142_v56 = vld [vmem:[%s2845_s1 + $0x118] sm:$0xff]   ;;  %v2143_v57 = vld [vmem:[%s2845_s1 + $0x188] sm:$0xff]   ;;  %v2150_v62 = vld [vmem:[%s2845_s1 + $0x160] sm:$0xff]  }
  0x15   :  { %1829 = vmatpush3.bf16.msra.mxu1 %v2095_v19  ;;  %1766 = vmatprep.subr.bf16.mxu0 %v2096_v20  ;;  %v2138_v58 = vld [vmem:[%s2846_s0 + $0xd8] ss:$36 sps:$4 sm:$0xff]   ;;  %v2144_v60 = vld [vmem:[%s2846_s0 + $0x124] ss:$36 sps:$4 sm:$0xff]   ;;  %v2146_v61 = vld [vmem:[%s2846_s0 + $0x12c] ss:$36 sps:$4 sm:$0xff]  }
  0x16   :  { %1830 = vmatprep.subr.bf16.mxu1 %v2097_v21  ;;  %v2151_v63 = vld [vmem:[%s2845_s1 + $0x1d0] sm:$0xff]   ;;  %v2152_v0 = vld [vmem:[%s2845_s1 + $0x120] sm:$0xff]   ;;  %v2149_v3 = vld [vmem:[%s2846_s0 + $0x128] ss:$36 sps:$4 sm:$0xff]  }
  0x17   :  { %v2153_v1 = vld [vmem:[%s2845_s1 + $0x190] sm:$0xff]   ;;  %v2148_v2 = vld [vmem:[%s2846_s0 + $0x120] ss:$36 sps:$4 sm:$0xff]   ;;  %v2160_v6 = vld [vmem:[%s2845_s1 + $0x168] sm:$0xff]  }
  0x18   :  { %1767 = vmatpush3.bf16.msra.mxu0 %v2098_v22  ;;  %v2154_v4 = vld [vmem:[%s2846_s0 + $0x16c] ss:$36 sps:$4 sm:$0xff]   ;;  %v2156_v5 = vld [vmem:[%s2846_s0 + $0x174] ss:$36 sps:$4 sm:$0xff]   ;;  %v2166_v14 = vld [vmem:[%s2846_s0 + $0x1bc] ss:$36 sps:$4 sm:$0xff]  }
  0x19   :  { %1831 = vmatpush3.bf16.msra.mxu1 %v2099_v23  ;;  %1768 = vmatprep.subr.bf16.mxu0 %v2100_v24  ;;  %v2161_v7 = vld [vmem:[%s2845_s1 + $0x1d8] sm:$0xff]   ;;  %v2162_v8 = vld [vmem:[%s2845_s1 + $0x128] sm:$0xff]   ;;  %v2159_v11 = vld [vmem:[%s2846_s0 + $0x170] ss:$36 sps:$4 sm:$0xff]  }
  0x1a   :  { %1832 = vmatprep.subr.bf16.mxu1 %v2101_v25  ;;  %v2163_v9 = vld [vmem:[%s2845_s1 + $0x198] sm:$0xff]   ;;  %v2158_v10 = vld [vmem:[%s2846_s0 + $0x168] ss:$36 sps:$4 sm:$0xff]   ;;  %v2170_v13 = vld [vmem:[%s2845_s1 + $0x170] sm:$0xff]  }
  0x1b   :  { %v2164_v12 = vld [vmem:[%s2846_s0 + $0x1b4] ss:$36 sps:$4 sm:$0xff]   ;;  %v2171_v15 = vld [vmem:[%s2845_s1 + $0x1e0] sm:$0xff]   ;;  %v2174_v18 = vld [vmem:[%s2845_s1 + $0x1e8] sm:$0xff]  }
  0x1c   :  { %1769 = vmatpush3.bf16.msra.mxu0 %v2102_v26  ;;  %v2172_v16 = vld [vmem:[%s2845_s1 + $0x130] sm:$0xff]   ;;  %v2173_v17 = vld [vmem:[%s2845_s1 + $0x1a0] sm:$0xff]   ;;  %v2175_v19 = vld [vmem:[%s2845_s1 + $0x1a8] sm:$0xff]  }
  0x1d   :  { %1833 = vmatpush3.bf16.msra.mxu1 %v2103_v27  ;;  %1770 = vmatprep.subr.bf16.mxu0 %v2104_v28  ;;  %v2168_v20 = vld [vmem:[%s2846_s0 + $0x1b0] ss:$36 sps:$4 sm:$0xff]   ;;  %v2169_v21 = vld [vmem:[%s2846_s0 + $0x1b8] ss:$36 sps:$4 sm:$0xff]   ;;  %v2178_v23 = vld [vmem:[%s2846_s0 + $0x204] ss:$36 sps:$4 sm:$0xff]  }
  0x1e   :  { %1834 = vmatprep.subr.bf16.mxu1 %v2105_v29  ;;  %v2176_v22 = vld [vmem:[%s2846_s0 + $0x1fc] ss:$36 sps:$4 sm:$0xff]   ;;  %v2183_v25 = vld [vmem:[%s2845_s1 + $0x1f0] sm:$0xff]  }
  0x1f   :  { %v2182_v24 = vld [vmem:[%s2845_s1 + $0x178] sm:$0xff]   ;;  %v2185_v27 = vld [vmem:[%s2845_s1 + $0x1b0] sm:$0xff]  }
  0x20   :  { %1771 = vmatpush3.bf16.msra.mxu0 %v2106_v30  ;;  %v2184_v26 = vld [vmem:[%s2845_s1 + $0x138] sm:$0xff]   ;;  %v2181_v30 = vld [vmem:[%s2846_s0 + $0x200] ss:$36 sps:$4 sm:$0xff]   ;;  %v2188_v35 = vld [vmem:[%s2846_s0 + $0x10] ss:$36 sps:$4 sm:$0xff]  }
  0x21   :  { %1835 = vmatpush3.bf16.msra.mxu1 %v2107_v31  ;;  %1884 = vmatprep.subr.bf16.mxu0 %v2114_v36  ;;  %v2186_v28 = vld [vmem:[%s2845_s1 + $0x1f8] sm:$0xff]  }
  0x22   :  { %1948 = vmatprep.subr.bf16.mxu1 %v2131_v47  ;;  %v2180_v29 = vld [vmem:[%s2846_s0 + $0x1f8] ss:$36 sps:$4 sm:$0xff]   ;;  %v2206_v47 = vld [vmem:[%s2846_s0 + $0xa0] ss:$36 sps:$4 sm:$0xff]  }
  0x23   :  { %1071 = vmatmul.mubr.bf16.vlgmr.msra.gmra.mrb[0].mxu0 %v2108_v32  ;;  %v2187_v31 = vld [vmem:[%s2845_s1 + $0x1b8] sm:$0xff]   ;;  %v2194_v32 = vld [vmem:[%s2845_s1 + $0x200] sm:$0xff]  }
  0x24   :  { %1168 = vmatmul.mubr.bf16.vlgmr.msra.gmra.mrb[0].mxu1 %v2111_v34  ;;  %1885 = vmatpush3.bf16.msra.mxu0 %v2115_v37  ;;  %v2190_v33 = vld [vmem:[%s2846_s0 + $0x14] ss:$36 sps:$4 sm:$0xff]   ;;  %v2193_v34 = vld [vmem:[%s2846_s0 + $0x1c] ss:$36 sps:$4 sm:$0xff]  }
  0x25   :  { %1078 = vmatprep.mubr.bf16.mxu0 %v2116_v38  ;;  %1175 = vmatprep.mubr.bf16.mxu1 %v2118_v39  ;;  %v2191_v36 = vld [vmem:[%s2846_s0 + $0x18] ss:$36 sps:$4 sm:$0xff]   ;;  %v2197_v38 = vld [vmem:[%s2846_s0 + $0x64] ss:$36 sps:$4 sm:$0xff]  }
  0x26   :  { %1886 = vmatprep.subr.bf16.mxu0 %v2122_v42  ;;  %1949 = vmatpush3.bf16.msra.mxu1 %v2133_v50  ;;  %v2195_v37 = vld [vmem:[%s2846_s0 + $0x5c] ss:$36 sps:$4 sm:$0xff]   ;;  %v2201_v39 = vld [vmem:[%s2845_s1 + $0x208] sm:$0xff]   ;;  %v2211_v50 = vld [vmem:[%s2846_s0 + $0xf4] ss:$36 sps:$4 sm:$0xff]  }
  0x27   :  { %1950 = vmatprep.subr.bf16.mxu1 %v2141_v55  ;;  %v2200_v42 = vld [vmem:[%s2846_s0 + $0x60] ss:$36 sps:$4 sm:$0xff]   ;;  %v2216_v55 = vld [vmem:[%s2846_s0 + $0x134] ss:$36 sps:$4 sm:$0xff]  }
  0x28   :  { %1887 = vmatpush3.bf16.msra.mxu0 %v2123_v43  ;;  %v2202_v43 = vld [vmem:[%s2846_s0 + $0xa4] ss:$36 sps:$4 sm:$0xff]  }
  0x29   :  { %1888 = vmatprep.subr.bf16.mxu0 %v2130_v46  ;;  %v2222_v46 = vld [vmem:[%s2845_s1 + $0x220] sm:$0xff]  }
  0x2a   :  { %1951 = vmatpush3.bf16.msra.mxu1 %v2143_v57  ;;  %v2243_v57 = vld [vmem:[%s2845_s1 + $0x238] sm:$0xff]  }
  0x2b   :  { %1079 = vmatmul.mubr.bf16.gmra.mrb[4].mxu0 %v2120_v40  ;;  %1952 = vmatprep.subr.bf16.mxu1 %v2151_v63  ;;  %v2208_v40 = vld [vmem:[%s2845_s1 + $0x210] sm:$0xff]   ;;  %v2228_v63 = vld [vmem:[%s2846_s0 + $0x180] ss:$36 sps:$4 sm:$0xff]  }
  0x2c   :  { %1176 = vmatmul.mubr.bf16.gmra.mrb[4].mxu1 %v2121_v41  ;;  %1086 = vmatprep.mubr.bf16.mxu0 %v2124_v44  ;;  %v2199_v41 = vld [vmem:[%s2846_s0 + $0x58] ss:$36 sps:$4 sm:$0xff]   ;;  %v2204_v44 = vld [vmem:[%s2846_s0 + $0xac] ss:$36 sps:$4 sm:$0xff]  }
  0x2d   :  { %1183 = vmatprep.mubr.bf16.mxu1 %v2126_v45  ;;  %1889 = vmatpush3.bf16.msra.mxu0 %v2132_v49  ;;  %v2215_v45 = vld [vmem:[%s2845_s1 + $0x218] sm:$0xff]   ;;  %v2209_v49 = vld [vmem:[%s2846_s0 + $0xec] ss:$36 sps:$4 sm:$0xff]  }
  0x2e   :  { %1890 = vmatprep.subr.bf16.mxu0 %v2140_v54  ;;  %1953 = vmatpush3.bf16.msra.mxu1 %v2153_v1  ;;  %v2214_v54 = vld [vmem:[%s2846_s0 + $0xf0] ss:$36 sps:$4 sm:$0xff]  }
  0x2f   :  { %1954 = vmatprep.subr.bf16.mxu1 %v2161_v7  ;;  %v2232_v1 = vld [vmem:[%s2846_s0 + $0x1cc] ss:$36 sps:$4 sm:$0xff]  }
  0x30   :  { %v2242_v7 = vld [vmem:[%s2846_s0 + $0x210] ss:$36 sps:$4 sm:$0xff]  }
  0x31   :  { %1891 = vmatpush3.bf16.msra.mxu0 %v2142_v56  ;;  %v2218_v56 = vld [vmem:[%s2846_s0 + $0x13c] ss:$36 sps:$4 sm:$0xff]  }
  0x32   :  { %1892 = vmatprep.subr.bf16.mxu0 %v2150_v62  ;;  %1955 = vmatpush3.bf16.msra.mxu1 %v2163_v9  ;;  %v2227_v62 = vld [vmem:[%s2846_s0 + $0x178] ss:$36 sps:$4 sm:$0xff]   ;;  %v2245_v9 = vld [vmem:[%s2846_s0 + $0x140] ss:$36 sps:$4 sm:$0xff]  }
  0x33   :  { %1087 = vmatmul.mubr.bf16.gmra.mrb[8].mxu0 %v2128_v48  ;;  %1956 = vmatprep.subr.bf16.mxu1 %v2171_v15  ;;  %v2207_v48 = vld [vmem:[%s2846_s0 + $0xa8] ss:$36 sps:$4 sm:$0xff]   ;;  %v2251_v15 = vld [vmem:[%s2846_s0 + $0x218] ss:$36 sps:$4 sm:$0xff]  }
  0x34   :  { %1184 = vmatmul.mubr.bf16.gmra.mrb[8].mxu1 %v2129_v51  ;;  %1094 = vmatprep.mubr.bf16.mxu0 %v2134_v52  ;;  %v2229_v51 = vld [vmem:[%s2845_s1 + $0x228] sm:$0xff]  }
  0x35   :  { %1191 = vmatprep.mubr.bf16.mxu1 %v2136_v53  ;;  %1893 = vmatpush3.bf16.msra.mxu0 %v2152_v0  ;;  %v2213_v52 = vld [vmem:[%s2846_s0 + $0xe8] ss:$36 sps:$4 sm:$0xff]   ;;  %v2236_v53 = vld [vmem:[%s2845_s1 + $0x230] sm:$0xff]  }
  0x36   :  { %1894 = vmatprep.subr.bf16.mxu0 %v2160_v6  ;;  %1957 = vmatpush3.bf16.msra.mxu1 %v2173_v17  ;;  %v2230_v0 = vld [vmem:[%s2846_s0 + $0x1c4] ss:$36 sps:$4 sm:$0xff]  }
  0x37   :  { %1958 = vmatprep.subr.bf16.mxu1 %v2174_v18  ;;  %v2241_v6 = vld [vmem:[%s2846_s0 + $0x208] ss:$36 sps:$4 sm:$0xff]  }
  0x39   :  { %1895 = vmatpush3.bf16.msra.mxu0 %v2162_v8  ;;  %v2244_v8 = vld [vmem:[%s2846_s0 + $0x20] ss:$36 sps:$4 sm:$0xff]  }
  0x3a   :  { %1896 = vmatprep.subr.bf16.mxu0 %v2170_v13  ;;  %1959 = vmatpush3.bf16.msra.mxu1 %v2175_v19  ;;  %v2249_v13 = vld [vmem:[%s2846_s0 + $0x1d0] ss:$36 sps:$4 sm:$0xff]  }
  0x3b   :  { %1095 = vmatmul.mubr.bf16.gmra.mrb[12].mxu0 %v2138_v58  ;;  %1960 = vmatprep.subr.bf16.mxu1 %v2183_v25  ;;  %v2220_v58 = vld [vmem:[%s2846_s0 + $0x130] ss:$36 sps:$4 sm:$0xff]  }
  0x3c   :  { %1192 = vmatmul.mubr.bf16.gmra.mrb[12].mxu1 %v2139_v59  ;;  %1102 = vmatprep.mubr.bf16.mxu0 %v2144_v60  ;;  %v2221_v59 = vld [vmem:[%s2846_s0 + $0x138] ss:$36 sps:$4 sm:$0xff]  }
  0x3d   :  { %1199 = vmatprep.mubr.bf16.mxu1 %v2146_v61  ;;  %1897 = vmatpush3.bf16.msra.mxu0 %v2172_v16  ;;  %v2223_v60 = vld [vmem:[%s2846_s0 + $0x17c] ss:$36 sps:$4 sm:$0xff]   ;;  %v2225_v61 = vld [vmem:[%s2846_s0 + $0x184] ss:$36 sps:$4 sm:$0xff]  }
  0x3e   :  { %1898 = vmatprep.subr.bf16.mxu0 %v2182_v24  ;;  %1961 = vmatpush3.bf16.msra.mxu1 %v2185_v27 }
  0x3f   :  { %1962 = vmatprep.subr.bf16.mxu1 %v2186_v28 }
  0x41   :  { %1899 = vmatpush3.bf16.msra.mxu0 %v2184_v26 }
  0x42   :  { %2028 = vmatprep.subr.bf16.mxu0 %v2194_v32  ;;  %1963 = vmatpush3.bf16.msra.mxu1 %v2187_v31 }
  0x43   :  { %1103 = vmatmul.mubr.bf16.gmra.mrb[16].mxu0 %v2148_v2  ;;  %2060 = vmatprep.subr.bf16.mxu1 %v2194_v32  ;;  %v2234_v2 = vld [vmem:[%s2846_s0 + $0x1c0] ss:$36 sps:$4 sm:$0xff]  }
  0x44   :  { %1200 = vmatmul.mubr.bf16.gmra.mrb[16].mxu1 %v2149_v3  ;;  %1110 = vmatprep.mubr.bf16.mxu0 %v2154_v4  ;;  %v2235_v3 = vld [vmem:[%s2846_s0 + $0x1c8] ss:$36 sps:$4 sm:$0xff]  }
  0x45   :  { %1207 = vmatprep.mubr.bf16.mxu1 %v2156_v5  ;;  %v2237_v4 = vld [vmem:[%s2846_s0 + $0x20c] ss:$36 sps:$4 sm:$0xff]   ;;  %v2239_v5 = vld [vmem:[%s2846_s0 + $0x214] ss:$36 sps:$4 sm:$0xff]  }
  0x4b   :  { %1111 = vmatmul.mubr.bf16.gmra.mrb[20].mxu0 %v2158_v10  ;;  %v2246_v10 = vld [vmem:[%s2846_s0 + $0x68] ss:$36 sps:$4 sm:$0xff]  }
  0x4c   :  { %1208 = vmatmul.mubr.bf16.gmra.mrb[20].mxu1 %v2159_v11  ;;  %1118 = vmatprep.mubr.bf16.mxu0 %v2164_v12  ;;  %v2247_v11 = vld [vmem:[%s2846_s0 + $0x188] ss:$36 sps:$4 sm:$0xff]   ;;  %v2248_v12 = vld [vmem:[%s2846_s0 + $0xb0] ss:$36 sps:$4 sm:$0xff]  }
  0x4d   :  { %1215 = vmatprep.mubr.bf16.mxu1 %v2166_v14  ;;  %v2250_v14 = vld [vmem:[%s2846_s0 + $0xf8] ss:$36 sps:$4 sm:$0xff]  }
  0x53   :  { %1119 = vmatmul.mubr.bf16.gmra.mrb[24].mxu0 %v2168_v20 }
  0x54   :  { %1216 = vmatmul.mubr.bf16.gmra.mrb[24].mxu1 %v2169_v21  ;;  %1126 = vmatprep.mubr.bf16.mxu0 %v2176_v22 }
  0x55   :  { %1223 = vmatprep.mubr.bf16.mxu1 %v2178_v23 }
  0x5b   :  { %1127 = vmatmul.mubr.bf16.gmra.mrb[28].mxu0 %v2180_v29 }
  0x5c   :  { %1224 = vmatmul.mubr.bf16.gmra.mrb[28].mxu1 %v2181_v30  ;;  %1264 = vmatprep.mubr.bf16.mxu0 %v2190_v33 }
  0x5d   :  { %1361 = vmatprep.mubr.bf16.mxu1 %v2193_v34 }
  0x63   :  { %1265 = vmatmul.mubr.bf16.vlgmr.msra.gmra.mrb[32].mxu0 %v2188_v35 }
  0x64   :  { %1362 = vmatmul.mubr.bf16.vlgmr.msra.gmra.mrb[32].mxu1 %v2191_v36  ;;  %2029 = vmatpush3.bf16.msra.mxu0 %v2194_v32 }
  0x65   :  { %1272 = vmatprep.mubr.bf16.mxu0 %v2195_v37  ;;  %1369 = vmatprep.mubr.bf16.mxu1 %v2197_v38 }
  0x66   :  { %2030 = vmatprep.subr.bf16.mxu0 %v2201_v39  ;;  %2068 = vmatpush3.bf16.msra.mxu1 %v2194_v32 }
  0x67   :  { %2061 = vmatprep.subr.bf16.mxu1 %v2201_v39 }
  0x68   :  { %2031 = vmatpush3.bf16.msra.mxu0 %v2201_v39 }
  0x69   :  { %2032 = vmatprep.subr.bf16.mxu0 %v2208_v40 }
  0x6a   :  { %2069 = vmatpush3.bf16.msra.mxu1 %v2201_v39 }
  0x6b   :  { %1273 = vmatmul.mubr.bf16.gmra.mrb[36].mxu0 %v2199_v41  ;;  %2062 = vmatprep.subr.bf16.mxu1 %v2208_v40 }
  0x6c   :  { %1370 = vmatmul.mubr.bf16.gmra.mrb[36].mxu1 %v2200_v42  ;;  %1280 = vmatprep.mubr.bf16.mxu0 %v2202_v43 }
  0x6d   :  { %1377 = vmatprep.mubr.bf16.mxu1 %v2204_v44  ;;  %2033 = vmatpush3.bf16.msra.mxu0 %v2208_v40 }
  0x6e   :  { %2034 = vmatprep.subr.bf16.mxu0 %v2215_v45  ;;  %2070 = vmatpush3.bf16.msra.mxu1 %v2208_v40 }
  0x6f   :  { %2063 = vmatprep.subr.bf16.mxu1 %v2215_v45 }
  0x71   :  { %2035 = vmatpush3.bf16.msra.mxu0 %v2215_v45 }
  0x72   :  { %2036 = vmatprep.subr.bf16.mxu0 %v2222_v46  ;;  %2071 = vmatpush3.bf16.msra.mxu1 %v2215_v45 }
  0x73   :  { %1281 = vmatmul.mubr.bf16.gmra.mrb[40].mxu0 %v2206_v47  ;;  %2064 = vmatprep.subr.bf16.mxu1 %v2222_v46 }
  0x74   :  { %1378 = vmatmul.mubr.bf16.gmra.mrb[40].mxu1 %v2207_v48  ;;  %1288 = vmatprep.mubr.bf16.mxu0 %v2209_v49 }
  0x75   :  { %1385 = vmatprep.mubr.bf16.mxu1 %v2211_v50  ;;  %2037 = vmatpush3.bf16.msra.mxu0 %v2222_v46 }
  0x76   :  { %2038 = vmatprep.subr.bf16.mxu0 %v2229_v51  ;;  %2072 = vmatpush3.bf16.msra.mxu1 %v2222_v46 }
  0x77   :  { %2065 = vmatprep.subr.bf16.mxu1 %v2229_v51 }
  0x79   :  { %2039 = vmatpush3.bf16.msra.mxu0 %v2229_v51 }
  0x7a   :  { %2040 = vmatprep.subr.bf16.mxu0 %v2236_v53  ;;  %2073 = vmatpush3.bf16.msra.mxu1 %v2229_v51 }
  0x7b   :  { %1289 = vmatmul.mubr.bf16.gmra.mrb[44].mxu0 %v2213_v52  ;;  %2066 = vmatprep.subr.bf16.mxu1 %v2236_v53 }
  0x7c   :  { %1386 = vmatmul.mubr.bf16.gmra.mrb[44].mxu1 %v2214_v54  ;;  %1296 = vmatprep.mubr.bf16.mxu0 %v2216_v55 }
  0x7d   :  { %1393 = vmatprep.mubr.bf16.mxu1 %v2218_v56  ;;  %2041 = vmatpush3.bf16.msra.mxu0 %v2236_v53 }
  0x7e   :  { %2042 = vmatprep.subr.bf16.mxu0 %v2243_v57  ;;  %2074 = vmatpush3.bf16.msra.mxu1 %v2236_v53 }
  0x7f   :  { %2067 = vmatprep.subr.bf16.mxu1 %v2243_v57 }
  0x81   :  { %2043 = vmatpush3.bf16.msra.mxu0 %v2243_v57 }
  0x82   :  { %2075 = vmatpush3.bf16.msra.mxu1 %v2243_v57 }
  0x83   :  { %1297 = vmatmul.mubr.bf16.gmra.mrb[48].mxu0 %v2220_v58 }
  0x84   :  { %1394 = vmatmul.mubr.bf16.gmra.mrb[48].mxu1 %v2221_v59  ;;  %1304 = vmatprep.mubr.bf16.mxu0 %v2223_v60 }
  0x85   :  { %1401 = vmatprep.mubr.bf16.mxu1 %v2225_v61 }
  0x8b   :  { %1305 = vmatmul.mubr.bf16.gmra.mrb[52].mxu0 %v2227_v62 }
  0x8c   :  { %1402 = vmatmul.mubr.bf16.gmra.mrb[52].mxu1 %v2228_v63  ;;  %1312 = vmatprep.mubr.bf16.mxu0 %v2230_v0 }
  0x8d   :  { %1409 = vmatprep.mubr.bf16.mxu1 %v2232_v1 }
  0x93   :  { %1313 = vmatmul.mubr.bf16.gmra.mrb[56].mxu0 %v2234_v2 }
  0x94   :  { %1410 = vmatmul.mubr.bf16.gmra.mrb[56].mxu1 %v2235_v3  ;;  %1320 = vmatprep.mubr.bf16.mxu0 %v2237_v4 }
  0x95   :  { %1417 = vmatprep.mubr.bf16.mxu1 %v2239_v5 }
  0x9b   :  { %1321 = vmatmul.mubr.bf16.gmra.mrb[60].mxu0 %v2241_v6 }
  0x9c   :  { %1418 = vmatmul.mubr.bf16.gmra.mrb[60].mxu1 %v2242_v7  ;;  %2044 = vmatprep.mubr.bf16.mxu0 %v2244_v8 }
  0x9d   :  { %2052 = vmatprep.mubr.bf16.mxu1 %v2245_v9 }
  0xa3   :  { %2045 = vmatmul.mubr.bf16.vlgmr.msra.gmra.mrb[64].mxu0 %v2246_v10 }
  0xa4   :  { %2053 = vmatmul.mubr.bf16.vlgmr.msra.gmra.mrb[64].mxu1 %v2247_v11  ;;  %2048 = vmatprep.mubr.bf16.mxu0 %v2248_v12 }
  0xa5   :  { %2056 = vmatprep.mubr.bf16.mxu1 %v2249_v13 }
  0xab   :  { %2049 = vmatmul.mubr.bf16.gmra.mrb[68].mxu0 %v2250_v14 }
  0xac   :  { %2057 = vmatmul.mubr.bf16.gmra.mrb[68].mxu1 %v2251_v15 }
  0xf6   :  { %v1772_v16 = vpop.f32.mrb[0].mxu0 }
  0xf7   :  { %v1836_v17 = vpop.f32.mrb[0].mxu1  ;;  %v1773_v18 = vpop.f32.mrb[1].mxu0 }
  0xf8   :  { %v1774_v19 = vadd.f32 %v1773_v18, %v1772_v16  ;;  %v1837_v20 = vpop.f32.mrb[1].mxu1  ;;  %v1775_v21 = vpop.f32.mrb[2].mxu0 }
  0xf9   :  { %v1838_v22 = vadd.f32 %v1837_v20, %v1836_v17  ;;  %v1839_v23 = vpop.f32.mrb[2].mxu1  ;;  %v1776_v24 = vpop.f32.mrb[3].mxu0 }
  0xfa   :  { %v1777_v25 = vadd.f32 %v1776_v24, %v1775_v21  ;;  %v1840_v26 = vpop.f32.mrb[3].mxu1 }
  0xfb   :  { %v2704_v27 = vadd.f32 %v1838_v22, %v1774_v19  ;;  %v1841_v28 = vadd.f32 %v1840_v26, %v1839_v23 }
  0xfd   :  { %v2706_v29 = vadd.f32 %v1841_v28, %v1777_v25 }
  0xfe   :  { %v1778_v30 = vpop.f32.mrb[4].mxu0 }
  0xff   :  { %v1842_v31 = vpop.f32.mrb[4].mxu1  ;;  %v1779_v32 = vpop.f32.mrb[5].mxu0 }
 0x100   :  { %v1780_v33 = vadd.f32 %v1779_v32, %v1778_v30  ;;  %v1843_v34 = vpop.f32.mrb[5].mxu1  ;;  %v1781_v35 = vpop.f32.mrb[6].mxu0 }
 0x101   :  { %v1844_v36 = vadd.f32 %v1843_v34, %v1842_v31  ;;  %v1845_v37 = vpop.f32.mrb[6].mxu1  ;;  %v1782_v38 = vpop.f32.mrb[7].mxu0 }
 0x102   :  { %v1783_v39 = vadd.f32 %v1782_v38, %v1781_v35  ;;  %v1846_v40 = vpop.f32.mrb[7].mxu1 }
 0x103   :  { %v2708_v41 = vadd.f32 %v1844_v36, %v1780_v33  ;;  %v1847_v42 = vadd.f32 %v1846_v40, %v1845_v37 }
 0x105   :  { %v2710_v43 = vadd.f32 %v1847_v42, %v1783_v39 }
 0x106   :  { %v1784_v44 = vpop.f32.mrb[8].mxu0 }
 0x107   :  { %v1848_v45 = vpop.f32.mrb[8].mxu1  ;;  %v1785_v46 = vpop.f32.mrb[9].mxu0 }
 0x108   :  { %v1786_v47 = vadd.f32 %v1785_v46, %v1784_v44  ;;  %v1849_v48 = vpop.f32.mrb[9].mxu1  ;;  %v1787_v49 = vpop.f32.mrb[10].mxu0 }
 0x109   :  { %v1850_v50 = vadd.f32 %v1849_v48, %v1848_v45  ;;  %v1851_v51 = vpop.f32.mrb[10].mxu1  ;;  %v1788_v52 = vpop.f32.mrb[11].mxu0 }
 0x10a   :  { %v1789_v53 = vadd.f32 %v1788_v52, %v1787_v49  ;;  %v1852_v54 = vpop.f32.mrb[11].mxu1 }
 0x10b   :  { %v2712_v55 = vadd.f32 %v1850_v50, %v1786_v47  ;;  %v1853_v56 = vadd.f32 %v1852_v54, %v1851_v51 }
 0x10d   :  { %v2714_v57 = vadd.f32 %v1853_v56, %v1789_v53 }
 0x10e   :  { %v1790_v58 = vpop.f32.mrb[12].mxu0 }
 0x10f   :  { %v1854_v59 = vpop.f32.mrb[12].mxu1  ;;  %v1791_v60 = vpop.f32.mrb[13].mxu0 }
 0x110   :  { %v1792_v61 = vadd.f32 %v1791_v60, %v1790_v58  ;;  %v1855_v62 = vpop.f32.mrb[13].mxu1  ;;  %v1793_v63 = vpop.f32.mrb[14].mxu0 }
 0x111   :  { %v1856_v0 = vadd.f32 %v1855_v62, %v1854_v59  ;;  %v1857_v1 = vpop.f32.mrb[14].mxu1  ;;  %v1794_v2 = vpop.f32.mrb[15].mxu0 }
 0x112   :  { %v1795_v3 = vadd.f32 %v1794_v2, %v1793_v63  ;;  %v1858_v4 = vpop.f32.mrb[15].mxu1 }
 0x113   :  { %v2716_v5 = vadd.f32 %v1856_v0, %v1792_v61  ;;  %v1859_v6 = vadd.f32 %v1858_v4, %v1857_v1 }
 0x115   :  { %v2718_v7 = vadd.f32 %v1859_v6, %v1795_v3 }
 0x116   :  { %v1796_v8 = vpop.f32.mrb[16].mxu0 }
 0x117   :  { %v1860_v9 = vpop.f32.mrb[16].mxu1  ;;  %v1797_v10 = vpop.f32.mrb[17].mxu0 }
 0x118   :  { %v1798_v11 = vadd.f32 %v1797_v10, %v1796_v8  ;;  %v1861_v12 = vpop.f32.mrb[17].mxu1  ;;  %v1799_v13 = vpop.f32.mrb[18].mxu0 }
 0x119   :  { %v1862_v14 = vadd.f32 %v1861_v12, %v1860_v9  ;;  %v1863_v15 = vpop.f32.mrb[18].mxu1  ;;  %v1800_v16 = vpop.f32.mrb[19].mxu0 }
 0x11a   :  { %v1801_v17 = vadd.f32 %v1800_v16, %v1799_v13  ;;  %v1864_v18 = vpop.f32.mrb[19].mxu1 }
 0x11b   :  { %v2720_v19 = vadd.f32 %v1862_v14, %v1798_v11  ;;  %v1865_v20 = vadd.f32 %v1864_v18, %v1863_v15 }
 0x11d   :  { %v2722_v21 = vadd.f32 %v1865_v20, %v1801_v17 }
 0x11e   :  { %v1802_v22 = vpop.f32.mrb[20].mxu0 }
 0x11f   :  { %v1866_v23 = vpop.f32.mrb[20].mxu1  ;;  %v1803_v24 = vpop.f32.mrb[21].mxu0 }
 0x120   :  { %v1804_v25 = vadd.f32 %v1803_v24, %v1802_v22  ;;  %v1867_v26 = vpop.f32.mrb[21].mxu1  ;;  %v1805_v28 = vpop.f32.mrb[22].mxu0 }
 0x121   :  { %v1868_v30 = vadd.f32 %v1867_v26, %v1866_v23  ;;  %v1869_v31 = vpop.f32.mrb[22].mxu1  ;;  %v1806_v32 = vpop.f32.mrb[23].mxu0 }
 0x122   :  { %v1807_v33 = vadd.f32 %v1806_v32, %v1805_v28  ;;  %v1870_v34 = vpop.f32.mrb[23].mxu1 }
 0x123   :  { %v2724_v35 = vadd.f32 %v1868_v30, %v1804_v25  ;;  %v1871_v36 = vadd.f32 %v1870_v34, %v1869_v31 }
 0x125   :  { %v2726_v37 = vadd.f32 %v1871_v36, %v1807_v33 }
 0x126   :  { %v1808_v38 = vpop.f32.mrb[24].mxu0 }
 0x127   :  { %v1872_v39 = vpop.f32.mrb[24].mxu1  ;;  %v1809_v40 = vpop.f32.mrb[25].mxu0 }
 0x128   :  { %v1810_v42 = vadd.f32 %v1809_v40, %v1808_v38  ;;  %v1873_v44 = vpop.f32.mrb[25].mxu1  ;;  %v1811_v45 = vpop.f32.mrb[26].mxu0 }
 0x129   :  { %v1874_v46 = vadd.f32 %v1873_v44, %v1872_v39  ;;  %v1875_v47 = vpop.f32.mrb[26].mxu1  ;;  %v1812_v48 = vpop.f32.mrb[27].mxu0 }
 0x12a   :  { %v1813_v49 = vadd.f32 %v1812_v48, %v1811_v45  ;;  %v1876_v50 = vpop.f32.mrb[27].mxu1 }
 0x12b   :  { %v2728_v51 = vadd.f32 %v1874_v46, %v1810_v42  ;;  %v1877_v52 = vadd.f32 %v1876_v50, %v1875_v47 }
 0x12d   :  { %v2730_v53 = vadd.f32 %v1877_v52, %v1813_v49 }
 0x12e   :  { %v1814_v54 = vpop.f32.mrb[28].mxu0 }
 0x12f   :  { %v1878_v56 = vpop.f32.mrb[28].mxu1  ;;  %v1815_v58 = vpop.f32.mrb[29].mxu0 }
 0x130   :  { %v1816_v59 = vadd.f32 %v1815_v58, %v1814_v54  ;;  %v1879_v60 = vpop.f32.mrb[29].mxu1  ;;  %v1817_v61 = vpop.f32.mrb[30].mxu0 }
 0x131   :  { %v1880_v62 = vadd.f32 %v1879_v60, %v1878_v56  ;;  %v1881_v63 = vpop.f32.mrb[30].mxu1  ;;  %v1818_v0 = vpop.f32.mrb[31].mxu0 }
 0x132   :  { %v1819_v1 = vadd.f32 %v1818_v0, %v1817_v61  ;;  %v1882_v2 = vpop.f32.mrb[31].mxu1 }
 0x133   :  { %v2732_v3 = vadd.f32 %v1880_v62, %v1816_v59  ;;  %v1883_v4 = vadd.f32 %v1882_v2, %v1881_v63 }
 0x135   :  { %v2734_v6 = vadd.f32 %v1883_v4, %v1819_v1 }
 0x136   :  { %v1900_v8 = vpop.f32.mrb[32].mxu0 }
 0x137   :  { %v1901_v9 = vpop.f32.mrb[33].mxu0  ;;  %v1964_v10 = vpop.f32.mrb[32].mxu1 }
 0x138   :  { %v1902_v11 = vadd.f32 %v1901_v9, %v1900_v8  ;;  %v1903_v12 = vpop.f32.mrb[34].mxu0  ;;  %v1965_v13 = vpop.f32.mrb[33].mxu1 }
 0x139   :  { %v1904_v14 = vpop.f32.mrb[35].mxu0  ;;  %v1966_v15 = vadd.f32 %v1965_v13, %v1964_v10  ;;  %v1967_v16 = vpop.f32.mrb[34].mxu1 }
 0x13a   :  { %v1267_v17 = vadd.f32 %v1902_v11, %v2704_v27  ;;  %v1905_v18 = vadd.f32 %v1904_v14, %v1903_v12  ;;  %v1968_v20 = vpop.f32.mrb[35].mxu1 }
 0x13b   :  { %v1969_v22 = vadd.f32 %v1968_v20, %v1967_v16 }
 0x13c   :  { %v1270_v23 = vadd.f32 %v1905_v18, %v2706_v29  ;;  %v2738_v24 = vadd.f32 %v1966_v15, %v1267_v17 }
 0x13e   :  { %v1906_v25 = vpop.f32.mrb[36].mxu0  ;;  %v2740_v26 = vadd.f32 %v1969_v22, %v1270_v23 }
 0x13f   :  { %v1907_v28 = vpop.f32.mrb[37].mxu0  ;;  %v1970_v30 = vpop.f32.mrb[36].mxu1 }
 0x140   :  { %v1908_v31 = vadd.f32 %v1907_v28, %v1906_v25  ;;  %v1909_v32 = vpop.f32.mrb[38].mxu0  ;;  %v1971_v33 = vpop.f32.mrb[37].mxu1 }
 0x141   :  { %v1910_v34 = vpop.f32.mrb[39].mxu0  ;;  %v1972_v36 = vadd.f32 %v1971_v33, %v1970_v30  ;;  %v1973_v38 = vpop.f32.mrb[38].mxu1 }
 0x142   :  { %v1275_v27 = vadd.f32 %v1908_v31, %v2708_v41  ;;  %v1911_v39 = vadd.f32 %v1910_v34, %v1909_v32  ;;  %v1974_v40 = vpop.f32.mrb[39].mxu1 }
 0x143   :  { %v1975_v42 = vadd.f32 %v1974_v40, %v1973_v38 }
 0x144   :  { %v1278_v29 = vadd.f32 %v1911_v39, %v2710_v43  ;;  %v2744_v44 = vadd.f32 %v1972_v36, %v1275_v27 }
 0x146   :  { %v1912_v45 = vpop.f32.mrb[40].mxu0  ;;  %v2746_v46 = vadd.f32 %v1975_v42, %v1278_v29 }
 0x147   :  { %v1913_v47 = vpop.f32.mrb[41].mxu0  ;;  %v1976_v48 = vpop.f32.mrb[40].mxu1 }
 0x148   :  { %v1914_v49 = vadd.f32 %v1913_v47, %v1912_v45  ;;  %v1915_v50 = vpop.f32.mrb[42].mxu0  ;;  %v1977_v52 = vpop.f32.mrb[41].mxu1 }
 0x149   :  { %v1916_v54 = vpop.f32.mrb[43].mxu0  ;;  %v1978_v56 = vadd.f32 %v1977_v52, %v1976_v48  ;;  %v1979_v58 = vpop.f32.mrb[42].mxu1 }
 0x14a   :  { %v1283_v41 = vadd.f32 %v1914_v49, %v2712_v55  ;;  %v1917_v59 = vadd.f32 %v1916_v54, %v1915_v50  ;;  %v1980_v60 = vpop.f32.mrb[43].mxu1 }
 0x14b   :  { %v1981_v61 = vadd.f32 %v1980_v60, %v1979_v58 }
 0x14c   :  { %v1286_v43 = vadd.f32 %v1917_v59, %v2714_v57  ;;  %v2750_v62 = vadd.f32 %v1978_v56, %v1283_v41 }
 0x14e   :  { %v1918_v63 = vpop.f32.mrb[44].mxu0  ;;  %v2752_v0 = vadd.f32 %v1981_v61, %v1286_v43 }
 0x14f   :  { %v1919_v1 = vpop.f32.mrb[45].mxu0  ;;  %v1982_v2 = vpop.f32.mrb[44].mxu1 }
 0x150   :  { %v1920_v4 = vadd.f32 %v1919_v1, %v1918_v63  ;;  %v1921_v8 = vpop.f32.mrb[46].mxu0  ;;  %v1983_v9 = vpop.f32.mrb[45].mxu1 }
 0x151   :  { %v1922_v10 = vpop.f32.mrb[47].mxu0  ;;  %v1984_v11 = vadd.f32 %v1983_v9, %v1982_v2  ;;  %v1985_v12 = vpop.f32.mrb[46].mxu1 }
 0x152   :  { %v1291_v55 = vadd.f32 %v1920_v4, %v2716_v5  ;;  %v1923_v13 = vadd.f32 %v1922_v10, %v1921_v8  ;;  %v1986_v14 = vpop.f32.mrb[47].mxu1 }
 0x153   :  { %v1987_v15 = vadd.f32 %v1986_v14, %v1985_v12 }
 0x154   :  { %v1294_v57 = vadd.f32 %v1923_v13, %v2718_v7  ;;  %v2756_v16 = vadd.f32 %v1984_v11, %v1291_v55 }
 0x156   :  { %v1924_v17 = vpop.f32.mrb[48].mxu0  ;;  %v2758_v18 = vadd.f32 %v1987_v15, %v1294_v57 }
 0x157   :  { %v1925_v20 = vpop.f32.mrb[49].mxu0  ;;  %v1988_v22 = vpop.f32.mrb[48].mxu1 }
 0x158   :  { %v1926_v23 = vadd.f32 %v1925_v20, %v1924_v17  ;;  %v1927_v25 = vpop.f32.mrb[50].mxu0  ;;  %v1989_v28 = vpop.f32.mrb[49].mxu1 }
 0x159   :  { %v1928_v30 = vpop.f32.mrb[51].mxu0  ;;  %v1990_v31 = vadd.f32 %v1989_v28, %v1988_v22  ;;  %v1991_v32 = vpop.f32.mrb[50].mxu1 }
 0x15a   :  { %v1299_v5 = vadd.f32 %v1926_v23, %v2720_v19  ;;  %v1929_v33 = vadd.f32 %v1928_v30, %v1927_v25  ;;  %v1992_v34 = vpop.f32.mrb[51].mxu1 }
 0x15b   :  { %v1993_v36 = vadd.f32 %v1992_v34, %v1991_v32 }
 0x15c   :  { %v1302_v7 = vadd.f32 %v1929_v33, %v2722_v21  ;;  %v1396_v38 = vadd.f32 %v1990_v31, %v1299_v5 }
 0x15e   :  { %v1930_v27 = vpop.f32.mrb[52].mxu0  ;;  %v2762_v39 = vadd.f32 %v1993_v36, %v1302_v7 }
 0x15f   :  { %v1931_v40 = vpop.f32.mrb[53].mxu0  ;;  %v1994_v42 = vpop.f32.mrb[52].mxu1 }
 0x160   :  { %v1932_v29 = vadd.f32 %v1931_v40, %v1930_v27  ;;  %v1933_v45 = vpop.f32.mrb[54].mxu0  ;;  %v1995_v47 = vpop.f32.mrb[53].mxu1 }
 0x161   :  { %v1934_v48 = vpop.f32.mrb[55].mxu0  ;;  %v1996_v49 = vadd.f32 %v1995_v47, %v1994_v42  ;;  %v1997_v50 = vpop.f32.mrb[54].mxu1 }
 0x162   :  { %v1307_v52 = vadd.f32 %v1932_v29, %v2724_v35  ;;  %v1935_v19 = vadd.f32 %v1934_v48, %v1933_v45  ;;  %v1998_v54 = vpop.f32.mrb[55].mxu1 }
 0x163   :  { %v1999_v56 = vadd.f32 %v1998_v54, %v1997_v50 }
 0x164   :  { %v1310_v58 = vadd.f32 %v1935_v19, %v2726_v37  ;;  %v1404_v21 = vadd.f32 %v1996_v49, %v1307_v52 }
 0x166   :  { %v1936_v41 = vpop.f32.mrb[56].mxu0  ;;  %v1407_v59 = vadd.f32 %v1999_v56, %v1310_v58 }
 0x167   :  { %v1937_v60 = vpop.f32.mrb[57].mxu0  ;;  %v2000_v61 = vpop.f32.mrb[56].mxu1 }
 0x168   :  { %v1938_v43 = vadd.f32 %v1937_v60, %v1936_v41  ;;  %v1939_v63 = vpop.f32.mrb[58].mxu0  ;;  %v2001_v1 = vpop.f32.mrb[57].mxu1 }
 0x169   :  { %v1940_v2 = vpop.f32.mrb[59].mxu0  ;;  %v2002_v4 = vadd.f32 %v2001_v1, %v2000_v61  ;;  %v2003_v8 = vpop.f32.mrb[58].mxu1 }
 0x16a   :  { %v1315_v9 = vadd.f32 %v1938_v43, %v2728_v51  ;;  %v1941_v10 = vadd.f32 %v1940_v2, %v1939_v63  ;;  %v2004_v35 = vpop.f32.mrb[59].mxu1 }
 0x16b   :  { %v2005_v11 = vadd.f32 %v2004_v35, %v2003_v8 }
 0x16c   :  { %v1318_v12 = vadd.f32 %v1941_v10, %v2730_v53  ;;  %v1412_v55 = vadd.f32 %v2002_v4, %v1315_v9 }
 0x16e   :  { %v1942_v37 = vpop.f32.mrb[60].mxu0  ;;  %v2768_v13 = vadd.f32 %v2005_v11, %v1318_v12 }
 0x16f   :  { %v1943_v14 = vpop.f32.mrb[61].mxu0  ;;  %v2006_v15 = vpop.f32.mrb[60].mxu1 }
 0x170   :  { %v1944_v57 = vadd.f32 %v1943_v14, %v1942_v37  ;;  %v1945_v17 = vpop.f32.mrb[62].mxu0  ;;  %v2007_v20 = vpop.f32.mrb[61].mxu1 }
 0x171   :  { %v1946_v22 = vpop.f32.mrb[63].mxu0  ;;  %v2008_v23 = vadd.f32 %v2007_v20, %v2006_v15  ;;  %v2009_v25 = vpop.f32.mrb[62].mxu1 }
 0x172   :  { %v1323_v28 = vadd.f32 %v1944_v57, %v2732_v3  ;;  %v1947_v51 = vadd.f32 %v1946_v22, %v1945_v17  ;;  %v2010_v30 = vpop.f32.mrb[63].mxu1 }
 0x173   :  { %v2011_v31 = vadd.f32 %v2010_v30, %v2009_v25 }
 0x174   :  { %v1326_v32 = vadd.f32 %v1947_v51, %v2734_v6  ;;  %v1420_v53 = vadd.f32 %v2008_v23, %v1323_v28 }
 0x176   :  { %v2046_v5 = vpop.f32.mrb[64].mxu0  ;;  %v1423_v33 = vadd.f32 %v2011_v31, %v1326_v32 }
 0x177   :  { %v1469_v34 = vadd.f32 %v2046_v5, %v2744_v44  ;;  %v2054_v36 = vpop.f32.mrb[64].mxu1  ;;  %v1460_v7 = vpop.f32.mrb[65].mxu0 }
 0x178   :  { %v2773_v27 = vadd.f32 %v2054_v36, %v1404_v21  ;;  %v1461_v40 = vadd.f32 %v1460_v7, %v2738_v24  ;;  %v1492_v42 = vpop.f32.mrb[65].mxu1  ;;  %v2047_v29 = vpop.f32.mrb[66].mxu0 }
 0x179   :  { %1525 = vst [vmem:[%s2847_s2 + $0x10] sm:$0xff] %v1469_v34  ;;  %v1493_v3 = vadd.f32 %v1492_v42, %v1396_v38  ;;  %v1472_v6 = vadd.f32 %v2047_v29, %v2746_v46  ;;  %v2055_v45 = vpop.f32.mrb[66].mxu1  ;;  %v1463_v47 = vpop.f32.mrb[67].mxu0  ;;  %v1562_v50 = vmul.f32 %v1469_v34, %v1469_v34 }
 0x17a   :  { %1533 = vst [vmem:[%s2847_s2 + $0x50] sm:$0xff] %v2773_v27  ;;  %1523 = vst [vmem:[%s2847_s2] sm:$0xff] %v1461_v40  ;;  %v2787_v24 = vadd.f32 %v2055_v45, %v1407_v59  ;;  %v1464_v44 = vadd.f32 %v1463_v47, %v2740_v26  ;;  %v1495_v48 = vpop.f32.mrb[67].mxu1  ;;  %v1560_v38 = vmul.f32 %v1461_v40, %v1461_v40 }
 0x17b   :  { %1531 = vst [vmem:[%s2847_s2 + $0x40] sm:$0xff] %v1493_v3  ;;  %1526 = vst [vmem:[%s2847_s2 + $0x18] sm:$0xff] %v1472_v6  ;;  %v1496_v46 = vadd.f32 %v1495_v48, %v2762_v39  ;;  %v1563_v54 = vmul.f32 %v1472_v6, %v1472_v6  ;;  %v1568_v20 = vmul.f32 %v1493_v3, %v1493_v3 }
 0x17c   :  { %1534 = vst [vmem:[%s2847_s2 + $0x58] sm:$0xff] %v2787_v24  ;;  %1524 = vst [vmem:[%s2847_s2 + $0x8] sm:$0xff] %v1464_v44  ;;  %v1539_v26 = vadd.f32 %v1464_v44, %v1461_v40  ;;  %v1561_v49 = vmul.f32 %v1464_v44, %v1464_v44  ;;  %v1570_v30 = vmul.f32 %v2773_v27, %v2773_v27 }
 0x17d   :  { %1532 = vst [vmem:[%s2847_s2 + $0x48] sm:$0xff] %v1496_v46  ;;  %v1569_v25 = vmul.f32 %v1496_v46, %v1496_v46 }
 0x17e   :  { %v1540_v52 = vadd.f32 %v1539_v26, %v1469_v34  ;;  %v1576_v19 = vadd.f32 %v1561_v49, %v1560_v38  ;;  %v2050_v39 = vpop.f32.mrb[68].mxu0  ;;  %v1597_v49 = vlaneseq }
 0x17f   :  { %v1485_v56 = vadd.f32 %v2050_v39, %v2756_v16  ;;  %v2058_v58 = vpop.f32.mrb[68].mxu1  ;;  %v1476_v21 = vpop.f32.mrb[69].mxu0 }
 0x180   :  { %v1577_v41 = vadd.f32 %v1576_v19, %v1562_v50  ;;  %v1517_v59 = vadd.f32 %v2058_v58, %v1420_v53  ;;  %v1477_v60 = vadd.f32 %v1476_v21, %v2750_v62  ;;  %v1541_v61 = vadd.f32 %v1540_v52, %v1472_v6  ;;  %v1508_v43 = vpop.f32.mrb[69].mxu1  ;;  %v2051_v63 = vpop.f32.mrb[70].mxu0 }
 0x181   :  { %1529 = vst [vmem:[%s2847_s2 + $0x30] sm:$0xff] %v1485_v56  ;;  %v1509_v1 = vadd.f32 %v1508_v43, %v1412_v55  ;;  %v1488_v2 = vadd.f32 %v2051_v63, %v2758_v18  ;;  %v2059_v4 = vpop.f32.mrb[70].mxu1  ;;  %v1479_v8 = vpop.f32.mrb[71].mxu0  ;;  %v1566_v14 = vmul.f32 %v1485_v56, %v1485_v56  ;;  %v1571_v53 = vmul.f32 %v2787_v24, %v2787_v24 }
 0x182   :  { %1537 = vst [vmem:[%s2847_s2 + $0x70] sm:$0xff] %v1517_v59  ;;  %1527 = vst [vmem:[%s2847_s2 + $0x20] sm:$0xff] %v1477_v60  ;;  %v1542_v62 = vadd.f32 %v1541_v61, %v1477_v60  ;;  %v1564_v16 = vmul.f32 %v1477_v60, %v1477_v60  ;;  %v1578_v9 = vadd.f32 %v1577_v41, %v1563_v54  ;;  %v1511_v10 = vpop.f32.mrb[71].mxu1  ;;  %v1598_v39 = vshrl.u32 %v1597_v49, 7 }
 0x183   :  { %1535 = vst [vmem:[%s2847_s2 + $0x60] sm:$0xff] %v1509_v1  ;;  %1530 = vst [vmem:[%s2847_s2 + $0x38] sm:$0xff] %v1488_v2  ;;  %v1520_v18 = vadd.f32 %v2059_v4, %v1423_v33  ;;  %v1480_v35 = vadd.f32 %v1479_v8, %v2752_v0  ;;  %v1512_v12 = vadd.f32 %v1511_v10, %v2768_v13 }
 0x184   :  { %v1579_v11 = vadd.f32 %v1578_v9, %v1564_v16  ;;  %v1567_v57 = vmul.f32 %v1488_v2, %v1488_v2  ;;  %v1572_v34 = vmul.f32 %v1509_v1, %v1509_v1  ;;  %vm1600_vm0 = vcmp.eq.s32.totalorder %v1598_v39, 1 }
 0x185   :  { %1538 = vst [vmem:[%s2847_s2 + $0x78] sm:$0xff] %v1520_v18  ;;  %1528 = vst [vmem:[%s2847_s2 + $0x28] sm:$0xff] %v1480_v35  ;;  %v1543_v55 = vadd.f32 %v1542_v62, %v1480_v35  ;;  %v1565_v37 = vmul.f32 %v1480_v35, %v1480_v35  ;;  %v1573_v42 = vmul.f32 %v1512_v12, %v1512_v12  ;;  %vm1599_vm1 = vcmp.eq.s32.totalorder %v1598_v39, 0 }
 0x186   :  { %1536 = vst [vmem:[%s2847_s2 + $0x68] sm:$0xff] %v1512_v12  ;;  %v1575_v47 = vmul.f32 %v1520_v18, %v1520_v18 }
 0x187   :  { %v1544_v15 = vadd.f32 %v1543_v55, %v1485_v56  ;;  %v1580_v0 = vadd.f32 %v1579_v11, %v1565_v37 }
 0x189   :  { %v1545_v17 = vadd.f32 %v1544_v15, %v1488_v2  ;;  %v1581_v13 = vadd.f32 %v1580_v0, %v1566_v14 }
 0x18b   :  { %v1546_v22 = vadd.f32 %v1545_v17, %v1493_v3  ;;  %v1582_v23 = vadd.f32 %v1581_v13, %v1567_v57  ;;  %v1574_v3 = vmul.f32 %v1517_v59, %v1517_v59 }
 0x18d   :  { %v1583_v28 = vadd.f32 %v1582_v23, %v1568_v20  ;;  %v1547_v51 = vadd.f32 %v1546_v22, %v1496_v46 }
 0x18f   :  { %v1548_v31 = vadd.f32 %v1547_v51, %v2773_v27  ;;  %v1584_v32 = vadd.f32 %v1583_v28, %v1569_v25 }
 0x191   :  { %v1549_v5 = vadd.f32 %v1548_v31, %v2787_v24  ;;  %v1585_v33 = vadd.f32 %v1584_v32, %v1570_v30 }
 0x193   :  { %v1550_v36 = vadd.f32 %v1549_v5, %v1509_v1  ;;  %v1586_v7 = vadd.f32 %v1585_v33, %v1571_v53 }
 0x195   :  { %v1551_v40 = vadd.f32 %v1550_v36, %v1512_v12  ;;  %v1587_v29 = vadd.f32 %v1586_v7, %v1572_v34 }
 0x197   :  { %v1552_v6 = vadd.f32 %v1551_v40, %v1517_v59  ;;  %v1588_v45 = vadd.f32 %v1587_v29, %v1573_v42 }
 0x199   :  { %v1553_v44 = vadd.f32 %v1552_v6, %v1520_v18  ;;  %v1589_v48 = vadd.f32 %v1588_v45, %v1574_v3 }
 0x19b   :  { %v1554_v27 = vrot.slane %v1553_v44, 4  ;;  %v1590_v46 = vadd.f32 %v1589_v48, %v1575_v47 }
 0x19d   :  { %v1555_v38 = vadd.f32 %v1554_v27, %v1553_v44  ;;  %v1591_v26 = vrot.slane %v1590_v46, 4 }
 0x19f   :  { %v1556_v50 = vrot.slane %v1555_v38, 2  ;;  %v1592_v24 = vadd.f32 %v1591_v26, %v1590_v46 }
 0x1a1   :  { %v1557_v52 = vadd.f32 %v1556_v50, %v1555_v38  ;;  %v1593_v19 = vrot.slane %v1592_v24, 2 }
 0x1a3   :  { %v1594_v54 = vadd.f32 %v1593_v19, %v1592_v24  ;;  %v1558_v56 = vrot.slane %v1557_v52, 1 }
 0x1a5   :  { %v1595_v58 = vrot.slane %v1594_v54, 1  ;;  %v1559_v41 = vadd.f32 %v1558_v56, %v1557_v52 }
 0x1a7   :  { %v1596_v21 = vadd.f32 %v1595_v58, %v1594_v54 }
 0x1a9   :  { %v1601_v59 = vsel %vm1600_vm0, %v1596_v21, 0.0 }
 0x1aa   :  { %v1602_v60 = vsel %vm1599_vm1, %v1559_v41, %v1601_v59 }
 0x1ab   :  { %1603 = vst [vmem:[%s2848_s3] sm:$0xff] %v1602_v60 }

// kernel: resnet_generator_forward.36
= control target key start
LH: loop header
LB: loop body
LE: loop exit
PB: predicated region body
PF: predicated region fallthrough
CT: control target
= control target key end

     0   :  { %s133_s0 = inlined_call_operand.vmem [shape: f32[32,128], index: 0, kind: input, shape index: {}]   ;;  %s134_s1 = inlined_call_operand.vmem [shape: f32[1,128], index: 1, kind: input, shape index: {}]   ;;  %s135_s2 = inlined_call_operand.vmem [shape: f32[1,128], index: 2, kind: input, shape index: {}]   ;;  %s136_s3 = inlined_call_operand.vmem [shape: bf16[32,128], index: 3, kind: output, shape index: {}]  }
   0x1   :  { %v14_v0 = vld [vmem:[%s133_s0] sm:$0xff]  ;;  %v15_v1 = vld [vmem:[%s133_s0 + $0x8] sm:$0xff]  ;;  %v16_v6 = vld [vmem:[%s133_s0 + $0x10] sm:$0xff] }
   0x2   :  { %v68_v2 = vld [vmem:[%s134_s1] ss:$0 sm:$0xff]  ;;  %v17_v7 = vld [vmem:[%s133_s0 + $0x18] sm:$0xff] }
   0x3   :  { %v25_v3 = vmul.f32 %v68_v2, %v14_v0  ;;  %v26_v4 = vmul.f32 %v68_v2, %v15_v1  ;;  %v69_v5 = vld [vmem:[%s135_s2] ss:$0 sm:$0xff]  ;;  %v27_v8 = vmul.f32 %v68_v2, %v16_v6  ;;  %v28_v9 = vmul.f32 %v68_v2, %v17_v7 }
   0x5   :  { %v36_v10 = vadd.f32 %v69_v5, %v25_v3  ;;  %v37_v11 = vadd.f32 %v69_v5, %v26_v4  ;;  %v38_v12 = vadd.f32 %v69_v5, %v27_v8  ;;  %v39_v13 = vadd.f32 %v69_v5, %v28_v9 }
   0x7   :  { %v40_v14 = vmax.f32 %v36_v10, 0.0  ;;  %v41_v15 = vmax.f32 %v37_v11, 0.0  ;;  %v42_v16 = vmax.f32 %v38_v12, 0.0  ;;  %v43_v17 = vmax.f32 %v39_v13, 0.0 }
   0x9   :  { %v81_v18 = vpack.c.bf16 %v41_v15, %v40_v14  ;;  %v86_v19 = vpack.c.bf16 %v43_v17, %v42_v16 }
   0xb   :  { %82 = vst [vmem:[%s136_s3] sm:$0xff] %v81_v18   ;;  %88 = vst [vmem:[%s136_s3 + $0x8] sm:$0xff] %v86_v19  }

// kernel: resnet_generator_forward.35
= control target key start
LH: loop header
LB: loop body
LE: loop exit
PB: predicated region body
PF: predicated region fallthrough
CT: control target
= control target key end

     0   :  { %s1623_s1 = inlined_call_operand.vmem [shape: bf16[1152,128], index: 1, kind: input, shape index: {}]   ;;  %s1624_s0 = inlined_call_operand.vmem [shape: bf16[32,1152], index: 0, kind: input, shape index: {}]   ;;  %s1625_s2 = inlined_call_operand.vmem [shape: f32[32,128], index: 2, kind: output, shape index: {0}]   ;;  %s1626_s3 = inlined_call_operand.vmem [shape: f32[1,8,128], index: 3, kind: output, shape index: {1}]  }
   0x1   :  { %v1220_v0 = vld [vmem:[%s1623_s1 + $0x40] sm:$0xff]   ;;  %v1224_v4 = vld [vmem:[%s1623_s1 + $0x48] sm:$0xff]   ;;  %v1228_v8 = vld [vmem:[%s1623_s1 + $0x50] sm:$0xff]  }
   0x2   :  { %v1221_v1 = vld [vmem:[%s1623_s1 + $0xc0] sm:$0xff]   ;;  %1078 = vmatprep.subr.bf16.mxu0 %v1220_v0  ;;  %v1225_v5 = vld [vmem:[%s1623_s1 + $0xc8] sm:$0xff]   ;;  %v1229_v9 = vld [vmem:[%s1623_s1 + $0xd0] sm:$0xff]  }
   0x3   :  { %v1222_v2 = vld [vmem:[%s1623_s1] sm:$0xff]   ;;  %1106 = vmatprep.subr.bf16.mxu1 %v1221_v1  ;;  %v1226_v6 = vld [vmem:[%s1623_s1 + $0x8] sm:$0xff]   ;;  %v1230_v10 = vld [vmem:[%s1623_s1 + $0x10] sm:$0xff]  }
   0x4   :  { %v1223_v3 = vld [vmem:[%s1623_s1 + $0x80] sm:$0xff]   ;;  %1079 = vmatpush3.bf16.msra.mxu0 %v1222_v2  ;;  %v1227_v7 = vld [vmem:[%s1623_s1 + $0x88] sm:$0xff]   ;;  %v1231_v11 = vld [vmem:[%s1623_s1 + $0x90] sm:$0xff]  }
   0x5   :  { %1107 = vmatpush3.bf16.msra.mxu1 %v1223_v3  ;;  %1080 = vmatprep.subr.bf16.mxu0 %v1224_v4  ;;  %v1232_v12 = vld [vmem:[%s1623_s1 + $0x58] sm:$0xff]   ;;  %v1236_v16 = vld [vmem:[%s1623_s1 + $0x60] sm:$0xff]   ;;  %v1240_v20 = vld [vmem:[%s1623_s1 + $0x68] sm:$0xff]  }
   0x6   :  { %1108 = vmatprep.subr.bf16.mxu1 %v1225_v5  ;;  %v1233_v13 = vld [vmem:[%s1623_s1 + $0xd8] sm:$0xff]   ;;  %v1237_v17 = vld [vmem:[%s1623_s1 + $0xe0] sm:$0xff]   ;;  %v1241_v21 = vld [vmem:[%s1623_s1 + $0xe8] sm:$0xff]  }
   0x7   :  { %v1234_v14 = vld [vmem:[%s1623_s1 + $0x18] sm:$0xff]   ;;  %v1238_v18 = vld [vmem:[%s1623_s1 + $0x20] sm:$0xff]   ;;  %v1242_v22 = vld [vmem:[%s1623_s1 + $0x28] sm:$0xff]  }
   0x8   :  { %1081 = vmatpush3.bf16.msra.mxu0 %v1226_v6  ;;  %v1235_v15 = vld [vmem:[%s1623_s1 + $0x98] sm:$0xff]   ;;  %v1239_v19 = vld [vmem:[%s1623_s1 + $0xa0] sm:$0xff]   ;;  %v1243_v23 = vld [vmem:[%s1623_s1 + $0xa8] sm:$0xff]  }
   0x9   :  { %1109 = vmatpush3.bf16.msra.mxu1 %v1227_v7  ;;  %1082 = vmatprep.subr.bf16.mxu0 %v1228_v8  ;;  %v1244_v24 = vld [vmem:[%s1623_s1 + $0x70] sm:$0xff]   ;;  %v1248_v28 = vld [vmem:[%s1623_s1 + $0x78] sm:$0xff]   ;;  %v1252_v32 = vld [vmem:[%s1624_s0] ss:$36 sps:$4 sm:$0xff]  }
   0xa   :  { %1110 = vmatprep.subr.bf16.mxu1 %v1229_v9  ;;  %v1245_v25 = vld [vmem:[%s1623_s1 + $0xf0] sm:$0xff]   ;;  %v1249_v29 = vld [vmem:[%s1623_s1 + $0xf8] sm:$0xff]   ;;  %v1254_v33 = vld [vmem:[%s1624_s0 + $0x4] ss:$36 sps:$4 sm:$0xff]  }
   0xb   :  { %v1246_v26 = vld [vmem:[%s1623_s1 + $0x30] sm:$0xff]   ;;  %v1250_v30 = vld [vmem:[%s1623_s1 + $0x38] sm:$0xff]   ;;  %v1255_v34 = vld [vmem:[%s1624_s0 + $0x8] ss:$36 sps:$4 sm:$0xff]   ;;  %734 = vmatprep.mubr.bf16.mxu0 %v1254_v33 }
   0xc   :  { %1083 = vmatpush3.bf16.msra.mxu0 %v1230_v10  ;;  %v1247_v27 = vld [vmem:[%s1623_s1 + $0xb0] sm:$0xff]   ;;  %v1251_v31 = vld [vmem:[%s1623_s1 + $0xb8] sm:$0xff]   ;;  %v1258_v36 = vld [vmem:[%s1623_s1 + $0x140] sm:$0xff]  }
   0xd   :  { %1111 = vmatpush3.bf16.msra.mxu1 %v1231_v11  ;;  %1084 = vmatprep.subr.bf16.mxu0 %v1232_v12  ;;  %v1257_v35 = vld [vmem:[%s1624_s0 + $0xc] ss:$36 sps:$4 sm:$0xff]   ;;  %v1259_v37 = vld [vmem:[%s1623_s1 + $0x100] sm:$0xff]   ;;  %v1270_v48 = vld [vmem:[%s1623_s1 + $0x158] sm:$0xff]  }
   0xe   :  { %1112 = vmatprep.subr.bf16.mxu1 %v1233_v13  ;;  %783 = vmatprep.mubr.bf16.mxu1 %v1257_v35  ;;  %v1260_v38 = vld [vmem:[%s1623_s1 + $0x1c0] sm:$0xff]   ;;  %v1262_v40 = vld [vmem:[%s1623_s1 + $0x148] sm:$0xff]   ;;  %v1266_v44 = vld [vmem:[%s1623_s1 + $0x150] sm:$0xff]  }
   0xf   :  { %v1261_v39 = vld [vmem:[%s1623_s1 + $0x180] sm:$0xff]   ;;  %v1263_v41 = vld [vmem:[%s1623_s1 + $0x108] sm:$0xff]   ;;  %v1267_v45 = vld [vmem:[%s1623_s1 + $0x110] sm:$0xff]  }
  0x10   :  { %1085 = vmatpush3.bf16.msra.mxu0 %v1234_v14  ;;  %v1264_v42 = vld [vmem:[%s1623_s1 + $0x1c8] sm:$0xff]   ;;  %v1268_v46 = vld [vmem:[%s1623_s1 + $0x1d0] sm:$0xff]   ;;  %v1271_v49 = vld [vmem:[%s1623_s1 + $0x118] sm:$0xff]  }
  0x11   :  { %1113 = vmatpush3.bf16.msra.mxu1 %v1235_v15  ;;  %1086 = vmatprep.subr.bf16.mxu0 %v1236_v16  ;;  %v1265_v43 = vld [vmem:[%s1623_s1 + $0x188] sm:$0xff]   ;;  %v1269_v47 = vld [vmem:[%s1623_s1 + $0x190] sm:$0xff]   ;;  %v1272_v50 = vld [vmem:[%s1623_s1 + $0x1d8] sm:$0xff]  }
  0x12   :  { %1114 = vmatprep.subr.bf16.mxu1 %v1237_v17  ;;  %v1273_v51 = vld [vmem:[%s1623_s1 + $0x198] sm:$0xff]   ;;  %v1274_v52 = vld [vmem:[%s1623_s1 + $0x160] sm:$0xff]   ;;  %v1278_v56 = vld [vmem:[%s1623_s1 + $0x168] sm:$0xff]  }
  0x13   :  { %v1275_v53 = vld [vmem:[%s1623_s1 + $0x120] sm:$0xff]   ;;  %v1279_v57 = vld [vmem:[%s1624_s0 + $0x4c] ss:$36 sps:$4 sm:$0xff]   ;;  %v1281_v58 = vld [vmem:[%s1624_s0 + $0x54] ss:$36 sps:$4 sm:$0xff]  }
  0x14   :  { %1087 = vmatpush3.bf16.msra.mxu0 %v1238_v18  ;;  %v1276_v54 = vld [vmem:[%s1623_s1 + $0x1e0] sm:$0xff]   ;;  %v1283_v59 = vld [vmem:[%s1623_s1 + $0x128] sm:$0xff]   ;;  %v1285_v61 = vld [vmem:[%s1624_s0 + $0x50] ss:$36 sps:$4 sm:$0xff]  }
  0x15   :  { %1115 = vmatpush3.bf16.msra.mxu1 %v1239_v19  ;;  %1088 = vmatprep.subr.bf16.mxu0 %v1240_v20  ;;  %v1277_v55 = vld [vmem:[%s1623_s1 + $0x1a0] sm:$0xff]   ;;  %v1284_v60 = vld [vmem:[%s1624_s0 + $0x48] ss:$36 sps:$4 sm:$0xff]   ;;  %v1288_v0 = vld [vmem:[%s1623_s1 + $0x170] sm:$0xff]  }
  0x16   :  { %1116 = vmatprep.subr.bf16.mxu1 %v1241_v21  ;;  %v1286_v62 = vld [vmem:[%s1623_s1 + $0x1e8] sm:$0xff]   ;;  %v1289_v1 = vld [vmem:[%s1623_s1 + $0x130] sm:$0xff]   ;;  %v1292_v4 = vld [vmem:[%s1623_s1 + $0x178] sm:$0xff]  }
  0x17   :  { %v1287_v63 = vld [vmem:[%s1623_s1 + $0x1a8] sm:$0xff]   ;;  %v1290_v2 = vld [vmem:[%s1623_s1 + $0x1f0] sm:$0xff]   ;;  %v1293_v5 = vld [vmem:[%s1623_s1 + $0x138] sm:$0xff]  }
  0x18   :  { %1089 = vmatpush3.bf16.msra.mxu0 %v1242_v22  ;;  %v1291_v3 = vld [vmem:[%s1623_s1 + $0x1b0] sm:$0xff]   ;;  %v1294_v6 = vld [vmem:[%s1623_s1 + $0x1f8] sm:$0xff]   ;;  %v1299_v10 = vld [vmem:[%s1623_s1 + $0x200] sm:$0xff]  }
  0x19   :  { %1117 = vmatpush3.bf16.msra.mxu1 %v1243_v23  ;;  %1090 = vmatprep.subr.bf16.mxu0 %v1244_v24  ;;  %v1295_v7 = vld [vmem:[%s1624_s0 + $0x10] ss:$36 sps:$4 sm:$0xff]   ;;  %v1298_v9 = vld [vmem:[%s1623_s1 + $0x1b8] sm:$0xff]   ;;  %v1303_v13 = vld [vmem:[%s1623_s1 + $0x208] sm:$0xff]  }
  0x1a   :  { %1118 = vmatprep.subr.bf16.mxu1 %v1245_v25  ;;  %v1297_v8 = vld [vmem:[%s1624_s0 + $0x14] ss:$36 sps:$4 sm:$0xff]   ;;  %v1302_v12 = vld [vmem:[%s1624_s0 + $0x1c] ss:$36 sps:$4 sm:$0xff]   ;;  %v1308_v17 = vld [vmem:[%s1624_s0 + $0x64] ss:$36 sps:$4 sm:$0xff]  }
  0x1b   :  { %v1300_v11 = vld [vmem:[%s1624_s0 + $0x18] ss:$36 sps:$4 sm:$0xff]   ;;  %v1307_v16 = vld [vmem:[%s1623_s1 + $0x210] sm:$0xff]   ;;  %v1310_v18 = vld [vmem:[%s1624_s0 + $0x60] ss:$36 sps:$4 sm:$0xff]  }
  0x1c   :  { %1091 = vmatpush3.bf16.msra.mxu0 %v1246_v26  ;;  %v1304_v14 = vld [vmem:[%s1624_s0 + $0x5c] ss:$36 sps:$4 sm:$0xff]   ;;  %v1313_v22 = vld [vmem:[%s1623_s1 + $0x228] sm:$0xff]   ;;  %v1314_v23 = vld [vmem:[%s1623_s1 + $0x230] sm:$0xff]  }
  0x1d   :  { %1119 = vmatpush3.bf16.msra.mxu1 %v1247_v27  ;;  %1092 = vmatprep.subr.bf16.mxu0 %v1248_v28  ;;  %v1306_v15 = vld [vmem:[%s1624_s0 + $0x58] ss:$36 sps:$4 sm:$0xff]   ;;  %v1312_v20 = vld [vmem:[%s1623_s1 + $0x220] sm:$0xff]   ;;  %v1317_v25 = vld [vmem:[%s1624_s0 + $0x68] ss:$36 sps:$4 sm:$0xff]  }
  0x1e   :  { %1120 = vmatprep.subr.bf16.mxu1 %v1249_v29  ;;  %v1311_v19 = vld [vmem:[%s1623_s1 + $0x218] sm:$0xff]   ;;  %v1316_v21 = vld [vmem:[%s1624_s0 + $0x20] ss:$36 sps:$4 sm:$0xff]  }
  0x1f   :  { %v1315_v24 = vld [vmem:[%s1623_s1 + $0x238] sm:$0xff]  }
  0x20   :  { %1093 = vmatpush3.bf16.msra.mxu0 %v1250_v30 }
  0x21   :  { %1121 = vmatpush3.bf16.msra.mxu1 %v1251_v31  ;;  %1134 = vmatprep.subr.bf16.mxu0 %v1258_v36 }
  0x22   :  { %1162 = vmatprep.subr.bf16.mxu1 %v1260_v38 }
  0x23   :  { %735 = vmatmul.mubr.bf16.vlgmr.msra.gmra.mrb[0].mxu0 %v1252_v32 }
  0x24   :  { %784 = vmatmul.mubr.bf16.vlgmr.msra.gmra.mrb[0].mxu1 %v1255_v34  ;;  %1135 = vmatpush3.bf16.msra.mxu0 %v1259_v37 }
  0x25   :  { %1163 = vmatpush3.bf16.msra.mxu1 %v1261_v39  ;;  %1136 = vmatprep.subr.bf16.mxu0 %v1262_v40 }
  0x26   :  { %1164 = vmatprep.subr.bf16.mxu1 %v1264_v42  ;;  %742 = vmatprep.mubr.bf16.mxu0 %v1279_v57 }
  0x27   :  { %791 = vmatprep.mubr.bf16.mxu1 %v1281_v58 }
  0x28   :  { %1137 = vmatpush3.bf16.msra.mxu0 %v1263_v41 }
  0x29   :  { %1165 = vmatpush3.bf16.msra.mxu1 %v1265_v43  ;;  %1138 = vmatprep.subr.bf16.mxu0 %v1266_v44 }
  0x2a   :  { %1166 = vmatprep.subr.bf16.mxu1 %v1268_v46 }
  0x2b   :  { %743 = vmatmul.mubr.bf16.gmra.mrb[4].mxu0 %v1284_v60 }
  0x2c   :  { %1139 = vmatpush3.bf16.msra.mxu0 %v1267_v45  ;;  %792 = vmatmul.mubr.bf16.gmra.mrb[4].mxu1 %v1285_v61 }
  0x2d   :  { %1167 = vmatpush3.bf16.msra.mxu1 %v1269_v47  ;;  %1140 = vmatprep.subr.bf16.mxu0 %v1270_v48 }
  0x2e   :  { %1168 = vmatprep.subr.bf16.mxu1 %v1272_v50  ;;  %832 = vmatprep.mubr.bf16.mxu0 %v1297_v8 }
  0x2f   :  { %881 = vmatprep.mubr.bf16.mxu1 %v1302_v12 }
  0x30   :  { %1141 = vmatpush3.bf16.msra.mxu0 %v1271_v49 }
  0x31   :  { %1169 = vmatpush3.bf16.msra.mxu1 %v1273_v51  ;;  %1142 = vmatprep.subr.bf16.mxu0 %v1274_v52 }
  0x32   :  { %1170 = vmatprep.subr.bf16.mxu1 %v1276_v54 }
  0x34   :  { %1143 = vmatpush3.bf16.msra.mxu0 %v1275_v53 }
  0x35   :  { %1171 = vmatpush3.bf16.msra.mxu1 %v1277_v55  ;;  %1144 = vmatprep.subr.bf16.mxu0 %v1278_v56 }
  0x36   :  { %1172 = vmatprep.subr.bf16.mxu1 %v1286_v62 }
  0x38   :  { %1145 = vmatpush3.bf16.msra.mxu0 %v1283_v59 }
  0x39   :  { %1173 = vmatpush3.bf16.msra.mxu1 %v1287_v63  ;;  %1146 = vmatprep.subr.bf16.mxu0 %v1288_v0 }
  0x3a   :  { %1174 = vmatprep.subr.bf16.mxu1 %v1290_v2 }
  0x3c   :  { %1147 = vmatpush3.bf16.msra.mxu0 %v1289_v1 }
  0x3d   :  { %1175 = vmatpush3.bf16.msra.mxu1 %v1291_v3  ;;  %1148 = vmatprep.subr.bf16.mxu0 %v1292_v4 }
  0x3e   :  { %1176 = vmatprep.subr.bf16.mxu1 %v1294_v6 }
  0x40   :  { %1149 = vmatpush3.bf16.msra.mxu0 %v1293_v5 }
  0x41   :  { %1177 = vmatpush3.bf16.msra.mxu1 %v1298_v9  ;;  %1200 = vmatprep.subr.bf16.mxu0 %v1299_v10 }
  0x43   :  { %833 = vmatmul.mubr.bf16.vlgmr.msra.gmra.mrb[8].mxu0 %v1295_v7 }
  0x44   :  { %1201 = vmatpush3.bf16.msra.mxu0 %v1299_v10  ;;  %882 = vmatmul.mubr.bf16.vlgmr.msra.gmra.mrb[8].mxu1 %v1300_v11 }
  0x45   :  { %1202 = vmatprep.subr.bf16.mxu0 %v1303_v13  ;;  %840 = vmatprep.mubr.bf16.mxu0 %v1304_v14 }
  0x46   :  { %889 = vmatprep.mubr.bf16.mxu1 %v1308_v17 }
  0x48   :  { %1203 = vmatpush3.bf16.msra.mxu0 %v1303_v13 }
  0x49   :  { %1204 = vmatprep.subr.bf16.mxu0 %v1307_v16 }
  0x4b   :  { %841 = vmatmul.mubr.bf16.gmra.mrb[12].mxu0 %v1306_v15 }
  0x4c   :  { %1205 = vmatpush3.bf16.msra.mxu0 %v1307_v16  ;;  %890 = vmatmul.mubr.bf16.gmra.mrb[12].mxu1 %v1310_v18 }
  0x4d   :  { %1206 = vmatprep.subr.bf16.mxu0 %v1311_v19  ;;  %1216 = vmatprep.mubr.bf16.mxu0 %v1316_v21 }
  0x50   :  { %1207 = vmatpush3.bf16.msra.mxu0 %v1311_v19 }
  0x51   :  { %1208 = vmatprep.subr.bf16.mxu0 %v1312_v20 }
  0x54   :  { %1209 = vmatpush3.bf16.msra.mxu0 %v1312_v20 }
  0x55   :  { %1210 = vmatprep.subr.bf16.mxu0 %v1313_v22 }
  0x58   :  { %1211 = vmatpush3.bf16.msra.mxu0 %v1313_v22 }
  0x59   :  { %1212 = vmatprep.subr.bf16.mxu0 %v1314_v23 }
  0x5c   :  { %1213 = vmatpush3.bf16.msra.mxu0 %v1314_v23 }
  0x5d   :  { %1214 = vmatprep.subr.bf16.mxu0 %v1315_v24 }
  0x60   :  { %1215 = vmatpush3.bf16.msra.mxu0 %v1315_v24 }
  0x63   :  { %1217 = vmatmul.mubr.bf16.vlgmr.msra.gmra.mrb[16].mxu0 %v1317_v25 }
  0xf6   :  { %v1094_v26 = vpop.f32.mrb[0].mxu0 }
  0xf7   :  { %v1122_v27 = vpop.f32.mrb[0].mxu1  ;;  %v1095_v28 = vpop.f32.mrb[1].mxu0 }
  0xf8   :  { %v1096_v29 = vadd.f32 %v1095_v28, %v1094_v26  ;;  %v1123_v30 = vpop.f32.mrb[1].mxu1  ;;  %v1097_v31 = vpop.f32.mrb[2].mxu0 }
  0xf9   :  { %v1124_v32 = vadd.f32 %v1123_v30, %v1122_v27  ;;  %v1125_v33 = vpop.f32.mrb[2].mxu1  ;;  %v1098_v34 = vpop.f32.mrb[3].mxu0 }
  0xfa   :  { %v1099_v35 = vadd.f32 %v1098_v34, %v1097_v31  ;;  %v1126_v36 = vpop.f32.mrb[3].mxu1 }
  0xfb   :  { %v786_v37 = vadd.f32 %v1124_v32, %v1096_v29  ;;  %v1127_v38 = vadd.f32 %v1126_v36, %v1125_v33 }
  0xfd   :  { %v789_v39 = vadd.f32 %v1127_v38, %v1099_v35 }
  0xfe   :  { %v1100_v40 = vpop.f32.mrb[4].mxu0 }
  0xff   :  { %v1128_v41 = vpop.f32.mrb[4].mxu1  ;;  %v1101_v42 = vpop.f32.mrb[5].mxu0 }
 0x100   :  { %v1129_v43 = vpop.f32.mrb[5].mxu1  ;;  %v1102_v44 = vadd.f32 %v1101_v42, %v1100_v40  ;;  %v1103_v46 = vpop.f32.mrb[6].mxu0 }
 0x101   :  { %v1130_v45 = vadd.f32 %v1129_v43, %v1128_v41  ;;  %v1131_v47 = vpop.f32.mrb[6].mxu1  ;;  %v1104_v48 = vpop.f32.mrb[7].mxu0  ;;  %v973_v43 = vlaneseq }
 0x102   :  { %v1132_v49 = vpop.f32.mrb[7].mxu1  ;;  %v1105_v51 = vadd.f32 %v1104_v48, %v1103_v46 }
 0x103   :  { %v794_v50 = vadd.f32 %v1130_v45, %v1102_v44  ;;  %v1133_v52 = vadd.f32 %v1132_v49, %v1131_v47  ;;  %v974_v48 = vshrl.u32 %v973_v43, 7 }
 0x105   :  { %v797_v53 = vadd.f32 %v1133_v52, %v1105_v51  ;;  %vm976_vm0 = vcmp.eq.s32.totalorder %v974_v48, 1  ;;  %vm975_vm1 = vcmp.eq.s32.totalorder %v974_v48, 0 }
 0x116   :  { %v1150_v54 = vpop.f32.mrb[8].mxu0 }
 0x117   :  { %v1151_v55 = vpop.f32.mrb[9].mxu0  ;;  %v1178_v58 = vpop.f32.mrb[8].mxu1 }
 0x118   :  { %v1152_v56 = vadd.f32 %v1151_v55, %v1150_v54  ;;  %v1153_v57 = vpop.f32.mrb[10].mxu0  ;;  %v1179_v62 = vpop.f32.mrb[9].mxu1 }
 0x119   :  { %v1154_v59 = vpop.f32.mrb[11].mxu0  ;;  %v1180_v63 = vadd.f32 %v1179_v62, %v1178_v58  ;;  %v1181_v0 = vpop.f32.mrb[10].mxu1 }
 0x11a   :  { %v835_v60 = vadd.f32 %v1152_v56, %v786_v37  ;;  %v1155_v61 = vadd.f32 %v1154_v59, %v1153_v57  ;;  %v1182_v2 = vpop.f32.mrb[11].mxu1 }
 0x11b   :  { %v1183_v3 = vadd.f32 %v1182_v2, %v1181_v0 }
 0x11c   :  { %v838_v1 = vadd.f32 %v1155_v61, %v789_v39  ;;  %v884_v4 = vadd.f32 %v1180_v63, %v835_v60 }
 0x11e   :  { %v1156_v5 = vpop.f32.mrb[12].mxu0  ;;  %v887_v7 = vadd.f32 %v1183_v3, %v838_v1 }
 0x11f   :  { %v1157_v6 = vpop.f32.mrb[13].mxu0  ;;  %v1184_v10 = vpop.f32.mrb[12].mxu1 }
 0x120   :  { %v1158_v8 = vadd.f32 %v1157_v6, %v1156_v5  ;;  %v1159_v9 = vpop.f32.mrb[14].mxu0  ;;  %v1185_v14 = vpop.f32.mrb[13].mxu1 }
 0x121   :  { %v1160_v11 = vpop.f32.mrb[15].mxu0  ;;  %v1186_v15 = vadd.f32 %v1185_v14, %v1184_v10  ;;  %v1187_v16 = vpop.f32.mrb[14].mxu1 }
 0x122   :  { %v843_v12 = vadd.f32 %v1158_v8, %v794_v50  ;;  %v1161_v13 = vadd.f32 %v1160_v11, %v1159_v9  ;;  %v1188_v18 = vpop.f32.mrb[15].mxu1 }
 0x123   :  { %v1189_v19 = vadd.f32 %v1188_v18, %v1187_v16 }
 0x124   :  { %v846_v17 = vadd.f32 %v1161_v13, %v797_v53  ;;  %v892_v20 = vadd.f32 %v1186_v15, %v843_v12 }
 0x126   :  { %v895_v21 = vadd.f32 %v1189_v19, %v846_v17 }
 0x136   :  { %v1218_v22 = vpop.f32.mrb[16].mxu0 }
 0x137   :  { %v941_v23 = vadd.f32 %v1218_v22, %v892_v20  ;;  %v932_v24 = vpop.f32.mrb[17].mxu0 }
 0x138   :  { %v933_v25 = vadd.f32 %v932_v24, %v884_v4  ;;  %v1219_v26 = vpop.f32.mrb[18].mxu0 }
 0x139   :  { %949 = vst [vmem:[%s1625_s2 + $0x10] sm:$0xff] %v941_v23  ;;  %v944_v27 = vadd.f32 %v1219_v26, %v895_v21  ;;  %v935_v28 = vpop.f32.mrb[19].mxu0  ;;  %v962_v33 = vmul.f32 %v941_v23, %v941_v23 }
 0x13a   :  { %947 = vst [vmem:[%s1625_s2] sm:$0xff] %v933_v25  ;;  %v936_v29 = vadd.f32 %v935_v28, %v887_v7  ;;  %v960_v30 = vmul.f32 %v933_v25, %v933_v25 }
 0x13b   :  { %950 = vst [vmem:[%s1625_s2 + $0x18] sm:$0xff] %v944_v27  ;;  %v963_v36 = vmul.f32 %v944_v27, %v944_v27 }
 0x13c   :  { %948 = vst [vmem:[%s1625_s2 + $0x8] sm:$0xff] %v936_v29  ;;  %v951_v31 = vadd.f32 %v936_v29, %v933_v25  ;;  %v961_v32 = vmul.f32 %v936_v29, %v936_v29 }
 0x13e   :  { %v952_v34 = vadd.f32 %v951_v31, %v941_v23  ;;  %v964_v35 = vadd.f32 %v961_v32, %v960_v30 }
 0x140   :  { %v953_v37 = vadd.f32 %v952_v34, %v944_v27  ;;  %v965_v38 = vadd.f32 %v964_v35, %v962_v33 }
 0x142   :  { %v954_v39 = vrot.slane %v953_v37, 4  ;;  %v966_v40 = vadd.f32 %v965_v38, %v963_v36 }
 0x144   :  { %v955_v41 = vadd.f32 %v954_v39, %v953_v37  ;;  %v967_v42 = vrot.slane %v966_v40, 4 }
 0x146   :  { %v956_v44 = vrot.slane %v955_v41, 2  ;;  %v968_v45 = vadd.f32 %v967_v42, %v966_v40 }
 0x148   :  { %v957_v46 = vadd.f32 %v956_v44, %v955_v41  ;;  %v969_v47 = vrot.slane %v968_v45, 2 }
 0x14a   :  { %v970_v49 = vadd.f32 %v969_v47, %v968_v45  ;;  %v958_v50 = vrot.slane %v957_v46, 1 }
 0x14c   :  { %v971_v51 = vrot.slane %v970_v49, 1  ;;  %v959_v53 = vadd.f32 %v958_v50, %v957_v46 }
 0x14e   :  { %v972_v52 = vadd.f32 %v971_v51, %v970_v49 }
 0x150   :  { %v977_v54 = vsel %vm976_vm0, %v972_v52, 0.0 }
 0x151   :  { %v978_v55 = vsel %vm975_vm1, %v959_v53, %v977_v54 }
 0x152   :  { %979 = vst [vmem:[%s1626_s3] sm:$0xff] %v978_v55 }

// kernel: resnet_generator_forward.40
= control target key start
LH: loop header
LB: loop body
LE: loop exit
PB: predicated region body
PF: predicated region fallthrough
CT: control target
= control target key end

     0   :  { %s164_s0 = inlined_call_operand.vmem [shape: f32[32,128], index: 0, kind: input, shape index: {}]   ;;  %s165_s1 = inlined_call_operand.vmem [shape: f32[1,128], index: 1, kind: input, shape index: {}]   ;;  %s166_s2 = inlined_call_operand.vmem [shape: f32[1,128], index: 2, kind: input, shape index: {}]   ;;  %s167_s3 = inlined_call_operand.vmem [shape: bf16[32,128], index: 3, kind: input, shape index: {}]   ;;  %s168_s4 = inlined_call_operand.vmem [shape: bf16[32,128], index: 4, kind: output, shape index: {}]  }
   0x1   :  { %v17_v0 = vld [vmem:[%s164_s0] sm:$0xff]  ;;  %v18_v1 = vld [vmem:[%s164_s0 + $0x8] sm:$0xff]  ;;  %v19_v7 = vld [vmem:[%s164_s0 + $0x10] sm:$0xff] }
   0x2   :  { %v79_v2 = vld [vmem:[%s165_s1] ss:$0 sm:$0xff]  ;;  %v20_v10 = vld [vmem:[%s164_s0 + $0x18] sm:$0xff]  ;;  %v107_v12 = vld [vmem:[%s167_s3 + $0x8] sm:$0xff]  }
   0x3   :  { %v28_v3 = vmul.f32 %v79_v2, %v17_v0  ;;  %v29_v4 = vmul.f32 %v79_v2, %v18_v1  ;;  %v80_v5 = vld [vmem:[%s166_s2] ss:$0 sm:$0xff]  ;;  %v30_v11 = vmul.f32 %v79_v2, %v19_v7  ;;  %v31_v15 = vmul.f32 %v79_v2, %v20_v10 }
   0x4   :  { %v90_v6 = vld [vmem:[%s167_s3] sm:$0xff]   ;;  %v95_v16 = vunpack.c.l.bf16 %v107_v12  ;;  %v96_v18 = vunpack.c.h.bf16 %v107_v12 }
   0x5   :  { %v91_v8 = vunpack.c.l.bf16 %v90_v6  ;;  %v92_v9 = vunpack.c.h.bf16 %v90_v6  ;;  %v39_v13 = vadd.f32 %v80_v5, %v28_v3  ;;  %v40_v14 = vadd.f32 %v80_v5, %v29_v4 }
   0x6   :  { %v41_v17 = vadd.f32 %v80_v5, %v30_v11  ;;  %v42_v21 = vadd.f32 %v80_v5, %v31_v15 }
   0x7   :  { %v51_v19 = vadd.f32 %v91_v8, %v39_v13  ;;  %v52_v20 = vadd.f32 %v92_v9, %v40_v14 }
   0x8   :  { %v53_v22 = vadd.f32 %v95_v16, %v41_v17  ;;  %v54_v24 = vadd.f32 %v96_v18, %v42_v21 }
   0x9   :  { %v100_v23 = vpack.c.bf16 %v52_v20, %v51_v19 }
   0xa   :  { %v105_v25 = vpack.c.bf16 %v54_v24, %v53_v22 }
   0xb   :  { %101 = vst [vmem:[%s168_s4] sm:$0xff] %v100_v23  }
   0xc   :  { %108 = vst [vmem:[%s168_s4 + $0x8] sm:$0xff] %v105_v25  }

// kernel: resnet_generator_forward.46
= control target key start
LH: loop header
LB: loop body
LE: loop exit
PB: predicated region body
PF: predicated region fallthrough
CT: control target
= control target key end

     0   :  { %v241_v45 = vlaneseq  ;;  %s437_s1 = inlined_call_operand.vmem [shape: bf16[256,128], index: 1, kind: input, shape index: {}]   ;;  %s438_s0 = inlined_call_operand.vmem [shape: bf16[32,256], index: 0, kind: input, shape index: {}]   ;;  %s439_s2 = inlined_call_operand.vmem [shape: f32[32,128], index: 2, kind: output, shape index: {0}]   ;;  %s440_s3 = inlined_call_operand.vmem [shape: f32[1,8,128], index: 3, kind: output, shape index: {1}]  }
   0x1   :  { %v320_v0 = vld [vmem:[%s437_s1 + $0x40] sm:$0xff]   ;;  %v322_v2 = vld [vmem:[%s437_s1 + $0x48] sm:$0xff]   ;;  %v324_v4 = vld [vmem:[%s437_s1 + $0x50] sm:$0xff]  }
   0x2   :  { %v321_v1 = vld [vmem:[%s437_s1] sm:$0xff]   ;;  %276 = vmatprep.subr.bf16.mxu0 %v320_v0  ;;  %304 = vmatprep.subr.bf16.mxu1 %v320_v0  ;;  %v323_v3 = vld [vmem:[%s437_s1 + $0x8] sm:$0xff]   ;;  %v325_v5 = vld [vmem:[%s437_s1 + $0x10] sm:$0xff]   ;;  %v242_v50 = vshrl.u32 %v241_v45, 7 }
   0x3   :  { %277 = vmatpush3.bf16.msra.mxu0 %v321_v1  ;;  %312 = vmatpush3.bf16.msra.mxu1 %v321_v1  ;;  %v326_v6 = vld [vmem:[%s437_s1 + $0x58] sm:$0xff]   ;;  %v328_v8 = vld [vmem:[%s437_s1 + $0x60] sm:$0xff]   ;;  %v330_v10 = vld [vmem:[%s437_s1 + $0x68] sm:$0xff]  }
   0x4   :  { %278 = vmatprep.subr.bf16.mxu0 %v322_v2  ;;  %305 = vmatprep.subr.bf16.mxu1 %v322_v2  ;;  %v327_v7 = vld [vmem:[%s437_s1 + $0x18] sm:$0xff]   ;;  %v329_v9 = vld [vmem:[%s437_s1 + $0x20] sm:$0xff]   ;;  %v331_v13 = vld [vmem:[%s437_s1 + $0x28] sm:$0xff]   ;;  %vm244_vm0 = vcmp.eq.s32.totalorder %v242_v50, 1  ;;  %vm243_vm1 = vcmp.eq.s32.totalorder %v242_v50, 0 }
   0x5   :  { %v338_v11 = vld [vmem:[%s438_s0 + $0x4] ss:$8 sps:$4 sm:$0xff]   ;;  %v341_v12 = vld [vmem:[%s438_s0 + $0x14] ss:$8 sps:$4 sm:$0xff]   ;;  %v336_v18 = vld [vmem:[%s438_s0] ss:$8 sps:$4 sm:$0xff]  }
   0x6   :  { %v332_v14 = vld [vmem:[%s437_s1 + $0x70] sm:$0xff]   ;;  %198 = vmatprep.mubr.bf16.mxu0 %v338_v11  ;;  %206 = vmatprep.mubr.bf16.mxu1 %v341_v12  ;;  %v334_v16 = vld [vmem:[%s437_s1 + $0x78] sm:$0xff]  }
   0x7   :  { %279 = vmatpush3.bf16.msra.mxu0 %v323_v3  ;;  %313 = vmatpush3.bf16.msra.mxu1 %v323_v3  ;;  %v333_v15 = vld [vmem:[%s437_s1 + $0x30] sm:$0xff]   ;;  %v335_v17 = vld [vmem:[%s437_s1 + $0x38] sm:$0xff]  }
   0x8   :  { %280 = vmatprep.subr.bf16.mxu0 %v324_v4  ;;  %306 = vmatprep.subr.bf16.mxu1 %v324_v4  ;;  %v339_v19 = vld [vmem:[%s438_s0 + $0x10] ss:$8 sps:$4 sm:$0xff]  }
   0xb   :  { %281 = vmatpush3.bf16.msra.mxu0 %v325_v5  ;;  %314 = vmatpush3.bf16.msra.mxu1 %v325_v5 }
   0xc   :  { %282 = vmatprep.subr.bf16.mxu0 %v326_v6  ;;  %307 = vmatprep.subr.bf16.mxu1 %v326_v6 }
   0xf   :  { %283 = vmatpush3.bf16.msra.mxu0 %v327_v7  ;;  %315 = vmatpush3.bf16.msra.mxu1 %v327_v7 }
  0x10   :  { %284 = vmatprep.subr.bf16.mxu0 %v328_v8  ;;  %308 = vmatprep.subr.bf16.mxu1 %v328_v8 }
  0x13   :  { %285 = vmatpush3.bf16.msra.mxu0 %v329_v9  ;;  %316 = vmatpush3.bf16.msra.mxu1 %v329_v9 }
  0x14   :  { %286 = vmatprep.subr.bf16.mxu0 %v330_v10  ;;  %309 = vmatprep.subr.bf16.mxu1 %v330_v10 }
  0x17   :  { %287 = vmatpush3.bf16.msra.mxu0 %v331_v13  ;;  %317 = vmatpush3.bf16.msra.mxu1 %v331_v13 }
  0x18   :  { %288 = vmatprep.subr.bf16.mxu0 %v332_v14  ;;  %310 = vmatprep.subr.bf16.mxu1 %v332_v14 }
  0x1b   :  { %289 = vmatpush3.bf16.msra.mxu0 %v333_v15  ;;  %318 = vmatpush3.bf16.msra.mxu1 %v333_v15 }
  0x1c   :  { %290 = vmatprep.subr.bf16.mxu0 %v334_v16  ;;  %311 = vmatprep.subr.bf16.mxu1 %v334_v16 }
  0x1f   :  { %291 = vmatpush3.bf16.msra.mxu0 %v335_v17  ;;  %319 = vmatpush3.bf16.msra.mxu1 %v335_v17 }
  0x22   :  { %199 = vmatmul.mubr.bf16.vlgmr.msra.gmra.mrb[0].mxu0 %v336_v18  ;;  %207 = vmatmul.mubr.bf16.vlgmr.msra.gmra.mrb[0].mxu1 %v339_v19 }
  0xf5   :  { %v292_v20 = vpop.f32.mrb[0].mxu0  ;;  %v298_v21 = vpop.f32.mrb[0].mxu1 }
  0xf6   :  { %v293_v22 = vpop.f32.mrb[1].mxu0  ;;  %v299_v23 = vpop.f32.mrb[1].mxu1 }
  0xf7   :  { %v294_v24 = vadd.f32 %v293_v22, %v292_v20  ;;  %v295_v25 = vpop.f32.mrb[2].mxu0  ;;  %v300_v26 = vadd.f32 %v299_v23, %v298_v21  ;;  %v301_v27 = vpop.f32.mrb[2].mxu1 }
  0xf8   :  { %v296_v28 = vpop.f32.mrb[3].mxu0  ;;  %v302_v29 = vpop.f32.mrb[3].mxu1 }
  0xf9   :  { %215 = vst [vmem:[%s439_s2] sm:$0xff] %v294_v24  ;;  %217 = vst [vmem:[%s439_s2 + $0x10] sm:$0xff] %v300_v26  ;;  %v297_v30 = vadd.f32 %v296_v28, %v295_v25  ;;  %v303_v31 = vadd.f32 %v302_v29, %v301_v27  ;;  %v228_v32 = vmul.f32 %v294_v24, %v294_v24 }
  0xfa   :  { %v230_v33 = vmul.f32 %v300_v26, %v300_v26 }
  0xfb   :  { %216 = vst [vmem:[%s439_s2 + $0x8] sm:$0xff] %v297_v30  ;;  %v219_v34 = vadd.f32 %v297_v30, %v294_v24  ;;  %v229_v35 = vmul.f32 %v297_v30, %v297_v30  ;;  %218 = vst [vmem:[%s439_s2 + $0x18] sm:$0xff] %v303_v31  ;;  %v231_v39 = vmul.f32 %v303_v31, %v303_v31 }
  0xfd   :  { %v232_v36 = vadd.f32 %v229_v35, %v228_v32  ;;  %v220_v37 = vadd.f32 %v300_v26, %v219_v34 }
  0xff   :  { %v221_v38 = vadd.f32 %v303_v31, %v220_v37  ;;  %v233_v40 = vadd.f32 %v232_v36, %v230_v33 }
 0x101   :  { %v222_v41 = vrot.slane %v221_v38, 4  ;;  %v234_v42 = vadd.f32 %v233_v40, %v231_v39 }
 0x103   :  { %v223_v43 = vadd.f32 %v222_v41, %v221_v38  ;;  %v235_v44 = vrot.slane %v234_v42, 4 }
 0x105   :  { %v224_v46 = vrot.slane %v223_v43, 2  ;;  %v236_v47 = vadd.f32 %v235_v44, %v234_v42 }
 0x107   :  { %v225_v48 = vadd.f32 %v224_v46, %v223_v43  ;;  %v237_v49 = vrot.slane %v236_v47, 2 }
 0x109   :  { %v238_v51 = vadd.f32 %v237_v49, %v236_v47  ;;  %v226_v52 = vrot.slane %v225_v48, 1 }
 0x10b   :  { %v239_v53 = vrot.slane %v238_v51, 1  ;;  %v227_v55 = vadd.f32 %v226_v52, %v225_v48 }
 0x10d   :  { %v240_v54 = vadd.f32 %v239_v53, %v238_v51 }
 0x10f   :  { %v245_v56 = vsel %vm244_vm0, %v240_v54, 0.0 }
 0x110   :  { %v246_v57 = vsel %vm243_vm1, %v227_v55, %v245_v56 }
 0x111   :  { %247 = vst [vmem:[%s440_s3] sm:$0xff] %v246_v57 }

// kernel: resnet_generator_forward.48
= control target key start
LH: loop header
LB: loop body
LE: loop exit
PB: predicated region body
PF: predicated region fallthrough
CT: control target
= control target key end

     0   :  { %s752_s1 = inlined_call_operand.vmem [shape: bf16[512,128], index: 1, kind: input, shape index: {}]   ;;  %s753_s0 = inlined_call_operand.vmem [shape: bf16[32,512], index: 0, kind: input, shape index: {}]   ;;  %s754_s2 = inlined_call_operand.vmem [shape: f32[32,128], index: 2, kind: output, shape index: {0}]   ;;  %s755_s3 = inlined_call_operand.vmem [shape: f32[1,8,128], index: 3, kind: output, shape index: {1}]  }
   0x1   :  { %v553_v0 = vld [vmem:[%s752_s1 + $0x40] sm:$0xff]   ;;  %v557_v4 = vld [vmem:[%s752_s1 + $0x48] sm:$0xff]   ;;  %v561_v8 = vld [vmem:[%s752_s1 + $0x50] sm:$0xff]  }
   0x2   :  { %v554_v1 = vld [vmem:[%s752_s1 + $0xc0] sm:$0xff]   ;;  %497 = vmatprep.subr.bf16.mxu0 %v553_v0  ;;  %v558_v5 = vld [vmem:[%s752_s1 + $0xc8] sm:$0xff]   ;;  %v562_v9 = vld [vmem:[%s752_s1 + $0xd0] sm:$0xff]  }
   0x3   :  { %v555_v2 = vld [vmem:[%s752_s1] sm:$0xff]   ;;  %525 = vmatprep.subr.bf16.mxu1 %v554_v1  ;;  %v559_v6 = vld [vmem:[%s752_s1 + $0x8] sm:$0xff]   ;;  %v563_v10 = vld [vmem:[%s752_s1 + $0x10] sm:$0xff]  }
   0x4   :  { %v556_v3 = vld [vmem:[%s752_s1 + $0x80] sm:$0xff]   ;;  %498 = vmatpush3.bf16.msra.mxu0 %v555_v2  ;;  %v560_v7 = vld [vmem:[%s752_s1 + $0x88] sm:$0xff]   ;;  %v564_v11 = vld [vmem:[%s752_s1 + $0x90] sm:$0xff]  }
   0x5   :  { %526 = vmatpush3.bf16.msra.mxu1 %v556_v3  ;;  %499 = vmatprep.subr.bf16.mxu0 %v557_v4  ;;  %v565_v12 = vld [vmem:[%s752_s1 + $0x58] sm:$0xff]   ;;  %v569_v16 = vld [vmem:[%s752_s1 + $0x60] sm:$0xff]   ;;  %v573_v20 = vld [vmem:[%s752_s1 + $0x68] sm:$0xff]  }
   0x6   :  { %527 = vmatprep.subr.bf16.mxu1 %v558_v5  ;;  %v566_v13 = vld [vmem:[%s752_s1 + $0xd8] sm:$0xff]   ;;  %v570_v17 = vld [vmem:[%s752_s1 + $0xe0] sm:$0xff]   ;;  %v574_v21 = vld [vmem:[%s752_s1 + $0xe8] sm:$0xff]  }
   0x7   :  { %v567_v14 = vld [vmem:[%s752_s1 + $0x18] sm:$0xff]   ;;  %v571_v18 = vld [vmem:[%s752_s1 + $0x20] sm:$0xff]   ;;  %v575_v22 = vld [vmem:[%s752_s1 + $0x28] sm:$0xff]  }
   0x8   :  { %500 = vmatpush3.bf16.msra.mxu0 %v559_v6  ;;  %v568_v15 = vld [vmem:[%s752_s1 + $0x98] sm:$0xff]   ;;  %v572_v19 = vld [vmem:[%s752_s1 + $0xa0] sm:$0xff]   ;;  %v576_v23 = vld [vmem:[%s752_s1 + $0xa8] sm:$0xff]  }
   0x9   :  { %528 = vmatpush3.bf16.msra.mxu1 %v560_v7  ;;  %501 = vmatprep.subr.bf16.mxu0 %v561_v8  ;;  %v577_v24 = vld [vmem:[%s752_s1 + $0x70] sm:$0xff]   ;;  %v581_v28 = vld [vmem:[%s752_s1 + $0x78] sm:$0xff]  }
   0xa   :  { %529 = vmatprep.subr.bf16.mxu1 %v562_v9  ;;  %v578_v25 = vld [vmem:[%s752_s1 + $0xf0] sm:$0xff]   ;;  %v582_v29 = vld [vmem:[%s752_s1 + $0xf8] sm:$0xff]  }
   0xb   :  { %v579_v26 = vld [vmem:[%s752_s1 + $0x30] sm:$0xff]   ;;  %v583_v30 = vld [vmem:[%s752_s1 + $0x38] sm:$0xff]  }
   0xc   :  { %502 = vmatpush3.bf16.msra.mxu0 %v563_v10  ;;  %v580_v27 = vld [vmem:[%s752_s1 + $0xb0] sm:$0xff]   ;;  %v584_v31 = vld [vmem:[%s752_s1 + $0xb8] sm:$0xff]  }
   0xd   :  { %530 = vmatpush3.bf16.msra.mxu1 %v564_v11  ;;  %503 = vmatprep.subr.bf16.mxu0 %v565_v12  ;;  %v585_v32 = vld [vmem:[%s753_s0] ss:$16 sps:$4 sm:$0xff]   ;;  %v587_v33 = vld [vmem:[%s753_s0 + $0x4] ss:$16 sps:$4 sm:$0xff]   ;;  %v588_v34 = vld [vmem:[%s753_s0 + $0x8] ss:$16 sps:$4 sm:$0xff]  }
   0xe   :  { %531 = vmatprep.subr.bf16.mxu1 %v566_v13  ;;  %v590_v35 = vld [vmem:[%s753_s0 + $0xc] ss:$16 sps:$4 sm:$0xff]   ;;  %350 = vmatprep.mubr.bf16.mxu0 %v587_v33  ;;  %v591_v36 = vld [vmem:[%s753_s0 + $0x24] ss:$16 sps:$4 sm:$0xff]   ;;  %v595_v38 = vld [vmem:[%s753_s0 + $0x20] ss:$16 sps:$4 sm:$0xff]  }
   0xf   :  { %399 = vmatprep.mubr.bf16.mxu1 %v590_v35  ;;  %v593_v37 = vld [vmem:[%s753_s0 + $0x2c] ss:$16 sps:$4 sm:$0xff]   ;;  %v596_v39 = vld [vmem:[%s753_s0 + $0x28] ss:$16 sps:$4 sm:$0xff]  }
  0x10   :  { %504 = vmatpush3.bf16.msra.mxu0 %v567_v14 }
  0x11   :  { %532 = vmatpush3.bf16.msra.mxu1 %v568_v15  ;;  %505 = vmatprep.subr.bf16.mxu0 %v569_v16 }
  0x12   :  { %533 = vmatprep.subr.bf16.mxu1 %v570_v17  ;;  %v442_v17 = vlaneseq }
  0x14   :  { %506 = vmatpush3.bf16.msra.mxu0 %v571_v18 }
  0x15   :  { %534 = vmatpush3.bf16.msra.mxu1 %v572_v19  ;;  %507 = vmatprep.subr.bf16.mxu0 %v573_v20 }
  0x16   :  { %535 = vmatprep.subr.bf16.mxu1 %v574_v21 }
  0x18   :  { %508 = vmatpush3.bf16.msra.mxu0 %v575_v22  ;;  %v443_v22 = vshrl.u32 %v442_v17, 7 }
  0x19   :  { %536 = vmatpush3.bf16.msra.mxu1 %v576_v23  ;;  %509 = vmatprep.subr.bf16.mxu0 %v577_v24 }
  0x1a   :  { %537 = vmatprep.subr.bf16.mxu1 %v578_v25  ;;  %vm445_vm0 = vcmp.eq.s32.totalorder %v443_v22, 1  ;;  %vm444_vm1 = vcmp.eq.s32.totalorder %v443_v22, 0 }
  0x1c   :  { %510 = vmatpush3.bf16.msra.mxu0 %v579_v26 }
  0x1d   :  { %538 = vmatpush3.bf16.msra.mxu1 %v580_v27  ;;  %511 = vmatprep.subr.bf16.mxu0 %v581_v28 }
  0x1e   :  { %539 = vmatprep.subr.bf16.mxu1 %v582_v29 }
  0x20   :  { %512 = vmatpush3.bf16.msra.mxu0 %v583_v30 }
  0x21   :  { %540 = vmatpush3.bf16.msra.mxu1 %v584_v31 }
  0x23   :  { %351 = vmatmul.mubr.bf16.vlgmr.msra.gmra.mrb[0].mxu0 %v585_v32 }
  0x24   :  { %400 = vmatmul.mubr.bf16.vlgmr.msra.gmra.mrb[0].mxu1 %v588_v34  ;;  %358 = vmatprep.mubr.bf16.mxu0 %v591_v36 }
  0x25   :  { %407 = vmatprep.mubr.bf16.mxu1 %v593_v37 }
  0x2b   :  { %359 = vmatmul.mubr.bf16.gmra.mrb[4].mxu0 %v595_v38 }
  0x2c   :  { %408 = vmatmul.mubr.bf16.gmra.mrb[4].mxu1 %v596_v39 }
  0xf6   :  { %v513_v40 = vpop.f32.mrb[0].mxu0 }
  0xf7   :  { %v541_v41 = vpop.f32.mrb[0].mxu1  ;;  %v514_v42 = vpop.f32.mrb[1].mxu0 }
  0xf8   :  { %v515_v43 = vadd.f32 %v514_v42, %v513_v40  ;;  %v542_v44 = vpop.f32.mrb[1].mxu1  ;;  %v516_v45 = vpop.f32.mrb[2].mxu0 }
  0xf9   :  { %v543_v46 = vadd.f32 %v542_v44, %v541_v41  ;;  %v544_v47 = vpop.f32.mrb[2].mxu1  ;;  %v517_v48 = vpop.f32.mrb[3].mxu0 }
  0xfa   :  { %v518_v49 = vadd.f32 %v517_v48, %v516_v45  ;;  %v545_v50 = vpop.f32.mrb[3].mxu1 }
  0xfb   :  { %v402_v51 = vadd.f32 %v543_v46, %v515_v43  ;;  %v546_v52 = vadd.f32 %v545_v50, %v544_v47 }
  0xfd   :  { %416 = vst [vmem:[%s754_s2] sm:$0xff] %v402_v51  ;;  %v405_v53 = vadd.f32 %v546_v52, %v518_v49  ;;  %v429_v55 = vmul.f32 %v402_v51, %v402_v51 }
  0xfe   :  { %v519_v54 = vpop.f32.mrb[4].mxu0 }
  0xff   :  { %417 = vst [vmem:[%s754_s2 + $0x8] sm:$0xff] %v405_v53  ;;  %v420_v56 = vadd.f32 %v405_v53, %v402_v51  ;;  %v430_v57 = vmul.f32 %v405_v53, %v405_v53  ;;  %v547_v58 = vpop.f32.mrb[4].mxu1  ;;  %v520_v59 = vpop.f32.mrb[5].mxu0 }
 0x100   :  { %v521_v60 = vadd.f32 %v520_v59, %v519_v54  ;;  %v548_v61 = vpop.f32.mrb[5].mxu1  ;;  %v522_v62 = vpop.f32.mrb[6].mxu0 }
 0x101   :  { %v433_v63 = vadd.f32 %v430_v57, %v429_v55  ;;  %v549_v0 = vadd.f32 %v548_v61, %v547_v58  ;;  %v550_v1 = vpop.f32.mrb[6].mxu1  ;;  %v523_v2 = vpop.f32.mrb[7].mxu0 }
 0x102   :  { %v524_v3 = vadd.f32 %v523_v2, %v522_v62  ;;  %v551_v4 = vpop.f32.mrb[7].mxu1 }
 0x103   :  { %v410_v5 = vadd.f32 %v549_v0, %v521_v60  ;;  %v552_v6 = vadd.f32 %v551_v4, %v550_v1 }
 0x105   :  { %418 = vst [vmem:[%s754_s2 + $0x10] sm:$0xff] %v410_v5  ;;  %v421_v7 = vadd.f32 %v420_v56, %v410_v5  ;;  %v431_v8 = vmul.f32 %v410_v5, %v410_v5  ;;  %v413_v9 = vadd.f32 %v552_v6, %v524_v3 }
 0x107   :  { %v434_v10 = vadd.f32 %v433_v63, %v431_v8  ;;  %419 = vst [vmem:[%s754_s2 + $0x18] sm:$0xff] %v413_v9  ;;  %v422_v11 = vadd.f32 %v421_v7, %v413_v9  ;;  %v432_v12 = vmul.f32 %v413_v9, %v413_v9 }
 0x109   :  { %v423_v13 = vrot.slane %v422_v11, 4  ;;  %v435_v14 = vadd.f32 %v434_v10, %v432_v12 }
 0x10b   :  { %v424_v15 = vadd.f32 %v423_v13, %v422_v11  ;;  %v436_v16 = vrot.slane %v435_v14, 4 }
 0x10d   :  { %v425_v18 = vrot.slane %v424_v15, 2  ;;  %v437_v19 = vadd.f32 %v436_v16, %v435_v14 }
 0x10f   :  { %v426_v20 = vadd.f32 %v425_v18, %v424_v15  ;;  %v438_v21 = vrot.slane %v437_v19, 2 }
 0x111   :  { %v439_v23 = vadd.f32 %v438_v21, %v437_v19  ;;  %v427_v24 = vrot.slane %v426_v20, 1 }
 0x113   :  { %v440_v25 = vrot.slane %v439_v23, 1  ;;  %v428_v27 = vadd.f32 %v427_v24, %v426_v20 }
 0x115   :  { %v441_v26 = vadd.f32 %v440_v25, %v439_v23 }
 0x117   :  { %v446_v28 = vsel %vm445_vm0, %v441_v26, 0.0 }
 0x118   :  { %v447_v29 = vsel %vm444_vm1, %v428_v27, %v446_v28 }
 0x119   :  { %448 = vst [vmem:[%s755_s3] sm:$0xff] %v447_v29 }

// kernel: resnet_generator_forward.45
= control target key start
LH: loop header
LB: loop body
LE: loop exit
PB: predicated region body
PF: predicated region fallthrough
CT: control target
= control target key end

     0   :  { %v169_v27 = vlaneseq  ;;  %s299_s1 = inlined_call_operand.vmem [shape: bf16[128,128], index: 1, kind: input, shape index: {}]   ;;  %s300_s0 = inlined_call_operand.vmem [shape: bf16[32,128], index: 0, kind: input, shape index: {}]   ;;  %s301_s2 = inlined_call_operand.vmem [shape: f32[32,128], index: 2, kind: output, shape index: {0}]   ;;  %s302_s3 = inlined_call_operand.vmem [shape: f32[1,8,128], index: 3, kind: output, shape index: {1}]  }
   0x1   :  { %v224_v0 = vld [vmem:[%s299_s1] sm:$0xff]   ;;  %v225_v1 = vld [vmem:[%s299_s1 + $0x8] sm:$0xff]   ;;  %v226_v2 = vld [vmem:[%s299_s1 + $0x10] sm:$0xff]  }
   0x2   :  { %204 = vmatprep.subr.bf16.mxu0 %v224_v0  ;;  %v227_v3 = vld [vmem:[%s299_s1 + $0x18] sm:$0xff]   ;;  %v232_v4 = vld [vmem:[%s300_s0] sm:$0xff]   ;;  %v229_v6 = vld [vmem:[%s299_s1 + $0x28] sm:$0xff]   ;;  %v170_v32 = vshrl.u32 %v169_v27, 7 }
   0x3   :  { %205 = vmatpush3.bf16.msra.mxu0 %v224_v0  ;;  %220 = vmatprep.mubr.bf16.mxu0 %v232_v4  ;;  %v228_v5 = vld [vmem:[%s299_s1 + $0x20] sm:$0xff]   ;;  %v230_v7 = vld [vmem:[%s299_s1 + $0x30] sm:$0xff]   ;;  %v231_v8 = vld [vmem:[%s299_s1 + $0x38] sm:$0xff]  }
   0x4   :  { %206 = vmatprep.subr.bf16.mxu0 %v225_v1  ;;  %v233_v9 = vld [vmem:[%s300_s0 + $0x8] sm:$0xff]   ;;  %vm172_vm0 = vcmp.eq.s32.totalorder %v170_v32, 1  ;;  %vm171_vm1 = vcmp.eq.s32.totalorder %v170_v32, 0 }
   0x7   :  { %207 = vmatpush3.bf16.msra.mxu0 %v225_v1 }
   0x8   :  { %208 = vmatprep.subr.bf16.mxu0 %v226_v2 }
   0xb   :  { %209 = vmatpush3.bf16.msra.mxu0 %v226_v2 }
   0xc   :  { %210 = vmatprep.subr.bf16.mxu0 %v227_v3 }
   0xf   :  { %211 = vmatpush3.bf16.msra.mxu0 %v227_v3 }
  0x10   :  { %212 = vmatprep.subr.bf16.mxu0 %v228_v5 }
  0x13   :  { %213 = vmatpush3.bf16.msra.mxu0 %v228_v5 }
  0x14   :  { %214 = vmatprep.subr.bf16.mxu0 %v229_v6 }
  0x17   :  { %215 = vmatpush3.bf16.msra.mxu0 %v229_v6 }
  0x18   :  { %216 = vmatprep.subr.bf16.mxu0 %v230_v7 }
  0x1b   :  { %217 = vmatpush3.bf16.msra.mxu0 %v230_v7 }
  0x1c   :  { %218 = vmatprep.subr.bf16.mxu0 %v231_v8 }
  0x1f   :  { %219 = vmatpush3.bf16.msra.mxu0 %v231_v8 }
  0x22   :  { %221 = vmatmul.mubr.bf16.vlgmr.msra.gmra.mrb[0].mxu0 %v233_v9 }
  0xf5   :  { %v222_v10 = vpop.f32.mrb[0].mxu0 }
  0xf6   :  { %145 = vst [vmem:[%s301_s2 + $0x10] sm:$0xff] %v222_v10  ;;  %v128_v11 = vpop.f32.mrb[1].mxu0  ;;  %v158_v17 = vmul.f32 %v222_v10, %v222_v10 }
  0xf7   :  { %143 = vst [vmem:[%s301_s2] sm:$0xff] %v128_v11  ;;  %v223_v12 = vpop.f32.mrb[2].mxu0  ;;  %v156_v14 = vmul.f32 %v128_v11, %v128_v11 }
  0xf8   :  { %146 = vst [vmem:[%s301_s2 + $0x18] sm:$0xff] %v223_v12  ;;  %v131_v13 = vpop.f32.mrb[3].mxu0  ;;  %v159_v20 = vmul.f32 %v223_v12, %v223_v12 }
  0xf9   :  { %144 = vst [vmem:[%s301_s2 + $0x8] sm:$0xff] %v131_v13  ;;  %v147_v15 = vadd.f32 %v131_v13, %v128_v11  ;;  %v157_v16 = vmul.f32 %v131_v13, %v131_v13 }
  0xfb   :  { %v148_v18 = vadd.f32 %v222_v10, %v147_v15  ;;  %v160_v19 = vadd.f32 %v157_v16, %v156_v14 }
  0xfd   :  { %v149_v21 = vadd.f32 %v223_v12, %v148_v18  ;;  %v161_v22 = vadd.f32 %v160_v19, %v158_v17 }
  0xff   :  { %v150_v23 = vrot.slane %v149_v21, 4  ;;  %v162_v24 = vadd.f32 %v161_v22, %v159_v20 }
 0x101   :  { %v151_v25 = vadd.f32 %v150_v23, %v149_v21  ;;  %v163_v26 = vrot.slane %v162_v24, 4 }
 0x103   :  { %v152_v28 = vrot.slane %v151_v25, 2  ;;  %v164_v29 = vadd.f32 %v163_v26, %v162_v24 }
 0x105   :  { %v153_v30 = vadd.f32 %v152_v28, %v151_v25  ;;  %v165_v31 = vrot.slane %v164_v29, 2 }
 0x107   :  { %v166_v33 = vadd.f32 %v165_v31, %v164_v29  ;;  %v154_v34 = vrot.slane %v153_v30, 1 }
 0x109   :  { %v167_v35 = vrot.slane %v166_v33, 1  ;;  %v155_v37 = vadd.f32 %v154_v34, %v153_v30 }
 0x10b   :  { %v168_v36 = vadd.f32 %v167_v35, %v166_v33 }
 0x10d   :  { %v173_v38 = vsel %vm172_vm0, %v168_v36, 0.0 }
 0x10e   :  { %v174_v39 = vsel %vm171_vm1, %v155_v37, %v173_v38 }
 0x10f   :  { %175 = vst [vmem:[%s302_s3] sm:$0xff] %v174_v39 }

// kernel: resnet_generator_forward.54
= control target key start
LH: loop header
LB: loop body
LE: loop exit
PB: predicated region body
PF: predicated region fallthrough
CT: control target
= control target key end

     0   :  { %s761_s1 = inlined_call_operand.vmem [shape: bf16[256,128], index: 1, kind: input, shape index: {}]   ;;  %s762_s0 = inlined_call_operand.vmem [shape: bf16[128,256], index: 0, kind: input, shape index: {}]   ;;  %s763_s2 = inlined_call_operand.vmem [shape: f32[128,128], index: 2, kind: output, shape index: {0}]   ;;  %s764_s3 = inlined_call_operand.vmem [shape: f32[1,8,128], index: 3, kind: output, shape index: {1}]  }
   0x1   :  { %v536_v0 = vld [vmem:[%s761_s1 + $0x40] sm:$0xff]   ;;  %v538_v2 = vld [vmem:[%s761_s1 + $0x48] sm:$0xff]   ;;  %v540_v4 = vld [vmem:[%s761_s1 + $0x50] sm:$0xff]  }
   0x2   :  { %v537_v1 = vld [vmem:[%s761_s1] sm:$0xff]   ;;  %456 = vmatprep.subr.bf16.mxu0 %v536_v0  ;;  %520 = vmatprep.subr.bf16.mxu1 %v536_v0  ;;  %v539_v3 = vld [vmem:[%s761_s1 + $0x8] sm:$0xff]   ;;  %v541_v5 = vld [vmem:[%s761_s1 + $0x10] sm:$0xff]  }
   0x3   :  { %457 = vmatpush3.bf16.msra.mxu0 %v537_v1  ;;  %528 = vmatpush3.bf16.msra.mxu1 %v537_v1  ;;  %v542_v6 = vld [vmem:[%s761_s1 + $0x58] sm:$0xff]   ;;  %v544_v8 = vld [vmem:[%s761_s1 + $0x60] sm:$0xff]   ;;  %v546_v10 = vld [vmem:[%s761_s1 + $0x68] sm:$0xff]  }
   0x4   :  { %458 = vmatprep.subr.bf16.mxu0 %v538_v2  ;;  %521 = vmatprep.subr.bf16.mxu1 %v538_v2  ;;  %v543_v7 = vld [vmem:[%s761_s1 + $0x18] sm:$0xff]   ;;  %v545_v9 = vld [vmem:[%s761_s1 + $0x20] sm:$0xff]   ;;  %v547_v12 = vld [vmem:[%s761_s1 + $0x28] sm:$0xff]  }
   0x5   :  { %v554_v11 = vld [vmem:[%s762_s0 + $0x4] ss:$8 sps:$4 sm:$0xff]   ;;  %v548_v14 = vld [vmem:[%s761_s1 + $0x70] sm:$0xff]   ;;  %v550_v16 = vld [vmem:[%s761_s1 + $0x78] sm:$0xff]  }
   0x6   :  { %v560_v13 = vld [vmem:[%s762_s0 + $0x44] ss:$8 sps:$4 sm:$0xff]   ;;  %270 = vmatprep.mubr.bf16.mxu0 %v554_v11  ;;  %v549_v15 = vld [vmem:[%s761_s1 + $0x30] sm:$0xff]   ;;  %v551_v17 = vld [vmem:[%s761_s1 + $0x38] sm:$0xff]  }
   0x7   :  { %459 = vmatpush3.bf16.msra.mxu0 %v539_v3  ;;  %529 = vmatpush3.bf16.msra.mxu1 %v539_v3  ;;  %v552_v18 = vld [vmem:[%s762_s0] ss:$8 sps:$4 sm:$0xff]   ;;  %v555_v20 = vld [vmem:[%s762_s0 + $0x14] ss:$8 sps:$4 sm:$0xff]   ;;  %v557_v22 = vld [vmem:[%s762_s0 + $0x10] ss:$8 sps:$4 sm:$0xff]  }
   0x8   :  { %460 = vmatprep.subr.bf16.mxu0 %v540_v4  ;;  %522 = vmatprep.subr.bf16.mxu1 %v540_v4  ;;  %v558_v19 = vld [vmem:[%s762_s0 + $0x40] ss:$8 sps:$4 sm:$0xff]   ;;  %v564_v21 = vld [vmem:[%s762_s0 + $0x54] ss:$8 sps:$4 sm:$0xff]   ;;  %v566_v23 = vld [vmem:[%s762_s0 + $0x50] ss:$8 sps:$4 sm:$0xff]  }
   0x9   :  { %302 = vmatprep.mubr.bf16.mxu1 %v560_v13  ;;  %v561_v24 = vld [vmem:[%s762_s0 + $0x24] ss:$8 sps:$4 sm:$0xff]   ;;  %v563_v26 = vld [vmem:[%s762_s0 + $0x20] ss:$8 sps:$4 sm:$0xff]   ;;  %v567_v28 = vld [vmem:[%s762_s0 + $0x34] ss:$8 sps:$4 sm:$0xff]  }
   0xa   :  { %v570_v25 = vld [vmem:[%s762_s0 + $0x64] ss:$8 sps:$4 sm:$0xff]   ;;  %v572_v27 = vld [vmem:[%s762_s0 + $0x60] ss:$8 sps:$4 sm:$0xff]   ;;  %v573_v29 = vld [vmem:[%s762_s0 + $0x74] ss:$8 sps:$4 sm:$0xff]  }
   0xb   :  { %461 = vmatpush3.bf16.msra.mxu0 %v541_v5  ;;  %530 = vmatpush3.bf16.msra.mxu1 %v541_v5  ;;  %v569_v30 = vld [vmem:[%s762_s0 + $0x30] ss:$8 sps:$4 sm:$0xff]  }
   0xc   :  { %462 = vmatprep.subr.bf16.mxu0 %v542_v6  ;;  %523 = vmatprep.subr.bf16.mxu1 %v542_v6  ;;  %v575_v31 = vld [vmem:[%s762_s0 + $0x70] ss:$8 sps:$4 sm:$0xff]  }
   0xf   :  { %463 = vmatpush3.bf16.msra.mxu0 %v543_v7  ;;  %531 = vmatpush3.bf16.msra.mxu1 %v543_v7 }
  0x10   :  { %464 = vmatprep.subr.bf16.mxu0 %v544_v8  ;;  %524 = vmatprep.subr.bf16.mxu1 %v544_v8 }
  0x13   :  { %465 = vmatpush3.bf16.msra.mxu0 %v545_v9  ;;  %532 = vmatpush3.bf16.msra.mxu1 %v545_v9 }
  0x14   :  { %466 = vmatprep.subr.bf16.mxu0 %v546_v10  ;;  %525 = vmatprep.subr.bf16.mxu1 %v546_v10 }
  0x17   :  { %467 = vmatpush3.bf16.msra.mxu0 %v547_v12  ;;  %533 = vmatpush3.bf16.msra.mxu1 %v547_v12 }
  0x18   :  { %468 = vmatprep.subr.bf16.mxu0 %v548_v14  ;;  %526 = vmatprep.subr.bf16.mxu1 %v548_v14 }
  0x1b   :  { %469 = vmatpush3.bf16.msra.mxu0 %v549_v15  ;;  %534 = vmatpush3.bf16.msra.mxu1 %v549_v15 }
  0x1c   :  { %470 = vmatprep.subr.bf16.mxu0 %v550_v16  ;;  %527 = vmatprep.subr.bf16.mxu1 %v550_v16 }
  0x1f   :  { %471 = vmatpush3.bf16.msra.mxu0 %v551_v17  ;;  %535 = vmatpush3.bf16.msra.mxu1 %v551_v17 }
  0x22   :  { %271 = vmatmul.mubr.bf16.vlgmr.msra.gmra.mrb[0].mxu0 %v552_v18  ;;  %303 = vmatmul.mubr.bf16.vlgmr.msra.gmra.mrb[0].mxu1 %v558_v19 }
  0x23   :  { %278 = vmatprep.mubr.bf16.mxu0 %v555_v20  ;;  %310 = vmatprep.mubr.bf16.mxu1 %v564_v21 }
  0x2a   :  { %279 = vmatmul.mubr.bf16.gmra.mrb[4].mxu0 %v557_v22  ;;  %311 = vmatmul.mubr.bf16.gmra.mrb[4].mxu1 %v566_v23 }
  0x2b   :  { %286 = vmatprep.mubr.bf16.mxu0 %v561_v24  ;;  %318 = vmatprep.mubr.bf16.mxu1 %v570_v25 }
  0x32   :  { %287 = vmatmul.mubr.bf16.gmra.mrb[8].mxu0 %v563_v26  ;;  %319 = vmatmul.mubr.bf16.gmra.mrb[8].mxu1 %v572_v27 }
  0x33   :  { %294 = vmatprep.mubr.bf16.mxu0 %v567_v28  ;;  %326 = vmatprep.mubr.bf16.mxu1 %v573_v29 }
  0x3a   :  { %295 = vmatmul.mubr.bf16.gmra.mrb[12].mxu0 %v569_v30  ;;  %327 = vmatmul.mubr.bf16.gmra.mrb[12].mxu1 %v575_v31 }
  0xf5   :  { %v472_v32 = vpop.f32.mrb[0].mxu0  ;;  %v496_v33 = vpop.f32.mrb[0].mxu1 }
  0xf6   :  { %v473_v34 = vpop.f32.mrb[1].mxu0  ;;  %v497_v35 = vpop.f32.mrb[1].mxu1 }
  0xf7   :  { %v474_v36 = vadd.f32 %v473_v34, %v472_v32  ;;  %v475_v37 = vpop.f32.mrb[2].mxu0  ;;  %v692_v38 = vadd.f32 %v497_v35, %v496_v33  ;;  %v499_v39 = vpop.f32.mrb[2].mxu1 }
  0xf8   :  { %v476_v40 = vpop.f32.mrb[3].mxu0  ;;  %v500_v41 = vpop.f32.mrb[3].mxu1 }
  0xf9   :  { %335 = vst [vmem:[%s763_s2] sm:$0xff] %v474_v36  ;;  %v477_v42 = vadd.f32 %v476_v40, %v475_v37  ;;  %343 = vst [vmem:[%s763_s2 + $0x40] sm:$0xff] %v692_v38  ;;  %v701_v43 = vadd.f32 %v500_v41, %v499_v39  ;;  %v372_v44 = vmul.f32 %v474_v36, %v474_v36 }
  0xfa   :  { %v380_v37 = vmul.f32 %v692_v38, %v692_v38 }
  0xfb   :  { %336 = vst [vmem:[%s763_s2 + $0x8] sm:$0xff] %v477_v42  ;;  %v351_v45 = vadd.f32 %v477_v42, %v474_v36  ;;  %v373_v46 = vmul.f32 %v477_v42, %v477_v42  ;;  %344 = vst [vmem:[%s763_s2 + $0x48] sm:$0xff] %v701_v43  ;;  %v381_v41 = vmul.f32 %v701_v43, %v701_v43 }
  0xfd   :  { %v388_v47 = vadd.f32 %v373_v46, %v372_v44  ;;  %v478_v48 = vpop.f32.mrb[4].mxu0  ;;  %v502_v49 = vpop.f32.mrb[4].mxu1 }
  0xfe   :  { %v479_v50 = vpop.f32.mrb[5].mxu0  ;;  %v503_v51 = vpop.f32.mrb[5].mxu1 }
  0xff   :  { %v480_v52 = vadd.f32 %v479_v50, %v478_v48  ;;  %v481_v53 = vpop.f32.mrb[6].mxu0  ;;  %v710_v54 = vadd.f32 %v503_v51, %v502_v49  ;;  %v505_v55 = vpop.f32.mrb[6].mxu1 }
 0x100   :  { %v482_v56 = vpop.f32.mrb[7].mxu0  ;;  %v506_v57 = vpop.f32.mrb[7].mxu1 }
 0x101   :  { %337 = vst [vmem:[%s763_s2 + $0x10] sm:$0xff] %v480_v52  ;;  %v352_v58 = vadd.f32 %v480_v52, %v351_v45  ;;  %v374_v59 = vmul.f32 %v480_v52, %v480_v52  ;;  %v483_v60 = vadd.f32 %v482_v56, %v481_v53  ;;  %345 = vst [vmem:[%s763_s2 + $0x50] sm:$0xff] %v710_v54 }
 0x102   :  { %v507_v61 = vadd.f32 %v506_v57, %v505_v55  ;;  %v382_v45 = vmul.f32 %v710_v54, %v710_v54 }
 0x103   :  { %v389_v62 = vadd.f32 %v388_v47, %v374_v59  ;;  %338 = vst [vmem:[%s763_s2 + $0x18] sm:$0xff] %v483_v60  ;;  %v353_v63 = vadd.f32 %v483_v60, %v352_v58  ;;  %v375_v0 = vmul.f32 %v483_v60, %v483_v60 }
 0x104   :  { %346 = vst [vmem:[%s763_s2 + $0x58] sm:$0xff] %v507_v61  ;;  %v383_v48 = vmul.f32 %v507_v61, %v507_v61 }
 0x105   :  { %v390_v1 = vadd.f32 %v389_v62, %v375_v0  ;;  %v484_v2 = vpop.f32.mrb[8].mxu0  ;;  %v508_v3 = vpop.f32.mrb[8].mxu1 }
 0x106   :  { %v485_v4 = vpop.f32.mrb[9].mxu0  ;;  %v509_v5 = vpop.f32.mrb[9].mxu1 }
 0x107   :  { %v486_v6 = vadd.f32 %v485_v4, %v484_v2  ;;  %v487_v7 = vpop.f32.mrb[10].mxu0  ;;  %v510_v8 = vadd.f32 %v509_v5, %v508_v3  ;;  %v511_v9 = vpop.f32.mrb[10].mxu1 }
 0x108   :  { %v488_v10 = vpop.f32.mrb[11].mxu0  ;;  %v512_v11 = vpop.f32.mrb[11].mxu1 }
 0x109   :  { %339 = vst [vmem:[%s763_s2 + $0x20] sm:$0xff] %v486_v6  ;;  %v354_v12 = vadd.f32 %v486_v6, %v353_v63  ;;  %v376_v13 = vmul.f32 %v486_v6, %v486_v6  ;;  %v489_v14 = vadd.f32 %v488_v10, %v487_v7  ;;  %347 = vst [vmem:[%s763_s2 + $0x60] sm:$0xff] %v510_v8 }
 0x10a   :  { %v513_v15 = vadd.f32 %v512_v11, %v511_v9  ;;  %v384_v52 = vmul.f32 %v510_v8, %v510_v8 }
 0x10b   :  { %v391_v16 = vadd.f32 %v390_v1, %v376_v13  ;;  %340 = vst [vmem:[%s763_s2 + $0x28] sm:$0xff] %v489_v14  ;;  %v355_v17 = vadd.f32 %v489_v14, %v354_v12  ;;  %v377_v18 = vmul.f32 %v489_v14, %v489_v14 }
 0x10c   :  { %348 = vst [vmem:[%s763_s2 + $0x68] sm:$0xff] %v513_v15  ;;  %v385_v56 = vmul.f32 %v513_v15, %v513_v15 }
 0x10d   :  { %v392_v19 = vadd.f32 %v391_v16, %v377_v18  ;;  %v490_v20 = vpop.f32.mrb[12].mxu0  ;;  %v514_v21 = vpop.f32.mrb[12].mxu1 }
 0x10e   :  { %v491_v22 = vpop.f32.mrb[13].mxu0  ;;  %v515_v23 = vpop.f32.mrb[13].mxu1 }
 0x10f   :  { %v492_v24 = vadd.f32 %v491_v22, %v490_v20  ;;  %v493_v25 = vpop.f32.mrb[14].mxu0  ;;  %v516_v26 = vadd.f32 %v515_v23, %v514_v21  ;;  %v517_v27 = vpop.f32.mrb[14].mxu1 }
 0x110   :  { %v494_v28 = vpop.f32.mrb[15].mxu0  ;;  %v518_v29 = vpop.f32.mrb[15].mxu1 }
 0x111   :  { %341 = vst [vmem:[%s763_s2 + $0x30] sm:$0xff] %v492_v24  ;;  %v356_v30 = vadd.f32 %v492_v24, %v355_v17  ;;  %v378_v31 = vmul.f32 %v492_v24, %v492_v24  ;;  %v495_v32 = vadd.f32 %v494_v28, %v493_v25  ;;  %349 = vst [vmem:[%s763_s2 + $0x70] sm:$0xff] %v516_v26 }
 0x112   :  { %v519_v33 = vadd.f32 %v518_v29, %v517_v27  ;;  %v386_v57 = vmul.f32 %v516_v26, %v516_v26 }
 0x113   :  { %v393_v34 = vadd.f32 %v392_v19, %v378_v31  ;;  %342 = vst [vmem:[%s763_s2 + $0x38] sm:$0xff] %v495_v32  ;;  %v357_v35 = vadd.f32 %v495_v32, %v356_v30  ;;  %v379_v36 = vmul.f32 %v495_v32, %v495_v32 }
 0x114   :  { %350 = vst [vmem:[%s763_s2 + $0x78] sm:$0xff] %v519_v33  ;;  %v387_v62 = vmul.f32 %v519_v33, %v519_v33 }
 0x115   :  { %v358_v39 = vadd.f32 %v692_v38, %v357_v35  ;;  %v394_v40 = vadd.f32 %v393_v34, %v379_v36 }
 0x117   :  { %v359_v42 = vadd.f32 %v701_v43, %v358_v39  ;;  %v395_v44 = vadd.f32 %v394_v40, %v380_v37 }
 0x119   :  { %v396_v46 = vadd.f32 %v395_v44, %v381_v41  ;;  %v360_v47 = vadd.f32 %v710_v54, %v359_v42  ;;  %v409_v54 = vlaneseq }
 0x11b   :  { %v361_v49 = vadd.f32 %v507_v61, %v360_v47  ;;  %v397_v50 = vadd.f32 %v396_v46, %v382_v45  ;;  %v410_v6 = vshrl.u32 %v409_v54, 7 }
 0x11d   :  { %v362_v51 = vadd.f32 %v510_v8, %v361_v49  ;;  %v398_v53 = vadd.f32 %v397_v50, %v383_v48  ;;  %vm412_vm0 = vcmp.eq.s32.totalorder %v410_v6, 1  ;;  %vm411_vm1 = vcmp.eq.s32.totalorder %v410_v6, 0 }
 0x11f   :  { %v399_v38 = vadd.f32 %v398_v53, %v384_v52  ;;  %v363_v55 = vadd.f32 %v513_v15, %v362_v51 }
 0x121   :  { %v400_v58 = vadd.f32 %v399_v38, %v385_v56  ;;  %v364_v59 = vadd.f32 %v516_v26, %v363_v55 }
 0x123   :  { %v401_v43 = vadd.f32 %v400_v58, %v386_v57  ;;  %v365_v60 = vadd.f32 %v519_v33, %v364_v59 }
 0x125   :  { %v366_v63 = vrot.slane %v365_v60, 4  ;;  %v402_v0 = vadd.f32 %v401_v43, %v387_v62 }
 0x127   :  { %v367_v1 = vadd.f32 %v366_v63, %v365_v60  ;;  %v403_v2 = vrot.slane %v402_v0, 4 }
 0x129   :  { %v368_v3 = vrot.slane %v367_v1, 2  ;;  %v404_v61 = vadd.f32 %v403_v2, %v402_v0 }
 0x12b   :  { %v369_v4 = vadd.f32 %v368_v3, %v367_v1  ;;  %v405_v5 = vrot.slane %v404_v61, 2 }
 0x12d   :  { %v406_v7 = vadd.f32 %v405_v5, %v404_v61  ;;  %v370_v8 = vrot.slane %v369_v4, 1 }
 0x12f   :  { %v407_v9 = vrot.slane %v406_v7, 1  ;;  %v371_v11 = vadd.f32 %v370_v8, %v369_v4 }
 0x131   :  { %v408_v10 = vadd.f32 %v407_v9, %v406_v7 }
 0x133   :  { %v413_v12 = vsel %vm412_vm0, %v408_v10, 0.0 }
 0x134   :  { %v414_v13 = vsel %vm411_vm1, %v371_v11, %v413_v12 }
 0x135   :  { %415 = vst [vmem:[%s764_s3] sm:$0xff] %v414_v13 }

// kernel: resnet_generator_forward.53
= control target key start
LH: loop header
LB: loop body
LE: loop exit
PB: predicated region body
PF: predicated region fallthrough
CT: control target
= control target key end

     0   :  { %s543_s1 = inlined_call_operand.vmem [shape: bf16[128,128], index: 1, kind: input, shape index: {}]   ;;  %s544_s0 = inlined_call_operand.vmem [shape: bf16[128,128], index: 0, kind: input, shape index: {}]   ;;  %s545_s2 = inlined_call_operand.vmem [shape: f32[128,128], index: 2, kind: output, shape index: {0}]   ;;  %s546_s3 = inlined_call_operand.vmem [shape: f32[1,8,128], index: 3, kind: output, shape index: {1}]  }
   0x1   :  { %v408_v0 = vld [vmem:[%s543_s1] sm:$0xff]   ;;  %v409_v1 = vld [vmem:[%s543_s1 + $0x8] sm:$0xff]   ;;  %v410_v2 = vld [vmem:[%s543_s1 + $0x10] sm:$0xff]  }
   0x2   :  { %360 = vmatprep.subr.bf16.mxu0 %v408_v0  ;;  %392 = vmatprep.subr.bf16.mxu1 %v408_v0  ;;  %v411_v3 = vld [vmem:[%s543_s1 + $0x18] sm:$0xff]   ;;  %v416_v4 = vld [vmem:[%s544_s0] sm:$0xff]   ;;  %v413_v7 = vld [vmem:[%s543_s1 + $0x28] sm:$0xff]  }
   0x3   :  { %361 = vmatpush3.bf16.msra.mxu0 %v408_v0  ;;  %400 = vmatpush3.bf16.msra.mxu1 %v408_v0  ;;  %v412_v5 = vld [vmem:[%s543_s1 + $0x20] sm:$0xff]   ;;  %v414_v8 = vld [vmem:[%s543_s1 + $0x30] sm:$0xff]   ;;  %v415_v9 = vld [vmem:[%s543_s1 + $0x38] sm:$0xff]  }
   0x4   :  { %362 = vmatprep.subr.bf16.mxu0 %v409_v1  ;;  %393 = vmatprep.subr.bf16.mxu1 %v409_v1  ;;  %v420_v6 = vld [vmem:[%s544_s0 + $0x20] sm:$0xff]   ;;  %v417_v10 = vld [vmem:[%s544_s0 + $0x8] sm:$0xff]   ;;  %v418_v12 = vld [vmem:[%s544_s0 + $0x10] sm:$0xff]  }
   0x5   :  { %376 = vmatprep.mubr.bf16.mxu0 %v416_v4  ;;  %384 = vmatprep.mubr.bf16.mxu1 %v420_v6  ;;  %v421_v11 = vld [vmem:[%s544_s0 + $0x28] sm:$0xff]   ;;  %v422_v13 = vld [vmem:[%s544_s0 + $0x30] sm:$0xff]   ;;  %v419_v14 = vld [vmem:[%s544_s0 + $0x18] sm:$0xff]  }
   0x6   :  { %v423_v15 = vld [vmem:[%s544_s0 + $0x38] sm:$0xff]  }
   0x7   :  { %363 = vmatpush3.bf16.msra.mxu0 %v409_v1  ;;  %401 = vmatpush3.bf16.msra.mxu1 %v409_v1 }
   0x8   :  { %364 = vmatprep.subr.bf16.mxu0 %v410_v2  ;;  %394 = vmatprep.subr.bf16.mxu1 %v410_v2 }
   0xb   :  { %365 = vmatpush3.bf16.msra.mxu0 %v410_v2  ;;  %402 = vmatpush3.bf16.msra.mxu1 %v410_v2 }
   0xc   :  { %366 = vmatprep.subr.bf16.mxu0 %v411_v3  ;;  %395 = vmatprep.subr.bf16.mxu1 %v411_v3 }
   0xf   :  { %367 = vmatpush3.bf16.msra.mxu0 %v411_v3  ;;  %403 = vmatpush3.bf16.msra.mxu1 %v411_v3 }
  0x10   :  { %368 = vmatprep.subr.bf16.mxu0 %v412_v5  ;;  %396 = vmatprep.subr.bf16.mxu1 %v412_v5 }
  0x13   :  { %369 = vmatpush3.bf16.msra.mxu0 %v412_v5  ;;  %404 = vmatpush3.bf16.msra.mxu1 %v412_v5 }
  0x14   :  { %370 = vmatprep.subr.bf16.mxu0 %v413_v7  ;;  %397 = vmatprep.subr.bf16.mxu1 %v413_v7 }
  0x17   :  { %371 = vmatpush3.bf16.msra.mxu0 %v413_v7  ;;  %405 = vmatpush3.bf16.msra.mxu1 %v413_v7 }
  0x18   :  { %372 = vmatprep.subr.bf16.mxu0 %v414_v8  ;;  %398 = vmatprep.subr.bf16.mxu1 %v414_v8 }
  0x1b   :  { %373 = vmatpush3.bf16.msra.mxu0 %v414_v8  ;;  %406 = vmatpush3.bf16.msra.mxu1 %v414_v8 }
  0x1c   :  { %374 = vmatprep.subr.bf16.mxu0 %v415_v9  ;;  %399 = vmatprep.subr.bf16.mxu1 %v415_v9 }
  0x1f   :  { %375 = vmatpush3.bf16.msra.mxu0 %v415_v9  ;;  %407 = vmatpush3.bf16.msra.mxu1 %v415_v9 }
  0x22   :  { %377 = vmatmul.mubr.bf16.vlgmr.msra.gmra.mrb[0].mxu0 %v417_v10  ;;  %385 = vmatmul.mubr.bf16.vlgmr.msra.gmra.mrb[0].mxu1 %v421_v11 }
  0x23   :  { %380 = vmatprep.mubr.bf16.mxu0 %v418_v12  ;;  %388 = vmatprep.mubr.bf16.mxu1 %v422_v13 }
  0x2a   :  { %381 = vmatmul.mubr.bf16.gmra.mrb[4].mxu0 %v419_v14  ;;  %389 = vmatmul.mubr.bf16.gmra.mrb[4].mxu1 %v423_v15 }
  0xf5   :  { %v378_v16 = vpop.f32.mrb[0].mxu0  ;;  %v386_v17 = vpop.f32.mrb[0].mxu1 }
  0xf6   :  { %241 = vst [vmem:[%s545_s2 + $0x10] sm:$0xff] %v378_v16  ;;  %v176_v18 = vpop.f32.mrb[1].mxu0  ;;  %249 = vst [vmem:[%s545_s2 + $0x50] sm:$0xff] %v386_v17  ;;  %v208_v19 = vpop.f32.mrb[1].mxu1  ;;  %v278_v27 = vmul.f32 %v378_v16, %v378_v16  ;;  %v286_v59 = vmul.f32 %v386_v17, %v386_v17 }
  0xf7   :  { %239 = vst [vmem:[%s545_s2] sm:$0xff] %v176_v18  ;;  %v379_v20 = vpop.f32.mrb[2].mxu0  ;;  %247 = vst [vmem:[%s545_s2 + $0x40] sm:$0xff] %v208_v19  ;;  %v387_v21 = vpop.f32.mrb[2].mxu1  ;;  %v276_v24 = vmul.f32 %v176_v18, %v176_v18  ;;  %v284_v53 = vmul.f32 %v208_v19, %v208_v19 }
  0xf8   :  { %242 = vst [vmem:[%s545_s2 + $0x18] sm:$0xff] %v379_v20  ;;  %v179_v22 = vpop.f32.mrb[3].mxu0  ;;  %250 = vst [vmem:[%s545_s2 + $0x58] sm:$0xff] %v387_v21  ;;  %v211_v23 = vpop.f32.mrb[3].mxu1  ;;  %v279_v30 = vmul.f32 %v379_v20, %v379_v20  ;;  %v287_v62 = vmul.f32 %v387_v21, %v387_v21 }
  0xf9   :  { %240 = vst [vmem:[%s545_s2 + $0x8] sm:$0xff] %v179_v22  ;;  %v255_v25 = vadd.f32 %v179_v22, %v176_v18  ;;  %v277_v26 = vmul.f32 %v179_v22, %v179_v22  ;;  %248 = vst [vmem:[%s545_s2 + $0x48] sm:$0xff] %v211_v23  ;;  %v285_v58 = vmul.f32 %v211_v23, %v211_v23 }
  0xfb   :  { %v256_v28 = vadd.f32 %v378_v16, %v255_v25  ;;  %v292_v29 = vadd.f32 %v277_v26, %v276_v24 }
  0xfd   :  { %v293_v31 = vadd.f32 %v292_v29, %v278_v27  ;;  %v382_v32 = vpop.f32.mrb[4].mxu0  ;;  %v257_v33 = vadd.f32 %v379_v20, %v256_v28  ;;  %v390_v34 = vpop.f32.mrb[4].mxu1 }
  0xfe   :  { %245 = vst [vmem:[%s545_s2 + $0x30] sm:$0xff] %v382_v32  ;;  %v192_v35 = vpop.f32.mrb[5].mxu0  ;;  %253 = vst [vmem:[%s545_s2 + $0x70] sm:$0xff] %v390_v34  ;;  %v224_v36 = vpop.f32.mrb[5].mxu1  ;;  %v282_v47 = vmul.f32 %v382_v32, %v382_v32  ;;  %v290_v7 = vmul.f32 %v390_v34, %v390_v34 }
  0xff   :  { %243 = vst [vmem:[%s545_s2 + $0x20] sm:$0xff] %v192_v35  ;;  %v258_v37 = vadd.f32 %v257_v33, %v192_v35  ;;  %v280_v38 = vmul.f32 %v192_v35, %v192_v35  ;;  %v294_v39 = vadd.f32 %v293_v31, %v279_v30  ;;  %v383_v40 = vpop.f32.mrb[6].mxu0  ;;  %251 = vst [vmem:[%s545_s2 + $0x60] sm:$0xff] %v224_v36  ;;  %v391_v41 = vpop.f32.mrb[6].mxu1 }
 0x100   :  { %246 = vst [vmem:[%s545_s2 + $0x38] sm:$0xff] %v383_v40  ;;  %v195_v42 = vpop.f32.mrb[7].mxu0  ;;  %254 = vst [vmem:[%s545_s2 + $0x78] sm:$0xff] %v391_v41  ;;  %v227_v43 = vpop.f32.mrb[7].mxu1  ;;  %v283_v50 = vmul.f32 %v383_v40, %v383_v40  ;;  %v288_v1 = vmul.f32 %v224_v36, %v224_v36  ;;  %v291_v10 = vmul.f32 %v391_v41, %v391_v41 }
 0x101   :  { %v295_v44 = vadd.f32 %v294_v39, %v280_v38  ;;  %244 = vst [vmem:[%s545_s2 + $0x28] sm:$0xff] %v195_v42  ;;  %v259_v45 = vadd.f32 %v258_v37, %v195_v42  ;;  %v281_v46 = vmul.f32 %v195_v42, %v195_v42  ;;  %252 = vst [vmem:[%s545_s2 + $0x68] sm:$0xff] %v227_v43 }
 0x102   :  { %v289_v6 = vmul.f32 %v227_v43, %v227_v43 }
 0x103   :  { %v260_v48 = vadd.f32 %v382_v32, %v259_v45  ;;  %v296_v49 = vadd.f32 %v295_v44, %v281_v46 }
 0x105   :  { %v297_v51 = vadd.f32 %v296_v49, %v282_v47  ;;  %v261_v52 = vadd.f32 %v383_v40, %v260_v48 }
 0x107   :  { %v262_v54 = vadd.f32 %v261_v52, %v208_v19  ;;  %v298_v55 = vadd.f32 %v297_v51, %v283_v50 }
 0x109   :  { %v299_v56 = vadd.f32 %v298_v55, %v284_v53  ;;  %v263_v57 = vadd.f32 %v262_v54, %v211_v23 }
 0x10b   :  { %v264_v60 = vadd.f32 %v386_v17, %v263_v57  ;;  %v300_v61 = vadd.f32 %v299_v56, %v285_v58  ;;  %v313_v17 = vlaneseq }
 0x10d   :  { %v301_v63 = vadd.f32 %v300_v61, %v286_v59  ;;  %v265_v0 = vadd.f32 %v387_v21, %v264_v60  ;;  %v314_v22 = vshrl.u32 %v313_v17, 7 }
 0x10f   :  { %v266_v2 = vadd.f32 %v265_v0, %v224_v36  ;;  %v302_v3 = vadd.f32 %v301_v63, %v287_v62  ;;  %vm316_vm0 = vcmp.eq.s32.totalorder %v314_v22, 1  ;;  %vm315_vm1 = vcmp.eq.s32.totalorder %v314_v22, 0 }
 0x111   :  { %v303_v4 = vadd.f32 %v302_v3, %v288_v1  ;;  %v267_v5 = vadd.f32 %v266_v2, %v227_v43 }
 0x113   :  { %v268_v8 = vadd.f32 %v390_v34, %v267_v5  ;;  %v304_v9 = vadd.f32 %v303_v4, %v289_v6 }
 0x115   :  { %v269_v11 = vadd.f32 %v391_v41, %v268_v8  ;;  %v305_v12 = vadd.f32 %v304_v9, %v290_v7 }
 0x117   :  { %v270_v13 = vrot.slane %v269_v11, 4  ;;  %v306_v14 = vadd.f32 %v305_v12, %v291_v10 }
 0x119   :  { %v271_v15 = vadd.f32 %v270_v13, %v269_v11  ;;  %v307_v16 = vrot.slane %v306_v14, 4 }
 0x11b   :  { %v272_v18 = vrot.slane %v271_v15, 2  ;;  %v308_v19 = vadd.f32 %v307_v16, %v306_v14 }
 0x11d   :  { %v273_v20 = vadd.f32 %v272_v18, %v271_v15  ;;  %v309_v21 = vrot.slane %v308_v19, 2 }
 0x11f   :  { %v310_v23 = vadd.f32 %v309_v21, %v308_v19  ;;  %v274_v24 = vrot.slane %v273_v20, 1 }
 0x121   :  { %v311_v25 = vrot.slane %v310_v23, 1  ;;  %v275_v27 = vadd.f32 %v274_v24, %v273_v20 }
 0x123   :  { %v312_v26 = vadd.f32 %v311_v25, %v310_v23 }
 0x125   :  { %v317_v28 = vsel %vm316_vm0, %v312_v26, 0.0 }
 0x126   :  { %v318_v29 = vsel %vm315_vm1, %v275_v27, %v317_v28 }
 0x127   :  { %319 = vst [vmem:[%s546_s3] sm:$0xff] %v318_v29 }

// kernel: resnet_generator_forward.56
= control target key start
LH: loop header
LB: loop body
LE: loop exit
PB: predicated region body
PF: predicated region fallthrough
CT: control target
= control target key end

     0   :  { %s1280_s1 = inlined_call_operand.vmem [shape: bf16[512,128], index: 1, kind: input, shape index: {}]   ;;  %s1281_s0 = inlined_call_operand.vmem [shape: bf16[128,512], index: 0, kind: input, shape index: {}]   ;;  %s1282_s2 = inlined_call_operand.vmem [shape: f32[128,128], index: 2, kind: output, shape index: {0}]   ;;  %s1283_s3 = inlined_call_operand.vmem [shape: f32[1,8,128], index: 3, kind: output, shape index: {1}]  }
   0x1   :  { %v937_v0 = vld [vmem:[%s1280_s1 + $0x40] sm:$0xff]   ;;  %v941_v4 = vld [vmem:[%s1280_s1 + $0x48] sm:$0xff]   ;;  %v945_v8 = vld [vmem:[%s1280_s1 + $0x50] sm:$0xff]  }
   0x2   :  { %v938_v1 = vld [vmem:[%s1280_s1 + $0xc0] sm:$0xff]   ;;  %809 = vmatprep.subr.bf16.mxu0 %v937_v0  ;;  %v942_v5 = vld [vmem:[%s1280_s1 + $0xc8] sm:$0xff]   ;;  %v946_v9 = vld [vmem:[%s1280_s1 + $0xd0] sm:$0xff]  }
   0x3   :  { %v939_v2 = vld [vmem:[%s1280_s1] sm:$0xff]   ;;  %873 = vmatprep.subr.bf16.mxu1 %v938_v1  ;;  %v943_v6 = vld [vmem:[%s1280_s1 + $0x8] sm:$0xff]   ;;  %v947_v10 = vld [vmem:[%s1280_s1 + $0x10] sm:$0xff]  }
   0x4   :  { %v940_v3 = vld [vmem:[%s1280_s1 + $0x80] sm:$0xff]   ;;  %810 = vmatpush3.bf16.msra.mxu0 %v939_v2  ;;  %v944_v7 = vld [vmem:[%s1280_s1 + $0x88] sm:$0xff]   ;;  %v948_v11 = vld [vmem:[%s1280_s1 + $0x90] sm:$0xff]  }
   0x5   :  { %874 = vmatpush3.bf16.msra.mxu1 %v940_v3  ;;  %811 = vmatprep.subr.bf16.mxu0 %v941_v4  ;;  %v949_v12 = vld [vmem:[%s1280_s1 + $0x58] sm:$0xff]   ;;  %v953_v16 = vld [vmem:[%s1280_s1 + $0x60] sm:$0xff]   ;;  %v957_v20 = vld [vmem:[%s1280_s1 + $0x68] sm:$0xff]  }
   0x6   :  { %875 = vmatprep.subr.bf16.mxu1 %v942_v5  ;;  %v950_v13 = vld [vmem:[%s1280_s1 + $0xd8] sm:$0xff]   ;;  %v954_v17 = vld [vmem:[%s1280_s1 + $0xe0] sm:$0xff]   ;;  %v958_v21 = vld [vmem:[%s1280_s1 + $0xe8] sm:$0xff]  }
   0x7   :  { %v951_v14 = vld [vmem:[%s1280_s1 + $0x18] sm:$0xff]   ;;  %v955_v18 = vld [vmem:[%s1280_s1 + $0x20] sm:$0xff]   ;;  %v959_v22 = vld [vmem:[%s1280_s1 + $0x28] sm:$0xff]  }
   0x8   :  { %812 = vmatpush3.bf16.msra.mxu0 %v943_v6  ;;  %v952_v15 = vld [vmem:[%s1280_s1 + $0x98] sm:$0xff]   ;;  %v956_v19 = vld [vmem:[%s1280_s1 + $0xa0] sm:$0xff]   ;;  %v960_v23 = vld [vmem:[%s1280_s1 + $0xa8] sm:$0xff]  }
   0x9   :  { %876 = vmatpush3.bf16.msra.mxu1 %v944_v7  ;;  %813 = vmatprep.subr.bf16.mxu0 %v945_v8  ;;  %v961_v24 = vld [vmem:[%s1280_s1 + $0x70] sm:$0xff]   ;;  %v965_v28 = vld [vmem:[%s1280_s1 + $0x78] sm:$0xff]  }
   0xa   :  { %877 = vmatprep.subr.bf16.mxu1 %v946_v9  ;;  %v962_v25 = vld [vmem:[%s1280_s1 + $0xf0] sm:$0xff]   ;;  %v966_v29 = vld [vmem:[%s1280_s1 + $0xf8] sm:$0xff]  }
   0xb   :  { %v963_v26 = vld [vmem:[%s1280_s1 + $0x30] sm:$0xff]   ;;  %v967_v30 = vld [vmem:[%s1280_s1 + $0x38] sm:$0xff]  }
   0xc   :  { %814 = vmatpush3.bf16.msra.mxu0 %v947_v10  ;;  %v964_v27 = vld [vmem:[%s1280_s1 + $0xb0] sm:$0xff]   ;;  %v968_v31 = vld [vmem:[%s1280_s1 + $0xb8] sm:$0xff]  }
   0xd   :  { %878 = vmatpush3.bf16.msra.mxu1 %v948_v11  ;;  %815 = vmatprep.subr.bf16.mxu0 %v949_v12  ;;  %v969_v32 = vld [vmem:[%s1281_s0] ss:$16 sps:$4 sm:$0xff]   ;;  %v971_v33 = vld [vmem:[%s1281_s0 + $0x4] ss:$16 sps:$4 sm:$0xff]   ;;  %v972_v34 = vld [vmem:[%s1281_s0 + $0x8] ss:$16 sps:$4 sm:$0xff]  }
   0xe   :  { %879 = vmatprep.subr.bf16.mxu1 %v950_v13  ;;  %v974_v35 = vld [vmem:[%s1281_s0 + $0xc] ss:$16 sps:$4 sm:$0xff]   ;;  %494 = vmatprep.mubr.bf16.mxu0 %v971_v33  ;;  %v975_v36 = vld [vmem:[%s1281_s0 + $0x24] ss:$16 sps:$4 sm:$0xff]   ;;  %v979_v38 = vld [vmem:[%s1281_s0 + $0x20] ss:$16 sps:$4 sm:$0xff]  }
   0xf   :  { %591 = vmatprep.mubr.bf16.mxu1 %v974_v35  ;;  %v977_v37 = vld [vmem:[%s1281_s0 + $0x2c] ss:$16 sps:$4 sm:$0xff]   ;;  %v980_v39 = vld [vmem:[%s1281_s0 + $0x28] ss:$16 sps:$4 sm:$0xff]   ;;  %v981_v40 = vld [vmem:[%s1281_s0 + $0x44] ss:$16 sps:$4 sm:$0xff]  }
  0x10   :  { %816 = vmatpush3.bf16.msra.mxu0 %v951_v14  ;;  %v983_v41 = vld [vmem:[%s1281_s0 + $0x4c] ss:$16 sps:$4 sm:$0xff]   ;;  %v985_v42 = vld [vmem:[%s1281_s0 + $0x40] ss:$16 sps:$4 sm:$0xff]   ;;  %v986_v43 = vld [vmem:[%s1281_s0 + $0x48] ss:$16 sps:$4 sm:$0xff]  }
  0x11   :  { %880 = vmatpush3.bf16.msra.mxu1 %v952_v15  ;;  %817 = vmatprep.subr.bf16.mxu0 %v953_v16  ;;  %v987_v44 = vld [vmem:[%s1281_s0 + $0x64] ss:$16 sps:$4 sm:$0xff]   ;;  %v989_v45 = vld [vmem:[%s1281_s0 + $0x6c] ss:$16 sps:$4 sm:$0xff]   ;;  %v991_v46 = vld [vmem:[%s1281_s0 + $0x60] ss:$16 sps:$4 sm:$0xff]  }
  0x12   :  { %881 = vmatprep.subr.bf16.mxu1 %v954_v17  ;;  %v992_v47 = vld [vmem:[%s1281_s0 + $0x68] ss:$16 sps:$4 sm:$0xff]   ;;  %v993_v48 = vld [vmem:[%s1281_s0 + $0x84] ss:$16 sps:$4 sm:$0xff]   ;;  %v995_v49 = vld [vmem:[%s1281_s0 + $0x8c] ss:$16 sps:$4 sm:$0xff]  }
  0x13   :  { %v997_v50 = vld [vmem:[%s1281_s0 + $0x80] ss:$16 sps:$4 sm:$0xff]   ;;  %v998_v51 = vld [vmem:[%s1281_s0 + $0x88] ss:$16 sps:$4 sm:$0xff]   ;;  %v999_v52 = vld [vmem:[%s1281_s0 + $0xa4] ss:$16 sps:$4 sm:$0xff]  }
  0x14   :  { %818 = vmatpush3.bf16.msra.mxu0 %v955_v18  ;;  %v1001_v53 = vld [vmem:[%s1281_s0 + $0xac] ss:$16 sps:$4 sm:$0xff]   ;;  %v1003_v54 = vld [vmem:[%s1281_s0 + $0xa0] ss:$16 sps:$4 sm:$0xff]   ;;  %v1004_v55 = vld [vmem:[%s1281_s0 + $0xa8] ss:$16 sps:$4 sm:$0xff]  }
  0x15   :  { %882 = vmatpush3.bf16.msra.mxu1 %v956_v19  ;;  %819 = vmatprep.subr.bf16.mxu0 %v957_v20  ;;  %v1005_v56 = vld [vmem:[%s1281_s0 + $0xc4] ss:$16 sps:$4 sm:$0xff]   ;;  %v1007_v57 = vld [vmem:[%s1281_s0 + $0xcc] ss:$16 sps:$4 sm:$0xff]   ;;  %v1009_v58 = vld [vmem:[%s1281_s0 + $0xc0] ss:$16 sps:$4 sm:$0xff]  }
  0x16   :  { %883 = vmatprep.subr.bf16.mxu1 %v958_v21  ;;  %v1010_v59 = vld [vmem:[%s1281_s0 + $0xc8] ss:$16 sps:$4 sm:$0xff]   ;;  %v1011_v60 = vld [vmem:[%s1281_s0 + $0xe4] ss:$16 sps:$4 sm:$0xff]   ;;  %v1013_v61 = vld [vmem:[%s1281_s0 + $0xec] ss:$16 sps:$4 sm:$0xff]  }
  0x17   :  { %v1015_v62 = vld [vmem:[%s1281_s0 + $0xe0] ss:$16 sps:$4 sm:$0xff]   ;;  %v1016_v63 = vld [vmem:[%s1281_s0 + $0xe8] ss:$16 sps:$4 sm:$0xff]  }
  0x18   :  { %820 = vmatpush3.bf16.msra.mxu0 %v959_v22 }
  0x19   :  { %884 = vmatpush3.bf16.msra.mxu1 %v960_v23  ;;  %821 = vmatprep.subr.bf16.mxu0 %v961_v24 }
  0x1a   :  { %885 = vmatprep.subr.bf16.mxu1 %v962_v25 }
  0x1c   :  { %822 = vmatpush3.bf16.msra.mxu0 %v963_v26 }
  0x1d   :  { %886 = vmatpush3.bf16.msra.mxu1 %v964_v27  ;;  %823 = vmatprep.subr.bf16.mxu0 %v965_v28 }
  0x1e   :  { %887 = vmatprep.subr.bf16.mxu1 %v966_v29 }
  0x20   :  { %824 = vmatpush3.bf16.msra.mxu0 %v967_v30 }
  0x21   :  { %888 = vmatpush3.bf16.msra.mxu1 %v968_v31 }
  0x23   :  { %495 = vmatmul.mubr.bf16.vlgmr.msra.gmra.mrb[0].mxu0 %v969_v32 }
  0x24   :  { %592 = vmatmul.mubr.bf16.vlgmr.msra.gmra.mrb[0].mxu1 %v972_v34  ;;  %502 = vmatprep.mubr.bf16.mxu0 %v975_v36 }
  0x25   :  { %599 = vmatprep.mubr.bf16.mxu1 %v977_v37 }
  0x2b   :  { %503 = vmatmul.mubr.bf16.gmra.mrb[4].mxu0 %v979_v38 }
  0x2c   :  { %600 = vmatmul.mubr.bf16.gmra.mrb[4].mxu1 %v980_v39  ;;  %510 = vmatprep.mubr.bf16.mxu0 %v981_v40 }
  0x2d   :  { %607 = vmatprep.mubr.bf16.mxu1 %v983_v41 }
  0x33   :  { %511 = vmatmul.mubr.bf16.gmra.mrb[8].mxu0 %v985_v42 }
  0x34   :  { %608 = vmatmul.mubr.bf16.gmra.mrb[8].mxu1 %v986_v43  ;;  %518 = vmatprep.mubr.bf16.mxu0 %v987_v44 }
  0x35   :  { %615 = vmatprep.mubr.bf16.mxu1 %v989_v45 }
  0x3b   :  { %519 = vmatmul.mubr.bf16.gmra.mrb[12].mxu0 %v991_v46 }
  0x3c   :  { %616 = vmatmul.mubr.bf16.gmra.mrb[12].mxu1 %v992_v47  ;;  %526 = vmatprep.mubr.bf16.mxu0 %v993_v48 }
  0x3d   :  { %623 = vmatprep.mubr.bf16.mxu1 %v995_v49 }
  0x43   :  { %527 = vmatmul.mubr.bf16.gmra.mrb[16].mxu0 %v997_v50 }
  0x44   :  { %624 = vmatmul.mubr.bf16.gmra.mrb[16].mxu1 %v998_v51  ;;  %534 = vmatprep.mubr.bf16.mxu0 %v999_v52 }
  0x45   :  { %631 = vmatprep.mubr.bf16.mxu1 %v1001_v53 }
  0x4b   :  { %535 = vmatmul.mubr.bf16.gmra.mrb[20].mxu0 %v1003_v54 }
  0x4c   :  { %632 = vmatmul.mubr.bf16.gmra.mrb[20].mxu1 %v1004_v55  ;;  %542 = vmatprep.mubr.bf16.mxu0 %v1005_v56 }
  0x4d   :  { %639 = vmatprep.mubr.bf16.mxu1 %v1007_v57 }
  0x53   :  { %543 = vmatmul.mubr.bf16.gmra.mrb[24].mxu0 %v1009_v58 }
  0x54   :  { %640 = vmatmul.mubr.bf16.gmra.mrb[24].mxu1 %v1010_v59  ;;  %550 = vmatprep.mubr.bf16.mxu0 %v1011_v60 }
  0x55   :  { %647 = vmatprep.mubr.bf16.mxu1 %v1013_v61 }
  0x5b   :  { %551 = vmatmul.mubr.bf16.gmra.mrb[28].mxu0 %v1015_v62 }
  0x5c   :  { %648 = vmatmul.mubr.bf16.gmra.mrb[28].mxu1 %v1016_v63 }
  0xf6   :  { %v825_v0 = vpop.f32.mrb[0].mxu0 }
  0xf7   :  { %v889_v1 = vpop.f32.mrb[0].mxu1  ;;  %v826_v2 = vpop.f32.mrb[1].mxu0 }
  0xf8   :  { %v827_v3 = vadd.f32 %v826_v2, %v825_v0  ;;  %v890_v4 = vpop.f32.mrb[1].mxu1  ;;  %v828_v5 = vpop.f32.mrb[2].mxu0 }
  0xf9   :  { %v891_v6 = vadd.f32 %v890_v4, %v889_v1  ;;  %v892_v7 = vpop.f32.mrb[2].mxu1  ;;  %v829_v8 = vpop.f32.mrb[3].mxu0 }
  0xfa   :  { %v830_v9 = vadd.f32 %v829_v8, %v828_v5  ;;  %v893_v10 = vpop.f32.mrb[3].mxu1 }
  0xfb   :  { %v594_v11 = vadd.f32 %v891_v6, %v827_v3  ;;  %v894_v12 = vadd.f32 %v893_v10, %v892_v7 }
  0xfd   :  { %656 = vst [vmem:[%s1282_s2] sm:$0xff] %v594_v11  ;;  %v597_v13 = vadd.f32 %v894_v12, %v830_v9  ;;  %v693_v15 = vmul.f32 %v594_v11, %v594_v11 }
  0xfe   :  { %v831_v14 = vpop.f32.mrb[4].mxu0 }
  0xff   :  { %657 = vst [vmem:[%s1282_s2 + $0x8] sm:$0xff] %v597_v13  ;;  %v672_v16 = vadd.f32 %v597_v13, %v594_v11  ;;  %v694_v17 = vmul.f32 %v597_v13, %v597_v13  ;;  %v895_v18 = vpop.f32.mrb[4].mxu1  ;;  %v832_v19 = vpop.f32.mrb[5].mxu0 }
 0x100   :  { %v833_v20 = vadd.f32 %v832_v19, %v831_v14  ;;  %v896_v21 = vpop.f32.mrb[5].mxu1  ;;  %v834_v22 = vpop.f32.mrb[6].mxu0 }
 0x101   :  { %v709_v23 = vadd.f32 %v694_v17, %v693_v15  ;;  %v897_v24 = vadd.f32 %v896_v21, %v895_v18  ;;  %v898_v25 = vpop.f32.mrb[6].mxu1  ;;  %v835_v26 = vpop.f32.mrb[7].mxu0 }
 0x102   :  { %v836_v27 = vadd.f32 %v835_v26, %v834_v22  ;;  %v899_v28 = vpop.f32.mrb[7].mxu1 }
 0x103   :  { %v602_v29 = vadd.f32 %v897_v24, %v833_v20  ;;  %v900_v30 = vadd.f32 %v899_v28, %v898_v25 }
 0x105   :  { %658 = vst [vmem:[%s1282_s2 + $0x10] sm:$0xff] %v602_v29  ;;  %v673_v31 = vadd.f32 %v672_v16, %v602_v29  ;;  %v695_v32 = vmul.f32 %v602_v29, %v602_v29  ;;  %v605_v33 = vadd.f32 %v900_v30, %v836_v27 }
 0x106   :  { %v837_v34 = vpop.f32.mrb[8].mxu0 }
 0x107   :  { %v710_v35 = vadd.f32 %v709_v23, %v695_v32  ;;  %659 = vst [vmem:[%s1282_s2 + $0x18] sm:$0xff] %v605_v33  ;;  %v674_v36 = vadd.f32 %v673_v31, %v605_v33  ;;  %v696_v37 = vmul.f32 %v605_v33, %v605_v33  ;;  %v901_v38 = vpop.f32.mrb[8].mxu1  ;;  %v838_v39 = vpop.f32.mrb[9].mxu0 }
 0x108   :  { %v839_v40 = vadd.f32 %v838_v39, %v837_v34  ;;  %v902_v41 = vpop.f32.mrb[9].mxu1  ;;  %v840_v42 = vpop.f32.mrb[10].mxu0 }
 0x109   :  { %v711_v43 = vadd.f32 %v710_v35, %v696_v37  ;;  %v903_v44 = vadd.f32 %v902_v41, %v901_v38  ;;  %v904_v45 = vpop.f32.mrb[10].mxu1  ;;  %v841_v46 = vpop.f32.mrb[11].mxu0 }
 0x10a   :  { %v842_v47 = vadd.f32 %v841_v46, %v840_v42  ;;  %v905_v48 = vpop.f32.mrb[11].mxu1 }
 0x10b   :  { %v610_v49 = vadd.f32 %v903_v44, %v839_v40  ;;  %v906_v50 = vadd.f32 %v905_v48, %v904_v45 }
 0x10d   :  { %660 = vst [vmem:[%s1282_s2 + $0x20] sm:$0xff] %v610_v49  ;;  %v675_v51 = vadd.f32 %v674_v36, %v610_v49  ;;  %v697_v52 = vmul.f32 %v610_v49, %v610_v49  ;;  %v613_v53 = vadd.f32 %v906_v50, %v842_v47 }
 0x10e   :  { %v843_v54 = vpop.f32.mrb[12].mxu0 }
 0x10f   :  { %v712_v55 = vadd.f32 %v711_v43, %v697_v52  ;;  %661 = vst [vmem:[%s1282_s2 + $0x28] sm:$0xff] %v613_v53  ;;  %v676_v56 = vadd.f32 %v675_v51, %v613_v53  ;;  %v698_v57 = vmul.f32 %v613_v53, %v613_v53  ;;  %v907_v58 = vpop.f32.mrb[12].mxu1  ;;  %v844_v59 = vpop.f32.mrb[13].mxu0 }
 0x110   :  { %v845_v60 = vadd.f32 %v844_v59, %v843_v54  ;;  %v908_v61 = vpop.f32.mrb[13].mxu1  ;;  %v846_v62 = vpop.f32.mrb[14].mxu0 }
 0x111   :  { %v713_v63 = vadd.f32 %v712_v55, %v698_v57  ;;  %v909_v0 = vadd.f32 %v908_v61, %v907_v58  ;;  %v910_v1 = vpop.f32.mrb[14].mxu1  ;;  %v847_v2 = vpop.f32.mrb[15].mxu0 }
 0x112   :  { %v848_v3 = vadd.f32 %v847_v2, %v846_v62  ;;  %v911_v4 = vpop.f32.mrb[15].mxu1 }
 0x113   :  { %v618_v5 = vadd.f32 %v909_v0, %v845_v60  ;;  %v912_v6 = vadd.f32 %v911_v4, %v910_v1 }
 0x115   :  { %662 = vst [vmem:[%s1282_s2 + $0x30] sm:$0xff] %v618_v5  ;;  %v677_v7 = vadd.f32 %v676_v56, %v618_v5  ;;  %v699_v8 = vmul.f32 %v618_v5, %v618_v5  ;;  %v621_v9 = vadd.f32 %v912_v6, %v848_v3 }
 0x116   :  { %v849_v10 = vpop.f32.mrb[16].mxu0 }
 0x117   :  { %v714_v11 = vadd.f32 %v713_v63, %v699_v8  ;;  %663 = vst [vmem:[%s1282_s2 + $0x38] sm:$0xff] %v621_v9  ;;  %v678_v12 = vadd.f32 %v677_v7, %v621_v9  ;;  %v700_v13 = vmul.f32 %v621_v9, %v621_v9  ;;  %v913_v14 = vpop.f32.mrb[16].mxu1  ;;  %v850_v15 = vpop.f32.mrb[17].mxu0 }
 0x118   :  { %v851_v16 = vadd.f32 %v850_v15, %v849_v10  ;;  %v914_v17 = vpop.f32.mrb[17].mxu1  ;;  %v852_v18 = vpop.f32.mrb[18].mxu0 }
 0x119   :  { %v715_v19 = vadd.f32 %v714_v11, %v700_v13  ;;  %v915_v20 = vadd.f32 %v914_v17, %v913_v14  ;;  %v916_v21 = vpop.f32.mrb[18].mxu1  ;;  %v853_v22 = vpop.f32.mrb[19].mxu0 }
 0x11a   :  { %v854_v23 = vadd.f32 %v853_v22, %v852_v18  ;;  %v917_v24 = vpop.f32.mrb[19].mxu1 }
 0x11b   :  { %v626_v25 = vadd.f32 %v915_v20, %v851_v16  ;;  %v918_v26 = vadd.f32 %v917_v24, %v916_v21 }
 0x11d   :  { %664 = vst [vmem:[%s1282_s2 + $0x40] sm:$0xff] %v626_v25  ;;  %v679_v27 = vadd.f32 %v678_v12, %v626_v25  ;;  %v701_v28 = vmul.f32 %v626_v25, %v626_v25  ;;  %v629_v29 = vadd.f32 %v918_v26, %v854_v23 }
 0x11e   :  { %v855_v30 = vpop.f32.mrb[20].mxu0 }
 0x11f   :  { %v716_v31 = vadd.f32 %v715_v19, %v701_v28  ;;  %665 = vst [vmem:[%s1282_s2 + $0x48] sm:$0xff] %v629_v29  ;;  %v680_v32 = vadd.f32 %v679_v27, %v629_v29  ;;  %v702_v33 = vmul.f32 %v629_v29, %v629_v29  ;;  %v919_v34 = vpop.f32.mrb[20].mxu1  ;;  %v856_v35 = vpop.f32.mrb[21].mxu0 }
 0x120   :  { %v857_v36 = vadd.f32 %v856_v35, %v855_v30  ;;  %v920_v37 = vpop.f32.mrb[21].mxu1  ;;  %v858_v38 = vpop.f32.mrb[22].mxu0 }
 0x121   :  { %v717_v39 = vadd.f32 %v716_v31, %v702_v33  ;;  %v921_v40 = vadd.f32 %v920_v37, %v919_v34  ;;  %v922_v41 = vpop.f32.mrb[22].mxu1  ;;  %v859_v42 = vpop.f32.mrb[23].mxu0  ;;  %v730_v33 = vlaneseq }
 0x122   :  { %v860_v43 = vadd.f32 %v859_v42, %v858_v38  ;;  %v923_v44 = vpop.f32.mrb[23].mxu1 }
 0x123   :  { %v634_v45 = vadd.f32 %v921_v40, %v857_v36  ;;  %v924_v46 = vadd.f32 %v923_v44, %v922_v41  ;;  %v731_v38 = vshrl.u32 %v730_v33, 7 }
 0x125   :  { %666 = vst [vmem:[%s1282_s2 + $0x50] sm:$0xff] %v634_v45  ;;  %v681_v47 = vadd.f32 %v680_v32, %v634_v45  ;;  %v703_v48 = vmul.f32 %v634_v45, %v634_v45  ;;  %v637_v49 = vadd.f32 %v924_v46, %v860_v43  ;;  %vm733_vm0 = vcmp.eq.s32.totalorder %v731_v38, 1 }
 0x126   :  { %v861_v50 = vpop.f32.mrb[24].mxu0  ;;  %vm732_vm1 = vcmp.eq.s32.totalorder %v731_v38, 0 }
 0x127   :  { %v718_v51 = vadd.f32 %v717_v39, %v703_v48  ;;  %667 = vst [vmem:[%s1282_s2 + $0x58] sm:$0xff] %v637_v49  ;;  %v682_v52 = vadd.f32 %v681_v47, %v637_v49  ;;  %v704_v53 = vmul.f32 %v637_v49, %v637_v49  ;;  %v925_v54 = vpop.f32.mrb[24].mxu1  ;;  %v862_v55 = vpop.f32.mrb[25].mxu0 }
 0x128   :  { %v863_v56 = vadd.f32 %v862_v55, %v861_v50  ;;  %v926_v57 = vpop.f32.mrb[25].mxu1  ;;  %v864_v58 = vpop.f32.mrb[26].mxu0 }
 0x129   :  { %v719_v59 = vadd.f32 %v718_v51, %v704_v53  ;;  %v927_v60 = vadd.f32 %v926_v57, %v925_v54  ;;  %v928_v61 = vpop.f32.mrb[26].mxu1  ;;  %v865_v62 = vpop.f32.mrb[27].mxu0 }
 0x12a   :  { %v866_v63 = vadd.f32 %v865_v62, %v864_v58  ;;  %v929_v0 = vpop.f32.mrb[27].mxu1 }
 0x12b   :  { %v642_v1 = vadd.f32 %v927_v60, %v863_v56  ;;  %v930_v2 = vadd.f32 %v929_v0, %v928_v61 }
 0x12d   :  { %668 = vst [vmem:[%s1282_s2 + $0x60] sm:$0xff] %v642_v1  ;;  %v683_v3 = vadd.f32 %v682_v52, %v642_v1  ;;  %v705_v4 = vmul.f32 %v642_v1, %v642_v1  ;;  %v645_v5 = vadd.f32 %v930_v2, %v866_v63 }
 0x12e   :  { %v867_v6 = vpop.f32.mrb[28].mxu0 }
 0x12f   :  { %v720_v7 = vadd.f32 %v719_v59, %v705_v4  ;;  %669 = vst [vmem:[%s1282_s2 + $0x68] sm:$0xff] %v645_v5  ;;  %v684_v8 = vadd.f32 %v683_v3, %v645_v5  ;;  %v706_v9 = vmul.f32 %v645_v5, %v645_v5  ;;  %v931_v10 = vpop.f32.mrb[28].mxu1  ;;  %v868_v11 = vpop.f32.mrb[29].mxu0 }
 0x130   :  { %v869_v12 = vadd.f32 %v868_v11, %v867_v6  ;;  %v932_v13 = vpop.f32.mrb[29].mxu1  ;;  %v870_v14 = vpop.f32.mrb[30].mxu0 }
 0x131   :  { %v721_v15 = vadd.f32 %v720_v7, %v706_v9  ;;  %v933_v16 = vadd.f32 %v932_v13, %v931_v10  ;;  %v934_v17 = vpop.f32.mrb[30].mxu1  ;;  %v871_v18 = vpop.f32.mrb[31].mxu0 }
 0x132   :  { %v872_v19 = vadd.f32 %v871_v18, %v870_v14  ;;  %v935_v20 = vpop.f32.mrb[31].mxu1 }
 0x133   :  { %v650_v21 = vadd.f32 %v933_v16, %v869_v12  ;;  %v936_v22 = vadd.f32 %v935_v20, %v934_v17 }
 0x135   :  { %670 = vst [vmem:[%s1282_s2 + $0x70] sm:$0xff] %v650_v21  ;;  %v685_v23 = vadd.f32 %v684_v8, %v650_v21  ;;  %v707_v24 = vmul.f32 %v650_v21, %v650_v21  ;;  %v653_v25 = vadd.f32 %v936_v22, %v872_v19 }
 0x137   :  { %v722_v26 = vadd.f32 %v721_v15, %v707_v24  ;;  %671 = vst [vmem:[%s1282_s2 + $0x78] sm:$0xff] %v653_v25  ;;  %v686_v27 = vadd.f32 %v685_v23, %v653_v25  ;;  %v708_v28 = vmul.f32 %v653_v25, %v653_v25 }
 0x139   :  { %v687_v29 = vrot.slane %v686_v27, 4  ;;  %v723_v30 = vadd.f32 %v722_v26, %v708_v28 }
 0x13b   :  { %v688_v31 = vadd.f32 %v687_v29, %v686_v27  ;;  %v724_v32 = vrot.slane %v723_v30, 4 }
 0x13d   :  { %v689_v34 = vrot.slane %v688_v31, 2  ;;  %v725_v35 = vadd.f32 %v724_v32, %v723_v30 }
 0x13f   :  { %v690_v36 = vadd.f32 %v689_v34, %v688_v31  ;;  %v726_v37 = vrot.slane %v725_v35, 2 }
 0x141   :  { %v727_v39 = vadd.f32 %v726_v37, %v725_v35  ;;  %v691_v40 = vrot.slane %v690_v36, 1 }
 0x143   :  { %v728_v41 = vrot.slane %v727_v39, 1  ;;  %v692_v43 = vadd.f32 %v691_v40, %v690_v36 }
 0x145   :  { %v729_v42 = vadd.f32 %v728_v41, %v727_v39 }
 0x147   :  { %v734_v44 = vsel %vm733_vm0, %v729_v42, 0.0 }
 0x148   :  { %v735_v45 = vsel %vm732_vm1, %v692_v43, %v734_v44 }
 0x149   :  { %736 = vst [vmem:[%s1283_s3] sm:$0xff] %v735_v45 }

// kernel: resnet_generator_forward.61
= control target key start
LH: loop header
LB: loop body
LE: loop exit
PB: predicated region body
PF: predicated region fallthrough
CT: control target
= control target key end

     0   :  { %v5354_v0 = vmov 0   ;;  %s7223_s1 = inlined_call_operand.vmem [shape: bf16[1152,128], index: 1, kind: input, shape index: {}]   ;;  %s7224_s0 = inlined_call_operand.vmem [shape: bf16[512,1152], index: 0, kind: input, shape index: {}]   ;;  %s7225_s2 = inlined_call_operand.vmem [shape: f32[1,128], index: 2, kind: input, shape index: {}]   ;;  %s7226_s3 = inlined_call_operand.vmem [shape: f32[512,128], index: 3, kind: output, shape index: {}]  }
   0x1   :  { %2390 = vmatprep.subr.bf16.mxu1 %v5354_v0  ;;  %2679 = vmatprep.subr.bf16.mxu0 %v5354_v0  ;;  %v4865_v1 = vld [vmem:[%s7223_s1] sm:$0xff]   ;;  %v4867_v3 = vld [vmem:[%s7223_s1 + $0x8] sm:$0xff]   ;;  %v4869_v5 = vld [vmem:[%s7223_s1 + $0x10] sm:$0xff]  }
   0x2   :  { %v5383_v2 = vld [vmem:[%s7223_s1 + $0x80] sm:$0xff]   ;;  %2391 = vmatpush1.bf16.msra.mxu1 %v4865_v1  ;;  %v5393_v4 = vld [vmem:[%s7223_s1 + $0x88] sm:$0xff]   ;;  %v5404_v6 = vld [vmem:[%s7223_s1 + $0x90] sm:$0xff]  }
   0x3   :  { %2680 = vmatpush1.bf16.msra.mxu0 %v5383_v2  ;;  %2392 = vmatprep.subr.bf16.mxu1 %v5354_v0  ;;  %v4871_v7 = vld [vmem:[%s7223_s1 + $0x18] sm:$0xff]   ;;  %v4873_v9 = vld [vmem:[%s7223_s1 + $0x20] sm:$0xff]   ;;  %v4875_v11 = vld [vmem:[%s7223_s1 + $0x28] sm:$0xff]  }
   0x4   :  { %2681 = vmatprep.subr.bf16.mxu0 %v5354_v0  ;;  %v5415_v8 = vld [vmem:[%s7223_s1 + $0x98] sm:$0xff]   ;;  %v5426_v10 = vld [vmem:[%s7223_s1 + $0xa0] sm:$0xff]   ;;  %v5437_v12 = vld [vmem:[%s7223_s1 + $0xa8] sm:$0xff]  }
   0x5   :  { %v4877_v13 = vld [vmem:[%s7223_s1 + $0x30] sm:$0xff]   ;;  %v4879_v15 = vld [vmem:[%s7223_s1 + $0x38] sm:$0xff]   ;;  %v4881_v17 = vld [vmem:[%s7223_s1 + $0x40] sm:$0xff]  }
   0x6   :  { %2393 = vmatpush1.bf16.msra.mxu1 %v4867_v3  ;;  %v5448_v14 = vld [vmem:[%s7223_s1 + $0xb0] sm:$0xff]   ;;  %v5459_v16 = vld [vmem:[%s7223_s1 + $0xb8] sm:$0xff]   ;;  %v5470_v18 = vld [vmem:[%s7223_s1 + $0xc0] sm:$0xff]  }
   0x7   :  { %2682 = vmatpush1.bf16.msra.mxu0 %v5393_v4  ;;  %2394 = vmatprep.subr.bf16.mxu1 %v5354_v0  ;;  %v4899_v19 = vld [vmem:[%s7224_s0 + $0x4] ss:$36 sps:$4 sm:$0xff]   ;;  %v4902_v21 = vld [vmem:[%s7224_s0 + $0xc] ss:$36 sps:$4 sm:$0xff]   ;;  %v4887_v25 = vld [vmem:[%s7223_s1 + $0x58] sm:$0xff]  }
   0x8   :  { %2683 = vmatprep.subr.bf16.mxu0 %v5354_v0  ;;  %v4883_v20 = vld [vmem:[%s7223_s1 + $0x48] sm:$0xff]   ;;  %2422 = vmatprep.mubr.bf16.mxu1 %v4899_v19  ;;  %v4885_v23 = vld [vmem:[%s7223_s1 + $0x50] sm:$0xff]   ;;  %v5509_v26 = vld [vmem:[%s7223_s1 + $0xd8] sm:$0xff]  }
   0x9   :  { %v5487_v22 = vld [vmem:[%s7223_s1 + $0xc8] sm:$0xff]   ;;  %2711 = vmatprep.mubr.bf16.mxu0 %v4902_v21  ;;  %v5498_v24 = vld [vmem:[%s7223_s1 + $0xd0] sm:$0xff]   ;;  %v4889_v27 = vld [vmem:[%s7223_s1 + $0x60] sm:$0xff]  }
   0xa   :  { %2395 = vmatpush1.bf16.msra.mxu1 %v4869_v5  ;;  %v5520_v28 = vld [vmem:[%s7223_s1 + $0xe0] sm:$0xff]   ;;  %v4891_v29 = vld [vmem:[%s7223_s1 + $0x68] sm:$0xff]   ;;  %v4893_v31 = vld [vmem:[%s7223_s1 + $0x70] sm:$0xff]  }
   0xb   :  { %2684 = vmatpush1.bf16.msra.mxu0 %v5404_v6  ;;  %2396 = vmatprep.subr.bf16.mxu1 %v5354_v0  ;;  %v5531_v30 = vld [vmem:[%s7223_s1 + $0xe8] sm:$0xff]   ;;  %v5542_v32 = vld [vmem:[%s7223_s1 + $0xf0] sm:$0xff]   ;;  %v4895_v33 = vld [vmem:[%s7223_s1 + $0x78] sm:$0xff]  }
   0xc   :  { %2685 = vmatprep.subr.bf16.mxu0 %v5354_v0  ;;  %v5553_v34 = vld [vmem:[%s7223_s1 + $0xf8] sm:$0xff]   ;;  %v4897_v35 = vld [vmem:[%s7224_s0] ss:$36 sps:$4 sm:$0xff]   ;;  %v4900_v36 = vld [vmem:[%s7224_s0 + $0x8] ss:$36 sps:$4 sm:$0xff]  }
   0xd   :  { %v4903_v37 = vld [vmem:[%s7223_s1 + $0x100] sm:$0xff]   ;;  %v4905_v38 = vld [vmem:[%s7224_s0 + $0x4c] ss:$36 sps:$4 sm:$0xff]   ;;  %v4907_v39 = vld [vmem:[%s7224_s0 + $0x54] ss:$36 sps:$4 sm:$0xff]  }
   0xe   :  { %2397 = vmatpush1.bf16.msra.mxu1 %v4871_v7  ;;  %v4904_v40 = vld [vmem:[%s7223_s1 + $0x108] sm:$0xff]   ;;  %v4910_v42 = vld [vmem:[%s7224_s0 + $0x50] ss:$36 sps:$4 sm:$0xff]   ;;  %v4915_v45 = vld [vmem:[%s7224_s0 + $0x9c] ss:$36 sps:$4 sm:$0xff]  }
   0xf   :  { %2686 = vmatpush1.bf16.msra.mxu0 %v5415_v8  ;;  %2398 = vmatprep.subr.bf16.mxu1 %v5354_v0  ;;  %v4909_v41 = vld [vmem:[%s7224_s0 + $0x48] ss:$36 sps:$4 sm:$0xff]   ;;  %v4913_v43 = vld [vmem:[%s7224_s0 + $0x94] ss:$36 sps:$4 sm:$0xff]   ;;  %v4919_v49 = vld [vmem:[%s7223_s1 + $0x120] sm:$0xff]  }
  0x10   :  { %2687 = vmatprep.subr.bf16.mxu0 %v5354_v0  ;;  %v4911_v44 = vld [vmem:[%s7223_s1 + $0x110] sm:$0xff]   ;;  %v4912_v46 = vld [vmem:[%s7223_s1 + $0x118] sm:$0xff]   ;;  %v4923_v51 = vld [vmem:[%s7224_s0 + $0xe4] ss:$36 sps:$4 sm:$0xff]  }
  0x11   :  { %v4917_v47 = vld [vmem:[%s7224_s0 + $0x90] ss:$36 sps:$4 sm:$0xff]   ;;  %v4918_v48 = vld [vmem:[%s7224_s0 + $0x98] ss:$36 sps:$4 sm:$0xff]   ;;  %v4920_v52 = vld [vmem:[%s7223_s1 + $0x128] sm:$0xff]  }
  0x12   :  { %2399 = vmatpush1.bf16.msra.mxu1 %v4873_v9  ;;  %v4921_v50 = vld [vmem:[%s7224_s0 + $0xdc] ss:$36 sps:$4 sm:$0xff]   ;;  %v4929_v55 = vld [vmem:[%s7224_s0 + $0x124] ss:$36 sps:$4 sm:$0xff]   ;;  %v4927_v56 = vld [vmem:[%s7223_s1 + $0x130] sm:$0xff]  }
  0x13   :  { %2688 = vmatpush1.bf16.msra.mxu0 %v5426_v10  ;;  %2400 = vmatprep.subr.bf16.mxu1 %v5354_v0  ;;  %v4925_v53 = vld [vmem:[%s7224_s0 + $0xd8] ss:$36 sps:$4 sm:$0xff]   ;;  %v4926_v54 = vld [vmem:[%s7224_s0 + $0xe0] ss:$36 sps:$4 sm:$0xff]   ;;  %v4931_v57 = vld [vmem:[%s7224_s0 + $0x12c] ss:$36 sps:$4 sm:$0xff]  }
  0x14   :  { %2689 = vmatprep.subr.bf16.mxu0 %v5354_v0  ;;  %v4928_v58 = vld [vmem:[%s7223_s1 + $0x138] sm:$0xff]   ;;  %v4933_v59 = vld [vmem:[%s7224_s0 + $0x120] ss:$36 sps:$4 sm:$0xff]   ;;  %v4934_v60 = vld [vmem:[%s7224_s0 + $0x128] ss:$36 sps:$4 sm:$0xff]  }
  0x15   :  { %v4935_v61 = vld [vmem:[%s7223_s1 + $0x140] sm:$0xff]   ;;  %v4937_v62 = vld [vmem:[%s7224_s0 + $0x16c] ss:$36 sps:$4 sm:$0xff]   ;;  %v4939_v63 = vld [vmem:[%s7224_s0 + $0x174] ss:$36 sps:$4 sm:$0xff]  }
  0x16   :  { %2401 = vmatpush1.bf16.msra.mxu1 %v4875_v11  ;;  %v4936_v1 = vld [vmem:[%s7223_s1 + $0x148] sm:$0xff]   ;;  %v4942_v3 = vld [vmem:[%s7224_s0 + $0x170] ss:$36 sps:$4 sm:$0xff]   ;;  %v4944_v7 = vld [vmem:[%s7223_s1 + $0x158] sm:$0xff]  }
  0x17   :  { %2690 = vmatpush1.bf16.msra.mxu0 %v5437_v12  ;;  %2402 = vmatprep.subr.bf16.mxu1 %v5354_v0  ;;  %v4943_v5 = vld [vmem:[%s7223_s1 + $0x150] sm:$0xff]   ;;  %v4950_v9 = vld [vmem:[%s7224_s0 + $0x1b8] ss:$36 sps:$4 sm:$0xff]  }
  0x18   :  { %2691 = vmatprep.subr.bf16.mxu0 %v5354_v0  ;;  %v4953_v11 = vld [vmem:[%s7224_s0 + $0x1fc] ss:$36 sps:$4 sm:$0xff]   ;;  %v4963_v21 = vld [vmem:[%s7224_s0 + $0x10] ss:$36 sps:$4 sm:$0xff]  }
  0x19   :  { %v4960_v19 = vld [vmem:[%s7223_s1 + $0x178] sm:$0xff]  }
  0x1a   :  { %2403 = vmatpush1.bf16.msra.mxu1 %v4877_v13  ;;  %v4952_v13 = vld [vmem:[%s7223_s1 + $0x168] sm:$0xff]  }
  0x1b   :  { %2692 = vmatpush1.bf16.msra.mxu0 %v5448_v14  ;;  %2404 = vmatprep.subr.bf16.mxu1 %v5354_v0 }
  0x1c   :  { %2693 = vmatprep.subr.bf16.mxu0 %v5354_v0 }
  0x1e   :  { %2405 = vmatpush1.bf16.msra.mxu1 %v4879_v15  ;;  %v4958_v15 = vld [vmem:[%s7224_s0 + $0x200] ss:$36 sps:$4 sm:$0xff]  }
  0x1f   :  { %2694 = vmatpush1.bf16.msra.mxu0 %v5459_v16  ;;  %2406 = vmatprep.subr.bf16.mxu1 %v5354_v0 }
  0x20   :  { %2695 = vmatprep.subr.bf16.mxu0 %v5354_v0 }
  0x22   :  { %2407 = vmatpush1.bf16.msra.mxu1 %v4881_v17  ;;  %v4959_v17 = vld [vmem:[%s7223_s1 + $0x170] sm:$0xff]  }
  0x23   :  { %2696 = vmatpush1.bf16.msra.mxu0 %v5470_v18  ;;  %2408 = vmatprep.subr.bf16.mxu1 %v5354_v0 }
  0x24   :  { %2697 = vmatprep.subr.bf16.mxu0 %v5354_v0 }
  0x26   :  { %2409 = vmatpush1.bf16.msra.mxu1 %v4883_v20  ;;  %v4966_v20 = vld [vmem:[%s7224_s0 + $0x240] ss:$36 sps:$4 sm:$0xff]  }
  0x27   :  { %2698 = vmatpush1.bf16.msra.mxu0 %v5487_v22  ;;  %2410 = vmatprep.subr.bf16.mxu1 %v5354_v0 }
  0x28   :  { %2699 = vmatprep.subr.bf16.mxu0 %v5354_v0 }
  0x2a   :  { %2411 = vmatpush1.bf16.msra.mxu1 %v4885_v23  ;;  %v4967_v23 = vld [vmem:[%s7223_s1 + $0x180] sm:$0xff]  }
  0x2b   :  { %2700 = vmatpush1.bf16.msra.mxu0 %v5498_v24  ;;  %2412 = vmatprep.subr.bf16.mxu1 %v5354_v0 }
  0x2c   :  { %2701 = vmatprep.subr.bf16.mxu0 %v5354_v0 }
  0x2e   :  { %2413 = vmatpush1.bf16.msra.mxu1 %v4887_v25  ;;  %v4972_v25 = vld [vmem:[%s7224_s0 + $0x288] ss:$36 sps:$4 sm:$0xff]  }
  0x2f   :  { %2702 = vmatpush1.bf16.msra.mxu0 %v5509_v26  ;;  %2414 = vmatprep.subr.bf16.mxu1 %v5354_v0 }
  0x30   :  { %2703 = vmatprep.subr.bf16.mxu0 %v5354_v0 }
  0x32   :  { %2415 = vmatpush1.bf16.msra.mxu1 %v4889_v27  ;;  %v4973_v27 = vld [vmem:[%s7224_s0 + $0x58] ss:$36 sps:$4 sm:$0xff]  }
  0x33   :  { %2704 = vmatpush1.bf16.msra.mxu0 %v5520_v28  ;;  %2416 = vmatprep.subr.bf16.mxu1 %v5354_v0 }
  0x34   :  { %2705 = vmatprep.subr.bf16.mxu0 %v5354_v0 }
  0x36   :  { %2417 = vmatpush1.bf16.msra.mxu1 %v4891_v29  ;;  %v4976_v29 = vld [vmem:[%s7224_s0 + $0xa4] ss:$36 sps:$4 sm:$0xff]  }
  0x37   :  { %2706 = vmatpush1.bf16.msra.mxu0 %v5531_v30  ;;  %2418 = vmatprep.subr.bf16.mxu1 %v5354_v0 }
  0x38   :  { %2707 = vmatprep.subr.bf16.mxu0 %v5354_v0 }
  0x3a   :  { %2419 = vmatpush1.bf16.msra.mxu1 %v4893_v31  ;;  %v4978_v31 = vld [vmem:[%s7224_s0 + $0x2d0] ss:$36 sps:$4 sm:$0xff]  }
  0x3b   :  { %2708 = vmatpush1.bf16.msra.mxu0 %v5542_v32  ;;  %2420 = vmatprep.subr.bf16.mxu1 %v5354_v0 }
  0x3c   :  { %2709 = vmatprep.subr.bf16.mxu0 %v5354_v0 }
  0x3e   :  { %2421 = vmatpush1.bf16.msra.mxu1 %v4895_v33  ;;  %v4979_v33 = vld [vmem:[%s7224_s0 + $0xa0] ss:$36 sps:$4 sm:$0xff]  }
  0x3f   :  { %2710 = vmatpush1.bf16.msra.mxu0 %v5553_v34  ;;  %4448 = vmatprep.subr.bf16.mxu1 %v5354_v0 }
  0x40   :  { %2968 = vmatprep.subr.bf16.mxu0 %v5354_v0 }
  0x41   :  { %2423 = vmatmul.mubr.bf16.vlgmr.msra.gmra.mrb[0].mxu1 %v4897_v35  ;;  %v4983_v35 = vld [vmem:[%s7224_s0 + $0xec] ss:$36 sps:$4 sm:$0xff]  }
  0x42   :  { %2712 = vmatmul.mubr.bf16.vlgmr.msra.gmra.mrb[0].mxu0 %v4900_v36  ;;  %4464 = vmatpush1.bf16.msra.mxu1 %v5383_v2  ;;  %v4941_v2 = vld [vmem:[%s7224_s0 + $0x168] ss:$36 sps:$4 sm:$0xff]   ;;  %v5019_v36 = vld [vmem:[%s7223_s1 + $0x1a0] sm:$0xff]  }
  0x43   :  { %2969 = vmatpush1.bf16.msra.mxu0 %v4903_v37  ;;  %2430 = vmatprep.mubr.bf16.mxu1 %v4905_v38  ;;  %v4985_v37 = vld [vmem:[%s7224_s0 + $0x318] ss:$36 sps:$4 sm:$0xff]   ;;  %v5032_v38 = vld [vmem:[%s7223_s1 + $0x1a8] sm:$0xff]  }
  0x44   :  { %2970 = vmatprep.subr.bf16.mxu0 %v5354_v0  ;;  %2719 = vmatprep.mubr.bf16.mxu0 %v4907_v39  ;;  %v4986_v39 = vld [vmem:[%s7224_s0 + $0xe8] ss:$36 sps:$4 sm:$0xff]  }
  0x45   :  { %4449 = vmatprep.subr.bf16.mxu1 %v5354_v0 }
  0x46   :  { %4465 = vmatpush1.bf16.msra.mxu1 %v5393_v4  ;;  %v4945_v4 = vld [vmem:[%s7224_s0 + $0x1b4] ss:$36 sps:$4 sm:$0xff]  }
  0x47   :  { %2971 = vmatpush1.bf16.msra.mxu0 %v4904_v40  ;;  %4450 = vmatprep.subr.bf16.mxu1 %v5354_v0  ;;  %v4987_v40 = vld [vmem:[%s7224_s0 + $0x364] ss:$36 sps:$4 sm:$0xff]  }
  0x48   :  { %2972 = vmatprep.subr.bf16.mxu0 %v5354_v0 }
  0x49   :  { %2431 = vmatmul.mubr.bf16.gmra.mrb[4].mxu1 %v4909_v41  ;;  %v4989_v41 = vld [vmem:[%s7224_s0 + $0x134] ss:$36 sps:$4 sm:$0xff]  }
  0x4a   :  { %2720 = vmatmul.mubr.bf16.gmra.mrb[4].mxu0 %v4910_v42  ;;  %2438 = vmatprep.mubr.bf16.mxu1 %v4913_v43  ;;  %v5045_v42 = vld [vmem:[%s7223_s1 + $0x1b0] sm:$0xff]   ;;  %v5058_v43 = vld [vmem:[%s7223_s1 + $0x1b8] sm:$0xff]  }
  0x4b   :  { %2973 = vmatpush1.bf16.msra.mxu0 %v4911_v44  ;;  %2727 = vmatprep.mubr.bf16.mxu0 %v4915_v45  ;;  %v4991_v44 = vld [vmem:[%s7224_s0 + $0x360] ss:$36 sps:$4 sm:$0xff]   ;;  %v4992_v45 = vld [vmem:[%s7224_s0 + $0x130] ss:$36 sps:$4 sm:$0xff]  }
  0x4c   :  { %2974 = vmatprep.subr.bf16.mxu0 %v5354_v0  ;;  %4466 = vmatpush1.bf16.msra.mxu1 %v5404_v6  ;;  %v4947_v6 = vld [vmem:[%s7224_s0 + $0x1bc] ss:$36 sps:$4 sm:$0xff]  }
  0x4d   :  { %4451 = vmatprep.subr.bf16.mxu1 %v5354_v0 }
  0x4f   :  { %2975 = vmatpush1.bf16.msra.mxu0 %v4912_v46  ;;  %v4994_v46 = vld [vmem:[%s7224_s0 + $0x3ac] ss:$36 sps:$4 sm:$0xff]  }
  0x50   :  { %2976 = vmatprep.subr.bf16.mxu0 %v5354_v0  ;;  %4467 = vmatpush1.bf16.msra.mxu1 %v5415_v8  ;;  %v4949_v8 = vld [vmem:[%s7224_s0 + $0x1b0] ss:$36 sps:$4 sm:$0xff]  }
  0x51   :  { %2439 = vmatmul.mubr.bf16.gmra.mrb[8].mxu1 %v4917_v47  ;;  %4452 = vmatprep.subr.bf16.mxu1 %v5354_v0  ;;  %v4996_v47 = vld [vmem:[%s7224_s0 + $0x17c] ss:$36 sps:$4 sm:$0xff]  }
  0x52   :  { %2728 = vmatmul.mubr.bf16.gmra.mrb[8].mxu0 %v4918_v48  ;;  %2446 = vmatprep.mubr.bf16.mxu1 %v4921_v50  ;;  %v5071_v48 = vld [vmem:[%s7223_s1 + $0x1c0] sm:$0xff]   ;;  %v4998_v50 = vld [vmem:[%s7224_s0 + $0x3a8] ss:$36 sps:$4 sm:$0xff]  }
  0x53   :  { %2977 = vmatpush1.bf16.msra.mxu0 %v4919_v49  ;;  %2735 = vmatprep.mubr.bf16.mxu0 %v4923_v51  ;;  %v5084_v49 = vld [vmem:[%s7223_s1 + $0x1c8] sm:$0xff]   ;;  %v4999_v51 = vld [vmem:[%s7224_s0 + $0x178] ss:$36 sps:$4 sm:$0xff]  }
  0x54   :  { %2978 = vmatprep.subr.bf16.mxu0 %v5354_v0  ;;  %4468 = vmatpush1.bf16.msra.mxu1 %v5426_v10  ;;  %v4951_v10 = vld [vmem:[%s7223_s1 + $0x160] sm:$0xff]  }
  0x55   :  { %4453 = vmatprep.subr.bf16.mxu1 %v5354_v0 }
  0x57   :  { %2979 = vmatpush1.bf16.msra.mxu0 %v4920_v52  ;;  %v5000_v52 = vld [vmem:[%s7224_s0 + $0x3f4] ss:$36 sps:$4 sm:$0xff]  }
  0x58   :  { %2980 = vmatprep.subr.bf16.mxu0 %v5354_v0  ;;  %4469 = vmatpush1.bf16.msra.mxu1 %v5437_v12  ;;  %v4955_v12 = vld [vmem:[%s7224_s0 + $0x204] ss:$36 sps:$4 sm:$0xff]  }
  0x59   :  { %2447 = vmatmul.mubr.bf16.gmra.mrb[12].mxu1 %v4925_v53  ;;  %4454 = vmatprep.subr.bf16.mxu1 %v5354_v0  ;;  %v5002_v53 = vld [vmem:[%s7224_s0 + $0x1c4] ss:$36 sps:$4 sm:$0xff]  }
  0x5a   :  { %2736 = vmatmul.mubr.bf16.gmra.mrb[12].mxu0 %v4926_v54  ;;  %2454 = vmatprep.mubr.bf16.mxu1 %v4929_v55  ;;  %v5097_v54 = vld [vmem:[%s7223_s1 + $0x1d0] sm:$0xff]  }
  0x5b   :  { %2981 = vmatpush1.bf16.msra.mxu0 %v4927_v56  ;;  %2743 = vmatprep.mubr.bf16.mxu0 %v4931_v57  ;;  %v5004_v55 = vld [vmem:[%s7224_s0 + $0x3f0] ss:$36 sps:$4 sm:$0xff]   ;;  %v5005_v56 = vld [vmem:[%s7224_s0 + $0x1c0] ss:$36 sps:$4 sm:$0xff]  }
  0x5c   :  { %2982 = vmatprep.subr.bf16.mxu0 %v5354_v0  ;;  %4470 = vmatpush1.bf16.msra.mxu1 %v5448_v14  ;;  %v4957_v14 = vld [vmem:[%s7224_s0 + $0x1f8] ss:$36 sps:$4 sm:$0xff]  }
  0x5d   :  { %4455 = vmatprep.subr.bf16.mxu1 %v5354_v0  ;;  %v5007_v57 = vld [vmem:[%s7224_s0 + $0x43c] ss:$36 sps:$4 sm:$0xff]  }
  0x5f   :  { %2983 = vmatpush1.bf16.msra.mxu0 %v4928_v58  ;;  %v5009_v58 = vld [vmem:[%s7224_s0 + $0x20c] ss:$36 sps:$4 sm:$0xff]  }
  0x60   :  { %2984 = vmatprep.subr.bf16.mxu0 %v5354_v0  ;;  %4471 = vmatpush1.bf16.msra.mxu1 %v5459_v16  ;;  %v4961_v16 = vld [vmem:[%s7224_s0 + $0x244] ss:$36 sps:$4 sm:$0xff]  }
  0x61   :  { %2455 = vmatmul.mubr.bf16.gmra.mrb[16].mxu1 %v4933_v59  ;;  %4456 = vmatprep.subr.bf16.mxu1 %v5354_v0  ;;  %v5110_v59 = vld [vmem:[%s7223_s1 + $0x1d8] sm:$0xff]  }
  0x62   :  { %2744 = vmatmul.mubr.bf16.gmra.mrb[16].mxu0 %v4934_v60  ;;  %2462 = vmatprep.mubr.bf16.mxu1 %v4937_v62  ;;  %v5011_v60 = vld [vmem:[%s7224_s0 + $0x438] ss:$36 sps:$4 sm:$0xff]   ;;  %v5013_v62 = vld [vmem:[%s7224_s0 + $0x484] ss:$36 sps:$4 sm:$0xff]  }
  0x63   :  { %2985 = vmatpush1.bf16.msra.mxu0 %v4935_v61  ;;  %2751 = vmatprep.mubr.bf16.mxu0 %v4939_v63  ;;  %v5012_v61 = vld [vmem:[%s7224_s0 + $0x208] ss:$36 sps:$4 sm:$0xff]   ;;  %v5015_v63 = vld [vmem:[%s7224_s0 + $0x254] ss:$36 sps:$4 sm:$0xff]  }
  0x64   :  { %2986 = vmatprep.subr.bf16.mxu0 %v5354_v0  ;;  %4472 = vmatpush1.bf16.msra.mxu1 %v5470_v18  ;;  %v4965_v18 = vld [vmem:[%s7224_s0 + $0x14] ss:$36 sps:$4 sm:$0xff]  }
  0x65   :  { %4457 = vmatprep.subr.bf16.mxu1 %v5354_v0 }
  0x67   :  { %2987 = vmatpush1.bf16.msra.mxu0 %v4936_v1  ;;  %v5017_v1 = vld [vmem:[%s7224_s0 + $0x480] ss:$36 sps:$4 sm:$0xff]  }
  0x68   :  { %2988 = vmatprep.subr.bf16.mxu0 %v5354_v0  ;;  %4473 = vmatpush1.bf16.msra.mxu1 %v5487_v22  ;;  %v4968_v22 = vld [vmem:[%s7224_s0 + $0x28c] ss:$36 sps:$4 sm:$0xff]  }
  0x69   :  { %2463 = vmatmul.mubr.bf16.gmra.mrb[20].mxu1 %v4941_v2  ;;  %4458 = vmatprep.subr.bf16.mxu1 %v5354_v0  ;;  %v5018_v2 = vld [vmem:[%s7224_s0 + $0x250] ss:$36 sps:$4 sm:$0xff]  }
  0x6a   :  { %2752 = vmatmul.mubr.bf16.gmra.mrb[20].mxu0 %v4942_v3  ;;  %2470 = vmatprep.mubr.bf16.mxu1 %v4945_v4  ;;  %v5020_v3 = vld [vmem:[%s7224_s0 + $0x4cc] ss:$36 sps:$4 sm:$0xff]   ;;  %v5022_v4 = vld [vmem:[%s7224_s0 + $0x29c] ss:$36 sps:$4 sm:$0xff]  }
  0x6b   :  { %2989 = vmatpush1.bf16.msra.mxu0 %v4943_v5  ;;  %2759 = vmatprep.mubr.bf16.mxu0 %v4947_v6  ;;  %v5123_v5 = vld [vmem:[%s7223_s1 + $0x1e0] sm:$0xff]  }
  0x6c   :  { %2990 = vmatprep.subr.bf16.mxu0 %v5354_v0  ;;  %4474 = vmatpush1.bf16.msra.mxu1 %v5498_v24  ;;  %v4970_v24 = vld [vmem:[%s7224_s0 + $0x5c] ss:$36 sps:$4 sm:$0xff]  }
  0x6d   :  { %4459 = vmatprep.subr.bf16.mxu1 %v5354_v0  ;;  %v5912_v6 = vld [vmem:[%s7223_s1 + $0x200] sm:$0xff]  }
  0x6f   :  { %2991 = vmatpush1.bf16.msra.mxu0 %v4944_v7  ;;  %v5024_v7 = vld [vmem:[%s7224_s0 + $0x4c8] ss:$36 sps:$4 sm:$0xff]  }
  0x70   :  { %2992 = vmatprep.subr.bf16.mxu0 %v5354_v0  ;;  %4475 = vmatpush1.bf16.msra.mxu1 %v5509_v26  ;;  %v4980_v26 = vld [vmem:[%s7223_s1 + $0x188] sm:$0xff]  }
  0x71   :  { %2471 = vmatmul.mubr.bf16.gmra.mrb[24].mxu1 %v4949_v8  ;;  %4460 = vmatprep.subr.bf16.mxu1 %v5354_v0  ;;  %v5025_v8 = vld [vmem:[%s7224_s0 + $0x298] ss:$36 sps:$4 sm:$0xff]  }
  0x72   :  { %2760 = vmatmul.mubr.bf16.gmra.mrb[24].mxu0 %v4950_v9  ;;  %2478 = vmatprep.mubr.bf16.mxu1 %v4953_v11  ;;  %v5026_v9 = vld [vmem:[%s7224_s0 + $0x514] ss:$36 sps:$4 sm:$0xff]  }
  0x73   :  { %2993 = vmatpush1.bf16.msra.mxu0 %v4951_v10  ;;  %2767 = vmatprep.mubr.bf16.mxu0 %v4955_v12  ;;  %v5028_v10 = vld [vmem:[%s7224_s0 + $0x2e4] ss:$36 sps:$4 sm:$0xff]   ;;  %v5030_v11 = vld [vmem:[%s7224_s0 + $0x510] ss:$36 sps:$4 sm:$0xff]  }
  0x74   :  { %2994 = vmatprep.subr.bf16.mxu0 %v5354_v0  ;;  %4476 = vmatpush1.bf16.msra.mxu1 %v5520_v28  ;;  %v4974_v28 = vld [vmem:[%s7224_s0 + $0x2d4] ss:$36 sps:$4 sm:$0xff]   ;;  %v5031_v12 = vld [vmem:[%s7224_s0 + $0x2e0] ss:$36 sps:$4 sm:$0xff]  }
  0x75   :  { %4461 = vmatprep.subr.bf16.mxu1 %v5354_v0 }
  0x77   :  { %2995 = vmatpush1.bf16.msra.mxu0 %v4952_v13  ;;  %v5033_v13 = vld [vmem:[%s7224_s0 + $0x55c] ss:$36 sps:$4 sm:$0xff]  }
  0x78   :  { %2996 = vmatprep.subr.bf16.mxu0 %v5354_v0  ;;  %4477 = vmatpush1.bf16.msra.mxu1 %v5531_v30  ;;  %v4993_v30 = vld [vmem:[%s7223_s1 + $0x190] sm:$0xff]  }
  0x79   :  { %2479 = vmatmul.mubr.bf16.gmra.mrb[28].mxu1 %v4957_v14  ;;  %4462 = vmatprep.subr.bf16.mxu1 %v5354_v0  ;;  %v5035_v14 = vld [vmem:[%s7224_s0 + $0x32c] ss:$36 sps:$4 sm:$0xff]  }
  0x7a   :  { %2768 = vmatmul.mubr.bf16.gmra.mrb[28].mxu0 %v4958_v15  ;;  %2486 = vmatprep.mubr.bf16.mxu1 %v4961_v16  ;;  %v5137_v15 = vld [vmem:[%s7223_s1 + $0x1e8] sm:$0xff]   ;;  %v5037_v16 = vld [vmem:[%s7224_s0 + $0x558] ss:$36 sps:$4 sm:$0xff]  }
  0x7b   :  { %2997 = vmatpush1.bf16.msra.mxu0 %v4959_v17  ;;  %3000 = vmatprep.mubr.bf16.mxu0 %v4965_v18  ;;  %v5038_v17 = vld [vmem:[%s7224_s0 + $0x328] ss:$36 sps:$4 sm:$0xff]  }
  0x7c   :  { %2998 = vmatprep.subr.bf16.mxu0 %v5354_v0  ;;  %4478 = vmatpush1.bf16.msra.mxu1 %v5542_v32  ;;  %v5006_v32 = vld [vmem:[%s7223_s1 + $0x198] sm:$0xff]   ;;  %v5039_v18 = vld [vmem:[%s7224_s0 + $0x5a4] ss:$36 sps:$4 sm:$0xff]  }
  0x7d   :  { %4463 = vmatprep.subr.bf16.mxu1 %v5354_v0 }
  0x7f   :  { %2999 = vmatpush1.bf16.msra.mxu0 %v4960_v19  ;;  %v5041_v19 = vld [vmem:[%s7224_s0 + $0x374] ss:$36 sps:$4 sm:$0xff]  }
  0x80   :  { %3257 = vmatprep.subr.bf16.mxu0 %v5354_v0  ;;  %4479 = vmatpush1.bf16.msra.mxu1 %v5553_v34  ;;  %v4981_v34 = vld [vmem:[%s7224_s0 + $0x31c] ss:$36 sps:$4 sm:$0xff]  }
  0x81   :  { %2487 = vmatmul.mubr.bf16.gmra.mrb[32].mxu1 %v4966_v20  ;;  %4368 = vmatprep.subr.bf16.mxu1 %v5912_v6  ;;  %v5043_v20 = vld [vmem:[%s7224_s0 + $0x5a0] ss:$36 sps:$4 sm:$0xff]  }
  0x82   :  { %3001 = vmatmul.mubr.bf16.vlgmr.msra.gmra.mrb[0].mxu0 %v4963_v21  ;;  %2494 = vmatprep.mubr.bf16.mxu1 %v4968_v22  ;;  %v5044_v21 = vld [vmem:[%s7224_s0 + $0x370] ss:$36 sps:$4 sm:$0xff]  }
  0x83   :  { %3258 = vmatpush1.bf16.msra.mxu0 %v4967_v23  ;;  %3008 = vmatprep.mubr.bf16.mxu0 %v4970_v24  ;;  %v5046_v22 = vld [vmem:[%s7224_s0 + $0x5ec] ss:$36 sps:$4 sm:$0xff]   ;;  %v5048_v23 = vld [vmem:[%s7224_s0 + $0x3bc] ss:$36 sps:$4 sm:$0xff]  }
  0x84   :  { %3259 = vmatprep.subr.bf16.mxu0 %v5354_v0  ;;  %v5151_v24 = vld [vmem:[%s7223_s1 + $0x1f0] sm:$0xff]  }
  0x87   :  { %3260 = vmatpush1.bf16.msra.mxu0 %v4980_v26  ;;  %v5051_v26 = vld [vmem:[%s7224_s0 + $0x3b8] ss:$36 sps:$4 sm:$0xff]  }
  0x88   :  { %3261 = vmatprep.subr.bf16.mxu0 %v5354_v0 }
  0x89   :  { %2495 = vmatmul.mubr.bf16.gmra.mrb[36].mxu1 %v4972_v25  ;;  %v5050_v25 = vld [vmem:[%s7224_s0 + $0x5e8] ss:$36 sps:$4 sm:$0xff]  }
  0x8a   :  { %3009 = vmatmul.mubr.bf16.gmra.mrb[4].mxu0 %v4973_v27  ;;  %2502 = vmatprep.mubr.bf16.mxu1 %v4974_v28  ;;  %v5052_v27 = vld [vmem:[%s7224_s0 + $0x634] ss:$36 sps:$4 sm:$0xff]   ;;  %v5054_v28 = vld [vmem:[%s7224_s0 + $0x404] ss:$36 sps:$4 sm:$0xff]  }
  0x8b   :  { %3016 = vmatprep.mubr.bf16.mxu0 %v4976_v29  ;;  %3262 = vmatpush1.bf16.msra.mxu0 %v4993_v30  ;;  %v5057_v29 = vld [vmem:[%s7224_s0 + $0x400] ss:$36 sps:$4 sm:$0xff]  }
  0x8c   :  { %3263 = vmatprep.subr.bf16.mxu0 %v5354_v0  ;;  %v5059_v30 = vld [vmem:[%s7224_s0 + $0x67c] ss:$36 sps:$4 sm:$0xff]  }
  0x8f   :  { %3264 = vmatpush1.bf16.msra.mxu0 %v5006_v32  ;;  %v5164_v32 = vld [vmem:[%s7223_s1 + $0x1f8] sm:$0xff]  }
  0x90   :  { %3265 = vmatprep.subr.bf16.mxu0 %v5354_v0 }
  0x91   :  { %2503 = vmatmul.mubr.bf16.gmra.mrb[40].mxu1 %v4978_v31  ;;  %v5061_v31 = vld [vmem:[%s7224_s0 + $0x44c] ss:$36 sps:$4 sm:$0xff]  }
  0x92   :  { %3017 = vmatmul.mubr.bf16.gmra.mrb[8].mxu0 %v4979_v33  ;;  %2510 = vmatprep.mubr.bf16.mxu1 %v4981_v34  ;;  %v5063_v33 = vld [vmem:[%s7224_s0 + $0x678] ss:$36 sps:$4 sm:$0xff]   ;;  %v5064_v34 = vld [vmem:[%s7224_s0 + $0x448] ss:$36 sps:$4 sm:$0xff]  }
  0x93   :  { %3024 = vmatprep.mubr.bf16.mxu0 %v4983_v35  ;;  %3266 = vmatpush1.bf16.msra.mxu0 %v5019_v36  ;;  %v5065_v35 = vld [vmem:[%s7224_s0 + $0x6c4] ss:$36 sps:$4 sm:$0xff]   ;;  %v5067_v36 = vld [vmem:[%s7224_s0 + $0x494] ss:$36 sps:$4 sm:$0xff]  }
  0x94   :  { %3267 = vmatprep.subr.bf16.mxu0 %v5354_v0 }
  0x97   :  { %3268 = vmatpush1.bf16.msra.mxu0 %v5032_v38  ;;  %v5070_v38 = vld [vmem:[%s7224_s0 + $0x490] ss:$36 sps:$4 sm:$0xff]  }
  0x98   :  { %3269 = vmatprep.subr.bf16.mxu0 %v5354_v0 }
  0x99   :  { %2511 = vmatmul.mubr.bf16.gmra.mrb[44].mxu1 %v4985_v37  ;;  %v5069_v37 = vld [vmem:[%s7224_s0 + $0x6c0] ss:$36 sps:$4 sm:$0xff]  }
  0x9a   :  { %3025 = vmatmul.mubr.bf16.gmra.mrb[12].mxu0 %v4986_v39  ;;  %2518 = vmatprep.mubr.bf16.mxu1 %v4987_v40  ;;  %v5072_v39 = vld [vmem:[%s7224_s0 + $0x70c] ss:$36 sps:$4 sm:$0xff]   ;;  %v5074_v40 = vld [vmem:[%s7224_s0 + $0x4dc] ss:$36 sps:$4 sm:$0xff]  }
  0x9b   :  { %3032 = vmatprep.mubr.bf16.mxu0 %v4989_v41  ;;  %3270 = vmatpush1.bf16.msra.mxu0 %v5045_v42  ;;  %v5076_v41 = vld [vmem:[%s7224_s0 + $0x708] ss:$36 sps:$4 sm:$0xff]   ;;  %v5077_v42 = vld [vmem:[%s7224_s0 + $0x4d8] ss:$36 sps:$4 sm:$0xff]  }
  0x9c   :  { %3271 = vmatprep.subr.bf16.mxu0 %v5354_v0 }
  0x9f   :  { %3272 = vmatpush1.bf16.msra.mxu0 %v5058_v43  ;;  %v5078_v43 = vld [vmem:[%s7224_s0 + $0x754] ss:$36 sps:$4 sm:$0xff]  }
  0xa0   :  { %3273 = vmatprep.subr.bf16.mxu0 %v5354_v0 }
  0xa1   :  { %2519 = vmatmul.mubr.bf16.gmra.mrb[48].mxu1 %v4991_v44  ;;  %v5080_v44 = vld [vmem:[%s7224_s0 + $0x524] ss:$36 sps:$4 sm:$0xff]  }
  0xa2   :  { %3033 = vmatmul.mubr.bf16.gmra.mrb[16].mxu0 %v4992_v45  ;;  %2526 = vmatprep.mubr.bf16.mxu1 %v4994_v46  ;;  %v5082_v45 = vld [vmem:[%s7224_s0 + $0x750] ss:$36 sps:$4 sm:$0xff]   ;;  %v5083_v46 = vld [vmem:[%s7224_s0 + $0x520] ss:$36 sps:$4 sm:$0xff]  }
  0xa3   :  { %3040 = vmatprep.mubr.bf16.mxu0 %v4996_v47  ;;  %3274 = vmatpush1.bf16.msra.mxu0 %v5071_v48  ;;  %v5085_v47 = vld [vmem:[%s7224_s0 + $0x79c] ss:$36 sps:$4 sm:$0xff]   ;;  %v5087_v48 = vld [vmem:[%s7224_s0 + $0x56c] ss:$36 sps:$4 sm:$0xff]  }
  0xa4   :  { %3275 = vmatprep.subr.bf16.mxu0 %v5354_v0 }
  0xa7   :  { %3276 = vmatpush1.bf16.msra.mxu0 %v5084_v49 }
  0xa8   :  { %3277 = vmatprep.subr.bf16.mxu0 %v5354_v0 }
  0xa9   :  { %2527 = vmatmul.mubr.bf16.gmra.mrb[52].mxu1 %v4998_v50 }
  0xaa   :  { %3041 = vmatmul.mubr.bf16.gmra.mrb[20].mxu0 %v4999_v51  ;;  %2534 = vmatprep.mubr.bf16.mxu1 %v5000_v52  ;;  %v5089_v51 = vld [vmem:[%s7224_s0 + $0x798] ss:$36 sps:$4 sm:$0xff]  }
  0xab   :  { %3048 = vmatprep.mubr.bf16.mxu0 %v5002_v53  ;;  %3278 = vmatpush1.bf16.msra.mxu0 %v5097_v54  ;;  %v5090_v53 = vld [vmem:[%s7224_s0 + $0x568] ss:$36 sps:$4 sm:$0xff]  }
  0xac   :  { %3279 = vmatprep.subr.bf16.mxu0 %v5354_v0  ;;  %v5091_v54 = vld [vmem:[%s7224_s0 + $0x7e4] ss:$36 sps:$4 sm:$0xff]  }
  0xaf   :  { %3280 = vmatpush1.bf16.msra.mxu0 %v5110_v59  ;;  %v5095_v59 = vld [vmem:[%s7224_s0 + $0x7e0] ss:$36 sps:$4 sm:$0xff]  }
  0xb0   :  { %3281 = vmatprep.subr.bf16.mxu0 %v5354_v0 }
  0xb1   :  { %2535 = vmatmul.mubr.bf16.gmra.mrb[56].mxu1 %v5004_v55 }
  0xb2   :  { %3049 = vmatmul.mubr.bf16.gmra.mrb[24].mxu0 %v5005_v56  ;;  %2542 = vmatprep.mubr.bf16.mxu1 %v5007_v57  ;;  %v5093_v56 = vld [vmem:[%s7224_s0 + $0x5b4] ss:$36 sps:$4 sm:$0xff]  }
  0xb3   :  { %3056 = vmatprep.mubr.bf16.mxu0 %v5009_v58  ;;  %3282 = vmatpush1.bf16.msra.mxu0 %v5123_v5 }
  0xb4   :  { %3283 = vmatprep.subr.bf16.mxu0 %v5354_v0 }
  0xb7   :  { %3284 = vmatpush1.bf16.msra.mxu0 %v5137_v15  ;;  %v5109_v15 = vld [vmem:[%s7224_s0 + $0x640] ss:$36 sps:$4 sm:$0xff]  }
  0xb8   :  { %3285 = vmatprep.subr.bf16.mxu0 %v5354_v0 }
  0xb9   :  { %2543 = vmatmul.mubr.bf16.gmra.mrb[60].mxu1 %v5011_v60 }
  0xba   :  { %3057 = vmatmul.mubr.bf16.gmra.mrb[28].mxu0 %v5012_v61  ;;  %2550 = vmatprep.mubr.bf16.mxu1 %v5013_v62  ;;  %v5096_v61 = vld [vmem:[%s7224_s0 + $0x5b0] ss:$36 sps:$4 sm:$0xff]  }
  0xbb   :  { %3064 = vmatprep.mubr.bf16.mxu0 %v5015_v63  ;;  %3286 = vmatpush1.bf16.msra.mxu0 %v5151_v24  ;;  %v5098_v62 = vld [vmem:[%s7224_s0 + $0x82c] ss:$36 sps:$4 sm:$0xff]  }
  0xbc   :  { %3287 = vmatprep.subr.bf16.mxu0 %v5354_v0  ;;  %v5056_v0 = vld [vmem:[%s7224_s0 + $0x630] ss:$36 sps:$4 sm:$0xff]  }
  0xbd   :  { %v5119_v24 = vld [vmem:[%s7224_s0 + $0x24c] ss:$36 sps:$4 sm:$0xff]  }
  0xbf   :  { %3288 = vmatpush1.bf16.msra.mxu0 %v5164_v32  ;;  %v5125_v32 = vld [vmem:[%s7224_s0 + $0x294] ss:$36 sps:$4 sm:$0xff]  }
  0xc1   :  { %2551 = vmatmul.mubr.bf16.gmra.mrb[64].mxu1 %v5017_v1  ;;  %v5100_v1 = vld [vmem:[%s7224_s0 + $0x5fc] ss:$36 sps:$4 sm:$0xff]  }
  0xc2   :  { %3065 = vmatmul.mubr.bf16.gmra.mrb[32].mxu0 %v5018_v2  ;;  %2558 = vmatprep.mubr.bf16.mxu1 %v5020_v3 }
  0xc3   :  { %3072 = vmatprep.mubr.bf16.mxu0 %v5022_v4  ;;  %v5102_v4 = vld [vmem:[%s7224_s0 + $0x828] ss:$36 sps:$4 sm:$0xff]  }
  0xc9   :  { %2559 = vmatmul.mubr.bf16.gmra.mrb[68].mxu1 %v5024_v7  ;;  %v5103_v7 = vld [vmem:[%s7224_s0 + $0x5f8] ss:$36 sps:$4 sm:$0xff]  }
  0xca   :  { %3073 = vmatmul.mubr.bf16.gmra.mrb[36].mxu0 %v5025_v8  ;;  %2566 = vmatprep.mubr.bf16.mxu1 %v5026_v9  ;;  %v5104_v8 = vld [vmem:[%s7224_s0 + $0x874] ss:$36 sps:$4 sm:$0xff]  }
  0xcb   :  { %3080 = vmatprep.mubr.bf16.mxu0 %v5028_v10  ;;  %v5106_v10 = vld [vmem:[%s7224_s0 + $0x644] ss:$36 sps:$4 sm:$0xff]  }
  0xd1   :  { %2567 = vmatmul.mubr.bf16.gmra.mrb[72].mxu1 %v5030_v11 }
  0xd2   :  { %3081 = vmatmul.mubr.bf16.gmra.mrb[40].mxu0 %v5031_v12  ;;  %2574 = vmatprep.mubr.bf16.mxu1 %v5033_v13  ;;  %v5108_v13 = vld [vmem:[%s7224_s0 + $0x870] ss:$36 sps:$4 sm:$0xff]  }
  0xd3   :  { %3088 = vmatprep.mubr.bf16.mxu0 %v5035_v14 }
  0xd9   :  { %2575 = vmatmul.mubr.bf16.gmra.mrb[76].mxu1 %v5037_v16  ;;  %v5111_v16 = vld [vmem:[%s7224_s0 + $0x8bc] ss:$36 sps:$4 sm:$0xff]  }
  0xda   :  { %3089 = vmatmul.mubr.bf16.gmra.mrb[44].mxu0 %v5038_v17  ;;  %2582 = vmatprep.mubr.bf16.mxu1 %v5039_v18  ;;  %v5113_v18 = vld [vmem:[%s7224_s0 + $0x68c] ss:$36 sps:$4 sm:$0xff]  }
  0xdb   :  { %3096 = vmatprep.mubr.bf16.mxu0 %v5041_v19 }
  0xe1   :  { %2583 = vmatmul.mubr.bf16.gmra.mrb[80].mxu1 %v5043_v20 }
  0xe2   :  { %3097 = vmatmul.mubr.bf16.gmra.mrb[48].mxu0 %v5044_v21  ;;  %2590 = vmatprep.mubr.bf16.mxu1 %v5046_v22  ;;  %v5115_v21 = vld [vmem:[%s7224_s0 + $0x8b8] ss:$36 sps:$4 sm:$0xff]  }
  0xe3   :  { %3104 = vmatprep.mubr.bf16.mxu0 %v5048_v23  ;;  %v5116_v23 = vld [vmem:[%s7224_s0 + $0x688] ss:$36 sps:$4 sm:$0xff]  }
  0xe9   :  { %2591 = vmatmul.mubr.bf16.gmra.mrb[84].mxu1 %v5050_v25 }
  0xea   :  { %3105 = vmatmul.mubr.bf16.gmra.mrb[52].mxu0 %v5051_v26  ;;  %2598 = vmatprep.mubr.bf16.mxu1 %v5052_v27  ;;  %v5120_v26 = vld [vmem:[%s7224_s0 + $0x6d4] ss:$36 sps:$4 sm:$0xff]  }
  0xeb   :  { %3112 = vmatprep.mubr.bf16.mxu0 %v5054_v28 }
  0xf1   :  { %2599 = vmatmul.mubr.bf16.gmra.mrb[88].mxu1 %v5056_v0  ;;  %v5117_v0 = vld [vmem:[%s7224_s0 + $0x248] ss:$36 sps:$4 sm:$0xff]  }
  0xf2   :  { %3113 = vmatmul.mubr.bf16.gmra.mrb[56].mxu0 %v5057_v29  ;;  %2606 = vmatprep.mubr.bf16.mxu1 %v5059_v30  ;;  %v5122_v30 = vld [vmem:[%s7224_s0 + $0x6d0] ss:$36 sps:$4 sm:$0xff]  }
  0xf3   :  { %3120 = vmatprep.mubr.bf16.mxu0 %v5061_v31 }
  0xf9   :  { %2607 = vmatmul.mubr.bf16.gmra.mrb[92].mxu1 %v5063_v33  ;;  %v5127_v33 = vld [vmem:[%s7224_s0 + $0x71c] ss:$36 sps:$4 sm:$0xff]  }
  0xfa   :  { %3121 = vmatmul.mubr.bf16.gmra.mrb[60].mxu0 %v5064_v34  ;;  %2614 = vmatprep.mubr.bf16.mxu1 %v5065_v35  ;;  %v5144_v34 = vld [vmem:[%s7223_s1 + $0x208] sm:$0xff]   ;;  %v5165_v35 = vld [vmem:[%s7223_s1 + $0x210] sm:$0xff]  }
  0xfb   :  { %3128 = vmatprep.mubr.bf16.mxu0 %v5067_v36 }
 0x101   :  { %2615 = vmatmul.mubr.bf16.gmra.mrb[96].mxu1 %v5069_v37 }
 0x102   :  { %3129 = vmatmul.mubr.bf16.gmra.mrb[64].mxu0 %v5070_v38  ;;  %2622 = vmatprep.mubr.bf16.mxu1 %v5072_v39  ;;  %v5129_v38 = vld [vmem:[%s7224_s0 + $0x290] ss:$36 sps:$4 sm:$0xff]  }
 0x103   :  { %3136 = vmatprep.mubr.bf16.mxu0 %v5074_v40  ;;  %v5131_v40 = vld [vmem:[%s7224_s0 + $0x2dc] ss:$36 sps:$4 sm:$0xff]  }
 0x109   :  { %2623 = vmatmul.mubr.bf16.gmra.mrb[100].mxu1 %v5076_v41 }
 0x10a   :  { %3137 = vmatmul.mubr.bf16.gmra.mrb[68].mxu0 %v5077_v42  ;;  %2630 = vmatprep.mubr.bf16.mxu1 %v5078_v43  ;;  %v5133_v42 = vld [vmem:[%s7224_s0 + $0x764] ss:$36 sps:$4 sm:$0xff]   ;;  %v5184_v43 = vld [vmem:[%s7223_s1 + $0x218] sm:$0xff]  }
 0x10b   :  { %3144 = vmatprep.mubr.bf16.mxu0 %v5080_v44 }
 0x111   :  { %2631 = vmatmul.mubr.bf16.gmra.mrb[104].mxu1 %v5082_v45  ;;  %v5203_v45 = vld [vmem:[%s7223_s1 + $0x220] sm:$0xff]  }
 0x112   :  { %3145 = vmatmul.mubr.bf16.gmra.mrb[72].mxu0 %v5083_v46  ;;  %2638 = vmatprep.mubr.bf16.mxu1 %v5085_v47  ;;  %v5135_v47 = vld [vmem:[%s7224_s0 + $0x2d8] ss:$36 sps:$4 sm:$0xff]  }
 0x113   :  { %3152 = vmatprep.mubr.bf16.mxu0 %v5087_v48 }
 0x114   :  { %v6047_v49 = vpop.f32.mrb[0].mxu1 }
 0x115   :  { %v2426_v50 = vpop.f32.mrb[1].mxu1 }
 0x116   :  { %v6052_v52 = vpop.f32.mrb[2].mxu1  ;;  %v5136_v50 = vld [vmem:[%s7224_s0 + $0x760] ss:$36 sps:$4 sm:$0xff]  }
 0x117   :  { %v2429_v55 = vpop.f32.mrb[3].mxu1 }
 0x118   :  { %v5222_v55 = vld [vmem:[%s7223_s1 + $0x228] sm:$0xff]  }
 0x119   :  { %2639 = vmatmul.mubr.bf16.gmra.mrb[108].mxu1 %v5089_v51  ;;  %v5138_v51 = vld [vmem:[%s7224_s0 + $0x324] ss:$36 sps:$4 sm:$0xff]  }
 0x11a   :  { %3153 = vmatmul.mubr.bf16.gmra.mrb[76].mxu0 %v5090_v53  ;;  %2646 = vmatprep.mubr.bf16.mxu1 %v5091_v54  ;;  %v5140_v54 = vld [vmem:[%s7224_s0 + $0x7ac] ss:$36 sps:$4 sm:$0xff]  }
 0x11b   :  { %3160 = vmatprep.mubr.bf16.mxu0 %v5093_v56  ;;  %v5241_v56 = vld [vmem:[%s7223_s1 + $0x230] sm:$0xff]  }
 0x11c   :  { %v6063_v57 = vpop.f32.mrb[4].mxu1 }
 0x11d   :  { %v2434_v58 = vpop.f32.mrb[5].mxu1 }
 0x11e   :  { %v6068_v60 = vpop.f32.mrb[6].mxu1  ;;  %v5142_v58 = vld [vmem:[%s7224_s0 + $0x320] ss:$36 sps:$4 sm:$0xff]  }
 0x11f   :  { %v2437_v63 = vpop.f32.mrb[7].mxu1 }
 0x120   :  { %v5149_v63 = vld [vmem:[%s7224_s0 + $0x368] ss:$36 sps:$4 sm:$0xff]  }
 0x121   :  { %2647 = vmatmul.mubr.bf16.gmra.mrb[112].mxu1 %v5095_v59  ;;  %v5143_v59 = vld [vmem:[%s7224_s0 + $0x7a8] ss:$36 sps:$4 sm:$0xff]  }
 0x122   :  { %3161 = vmatmul.mubr.bf16.gmra.mrb[80].mxu0 %v5096_v61  ;;  %2654 = vmatprep.mubr.bf16.mxu1 %v5098_v62  ;;  %v5145_v61 = vld [vmem:[%s7224_s0 + $0x36c] ss:$36 sps:$4 sm:$0xff]   ;;  %v5147_v62 = vld [vmem:[%s7224_s0 + $0x7f4] ss:$36 sps:$4 sm:$0xff]  }
 0x123   :  { %3168 = vmatprep.mubr.bf16.mxu0 %v5100_v1  ;;  %v5150_v1 = vld [vmem:[%s7224_s0 + $0x7f0] ss:$36 sps:$4 sm:$0xff]  }
 0x124   :  { %v6079_v2 = vpop.f32.mrb[8].mxu1 }
 0x125   :  { %v2442_v3 = vpop.f32.mrb[9].mxu1 }
 0x126   :  { %v6084_v5 = vpop.f32.mrb[10].mxu1  ;;  %v5152_v3 = vld [vmem:[%s7224_s0 + $0x3b4] ss:$36 sps:$4 sm:$0xff]  }
 0x127   :  { %v2445_v9 = vpop.f32.mrb[11].mxu1 }
 0x128   :  { %v5158_v9 = vld [vmem:[%s7224_s0 + $0x3fc] ss:$36 sps:$4 sm:$0xff]  }
 0x129   :  { %2655 = vmatmul.mubr.bf16.gmra.mrb[116].mxu1 %v5102_v4  ;;  %v5154_v4 = vld [vmem:[%s7224_s0 + $0x83c] ss:$36 sps:$4 sm:$0xff]  }
 0x12a   :  { %3169 = vmatmul.mubr.bf16.gmra.mrb[84].mxu0 %v5103_v7  ;;  %2662 = vmatprep.mubr.bf16.mxu1 %v5104_v8  ;;  %v5156_v7 = vld [vmem:[%s7224_s0 + $0x3b0] ss:$36 sps:$4 sm:$0xff]   ;;  %v5157_v8 = vld [vmem:[%s7224_s0 + $0x838] ss:$36 sps:$4 sm:$0xff]  }
 0x12b   :  { %3176 = vmatprep.mubr.bf16.mxu0 %v5106_v10  ;;  %v5160_v10 = vld [vmem:[%s7224_s0 + $0x884] ss:$36 sps:$4 sm:$0xff]  }
 0x12c   :  { %v6095_v11 = vpop.f32.mrb[12].mxu1 }
 0x12d   :  { %v2450_v12 = vpop.f32.mrb[13].mxu1 }
 0x12e   :  { %v6100_v14 = vpop.f32.mrb[14].mxu1  ;;  %v5260_v12 = vld [vmem:[%s7223_s1 + $0x238] sm:$0xff]  }
 0x12f   :  { %v2453_v17 = vpop.f32.mrb[15].mxu1 }
 0x130   :  { %v5168_v17 = vld [vmem:[%s7224_s0 + $0x8cc] ss:$36 sps:$4 sm:$0xff]  }
 0x131   :  { %2663 = vmatmul.mubr.bf16.gmra.mrb[120].mxu1 %v5108_v13  ;;  %v5162_v13 = vld [vmem:[%s7224_s0 + $0x3f8] ss:$36 sps:$4 sm:$0xff]  }
 0x132   :  { %3177 = vmatmul.mubr.bf16.gmra.mrb[88].mxu0 %v5109_v15  ;;  %2670 = vmatprep.mubr.bf16.mxu1 %v5111_v16  ;;  %v5163_v15 = vld [vmem:[%s7224_s0 + $0x880] ss:$36 sps:$4 sm:$0xff]  }
 0x133   :  { %3184 = vmatprep.mubr.bf16.mxu0 %v5113_v18  ;;  %v5166_v16 = vld [vmem:[%s7224_s0 + $0x444] ss:$36 sps:$4 sm:$0xff]  }
 0x134   :  { %v6111_v19 = vpop.f32.mrb[16].mxu1  ;;  %v5170_v18 = vld [vmem:[%s7224_s0 + $0x440] ss:$36 sps:$4 sm:$0xff]  }
 0x135   :  { %v2458_v20 = vpop.f32.mrb[17].mxu1 }
 0x136   :  { %v6116_v22 = vpop.f32.mrb[18].mxu1  ;;  %v5171_v20 = vld [vmem:[%s7224_s0 + $0x8c8] ss:$36 sps:$4 sm:$0xff]  }
 0x137   :  { %v2461_v25 = vpop.f32.mrb[19].mxu1 }
 0x138   :  { %v5174_v25 = vld [vmem:[%s7224_s0 + $0x18] ss:$36 sps:$4 sm:$0xff]  }
 0x139   :  { %2671 = vmatmul.mubr.bf16.gmra.mrb[124].mxu1 %v5115_v21  ;;  %v5172_v21 = vld [vmem:[%s7224_s0 + $0x48c] ss:$36 sps:$4 sm:$0xff]  }
 0x13a   :  { %3185 = vmatmul.mubr.bf16.gmra.mrb[92].mxu0 %v5116_v23  ;;  %2775 = vmatprep.mubr.bf16.mxu1 %v5119_v24  ;;  %v5176_v23 = vld [vmem:[%s7224_s0 + $0x1c] ss:$36 sps:$4 sm:$0xff]   ;;  %v5177_v24 = vld [vmem:[%s7224_s0 + $0x488] ss:$36 sps:$4 sm:$0xff]  }
 0x13b   :  { %3192 = vmatprep.mubr.bf16.mxu0 %v5120_v26  ;;  %v5178_v26 = vld [vmem:[%s7224_s0 + $0x4d4] ss:$36 sps:$4 sm:$0xff]  }
 0x13c   :  { %v6127_v27 = vpop.f32.mrb[20].mxu1 }
 0x13d   :  { %v2466_v28 = vpop.f32.mrb[21].mxu1 }
 0x13e   :  { %v6132_v29 = vpop.f32.mrb[22].mxu1  ;;  %v5180_v28 = vld [vmem:[%s7224_s0 + $0x64] ss:$36 sps:$4 sm:$0xff]  }
 0x13f   :  { %v2469_v31 = vpop.f32.mrb[23].mxu1 }
 0x140   :  { %v5185_v31 = vld [vmem:[%s7224_s0 + $0x51c] ss:$36 sps:$4 sm:$0xff]  }
 0x141   :  { %2776 = vmatmul.mubr.bf16.vlgmr.msra.gmra.mrb[32].mxu1 %v5117_v0  ;;  %v5182_v0 = vld [vmem:[%s7224_s0 + $0x4d0] ss:$36 sps:$4 sm:$0xff]  }
 0x142   :  { %3193 = vmatmul.mubr.bf16.gmra.mrb[96].mxu0 %v5122_v30  ;;  %4369 = vmatpush3.bf16.msra.mxu1 %v5912_v6  ;;  %v5130_v6 = vld [vmem:[%s7224_s0 + $0x718] ss:$36 sps:$4 sm:$0xff]   ;;  %v5183_v30 = vld [vmem:[%s7224_s0 + $0x60] ss:$36 sps:$4 sm:$0xff]  }
 0x143   :  { %2783 = vmatprep.mubr.bf16.mxu1 %v5125_v32  ;;  %3200 = vmatprep.mubr.bf16.mxu0 %v5127_v33  ;;  %v5187_v32 = vld [vmem:[%s7224_s0 + $0xac] ss:$36 sps:$4 sm:$0xff]   ;;  %v5189_v33 = vld [vmem:[%s7224_s0 + $0x518] ss:$36 sps:$4 sm:$0xff]  }
 0x144   :  { %v6150_v36 = vpop.f32.mrb[24].mxu1  ;;  %4370 = vmatprep.subr.bf16.mxu1 %v5144_v34 }
 0x145   :  { %v2474_v37 = vpop.f32.mrb[25].mxu1 }
 0x146   :  { %v6155_v39 = vpop.f32.mrb[26].mxu1  ;;  %4371 = vmatpush3.bf16.msra.mxu1 %v5144_v34  ;;  %v5190_v34 = vld [vmem:[%s7224_s0 + $0xa8] ss:$36 sps:$4 sm:$0xff]   ;;  %v5193_v37 = vld [vmem:[%s7224_s0 + $0xf4] ss:$36 sps:$4 sm:$0xff]  }
 0x147   :  { %v2477_v41 = vpop.f32.mrb[27].mxu1  ;;  %4372 = vmatprep.subr.bf16.mxu1 %v5165_v35 }
 0x148   :  { %v5199_v41 = vld [vmem:[%s7224_s0 + $0x13c] ss:$36 sps:$4 sm:$0xff]  }
 0x149   :  { %2784 = vmatmul.mubr.bf16.gmra.mrb[36].mxu1 %v5129_v38  ;;  %v5195_v38 = vld [vmem:[%s7224_s0 + $0x560] ss:$36 sps:$4 sm:$0xff]  }
 0x14a   :  { %3201 = vmatmul.mubr.bf16.gmra.mrb[100].mxu0 %v5130_v6  ;;  %2791 = vmatprep.mubr.bf16.mxu1 %v5131_v40  ;;  %v5196_v6 = vld [vmem:[%s7224_s0 + $0xf0] ss:$36 sps:$4 sm:$0xff]  }
 0x14b   :  { %3208 = vmatprep.mubr.bf16.mxu0 %v5133_v42  ;;  %4373 = vmatpush3.bf16.msra.mxu1 %v5165_v35  ;;  %v5191_v35 = vld [vmem:[%s7224_s0 + $0x564] ss:$36 sps:$4 sm:$0xff]   ;;  %v5197_v40 = vld [vmem:[%s7224_s0 + $0x5ac] ss:$36 sps:$4 sm:$0xff]  }
 0x14c   :  { %v6169_v44 = vpop.f32.mrb[28].mxu1  ;;  %4374 = vmatprep.subr.bf16.mxu1 %v5184_v43  ;;  %v5201_v42 = vld [vmem:[%s7224_s0 + $0x5a8] ss:$36 sps:$4 sm:$0xff]  }
 0x14d   :  { %v2482_v46 = vpop.f32.mrb[29].mxu1 }
 0x14e   :  { %v6177_v48 = vpop.f32.mrb[30].mxu1  ;;  %v5206_v46 = vld [vmem:[%s7224_s0 + $0x184] ss:$36 sps:$4 sm:$0xff]  }
 0x14f   :  { %v2485_v53 = vpop.f32.mrb[31].mxu1  ;;  %4375 = vmatpush3.bf16.msra.mxu1 %v5184_v43  ;;  %v5202_v43 = vld [vmem:[%s7224_s0 + $0x138] ss:$36 sps:$4 sm:$0xff]  }
 0x150   :  { %4376 = vmatprep.subr.bf16.mxu1 %v5203_v45  ;;  %v5212_v53 = vld [vmem:[%s7224_s0 + $0x1cc] ss:$36 sps:$4 sm:$0xff]  }
 0x151   :  { %2792 = vmatmul.mubr.bf16.gmra.mrb[40].mxu1 %v5135_v47  ;;  %v5208_v47 = vld [vmem:[%s7224_s0 + $0x5f0] ss:$36 sps:$4 sm:$0xff]  }
 0x152   :  { %3209 = vmatmul.mubr.bf16.gmra.mrb[104].mxu0 %v5136_v50  ;;  %2799 = vmatprep.mubr.bf16.mxu1 %v5138_v51  ;;  %v5209_v50 = vld [vmem:[%s7224_s0 + $0x180] ss:$36 sps:$4 sm:$0xff]  }
 0x153   :  { %3216 = vmatprep.mubr.bf16.mxu0 %v5140_v54  ;;  %4377 = vmatpush3.bf16.msra.mxu1 %v5203_v45  ;;  %v5204_v45 = vld [vmem:[%s7224_s0 + $0x5f4] ss:$36 sps:$4 sm:$0xff]   ;;  %v5210_v51 = vld [vmem:[%s7224_s0 + $0x63c] ss:$36 sps:$4 sm:$0xff]  }
 0x154   :  { %4378 = vmatprep.subr.bf16.mxu1 %v5222_v55  ;;  %v5214_v54 = vld [vmem:[%s7224_s0 + $0x638] ss:$36 sps:$4 sm:$0xff]  }
 0x157   :  { %4379 = vmatpush3.bf16.msra.mxu1 %v5222_v55  ;;  %v5215_v55 = vld [vmem:[%s7224_s0 + $0x1c8] ss:$36 sps:$4 sm:$0xff]  }
 0x158   :  { %4380 = vmatprep.subr.bf16.mxu1 %v5241_v56 }
 0x159   :  { %2800 = vmatmul.mubr.bf16.gmra.mrb[44].mxu1 %v5142_v58  ;;  %v5218_v58 = vld [vmem:[%s7224_s0 + $0x214] ss:$36 sps:$4 sm:$0xff]  }
 0x15a   :  { %3217 = vmatmul.mubr.bf16.gmra.mrb[108].mxu0 %v5143_v59  ;;  %2807 = vmatprep.mubr.bf16.mxu1 %v5145_v61  ;;  %v5220_v59 = vld [vmem:[%s7224_s0 + $0x680] ss:$36 sps:$4 sm:$0xff]   ;;  %v5221_v61 = vld [vmem:[%s7224_s0 + $0x210] ss:$36 sps:$4 sm:$0xff]  }
 0x15b   :  { %3224 = vmatprep.mubr.bf16.mxu0 %v5147_v62  ;;  %4381 = vmatpush3.bf16.msra.mxu1 %v5241_v56  ;;  %v5216_v56 = vld [vmem:[%s7224_s0 + $0x684] ss:$36 sps:$4 sm:$0xff]   ;;  %v5223_v62 = vld [vmem:[%s7224_s0 + $0x6cc] ss:$36 sps:$4 sm:$0xff]  }
 0x15c   :  { %4382 = vmatprep.subr.bf16.mxu1 %v5260_v12 }
 0x15f   :  { %4383 = vmatpush3.bf16.msra.mxu1 %v5260_v12  ;;  %v5237_v12 = vld [vmem:[%s7224_s0 + $0x2ec] ss:$36 sps:$4 sm:$0xff]  }
 0x161   :  { %2808 = vmatmul.mubr.bf16.gmra.mrb[48].mxu1 %v5149_v63  ;;  %v5225_v63 = vld [vmem:[%s7224_s0 + $0x25c] ss:$36 sps:$4 sm:$0xff]  }
 0x162   :  { %3225 = vmatmul.mubr.bf16.gmra.mrb[112].mxu0 %v5150_v1  ;;  %2815 = vmatprep.mubr.bf16.mxu1 %v5152_v3  ;;  %v5227_v1 = vld [vmem:[%s7224_s0 + $0x6c8] ss:$36 sps:$4 sm:$0xff]   ;;  %v5228_v3 = vld [vmem:[%s7224_s0 + $0x258] ss:$36 sps:$4 sm:$0xff]  }
 0x163   :  { %3232 = vmatprep.mubr.bf16.mxu0 %v5154_v4  ;;  %v5229_v4 = vld [vmem:[%s7224_s0 + $0x714] ss:$36 sps:$4 sm:$0xff]  }
 0x169   :  { %2816 = vmatmul.mubr.bf16.gmra.mrb[52].mxu1 %v5156_v7  ;;  %v5231_v7 = vld [vmem:[%s7224_s0 + $0x2a4] ss:$36 sps:$4 sm:$0xff]  }
 0x16a   :  { %3233 = vmatmul.mubr.bf16.gmra.mrb[116].mxu0 %v5157_v8  ;;  %2823 = vmatprep.mubr.bf16.mxu1 %v5158_v9  ;;  %v5233_v8 = vld [vmem:[%s7224_s0 + $0x710] ss:$36 sps:$4 sm:$0xff]   ;;  %v5234_v9 = vld [vmem:[%s7224_s0 + $0x2a0] ss:$36 sps:$4 sm:$0xff]  }
 0x16b   :  { %3240 = vmatprep.mubr.bf16.mxu0 %v5160_v10  ;;  %v5235_v10 = vld [vmem:[%s7224_s0 + $0x75c] ss:$36 sps:$4 sm:$0xff]  }
 0x171   :  { %2824 = vmatmul.mubr.bf16.gmra.mrb[56].mxu1 %v5162_v13  ;;  %v5239_v13 = vld [vmem:[%s7224_s0 + $0x758] ss:$36 sps:$4 sm:$0xff]  }
 0x172   :  { %3241 = vmatmul.mubr.bf16.gmra.mrb[120].mxu0 %v5163_v15  ;;  %2831 = vmatprep.mubr.bf16.mxu1 %v5166_v16  ;;  %v5240_v15 = vld [vmem:[%s7224_s0 + $0x2e8] ss:$36 sps:$4 sm:$0xff]  }
 0x173   :  { %3248 = vmatprep.mubr.bf16.mxu0 %v5168_v17  ;;  %v5242_v16 = vld [vmem:[%s7224_s0 + $0x7a4] ss:$36 sps:$4 sm:$0xff]   ;;  %v5244_v17 = vld [vmem:[%s7224_s0 + $0x334] ss:$36 sps:$4 sm:$0xff]  }
 0x179   :  { %2832 = vmatmul.mubr.bf16.gmra.mrb[60].mxu1 %v5170_v18  ;;  %v5246_v18 = vld [vmem:[%s7224_s0 + $0x7a0] ss:$36 sps:$4 sm:$0xff]  }
 0x17a   :  { %3249 = vmatmul.mubr.bf16.gmra.mrb[124].mxu0 %v5171_v20  ;;  %2839 = vmatprep.mubr.bf16.mxu1 %v5172_v21  ;;  %v5247_v20 = vld [vmem:[%s7224_s0 + $0x330] ss:$36 sps:$4 sm:$0xff]  }
 0x17b   :  { %3289 = vmatprep.mubr.bf16.mxu0 %v5176_v23  ;;  %v5248_v21 = vld [vmem:[%s7224_s0 + $0x7ec] ss:$36 sps:$4 sm:$0xff]   ;;  %v5250_v23 = vld [vmem:[%s7224_s0 + $0x37c] ss:$36 sps:$4 sm:$0xff]  }
 0x181   :  { %2840 = vmatmul.mubr.bf16.gmra.mrb[64].mxu1 %v5177_v24  ;;  %v5252_v24 = vld [vmem:[%s7224_s0 + $0x7e8] ss:$36 sps:$4 sm:$0xff]  }
 0x182   :  { %3290 = vmatmul.mubr.bf16.vlgmr.msra.gmra.mrb[0].mxu0 %v5174_v25  ;;  %2847 = vmatprep.mubr.bf16.mxu1 %v5178_v26  ;;  %v5253_v25 = vld [vmem:[%s7224_s0 + $0x378] ss:$36 sps:$4 sm:$0xff]  }
 0x183   :  { %3297 = vmatprep.mubr.bf16.mxu0 %v5180_v28  ;;  %v5254_v26 = vld [vmem:[%s7224_s0 + $0x834] ss:$36 sps:$4 sm:$0xff]   ;;  %v5256_v28 = vld [vmem:[%s7224_s0 + $0x3c4] ss:$36 sps:$4 sm:$0xff]  }
 0x189   :  { %2848 = vmatmul.mubr.bf16.gmra.mrb[68].mxu1 %v5182_v0  ;;  %v5258_v0 = vld [vmem:[%s7224_s0 + $0x830] ss:$36 sps:$4 sm:$0xff]  }
 0x18a   :  { %3298 = vmatmul.mubr.bf16.gmra.mrb[4].mxu0 %v5183_v30  ;;  %2855 = vmatprep.mubr.bf16.mxu1 %v5185_v31  ;;  %v5259_v30 = vld [vmem:[%s7224_s0 + $0x3c0] ss:$36 sps:$4 sm:$0xff]  }
 0x18b   :  { %3305 = vmatprep.mubr.bf16.mxu0 %v5187_v32  ;;  %v5261_v31 = vld [vmem:[%s7224_s0 + $0x87c] ss:$36 sps:$4 sm:$0xff]   ;;  %v5263_v32 = vld [vmem:[%s7224_s0 + $0x40c] ss:$36 sps:$4 sm:$0xff]  }
 0x191   :  { %2856 = vmatmul.mubr.bf16.gmra.mrb[72].mxu1 %v5189_v33  ;;  %v5265_v33 = vld [vmem:[%s7224_s0 + $0x878] ss:$36 sps:$4 sm:$0xff]  }
 0x192   :  { %3306 = vmatmul.mubr.bf16.gmra.mrb[8].mxu0 %v5190_v34  ;;  %2863 = vmatprep.mubr.bf16.mxu1 %v5191_v35  ;;  %v5266_v34 = vld [vmem:[%s7224_s0 + $0x408] ss:$36 sps:$4 sm:$0xff]  }
 0x193   :  { %3313 = vmatprep.mubr.bf16.mxu0 %v5193_v37  ;;  %v5267_v35 = vld [vmem:[%s7224_s0 + $0x8c4] ss:$36 sps:$4 sm:$0xff]   ;;  %v5269_v37 = vld [vmem:[%s7224_s0 + $0x454] ss:$36 sps:$4 sm:$0xff]  }
 0x199   :  { %2864 = vmatmul.mubr.bf16.gmra.mrb[76].mxu1 %v5195_v38  ;;  %v5271_v38 = vld [vmem:[%s7224_s0 + $0x8c0] ss:$36 sps:$4 sm:$0xff]  }
 0x19a   :  { %3314 = vmatmul.mubr.bf16.gmra.mrb[12].mxu0 %v5196_v6  ;;  %2871 = vmatprep.mubr.bf16.mxu1 %v5197_v40  ;;  %v5272_v6 = vld [vmem:[%s7224_s0 + $0x450] ss:$36 sps:$4 sm:$0xff]   ;;  %v5275_v40 = vld [vmem:[%s7224_s0 + $0x20] ss:$36 sps:$4 sm:$0xff]  }
 0x19b   :  { %3321 = vmatprep.mubr.bf16.mxu0 %v5199_v41  ;;  %v5273_v41 = vld [vmem:[%s7224_s0 + $0x49c] ss:$36 sps:$4 sm:$0xff]  }
 0x1a1   :  { %2872 = vmatmul.mubr.bf16.gmra.mrb[80].mxu1 %v5201_v42  ;;  %v5277_v42 = vld [vmem:[%s7224_s0 + $0x68] ss:$36 sps:$4 sm:$0xff]  }
 0x1a2   :  { %3322 = vmatmul.mubr.bf16.gmra.mrb[16].mxu0 %v5202_v43  ;;  %2879 = vmatprep.mubr.bf16.mxu1 %v5204_v45  ;;  %v5276_v43 = vld [vmem:[%s7224_s0 + $0x498] ss:$36 sps:$4 sm:$0xff]   ;;  %v5280_v45 = vld [vmem:[%s7224_s0 + $0xb0] ss:$36 sps:$4 sm:$0xff]  }
 0x1a3   :  { %3329 = vmatprep.mubr.bf16.mxu0 %v5206_v46  ;;  %v5278_v46 = vld [vmem:[%s7224_s0 + $0x4e4] ss:$36 sps:$4 sm:$0xff]  }
 0x1a9   :  { %2880 = vmatmul.mubr.bf16.gmra.mrb[84].mxu1 %v5208_v47  ;;  %v5282_v47 = vld [vmem:[%s7224_s0 + $0xf8] ss:$36 sps:$4 sm:$0xff]  }
 0x1aa   :  { %3330 = vmatmul.mubr.bf16.gmra.mrb[20].mxu0 %v5209_v50  ;;  %2887 = vmatprep.mubr.bf16.mxu1 %v5210_v51  ;;  %v5281_v50 = vld [vmem:[%s7224_s0 + $0x4e0] ss:$36 sps:$4 sm:$0xff]  }
 0x1ab   :  { %3337 = vmatprep.mubr.bf16.mxu0 %v5212_v53  ;;  %v5285_v51 = vld [vmem:[%s7224_s0 + $0x140] ss:$36 sps:$4 sm:$0xff]   ;;  %v5283_v53 = vld [vmem:[%s7224_s0 + $0x52c] ss:$36 sps:$4 sm:$0xff]  }
 0x1b1   :  { %2888 = vmatmul.mubr.bf16.gmra.mrb[88].mxu1 %v5214_v54  ;;  %v5287_v54 = vld [vmem:[%s7224_s0 + $0x188] ss:$36 sps:$4 sm:$0xff]  }
 0x1b2   :  { %3338 = vmatmul.mubr.bf16.gmra.mrb[24].mxu0 %v5215_v55  ;;  %2895 = vmatprep.mubr.bf16.mxu1 %v5216_v56  ;;  %v5286_v55 = vld [vmem:[%s7224_s0 + $0x528] ss:$36 sps:$4 sm:$0xff]   ;;  %v5290_v56 = vld [vmem:[%s7224_s0 + $0x1d0] ss:$36 sps:$4 sm:$0xff]  }
 0x1b3   :  { %3345 = vmatprep.mubr.bf16.mxu0 %v5218_v58  ;;  %v5288_v58 = vld [vmem:[%s7224_s0 + $0x574] ss:$36 sps:$4 sm:$0xff]  }
 0x1b9   :  { %2896 = vmatmul.mubr.bf16.gmra.mrb[92].mxu1 %v5220_v59 }
 0x1ba   :  { %3346 = vmatmul.mubr.bf16.gmra.mrb[28].mxu0 %v5221_v61  ;;  %2903 = vmatprep.mubr.bf16.mxu1 %v5223_v62  ;;  %v5292_v62 = vld [vmem:[%s7224_s0 + $0x218] ss:$36 sps:$4 sm:$0xff]  }
 0x1bb   :  { %3353 = vmatprep.mubr.bf16.mxu0 %v5225_v63 }
 0x1c1   :  { %2904 = vmatmul.mubr.bf16.gmra.mrb[96].mxu1 %v5227_v1  ;;  %v5291_v1 = vld [vmem:[%s7224_s0 + $0x570] ss:$36 sps:$4 sm:$0xff]  }
 0x1c2   :  { %3354 = vmatmul.mubr.bf16.gmra.mrb[32].mxu0 %v5228_v3  ;;  %2911 = vmatprep.mubr.bf16.mxu1 %v5229_v4  ;;  %v5295_v3 = vld [vmem:[%s7224_s0 + $0x260] ss:$36 sps:$4 sm:$0xff]  }
 0x1c3   :  { %3361 = vmatprep.mubr.bf16.mxu0 %v5231_v7  ;;  %v5293_v7 = vld [vmem:[%s7224_s0 + $0x5bc] ss:$36 sps:$4 sm:$0xff]  }
 0x1c9   :  { %2912 = vmatmul.mubr.bf16.gmra.mrb[100].mxu1 %v5233_v8 }
 0x1ca   :  { %3362 = vmatmul.mubr.bf16.gmra.mrb[36].mxu0 %v5234_v9  ;;  %2919 = vmatprep.mubr.bf16.mxu1 %v5235_v10  ;;  %v5297_v10 = vld [vmem:[%s7224_s0 + $0x2a8] ss:$36 sps:$4 sm:$0xff]  }
 0x1cb   :  { %3369 = vmatprep.mubr.bf16.mxu0 %v5237_v12 }
 0x1d1   :  { %2920 = vmatmul.mubr.bf16.gmra.mrb[104].mxu1 %v5239_v13  ;;  %v5296_v13 = vld [vmem:[%s7224_s0 + $0x5b8] ss:$36 sps:$4 sm:$0xff]  }
 0x1d2   :  { %3370 = vmatmul.mubr.bf16.gmra.mrb[40].mxu0 %v5240_v15  ;;  %2927 = vmatprep.mubr.bf16.mxu1 %v5242_v16  ;;  %v5300_v15 = vld [vmem:[%s7224_s0 + $0x2f0] ss:$36 sps:$4 sm:$0xff]  }
 0x1d3   :  { %3377 = vmatprep.mubr.bf16.mxu0 %v5244_v17  ;;  %v5298_v17 = vld [vmem:[%s7224_s0 + $0x604] ss:$36 sps:$4 sm:$0xff]  }
 0x1d9   :  { %2928 = vmatmul.mubr.bf16.gmra.mrb[108].mxu1 %v5246_v18 }
 0x1da   :  { %3378 = vmatmul.mubr.bf16.gmra.mrb[44].mxu0 %v5247_v20  ;;  %2935 = vmatprep.mubr.bf16.mxu1 %v5248_v21  ;;  %v5302_v21 = vld [vmem:[%s7224_s0 + $0x338] ss:$36 sps:$4 sm:$0xff]  }
 0x1db   :  { %3385 = vmatprep.mubr.bf16.mxu0 %v5250_v23 }
 0x1e1   :  { %2936 = vmatmul.mubr.bf16.gmra.mrb[112].mxu1 %v5252_v24  ;;  %v5301_v24 = vld [vmem:[%s7224_s0 + $0x600] ss:$36 sps:$4 sm:$0xff]  }
 0x1e2   :  { %3386 = vmatmul.mubr.bf16.gmra.mrb[48].mxu0 %v5253_v25  ;;  %2943 = vmatprep.mubr.bf16.mxu1 %v5254_v26  ;;  %v5305_v25 = vld [vmem:[%s7224_s0 + $0x380] ss:$36 sps:$4 sm:$0xff]  }
 0x1e3   :  { %3393 = vmatprep.mubr.bf16.mxu0 %v5256_v28  ;;  %v5303_v28 = vld [vmem:[%s7224_s0 + $0x64c] ss:$36 sps:$4 sm:$0xff]  }
 0x1e9   :  { %2944 = vmatmul.mubr.bf16.gmra.mrb[116].mxu1 %v5258_v0 }
 0x1ea   :  { %3394 = vmatmul.mubr.bf16.gmra.mrb[52].mxu0 %v5259_v30  ;;  %2951 = vmatprep.mubr.bf16.mxu1 %v5261_v31  ;;  %v5307_v31 = vld [vmem:[%s7224_s0 + $0x3c8] ss:$36 sps:$4 sm:$0xff]  }
 0x1eb   :  { %3401 = vmatprep.mubr.bf16.mxu0 %v5263_v32 }
 0x1f1   :  { %2952 = vmatmul.mubr.bf16.gmra.mrb[120].mxu1 %v5265_v33  ;;  %v5306_v33 = vld [vmem:[%s7224_s0 + $0x648] ss:$36 sps:$4 sm:$0xff]  }
 0x1f2   :  { %3402 = vmatmul.mubr.bf16.gmra.mrb[56].mxu0 %v5266_v34  ;;  %2959 = vmatprep.mubr.bf16.mxu1 %v5267_v35  ;;  %v5310_v34 = vld [vmem:[%s7224_s0 + $0x410] ss:$36 sps:$4 sm:$0xff]  }
 0x1f3   :  { %3409 = vmatprep.mubr.bf16.mxu0 %v5269_v37  ;;  %v5308_v37 = vld [vmem:[%s7224_s0 + $0x694] ss:$36 sps:$4 sm:$0xff]  }
 0x1f9   :  { %2960 = vmatmul.mubr.bf16.gmra.mrb[124].mxu1 %v5271_v38 }
 0x1fa   :  { %3410 = vmatmul.mubr.bf16.gmra.mrb[60].mxu0 %v5272_v6  ;;  %4384 = vmatprep.mubr.bf16.mxu1 %v5275_v40  ;;  %v5312_v40 = vld [vmem:[%s7224_s0 + $0x458] ss:$36 sps:$4 sm:$0xff]  }
 0x1fb   :  { %3417 = vmatprep.mubr.bf16.mxu0 %v5273_v41 }
 0x201   :  { %4385 = vmatmul.mubr.bf16.vlgmr.msra.gmra.mrb[128].mxu1 %v5277_v42  ;;  %v5311_v42 = vld [vmem:[%s7224_s0 + $0x690] ss:$36 sps:$4 sm:$0xff]  }
 0x202   :  { %3418 = vmatmul.mubr.bf16.gmra.mrb[64].mxu0 %v5276_v43  ;;  %4388 = vmatprep.mubr.bf16.mxu1 %v5280_v45  ;;  %v5315_v43 = vld [vmem:[%s7224_s0 + $0x4a0] ss:$36 sps:$4 sm:$0xff]  }
 0x203   :  { %3425 = vmatprep.mubr.bf16.mxu0 %v5278_v46  ;;  %v5313_v46 = vld [vmem:[%s7224_s0 + $0x6dc] ss:$36 sps:$4 sm:$0xff]  }
 0x209   :  { %4389 = vmatmul.mubr.bf16.gmra.mrb[132].mxu1 %v5282_v47 }
 0x20a   :  { %3426 = vmatmul.mubr.bf16.gmra.mrb[68].mxu0 %v5281_v50  ;;  %4392 = vmatprep.mubr.bf16.mxu1 %v5285_v51  ;;  %v5317_v51 = vld [vmem:[%s7224_s0 + $0x4e8] ss:$36 sps:$4 sm:$0xff]  }
 0x20b   :  { %3433 = vmatprep.mubr.bf16.mxu0 %v5283_v53 }
 0x211   :  { %4393 = vmatmul.mubr.bf16.gmra.mrb[136].mxu1 %v5287_v54  ;;  %v5316_v54 = vld [vmem:[%s7224_s0 + $0x6d8] ss:$36 sps:$4 sm:$0xff]  }
 0x212   :  { %3434 = vmatmul.mubr.bf16.gmra.mrb[72].mxu0 %v5286_v55  ;;  %4396 = vmatprep.mubr.bf16.mxu1 %v5290_v56  ;;  %v5320_v55 = vld [vmem:[%s7224_s0 + $0x530] ss:$36 sps:$4 sm:$0xff]  }
 0x213   :  { %3441 = vmatprep.mubr.bf16.mxu0 %v5288_v58  ;;  %v5318_v58 = vld [vmem:[%s7224_s0 + $0x724] ss:$36 sps:$4 sm:$0xff]  }
 0x214   :  { %v6485_v59 = vpop.f32.mrb[32].mxu1 }
 0x215   :  { %v2779_v61 = vpop.f32.mrb[33].mxu1 }
 0x216   :  { %v6490_v63 = vpop.f32.mrb[34].mxu1 }
 0x217   :  { %v2782_v4 = vpop.f32.mrb[35].mxu1 }
 0x218   :  { %v5321_v4 = vld [vmem:[%s7224_s0 + $0x720] ss:$36 sps:$4 sm:$0xff]  }
 0x219   :  { %4397 = vmatmul.mubr.bf16.gmra.mrb[140].mxu1 %v5292_v62 }
 0x21a   :  { %3442 = vmatmul.mubr.bf16.gmra.mrb[76].mxu0 %v5291_v1  ;;  %4400 = vmatprep.mubr.bf16.mxu1 %v5295_v3  ;;  %v5322_v1 = vld [vmem:[%s7224_s0 + $0x578] ss:$36 sps:$4 sm:$0xff]  }
 0x21b   :  { %3449 = vmatprep.mubr.bf16.mxu0 %v5293_v7  ;;  %v5325_v7 = vld [vmem:[%s7224_s0 + $0x5c0] ss:$36 sps:$4 sm:$0xff]  }
 0x21c   :  { %v6501_v8 = vpop.f32.mrb[36].mxu1 }
 0x21d   :  { %v2787_v9 = vpop.f32.mrb[37].mxu1 }
 0x21e   :  { %v6506_v12 = vpop.f32.mrb[38].mxu1 }
 0x21f   :  { %v2790_v16 = vpop.f32.mrb[39].mxu1 }
 0x220   :  { %v5327_v16 = vld [vmem:[%s7224_s0 + $0x608] ss:$36 sps:$4 sm:$0xff]  }
 0x221   :  { %4401 = vmatmul.mubr.bf16.gmra.mrb[144].mxu1 %v5297_v10  ;;  %v5323_v10 = vld [vmem:[%s7224_s0 + $0x76c] ss:$36 sps:$4 sm:$0xff]  }
 0x222   :  { %3450 = vmatmul.mubr.bf16.gmra.mrb[80].mxu0 %v5296_v13  ;;  %4404 = vmatprep.mubr.bf16.mxu1 %v5300_v15 }
 0x223   :  { %3457 = vmatprep.mubr.bf16.mxu0 %v5298_v17 }
 0x224   :  { %v6517_v18 = vpop.f32.mrb[40].mxu1 }
 0x225   :  { %v2795_v20 = vpop.f32.mrb[41].mxu1 }
 0x226   :  { %v6522_v23 = vpop.f32.mrb[42].mxu1  ;;  %v5326_v20 = vld [vmem:[%s7224_s0 + $0x768] ss:$36 sps:$4 sm:$0xff]  }
 0x227   :  { %v2798_v26 = vpop.f32.mrb[43].mxu1 }
 0x228   :  { %v6616_v26 = vld [vmem:[%s7225_s2] ss:$0 sm:$0xff] }
 0x229   :  { %4405 = vmatmul.mubr.bf16.gmra.mrb[148].mxu1 %v5302_v21  ;;  %v5330_v21 = vld [vmem:[%s7224_s0 + $0x650] ss:$36 sps:$4 sm:$0xff]  }
 0x22a   :  { %3458 = vmatmul.mubr.bf16.gmra.mrb[84].mxu0 %v5301_v24  ;;  %4408 = vmatprep.mubr.bf16.mxu1 %v5305_v25  ;;  %v5328_v25 = vld [vmem:[%s7224_s0 + $0x7b4] ss:$36 sps:$4 sm:$0xff]  }
 0x22b   :  { %3465 = vmatprep.mubr.bf16.mxu0 %v5303_v28  ;;  %v2425_v28 = vadd.f32 %v6616_v26, %v6047_v49  ;;  %v5331_v49 = vld [vmem:[%s7224_s0 + $0x7b0] ss:$36 sps:$4 sm:$0xff]  }
 0x22c   :  { %v6533_v0 = vpop.f32.mrb[44].mxu1 }
 0x22d   :  { %v2803_v30 = vpop.f32.mrb[45].mxu1 }
 0x22e   :  { %v6538_v32 = vpop.f32.mrb[46].mxu1 }
 0x22f   :  { %v2806_v35 = vpop.f32.mrb[47].mxu1 }
 0x230   :  { %v2428_v35 = vadd.f32 %v6616_v26, %v6052_v52 }
 0x231   :  { %4409 = vmatmul.mubr.bf16.gmra.mrb[152].mxu1 %v5307_v31 }
 0x232   :  { %3466 = vmatmul.mubr.bf16.gmra.mrb[88].mxu0 %v5306_v33  ;;  %4412 = vmatprep.mubr.bf16.mxu1 %v5310_v34  ;;  %v5332_v34 = vld [vmem:[%s7224_s0 + $0x698] ss:$36 sps:$4 sm:$0xff]  }
 0x233   :  { %3473 = vmatprep.mubr.bf16.mxu0 %v5308_v37 }
 0x234   :  { %v6549_v38 = vpop.f32.mrb[48].mxu1 }
 0x235   :  { %v2811_v6 = vpop.f32.mrb[49].mxu1 }
 0x236   :  { %v6554_v41 = vpop.f32.mrb[50].mxu1 }
 0x237   :  { %v2814_v45 = vpop.f32.mrb[51].mxu1 }
 0x239   :  { %4413 = vmatmul.mubr.bf16.gmra.mrb[156].mxu1 %v5312_v40 }
 0x23a   :  { %3474 = vmatmul.mubr.bf16.gmra.mrb[92].mxu0 %v5311_v42  ;;  %4416 = vmatprep.mubr.bf16.mxu1 %v5315_v43  ;;  %v5335_v42 = vld [vmem:[%s7224_s0 + $0x6e0] ss:$36 sps:$4 sm:$0xff]  }
 0x23b   :  { %3481 = vmatprep.mubr.bf16.mxu0 %v5313_v46  ;;  %v5333_v46 = vld [vmem:[%s7224_s0 + $0x7fc] ss:$36 sps:$4 sm:$0xff]  }
 0x23c   :  { %v6565_v47 = vpop.f32.mrb[52].mxu1 }
 0x23d   :  { %v2819_v50 = vpop.f32.mrb[53].mxu1 }
 0x23e   :  { %v6570_v53 = vpop.f32.mrb[54].mxu1 }
 0x23f   :  { %v2822_v56 = vpop.f32.mrb[55].mxu1 }
 0x241   :  { %4417 = vmatmul.mubr.bf16.gmra.mrb[160].mxu1 %v5317_v51  ;;  %v2433_v51 = vadd.f32 %v6616_v26, %v6063_v57  ;;  %v5336_v57 = vld [vmem:[%s7224_s0 + $0x7f8] ss:$36 sps:$4 sm:$0xff]  }
 0x242   :  { %3482 = vmatmul.mubr.bf16.gmra.mrb[96].mxu0 %v5316_v54  ;;  %4420 = vmatprep.mubr.bf16.mxu1 %v5320_v55 }
 0x243   :  { %3489 = vmatprep.mubr.bf16.mxu0 %v5318_v58  ;;  %v5337_v58 = vld [vmem:[%s7224_s0 + $0x728] ss:$36 sps:$4 sm:$0xff]  }
 0x244   :  { %v6581_v61 = vpop.f32.mrb[56].mxu1 }
 0x245   :  { %v2827_v62 = vpop.f32.mrb[57].mxu1 }
 0x246   :  { %v6586_v3 = vpop.f32.mrb[58].mxu1  ;;  %v2436_v62 = vadd.f32 %v6616_v26, %v6068_v60 }
 0x247   :  { %v2830_v9 = vpop.f32.mrb[59].mxu1 }
 0x248   :  { %v5340_v9 = vld [vmem:[%s7224_s0 + $0x770] ss:$36 sps:$4 sm:$0xff]  }
 0x249   :  { %4421 = vmatmul.mubr.bf16.gmra.mrb[164].mxu1 %v5322_v1 }
 0x24a   :  { %3490 = vmatmul.mubr.bf16.gmra.mrb[100].mxu0 %v5321_v4  ;;  %4424 = vmatprep.mubr.bf16.mxu1 %v5325_v7 }
 0x24b   :  { %3497 = vmatprep.mubr.bf16.mxu0 %v5323_v10 }
 0x24c   :  { %v6597_v13 = vpop.f32.mrb[60].mxu1 }
 0x24d   :  { %v2835_v15 = vpop.f32.mrb[61].mxu1 }
 0x24e   :  { %v6602_v17 = vpop.f32.mrb[62].mxu1 }
 0x24f   :  { %v2838_v24 = vpop.f32.mrb[63].mxu1 }
 0x251   :  { %4425 = vmatmul.mubr.bf16.gmra.mrb[168].mxu1 %v5327_v16  ;;  %v5338_v16 = vld [vmem:[%s7224_s0 + $0x844] ss:$36 sps:$4 sm:$0xff]  }
 0x252   :  { %3498 = vmatmul.mubr.bf16.gmra.mrb[104].mxu0 %v5326_v20  ;;  %4428 = vmatprep.mubr.bf16.mxu1 %v5330_v21  ;;  %v2441_v21 = vadd.f32 %v6616_v26, %v6079_v2  ;;  %v5341_v2 = vld [vmem:[%s7224_s0 + $0x840] ss:$36 sps:$4 sm:$0xff]  }
 0x253   :  { %3505 = vmatprep.mubr.bf16.mxu0 %v5328_v25 }
 0x254   :  { %v6620_v30 = vpop.f32.mrb[64].mxu1 }
 0x255   :  { %v3291_v31 = vpop.f32.mrb[0].mxu0  ;;  %v2843_v33 = vpop.f32.mrb[65].mxu1 }
 0x256   :  { %v6627_v37 = vadd.f32 %v3291_v31, %v2425_v28  ;;  %v3293_v6 = vpop.f32.mrb[1].mxu0  ;;  %v6629_v40 = vpop.f32.mrb[66].mxu1  ;;  %v5342_v31 = vld [vmem:[%s7224_s0 + $0x7b8] ss:$36 sps:$4 sm:$0xff]   ;;  %v2444_v33 = vadd.f32 %v6616_v26, %v6084_v5 }
 0x257   :  { %v3294_v43 = vpop.f32.mrb[2].mxu0  ;;  %v2846_v45 = vpop.f32.mrb[67].mxu1 }
 0x258   :  { %v6640_v52 = vadd.f32 %v3294_v43, %v2428_v35  ;;  %v3296_v50 = vpop.f32.mrb[3].mxu0  ;;  %v5343_v45 = vld [vmem:[%s7224_s0 + $0x88c] ss:$36 sps:$4 sm:$0xff]  }
 0x259   :  { %4429 = vmatmul.mubr.bf16.gmra.mrb[172].mxu1 %v5332_v34  ;;  %v2449_v50 = vadd.f32 %v6616_v26, %v6095_v11  ;;  %v5346_v11 = vld [vmem:[%s7224_s0 + $0x888] ss:$36 sps:$4 sm:$0xff]  }
 0x25a   :  { %3506 = vmatmul.mubr.bf16.gmra.mrb[108].mxu0 %v5331_v49  ;;  %4432 = vmatprep.mubr.bf16.mxu1 %v5335_v42  ;;  %v5345_v49 = vld [vmem:[%s7224_s0 + $0x800] ss:$36 sps:$4 sm:$0xff]  }
 0x25b   :  { %3513 = vmatprep.mubr.bf16.mxu0 %v5333_v46 }
 0x25c   :  { %v6644_v54 = vpop.f32.mrb[68].mxu1 }
 0x25d   :  { %v3299_v55 = vpop.f32.mrb[4].mxu0  ;;  %v2851_v56 = vpop.f32.mrb[69].mxu1 }
 0x25e   :  { %v6651_v1 = vadd.f32 %v3299_v55, %v2433_v51  ;;  %v3301_v4 = vpop.f32.mrb[5].mxu0  ;;  %v6653_v7 = vpop.f32.mrb[70].mxu1 }
 0x25f   :  { %v3302_v10 = vpop.f32.mrb[6].mxu0  ;;  %v2854_v15 = vpop.f32.mrb[71].mxu1 }
 0x260   :  { %v6664_v60 = vadd.f32 %v3302_v10, %v2436_v62  ;;  %v3304_v20 = vpop.f32.mrb[7].mxu0  ;;  %v2452_v62 = vadd.f32 %v6616_v26, %v6100_v14  ;;  %v5350_v10 = vld [vmem:[%s7224_s0 + $0x890] ss:$36 sps:$4 sm:$0xff]  }
 0x261   :  { %4433 = vmatmul.mubr.bf16.gmra.mrb[176].mxu1 %v5337_v58  ;;  %v5347_v58 = vld [vmem:[%s7224_s0 + $0x848] ss:$36 sps:$4 sm:$0xff]   ;;  %v5348_v20 = vld [vmem:[%s7224_s0 + $0x8d4] ss:$36 sps:$4 sm:$0xff]  }
 0x262   :  { %3514 = vmatmul.mubr.bf16.gmra.mrb[112].mxu0 %v5336_v57  ;;  %4436 = vmatprep.mubr.bf16.mxu1 %v5340_v9 }
 0x263   :  { %3521 = vmatprep.mubr.bf16.mxu0 %v5338_v16 }
 0x264   :  { %v6668_v24 = vpop.f32.mrb[72].mxu1 }
 0x265   :  { %v3307_v25 = vpop.f32.mrb[8].mxu0  ;;  %v2859_v28 = vpop.f32.mrb[73].mxu1 }
 0x266   :  { %v6675_v34 = vadd.f32 %v3307_v25, %v2441_v21  ;;  %v3309_v35 = vpop.f32.mrb[9].mxu0  ;;  %v6677_v6 = vpop.f32.mrb[74].mxu1  ;;  %v2457_v25 = vadd.f32 %v6616_v26, %v6111_v19  ;;  %v5351_v19 = vld [vmem:[%s7224_s0 + $0x8d0] ss:$36 sps:$4 sm:$0xff]  }
 0x267   :  { %v3310_v42 = vpop.f32.mrb[10].mxu0  ;;  %v2862_v43 = vpop.f32.mrb[75].mxu1  ;;  %v5352_v35 = vld [vmem:[%s7224_s0 + $0x8d8] ss:$36 sps:$4 sm:$0xff]  }
 0x268   :  { %v6688_v5 = vadd.f32 %v3310_v42, %v2444_v33  ;;  %v3312_v46 = vpop.f32.mrb[11].mxu0 }
 0x269   :  { %4437 = vmatmul.mubr.bf16.gmra.mrb[180].mxu1 %v5342_v31 }
 0x26a   :  { %3522 = vmatmul.mubr.bf16.gmra.mrb[116].mxu0 %v5341_v2  ;;  %4440 = vmatprep.mubr.bf16.mxu1 %v5345_v49  ;;  %v2460_v2 = vadd.f32 %v6616_v26, %v6116_v22 }
 0x26b   :  { %3529 = vmatprep.mubr.bf16.mxu0 %v5343_v45 }
 0x26c   :  { %v6692_v51 = vpop.f32.mrb[76].mxu1 }
 0x26d   :  { %v3315_v55 = vpop.f32.mrb[12].mxu0  ;;  %v2867_v56 = vpop.f32.mrb[77].mxu1 }
 0x26e   :  { %v6699_v4 = vadd.f32 %v3315_v55, %v2449_v50  ;;  %v3317_v57 = vpop.f32.mrb[13].mxu0  ;;  %v6701_v9 = vpop.f32.mrb[78].mxu1  ;;  %v2465_v56 = vadd.f32 %v6616_v26, %v6127_v27  ;;  %v2473_v27 = vadd.f32 %v6616_v26, %v6150_v36  ;;  %v2481_v36 = vadd.f32 %v6616_v26, %v6169_v44 }
 0x26f   :  { %v3318_v15 = vpop.f32.mrb[14].mxu0  ;;  %v2870_v16 = vpop.f32.mrb[79].mxu1  ;;  %v2468_v57 = vadd.f32 %v6616_v26, %v6132_v29  ;;  %v2476_v29 = vadd.f32 %v6616_v26, %v6155_v39  ;;  %v2484_v39 = vadd.f32 %v6616_v26, %v6177_v48  ;;  %v4512_v44 = vadd.f32 %v6616_v26, %v6485_v59 }
 0x270   :  { %v6712_v14 = vadd.f32 %v3318_v15, %v2452_v62  ;;  %v3320_v21 = vpop.f32.mrb[15].mxu0  ;;  %v4514_v48 = vadd.f32 %v6616_v26, %v6490_v63  ;;  %v4516_v59 = vadd.f32 %v6616_v26, %v6501_v8  ;;  %v4518_v63 = vadd.f32 %v6616_v26, %v6506_v12 }
 0x271   :  { %4441 = vmatmul.mubr.bf16.gmra.mrb[184].mxu1 %v5347_v58  ;;  %v4520_v8 = vadd.f32 %v6616_v26, %v6517_v18  ;;  %v4522_v12 = vadd.f32 %v6616_v26, %v6522_v23  ;;  %v4524_v18 = vadd.f32 %v6616_v26, %v6533_v0  ;;  %v4526_v23 = vadd.f32 %v6616_v26, %v6538_v32 }
 0x272   :  { %3530 = vmatmul.mubr.bf16.gmra.mrb[120].mxu0 %v5346_v11  ;;  %4444 = vmatprep.mubr.bf16.mxu1 %v5350_v10  ;;  %v4528_v0 = vadd.f32 %v6616_v26, %v6549_v38  ;;  %v4530_v32 = vadd.f32 %v6616_v26, %v6554_v41  ;;  %v4532_v38 = vadd.f32 %v6616_v26, %v6565_v47 }
 0x273   :  { %3537 = vmatprep.mubr.bf16.mxu0 %v5348_v20  ;;  %v4534_v41 = vadd.f32 %v6616_v26, %v6570_v53  ;;  %v4536_v47 = vadd.f32 %v6616_v26, %v6581_v61  ;;  %v4538_v53 = vadd.f32 %v6616_v26, %v6586_v3  ;;  %v4540_v61 = vadd.f32 %v6616_v26, %v6597_v13 }
 0x274   :  { %v6716_v28 = vpop.f32.mrb[80].mxu1  ;;  %v4542_v3 = vadd.f32 %v6616_v26, %v6602_v17  ;;  %v4544_v13 = vadd.f32 %v6616_v26, %v6620_v30  ;;  %v4546_v17 = vadd.f32 %v6616_v26, %v6629_v40 }
 0x275   :  { %v3323_v31 = vpop.f32.mrb[16].mxu0  ;;  %v2875_v33 = vpop.f32.mrb[81].mxu1 }
 0x276   :  { %v6723_v49 = vadd.f32 %v3323_v31, %v2457_v25  ;;  %v3325_v42 = vpop.f32.mrb[17].mxu0  ;;  %v6725_v43 = vpop.f32.mrb[82].mxu1 }
 0x277   :  { %v3326_v45 = vpop.f32.mrb[18].mxu0  ;;  %v2878_v46 = vpop.f32.mrb[83].mxu1 }
 0x278   :  { %v6730_v50 = vadd.f32 %v3326_v45, %v2460_v2  ;;  %v3328_v55 = vpop.f32.mrb[19].mxu0 }
 0x279   :  { %4445 = vmatmul.mubr.bf16.gmra.mrb[188].mxu1 %v5352_v35 }
 0x27a   :  { %3538 = vmatmul.mubr.bf16.gmra.mrb[124].mxu0 %v5351_v19 }
 0x27c   :  { %v6734_v22 = vpop.f32.mrb[84].mxu1 }
 0x27d   :  { %v3331_v58 = vpop.f32.mrb[20].mxu0  ;;  %v2883_v62 = vpop.f32.mrb[85].mxu1 }
 0x27e   :  { %v6738_v11 = vadd.f32 %v3331_v58, %v2465_v56  ;;  %v3333_v10 = vpop.f32.mrb[21].mxu0  ;;  %v6740_v15 = vpop.f32.mrb[86].mxu1 }
 0x27f   :  { %v3334_v16 = vpop.f32.mrb[22].mxu0  ;;  %v2886_v20 = vpop.f32.mrb[87].mxu1 }
 0x280   :  { %v6742_v21 = vadd.f32 %v3334_v16, %v2468_v57  ;;  %v3336_v25 = vpop.f32.mrb[23].mxu0 }
 0x284   :  { %v6746_v31 = vpop.f32.mrb[88].mxu1 }
 0x285   :  { %v3339_v33 = vpop.f32.mrb[24].mxu0  ;;  %v2891_v35 = vpop.f32.mrb[89].mxu1 }
 0x286   :  { %v6750_v2 = vadd.f32 %v3339_v33, %v2473_v27  ;;  %v3341_v42 = vpop.f32.mrb[25].mxu0  ;;  %v6752_v19 = vpop.f32.mrb[90].mxu1 }
 0x287   :  { %v3342_v45 = vpop.f32.mrb[26].mxu0  ;;  %v2894_v46 = vpop.f32.mrb[91].mxu1 }
 0x288   :  { %v6754_v55 = vadd.f32 %v3342_v45, %v2476_v29  ;;  %v3344_v56 = vpop.f32.mrb[27].mxu0 }
 0x28c   :  { %v6758_v58 = vpop.f32.mrb[92].mxu1 }
 0x28d   :  { %v3347_v62 = vpop.f32.mrb[28].mxu0  ;;  %v2899_v57 = vpop.f32.mrb[93].mxu1 }
 0x28e   :  { %v6762_v10 = vadd.f32 %v3347_v62, %v2481_v36  ;;  %v3349_v16 = vpop.f32.mrb[29].mxu0  ;;  %v6764_v20 = vpop.f32.mrb[94].mxu1 }
 0x28f   :  { %v3350_v25 = vpop.f32.mrb[30].mxu0  ;;  %v2902_v27 = vpop.f32.mrb[95].mxu1 }
 0x290   :  { %v6766_v33 = vadd.f32 %v3350_v25, %v2484_v39  ;;  %v3352_v35 = vpop.f32.mrb[31].mxu0 }
 0x294   :  { %v6770_v29 = vpop.f32.mrb[96].mxu1 }
 0x295   :  { %7227 = vst [vmem:[#allocation2_spill] sm:$0xff] %v6770_v29  ;;  %v3355_v42 = vpop.f32.mrb[32].mxu0  ;;  %v2907_v45 = vpop.f32.mrb[97].mxu1 }
 0x296   :  { %v6774_v46 = vadd.f32 %v4512_v44, %v3355_v42  ;;  %v3357_v56 = vpop.f32.mrb[33].mxu0  ;;  %v6776_v36 = vpop.f32.mrb[98].mxu1 }
 0x297   :  { %7228 = vst [vmem:[#allocation3_spill] sm:$0xff] %v6776_v36  ;;  %v3358_v62 = vpop.f32.mrb[34].mxu0  ;;  %v2910_v57 = vpop.f32.mrb[99].mxu1 }
 0x298   :  { %v6778_v39 = vadd.f32 %v4514_v48, %v3358_v62  ;;  %v3360_v16 = vpop.f32.mrb[35].mxu0 }
 0x29c   :  { %v6782_v25 = vpop.f32.mrb[100].mxu1 }
 0x29d   :  { %7229 = vst [vmem:[#allocation4_spill] sm:$0xff] %v6782_v25  ;;  %v3363_v27 = vpop.f32.mrb[36].mxu0  ;;  %v2915_v35 = vpop.f32.mrb[101].mxu1 }
 0x29e   :  { %v6786_v44 = vadd.f32 %v4516_v59, %v3363_v27  ;;  %v3365_v42 = vpop.f32.mrb[37].mxu0  ;;  %v6788_v45 = vpop.f32.mrb[102].mxu1 }
 0x29f   :  { %7230 = vst [vmem:[#allocation5_spill] sm:$0xff] %v6788_v45  ;;  %v3366_v56 = vpop.f32.mrb[38].mxu0  ;;  %v2918_v57 = vpop.f32.mrb[103].mxu1 }
 0x2a0   :  { %v6790_v48 = vadd.f32 %v4518_v63, %v3366_v56  ;;  %v3368_v62 = vpop.f32.mrb[39].mxu0 }
 0x2a4   :  { %v6794_v16 = vpop.f32.mrb[104].mxu1 }
 0x2a5   :  { %7231 = vst [vmem:[#allocation6_spill] sm:$0xff] %v6794_v16  ;;  %v3371_v25 = vpop.f32.mrb[40].mxu0  ;;  %v2923_v35 = vpop.f32.mrb[105].mxu1 }
 0x2a6   :  { %v6798_v59 = vadd.f32 %v4520_v8, %v3371_v25  ;;  %v3373_v27 = vpop.f32.mrb[41].mxu0  ;;  %v6800_v42 = vpop.f32.mrb[106].mxu1 }
 0x2a7   :  { %7232 = vst [vmem:[#allocation7_spill] sm:$0xff] %v6800_v42  ;;  %v3374_v45 = vpop.f32.mrb[42].mxu0  ;;  %v2926_v57 = vpop.f32.mrb[107].mxu1 }
 0x2a8   :  { %v6802_v63 = vadd.f32 %v4522_v12, %v3374_v45  ;;  %v3376_v56 = vpop.f32.mrb[43].mxu0 }
 0x2ac   :  { %v6806_v62 = vpop.f32.mrb[108].mxu1 }
 0x2ad   :  { %7233 = vst [vmem:[#allocation8_spill] sm:$0xff] %v6806_v62  ;;  %v3379_v16 = vpop.f32.mrb[44].mxu0  ;;  %v2931_v35 = vpop.f32.mrb[109].mxu1 }
 0x2ae   :  { %v6810_v25 = vadd.f32 %v4524_v18, %v3379_v16  ;;  %v3381_v8 = vpop.f32.mrb[45].mxu0  ;;  %v6812_v27 = vpop.f32.mrb[110].mxu1 }
 0x2af   :  { %7234 = vst [vmem:[#allocation9_spill] sm:$0xff] %v6812_v27  ;;  %v3382_v42 = vpop.f32.mrb[46].mxu0  ;;  %v2934_v57 = vpop.f32.mrb[111].mxu1 }
 0x2b0   :  { %v6814_v45 = vadd.f32 %v4526_v23, %v3382_v42  ;;  %v3384_v12 = vpop.f32.mrb[47].mxu0 }
 0x2b4   :  { %v6818_v56 = vpop.f32.mrb[112].mxu1 }
 0x2b5   :  { %7235 = vst [vmem:[#allocation10_spill] sm:$0xff] %v6818_v56  ;;  %v3387_v62 = vpop.f32.mrb[48].mxu0  ;;  %v2939_v35 = vpop.f32.mrb[113].mxu1 }
 0x2b6   :  { %v6822_v16 = vadd.f32 %v4528_v0, %v3387_v62  ;;  %v3389_v18 = vpop.f32.mrb[49].mxu0  ;;  %v6824_v8 = vpop.f32.mrb[114].mxu1 }
 0x2b7   :  { %7236 = vst [vmem:[#allocation11_spill] sm:$0xff] %v6824_v8  ;;  %v3390_v27 = vpop.f32.mrb[50].mxu0  ;;  %v2942_v57 = vpop.f32.mrb[115].mxu1 }
 0x2b8   :  { %v6826_v42 = vadd.f32 %v4530_v32, %v3390_v27  ;;  %v3392_v23 = vpop.f32.mrb[51].mxu0 }
 0x2bc   :  { %v6830_v12 = vpop.f32.mrb[116].mxu1 }
 0x2bd   :  { %7237 = vst [vmem:[#allocation12_spill] sm:$0xff] %v6830_v12  ;;  %v3395_v56 = vpop.f32.mrb[52].mxu0  ;;  %v2947_v35 = vpop.f32.mrb[117].mxu1 }
 0x2be   :  { %v6834_v62 = vadd.f32 %v4532_v38, %v3395_v56  ;;  %v3397_v0 = vpop.f32.mrb[53].mxu0  ;;  %v6836_v18 = vpop.f32.mrb[118].mxu1 }
 0x2bf   :  { %7238 = vst [vmem:[#allocation13_spill] sm:$0xff] %v6836_v18  ;;  %v3398_v8 = vpop.f32.mrb[54].mxu0  ;;  %v2950_v57 = vpop.f32.mrb[119].mxu1 }
 0x2c0   :  { %v6838_v27 = vadd.f32 %v4534_v41, %v3398_v8  ;;  %v3400_v32 = vpop.f32.mrb[55].mxu0 }
 0x2c4   :  { %v6842_v23 = vpop.f32.mrb[120].mxu1 }
 0x2c5   :  { %7239 = vst [vmem:[#allocation14_spill] sm:$0xff] %v6842_v23  ;;  %v3403_v12 = vpop.f32.mrb[56].mxu0  ;;  %v2955_v35 = vpop.f32.mrb[121].mxu1 }
 0x2c6   :  { %v6846_v56 = vadd.f32 %v4536_v47, %v3403_v12  ;;  %v3405_v38 = vpop.f32.mrb[57].mxu0  ;;  %v6848_v0 = vpop.f32.mrb[122].mxu1 }
 0x2c7   :  { %7240 = vst [vmem:[#allocation15_spill] sm:$0xff] %v6848_v0  ;;  %v3406_v18 = vpop.f32.mrb[58].mxu0  ;;  %v2958_v57 = vpop.f32.mrb[123].mxu1 }
 0x2c8   :  { %v6850_v8 = vadd.f32 %v4538_v53, %v3406_v18  ;;  %v3408_v41 = vpop.f32.mrb[59].mxu0 }
 0x2ca   :  { %7241 = vst [vmem:[#allocation16_spill] sm:$0xff] %v6850_v8 }
 0x2cc   :  { %v6854_v32 = vpop.f32.mrb[124].mxu1 }
 0x2cd   :  { %7242 = vst [vmem:[#allocation17_spill] sm:$0xff] %v6854_v32  ;;  %v3411_v23 = vpop.f32.mrb[60].mxu0  ;;  %v2963_v35 = vpop.f32.mrb[125].mxu1 }
 0x2ce   :  { %v6858_v12 = vadd.f32 %v4540_v61, %v3411_v23  ;;  %v3413_v47 = vpop.f32.mrb[61].mxu0  ;;  %v6860_v38 = vpop.f32.mrb[126].mxu1 }
 0x2cf   :  { %7243 = vst [vmem:[#allocation18_spill] sm:$0xff] %v6860_v38  ;;  %v3414_v0 = vpop.f32.mrb[62].mxu0  ;;  %v2966_v57 = vpop.f32.mrb[127].mxu1 }
 0x2d0   :  { %v6862_v18 = vadd.f32 %v4542_v3, %v3414_v0  ;;  %v3416_v53 = vpop.f32.mrb[63].mxu0 }
 0x2d4   :  { %v4386_v41 = vpop.f32.mrb[128].mxu1 }
 0x2d5   :  { %v3419_v32 = vpop.f32.mrb[64].mxu0  ;;  %v3589_v35 = vadd.f32 %v6651_v1, %v4386_v41  ;;  %v3580_v36 = vpop.f32.mrb[129].mxu1 }
 0x2d6   :  { %v6869_v23 = vadd.f32 %v4544_v13, %v3419_v32  ;;  %v3421_v61 = vpop.f32.mrb[65].mxu0  ;;  %v3581_v47 = vadd.f32 %v6627_v37, %v3580_v36  ;;  %v4387_v57 = vpop.f32.mrb[130].mxu1 }
 0x2d7   :  { %v3837_v0 = vmax.f32 %v3589_v35, 0.0  ;;  %v3422_v3 = vpop.f32.mrb[66].mxu0  ;;  %v3592_v53 = vadd.f32 %v6664_v60, %v4387_v57  ;;  %v3583_v38 = vpop.f32.mrb[131].mxu1  ;;  %v4548_v60 = vadd.f32 %v6616_v26, %v6644_v54 }
 0x2d8   :  { %v3835_v30 = vmax.f32 %v3581_v47, 0.0  ;;  %v6873_v29 = vadd.f32 %v4546_v17, %v3422_v3  ;;  %v3424_v8 = vpop.f32.mrb[67].mxu0  ;;  %v3584_v1 = vadd.f32 %v6640_v52, %v3583_v38  ;;  %v4550_v38 = vadd.f32 %v6616_v26, %v6653_v7 }
 0x2d9   :  { %3901 = vst [vmem:[%s7226_s3 + $0x10] sm:$0xff] %v3837_v0  ;;  %v3838_v40 = vmax.f32 %v3592_v53, 0.0 }
 0x2da   :  { %3899 = vst [vmem:[%s7226_s3] sm:$0xff] %v3835_v30  ;;  %v3836_v37 = vmax.f32 %v3584_v1, 0.0 }
 0x2db   :  { %3902 = vst [vmem:[%s7226_s3 + $0x18] sm:$0xff] %v3838_v40 }
 0x2dc   :  { %3900 = vst [vmem:[%s7226_s3 + $0x8] sm:$0xff] %v3836_v37  ;;  %v4390_v52 = vpop.f32.mrb[132].mxu1  ;;  %v4554_v37 = vadd.f32 %v6616_v26, %v6677_v6 }
 0x2dd   :  { %v3427_v36 = vpop.f32.mrb[68].mxu0  ;;  %v3605_v8 = vadd.f32 %v6699_v4, %v4390_v52  ;;  %v3596_v32 = vpop.f32.mrb[133].mxu1 }
 0x2de   :  { %v6893_v13 = vadd.f32 %v4548_v60, %v3427_v36  ;;  %v3429_v41 = vpop.f32.mrb[69].mxu0  ;;  %v3597_v35 = vadd.f32 %v6675_v34, %v3596_v32  ;;  %v4391_v17 = vpop.f32.mrb[134].mxu1 }
 0x2df   :  { %v3841_v61 = vmax.f32 %v3605_v8, 0.0  ;;  %v3430_v54 = vpop.f32.mrb[70].mxu0  ;;  %v3608_v47 = vadd.f32 %v6712_v14, %v4391_v17  ;;  %v3599_v57 = vpop.f32.mrb[135].mxu1  ;;  %v4552_v14 = vadd.f32 %v6616_v26, %v6668_v24 }
 0x2e0   :  { %v3839_v0 = vmax.f32 %v3597_v35, 0.0  ;;  %v6897_v3 = vadd.f32 %v4550_v38, %v3430_v54  ;;  %v3432_v53 = vpop.f32.mrb[71].mxu0  ;;  %v3600_v4 = vadd.f32 %v6688_v5, %v3599_v57 }
 0x2e1   :  { %3905 = vst [vmem:[%s7226_s3 + $0x30] sm:$0xff] %v3841_v61  ;;  %v3842_v7 = vmax.f32 %v3608_v47, 0.0 }
 0x2e2   :  { %3903 = vst [vmem:[%s7226_s3 + $0x20] sm:$0xff] %v3839_v0  ;;  %v3840_v34 = vmax.f32 %v3600_v4, 0.0  ;;  %v4558_v0 = vadd.f32 %v6616_v26, %v6701_v9 }
 0x2e3   :  { %3906 = vst [vmem:[%s7226_s3 + $0x38] sm:$0xff] %v3842_v7 }
 0x2e4   :  { %3904 = vst [vmem:[%s7226_s3 + $0x28] sm:$0xff] %v3840_v34  ;;  %v4394_v5 = vpop.f32.mrb[136].mxu1 }
 0x2e5   :  { %v3435_v30 = vpop.f32.mrb[72].mxu0  ;;  %v3621_v1 = vadd.f32 %v6738_v11, %v4394_v5  ;;  %v3612_v40 = vpop.f32.mrb[137].mxu1 }
 0x2e6   :  { %v6917_v60 = vadd.f32 %v4552_v14, %v3435_v30  ;;  %v3437_v52 = vpop.f32.mrb[73].mxu0  ;;  %v3613_v36 = vadd.f32 %v6723_v49, %v3612_v40  ;;  %v4395_v8 = vpop.f32.mrb[138].mxu1 }
 0x2e7   :  { %v3845_v32 = vmax.f32 %v3621_v1, 0.0  ;;  %v3438_v24 = vpop.f32.mrb[74].mxu0  ;;  %v3624_v38 = vadd.f32 %v6742_v21, %v4395_v8  ;;  %v3615_v41 = vpop.f32.mrb[139].mxu1  ;;  %v4556_v21 = vadd.f32 %v6616_v26, %v6692_v51 }
 0x2e8   :  { %v3843_v35 = vmax.f32 %v3613_v36, 0.0  ;;  %v6921_v17 = vadd.f32 %v4554_v37, %v3438_v24  ;;  %v3440_v61 = vpop.f32.mrb[75].mxu0  ;;  %v3616_v11 = vadd.f32 %v6730_v50, %v3615_v41 }
 0x2e9   :  { %3909 = vst [vmem:[%s7226_s3 + $0x50] sm:$0xff] %v3845_v32  ;;  %v3846_v6 = vmax.f32 %v3624_v38, 0.0  ;;  %v4562_v32 = vadd.f32 %v6616_v26, %v6725_v43 }
 0x2ea   :  { %3907 = vst [vmem:[%s7226_s3 + $0x40] sm:$0xff] %v3843_v35  ;;  %v3844_v49 = vmax.f32 %v3616_v11, 0.0 }
 0x2eb   :  { %3910 = vst [vmem:[%s7226_s3 + $0x58] sm:$0xff] %v3846_v6 }
 0x2ec   :  { %3908 = vst [vmem:[%s7226_s3 + $0x48] sm:$0xff] %v3844_v49  ;;  %v4398_v50 = vpop.f32.mrb[140].mxu1 }
 0x2ed   :  { %v3443_v54 = vpop.f32.mrb[76].mxu0  ;;  %v3637_v47 = vadd.f32 %v6762_v10, %v4398_v50  ;;  %v3628_v57 = vpop.f32.mrb[141].mxu1 }
 0x2ee   :  { %v6941_v53 = vadd.f32 %v4556_v21, %v3443_v54  ;;  %v3445_v4 = vpop.f32.mrb[77].mxu0  ;;  %v3629_v7 = vadd.f32 %v6750_v2, %v3628_v57  ;;  %v4399_v34 = vpop.f32.mrb[142].mxu1 }
 0x2ef   :  { %v3849_v14 = vmax.f32 %v3637_v47, 0.0  ;;  %v3446_v51 = vpop.f32.mrb[78].mxu0  ;;  %v3640_v5 = vadd.f32 %v6766_v33, %v4399_v34  ;;  %v3631_v30 = vpop.f32.mrb[143].mxu1  ;;  %v4560_v33 = vadd.f32 %v6616_v26, %v6716_v28 }
 0x2f0   :  { %v3847_v1 = vmax.f32 %v3629_v7, 0.0  ;;  %v6945_v40 = vadd.f32 %v4558_v0, %v3446_v51  ;;  %v3448_v37 = vpop.f32.mrb[79].mxu0  ;;  %v3632_v10 = vadd.f32 %v6754_v55, %v3631_v30  ;;  %v4566_v0 = vadd.f32 %v6616_v26, %v6740_v15 }
 0x2f1   :  { %3913 = vst [vmem:[%s7226_s3 + $0x70] sm:$0xff] %v3849_v14  ;;  %v3850_v9 = vmax.f32 %v3640_v5, 0.0 }
 0x2f2   :  { %3911 = vst [vmem:[%s7226_s3 + $0x60] sm:$0xff] %v3847_v1  ;;  %v3848_v2 = vmax.f32 %v3632_v10, 0.0 }
 0x2f3   :  { %3914 = vst [vmem:[%s7226_s3 + $0x78] sm:$0xff] %v3850_v9 }
 0x2f4   :  { %3912 = vst [vmem:[%s7226_s3 + $0x68] sm:$0xff] %v3848_v2  ;;  %v4402_v55 = vpop.f32.mrb[144].mxu1 }
 0x2f5   :  { %v3451_v52 = vpop.f32.mrb[80].mxu0  ;;  %v3653_v36 = vadd.f32 %v6786_v44, %v4402_v55  ;;  %v3644_v8 = vpop.f32.mrb[145].mxu1  ;;  %v4570_v55 = vadd.f32 %v6616_v26, %v6752_v19 }
 0x2f6   :  { %v6965_v24 = vadd.f32 %v4560_v33, %v3451_v52  ;;  %v3453_v38 = vpop.f32.mrb[81].mxu0  ;;  %v3645_v41 = vadd.f32 %v6774_v46, %v3644_v8  ;;  %v4403_v35 = vpop.f32.mrb[146].mxu1 }
 0x2f7   :  { %v3853_v61 = vmax.f32 %v3653_v36, 0.0  ;;  %v3454_v28 = vpop.f32.mrb[82].mxu0  ;;  %v3656_v11 = vadd.f32 %v6790_v48, %v4403_v35  ;;  %v3647_v6 = vpop.f32.mrb[147].mxu1  ;;  %v4564_v48 = vadd.f32 %v6616_v26, %v6734_v22 }
 0x2f8   :  { %v3851_v49 = vmax.f32 %v3645_v41, 0.0  ;;  %v6969_v21 = vadd.f32 %v4562_v32, %v3454_v28  ;;  %v3456_v50 = vpop.f32.mrb[83].mxu0  ;;  %v3648_v44 = vadd.f32 %v6778_v39, %v3647_v6 }
 0x2f9   :  { %3917 = vst [vmem:[%s7226_s3 + $0x90] sm:$0xff] %v3853_v61  ;;  %v3854_v43 = vmax.f32 %v3656_v11, 0.0 }
 0x2fa   :  { %3915 = vst [vmem:[%s7226_s3 + $0x80] sm:$0xff] %v3851_v49  ;;  %v3852_v46 = vmax.f32 %v3648_v44, 0.0  ;;  %v4574_v44 = vadd.f32 %v6616_v26, %v6764_v20 }
 0x2fb   :  { %3918 = vst [vmem:[%s7226_s3 + $0x98] sm:$0xff] %v3854_v43 }
 0x2fc   :  { %3916 = vst [vmem:[%s7226_s3 + $0x88] sm:$0xff] %v3852_v46  ;;  %v4406_v39 = vpop.f32.mrb[148].mxu1 }
 0x2fd   :  { %v3459_v54 = vpop.f32.mrb[84].mxu0  ;;  %v3669_v47 = vadd.f32 %v6810_v25, %v4406_v39  ;;  %v3660_v57 = vpop.f32.mrb[149].mxu1 }
 0x2fe   :  { %v6989_v4 = vadd.f32 %v4564_v48, %v3459_v54  ;;  %v3461_v7 = vpop.f32.mrb[85].mxu0  ;;  %v3661_v34 = vadd.f32 %v6798_v59, %v3660_v57  ;;  %v4407_v14 = vpop.f32.mrb[150].mxu1 }
 0x2ff   :  { %v3857_v51 = vmax.f32 %v3669_v47, 0.0  ;;  %v3462_v22 = vpop.f32.mrb[86].mxu0  ;;  %v3672_v5 = vadd.f32 %v6814_v45, %v4407_v14  ;;  %v3663_v30 = vpop.f32.mrb[151].mxu1  ;;  %v4568_v45 = vadd.f32 %v6616_v26, %v6746_v31 }
 0x300   :  { %v3855_v1 = vmax.f32 %v3661_v34, 0.0  ;;  %v6993_v37 = vadd.f32 %v4566_v0, %v3462_v22  ;;  %v3464_v10 = vpop.f32.mrb[87].mxu0  ;;  %v3664_v25 = vadd.f32 %v6802_v63, %v3663_v30 }
 0x301   :  { %3921 = vst [vmem:[%s7226_s3 + $0xb0] sm:$0xff] %v3857_v51  ;;  %v3858_v15 = vmax.f32 %v3672_v5, 0.0  ;;  %v7246_v10 = vld [vmem:[#allocation3_spill] sm:$0xff] }
 0x302   :  { %3919 = vst [vmem:[%s7226_s3 + $0xa0] sm:$0xff] %v3855_v1  ;;  %v3856_v59 = vmax.f32 %v3664_v25, 0.0  ;;  %v4578_v25 = vadd.f32 %v6616_v26, %v7246_v10 }
 0x303   :  { %3922 = vst [vmem:[%s7226_s3 + $0xb8] sm:$0xff] %v3858_v15 }
 0x304   :  { %3920 = vst [vmem:[%s7226_s3 + $0xa8] sm:$0xff] %v3856_v59  ;;  %v4410_v63 = vpop.f32.mrb[152].mxu1 }
 0x305   :  { %v3467_v9 = vpop.f32.mrb[88].mxu0  ;;  %v3685_v2 = vadd.f32 %v6834_v62, %v4410_v63  ;;  %v3676_v33 = vpop.f32.mrb[153].mxu1 }
 0x306   :  { %v7013_v52 = vadd.f32 %v4568_v45, %v3467_v9  ;;  %v3469_v36 = vpop.f32.mrb[89].mxu0  ;;  %v3677_v8 = vadd.f32 %v6822_v16, %v3676_v33  ;;  %v4411_v32 = vpop.f32.mrb[154].mxu1 }
 0x307   :  { %v3861_v38 = vmax.f32 %v3685_v2, 0.0  ;;  %v3470_v31 = vpop.f32.mrb[90].mxu0  ;;  %v3688_v41 = vadd.f32 %v6838_v27, %v4411_v32  ;;  %v3679_v35 = vpop.f32.mrb[155].mxu1  ;;  %v4572_v27 = vadd.f32 %v6616_v26, %v6758_v58 }
 0x308   :  { %v3859_v61 = vmax.f32 %v3677_v8, 0.0  ;;  %v7017_v28 = vadd.f32 %v4570_v55, %v3470_v31  ;;  %v3472_v11 = vpop.f32.mrb[91].mxu0  ;;  %v3680_v62 = vadd.f32 %v6826_v42, %v3679_v35 }
 0x309   :  { %3925 = vst [vmem:[%s7226_s3 + $0xd0] sm:$0xff] %v3861_v38  ;;  %v3862_v19 = vmax.f32 %v3688_v41, 0.0  ;;  %v7248_v11 = vld [vmem:[#allocation5_spill] sm:$0xff] }
 0x30a   :  { %3923 = vst [vmem:[%s7226_s3 + $0xc0] sm:$0xff] %v3859_v61  ;;  %v3860_v16 = vmax.f32 %v3680_v62, 0.0  ;;  %v4582_v62 = vadd.f32 %v6616_v26, %v7248_v11 }
 0x30b   :  { %3926 = vst [vmem:[%s7226_s3 + $0xd8] sm:$0xff] %v3862_v19 }
 0x30c   :  { %3924 = vst [vmem:[%s7226_s3 + $0xc8] sm:$0xff] %v3860_v16  ;;  %v4414_v42 = vpop.f32.mrb[156].mxu1 }
 0x30d   :  { %v3475_v6 = vpop.f32.mrb[92].mxu0  ;;  %v3701_v49 = vadd.f32 %v6858_v12, %v4414_v42  ;;  %v3692_v50 = vpop.f32.mrb[157].mxu1  ;;  %v7244_v12 = vld [vmem:[#allocation16_spill] sm:$0xff] }
 0x30e   :  { %v7037_v43 = vadd.f32 %v4572_v27, %v3475_v6  ;;  %v3477_v46 = vpop.f32.mrb[93].mxu0  ;;  %v3693_v48 = vadd.f32 %v6846_v56, %v3692_v50  ;;  %v4415_v39 = vpop.f32.mrb[158].mxu1 }
 0x30f   :  { %v3865_v54 = vmax.f32 %v3701_v49, 0.0  ;;  %v3478_v58 = vpop.f32.mrb[94].mxu0  ;;  %v3704_v47 = vadd.f32 %v6862_v18, %v4415_v39  ;;  %v3695_v57 = vpop.f32.mrb[159].mxu1  ;;  %v7245_v18 = vld [vmem:[#allocation2_spill] sm:$0xff] }
 0x310   :  { %v3863_v0 = vmax.f32 %v3693_v48, 0.0  ;;  %v7041_v7 = vadd.f32 %v4574_v44, %v3478_v58  ;;  %v3480_v34 = vpop.f32.mrb[95].mxu0  ;;  %v3696_v14 = vadd.f32 %v7244_v12, %v3695_v57  ;;  %v4576_v51 = vadd.f32 %v6616_v26, %v7245_v18 }
 0x311   :  { %3929 = vst [vmem:[%s7226_s3 + $0xf0] sm:$0xff] %v3865_v54  ;;  %v3866_v20 = vmax.f32 %v3704_v47, 0.0  ;;  %v7250_v34 = vld [vmem:[#allocation7_spill] sm:$0xff] }
 0x312   :  { %3927 = vst [vmem:[%s7226_s3 + $0xe0] sm:$0xff] %v3863_v0  ;;  %v3864_v56 = vmax.f32 %v3696_v14, 0.0  ;;  %v4586_v12 = vadd.f32 %v6616_v26, %v7250_v34 }
 0x313   :  { %3930 = vst [vmem:[%s7226_s3 + $0xf8] sm:$0xff] %v3866_v20 }
 0x314   :  { %3928 = vst [vmem:[%s7226_s3 + $0xe8] sm:$0xff] %v3864_v56  ;;  %v4418_v22 = vpop.f32.mrb[160].mxu1 }
 0x315   :  { %v3483_v5 = vpop.f32.mrb[96].mxu0  ;;  %v3717_v30 = vadd.f32 %v6893_v13, %v4418_v22  ;;  %v3708_v1 = vpop.f32.mrb[161].mxu1 }
 0x316   :  { %v7061_v15 = vadd.f32 %v4576_v51, %v3483_v5  ;;  %v3485_v59 = vpop.f32.mrb[97].mxu0  ;;  %v3709_v45 = vadd.f32 %v6869_v23, %v3708_v1  ;;  %v4419_v63 = vpop.f32.mrb[162].mxu1 }
 0x317   :  { %v3869_v9 = vmax.f32 %v3717_v30, 0.0  ;;  %v3486_v2 = vpop.f32.mrb[98].mxu0  ;;  %v3720_v33 = vadd.f32 %v6897_v3, %v4419_v63  ;;  %v3711_v55 = vpop.f32.mrb[163].mxu1  ;;  %v7247_v3 = vld [vmem:[#allocation4_spill] sm:$0xff] }
 0x318   :  { %v3867_v36 = vmax.f32 %v3709_v45, 0.0  ;;  %v7065_v8 = vadd.f32 %v4578_v25, %v3486_v2  ;;  %v3488_v32 = vpop.f32.mrb[99].mxu0  ;;  %v3712_v13 = vadd.f32 %v6873_v29, %v3711_v55  ;;  %v4580_v31 = vadd.f32 %v6616_v26, %v7247_v3 }
 0x319   :  { %3933 = vst [vmem:[%s7226_s3 + $0x110] sm:$0xff] %v3869_v9  ;;  %v3870_v38 = vmax.f32 %v3720_v33, 0.0  ;;  %v7252_v33 = vld [vmem:[#allocation9_spill] sm:$0xff] }
 0x31a   :  { %3931 = vst [vmem:[%s7226_s3 + $0x100] sm:$0xff] %v3867_v36  ;;  %v3868_v23 = vmax.f32 %v3712_v13, 0.0  ;;  %v4590_v55 = vadd.f32 %v6616_v26, %v7252_v33 }
 0x31b   :  { %3934 = vst [vmem:[%s7226_s3 + $0x118] sm:$0xff] %v3870_v38 }
 0x31c   :  { %3932 = vst [vmem:[%s7226_s3 + $0x108] sm:$0xff] %v3868_v23  ;;  %v4422_v29 = vpop.f32.mrb[164].mxu1 }
 0x31d   :  { %v3491_v41 = vpop.f32.mrb[100].mxu0  ;;  %v3733_v35 = vadd.f32 %v6941_v53, %v4422_v29  ;;  %v3724_v61 = vpop.f32.mrb[165].mxu1 }
 0x31e   :  { %v7085_v19 = vadd.f32 %v4580_v31, %v3491_v41  ;;  %v3493_v16 = vpop.f32.mrb[101].mxu0  ;;  %v3725_v27 = vadd.f32 %v6917_v60, %v3724_v61  ;;  %v4423_v42 = vpop.f32.mrb[166].mxu1 }
 0x31f   :  { %v3873_v6 = vmax.f32 %v3733_v35, 0.0  ;;  %v3494_v49 = vpop.f32.mrb[102].mxu0  ;;  %v3736_v50 = vadd.f32 %v6945_v40, %v4423_v42  ;;  %v3727_v44 = vpop.f32.mrb[167].mxu1  ;;  %v7249_v40 = vld [vmem:[#allocation6_spill] sm:$0xff] }
 0x320   :  { %v3871_v46 = vmax.f32 %v3725_v27, 0.0  ;;  %v7089_v48 = vadd.f32 %v4582_v62, %v3494_v49  ;;  %v3496_v39 = vpop.f32.mrb[103].mxu0  ;;  %v3728_v53 = vadd.f32 %v6921_v17, %v3727_v44  ;;  %v4584_v58 = vadd.f32 %v6616_v26, %v7249_v40 }
 0x321   :  { %3937 = vst [vmem:[%s7226_s3 + $0x130] sm:$0xff] %v3873_v6  ;;  %v3874_v54 = vmax.f32 %v3736_v50, 0.0  ;;  %v7254_v6 = vld [vmem:[#allocation11_spill] sm:$0xff] }
 0x322   :  { %3935 = vst [vmem:[%s7226_s3 + $0x120] sm:$0xff] %v3871_v46  ;;  %v3872_v60 = vmax.f32 %v3728_v53, 0.0 }
 0x323   :  { %3938 = vst [vmem:[%s7226_s3 + $0x138] sm:$0xff] %v3874_v54 }
 0x324   :  { %3936 = vst [vmem:[%s7226_s3 + $0x128] sm:$0xff] %v3872_v60  ;;  %v4426_v17 = vpop.f32.mrb[168].mxu1 }
 0x325   :  { %v3499_v47 = vpop.f32.mrb[104].mxu0  ;;  %v3749_v57 = vadd.f32 %v6989_v4, %v4426_v17  ;;  %v3740_v0 = vpop.f32.mrb[169].mxu1 }
 0x326   :  { %v7109_v14 = vadd.f32 %v4584_v58, %v3499_v47  ;;  %v3501_v20 = vpop.f32.mrb[105].mxu0  ;;  %v3741_v56 = vadd.f32 %v6965_v24, %v3740_v0  ;;  %v4427_v18 = vpop.f32.mrb[170].mxu1 }
 0x327   :  { %v3877_v51 = vmax.f32 %v3749_v57, 0.0  ;;  %v3502_v22 = vpop.f32.mrb[106].mxu0  ;;  %v3752_v5 = vadd.f32 %v6993_v37, %v4427_v18  ;;  %v3743_v30 = vpop.f32.mrb[171].mxu1  ;;  %v7251_v37 = vld [vmem:[#allocation8_spill] sm:$0xff] }
 0x328   :  { %v3875_v1 = vmax.f32 %v3741_v56, 0.0  ;;  %v7113_v10 = vadd.f32 %v4586_v12, %v3502_v22  ;;  %v3504_v25 = vpop.f32.mrb[107].mxu0  ;;  %v3744_v4 = vadd.f32 %v6969_v21, %v3743_v30  ;;  %v4588_v45 = vadd.f32 %v6616_v26, %v7251_v37  ;;  %v7256_v56 = vld [vmem:[#allocation13_spill] sm:$0xff] }
 0x329   :  { %3941 = vst [vmem:[%s7226_s3 + $0x150] sm:$0xff] %v3877_v51  ;;  %v3878_v59 = vmax.f32 %v3752_v5, 0.0 }
 0x32a   :  { %3939 = vst [vmem:[%s7226_s3 + $0x140] sm:$0xff] %v3875_v1  ;;  %v3876_v24 = vmax.f32 %v3744_v4, 0.0 }
 0x32b   :  { %3942 = vst [vmem:[%s7226_s3 + $0x158] sm:$0xff] %v3878_v59 }
 0x32c   :  { %3940 = vst [vmem:[%s7226_s3 + $0x148] sm:$0xff] %v3876_v24  ;;  %v4430_v21 = vpop.f32.mrb[172].mxu1 }
 0x32d   :  { %v3507_v63 = vpop.f32.mrb[108].mxu0  ;;  %v3765_v9 = vadd.f32 %v7037_v43, %v4430_v21  ;;  %v3756_v2 = vpop.f32.mrb[173].mxu1  ;;  %v7148_v43 = vld [vmem:[%s7225_s2] ss:$0 sm:$0xff] }
 0x32e   :  { %v4589_v36 = vadd.f32 %v4588_v45, %v3507_v63  ;;  %v3509_v32 = vpop.f32.mrb[109].mxu0  ;;  %v3757_v13 = vadd.f32 %v7013_v52, %v3756_v2  ;;  %v4431_v38 = vpop.f32.mrb[174].mxu1  ;;  %v4594_v49 = vadd.f32 %v7148_v43, %v7254_v6  ;;  %v4598_v18 = vadd.f32 %v7148_v43, %v7256_v56 }
 0x32f   :  { %v3881_v23 = vmax.f32 %v3765_v9, 0.0  ;;  %v3510_v3 = vpop.f32.mrb[110].mxu0  ;;  %v3768_v31 = vadd.f32 %v7041_v7, %v4431_v38  ;;  %v3759_v29 = vpop.f32.mrb[175].mxu1  ;;  %v7257_v9 = vld [vmem:[#allocation14_spill] sm:$0xff]  ;;  %v7258_v32 = vld [vmem:[#allocation15_spill] sm:$0xff] }
 0x330   :  { %v3879_v41 = vmax.f32 %v3757_v13, 0.0  ;;  %v4591_v35 = vadd.f32 %v4590_v55, %v3510_v3  ;;  %v3512_v61 = vpop.f32.mrb[111].mxu0  ;;  %v3760_v11 = vadd.f32 %v7017_v28, %v3759_v29  ;;  %v7253_v28 = vld [vmem:[#allocation10_spill] sm:$0xff]  ;;  %v4600_v2 = vadd.f32 %v7148_v43, %v7257_v9 }
 0x331   :  { %3945 = vst [vmem:[%s7226_s3 + $0x170] sm:$0xff] %v3881_v23  ;;  %v3882_v26 = vmax.f32 %v3768_v31, 0.0  ;;  %v4592_v7 = vadd.f32 %v7148_v43, %v7253_v28  ;;  %v4602_v13 = vadd.f32 %v7148_v43, %v7258_v32 }
 0x332   :  { %3943 = vst [vmem:[%s7226_s3 + $0x160] sm:$0xff] %v3879_v41  ;;  %v3880_v52 = vmax.f32 %v3760_v11, 0.0 }
 0x333   :  { %3946 = vst [vmem:[%s7226_s3 + $0x178] sm:$0xff] %v3882_v26 }
 0x334   :  { %3944 = vst [vmem:[%s7226_s3 + $0x168] sm:$0xff] %v3880_v52  ;;  %v4434_v62 = vpop.f32.mrb[176].mxu1 }
 0x335   :  { %v3515_v16 = vpop.f32.mrb[112].mxu0  ;;  %v3781_v27 = vadd.f32 %v7085_v19, %v4434_v62  ;;  %v3772_v42 = vpop.f32.mrb[177].mxu1 }
 0x336   :  { %v4593_v50 = vadd.f32 %v4592_v7, %v3515_v16  ;;  %v3517_v44 = vpop.f32.mrb[113].mxu0  ;;  %v3773_v46 = vadd.f32 %v7061_v15, %v3772_v42  ;;  %v4435_v39 = vpop.f32.mrb[178].mxu1  ;;  %v7259_v16 = vld [vmem:[#allocation17_spill] sm:$0xff] }
 0x337   :  { %v3885_v53 = vmax.f32 %v3781_v27, 0.0  ;;  %v3518_v54 = vpop.f32.mrb[114].mxu0  ;;  %v3784_v60 = vadd.f32 %v7089_v48, %v4435_v39  ;;  %v3775_v40 = vpop.f32.mrb[179].mxu1  ;;  %v7255_v48 = vld [vmem:[#allocation12_spill] sm:$0xff]  ;;  %v4604_v27 = vadd.f32 %v7148_v43, %v7259_v16 }
 0x338   :  { %v3883_v58 = vmax.f32 %v3773_v46, 0.0  ;;  %v4595_v17 = vadd.f32 %v4594_v49, %v3518_v54  ;;  %v3520_v47 = vpop.f32.mrb[115].mxu0  ;;  %v3776_v57 = vadd.f32 %v7065_v8, %v3775_v40  ;;  %v4596_v0 = vadd.f32 %v7148_v43, %v7255_v48 }
 0x339   :  { %3949 = vst [vmem:[%s7226_s3 + $0x190] sm:$0xff] %v3885_v53  ;;  %v3886_v19 = vmax.f32 %v3784_v60, 0.0 }
 0x33a   :  { %3947 = vst [vmem:[%s7226_s3 + $0x180] sm:$0xff] %v3883_v58  ;;  %v3884_v15 = vmax.f32 %v3776_v57, 0.0 }
 0x33b   :  { %3950 = vst [vmem:[%s7226_s3 + $0x198] sm:$0xff] %v3886_v19 }
 0x33c   :  { %3948 = vst [vmem:[%s7226_s3 + $0x188] sm:$0xff] %v3884_v15  ;;  %v4438_v8 = vpop.f32.mrb[180].mxu1 }
 0x33d   :  { %v3523_v34 = vpop.f32.mrb[116].mxu0  ;;  %v3797_v12 = vadd.f32 %v4589_v36, %v4438_v8  ;;  %v3788_v20 = vpop.f32.mrb[181].mxu1 }
 0x33e   :  { %v4597_v51 = vadd.f32 %v4596_v0, %v3523_v34  ;;  %v3525_v22 = vpop.f32.mrb[117].mxu0  ;;  %v3789_v5 = vadd.f32 %v7109_v14, %v3788_v20  ;;  %v4439_v30 = vpop.f32.mrb[182].mxu1 }
 0x33f   :  { %v3889_v1 = vmax.f32 %v3797_v12, 0.0  ;;  %v3526_v25 = vpop.f32.mrb[118].mxu0  ;;  %v3800_v4 = vadd.f32 %v4591_v35, %v4439_v30  ;;  %v3791_v59 = vpop.f32.mrb[183].mxu1 }
 0x340   :  { %v3887_v24 = vmax.f32 %v3789_v5, 0.0  ;;  %v4599_v37 = vadd.f32 %v4598_v18, %v3526_v25  ;;  %v3528_v45 = vpop.f32.mrb[119].mxu0  ;;  %v3792_v21 = vadd.f32 %v7113_v10, %v3791_v59 }
 0x341   :  { %3953 = vst [vmem:[%s7226_s3 + $0x1b0] sm:$0xff] %v3889_v1  ;;  %v3890_v63 = vmax.f32 %v3800_v4, 0.0 }
 0x342   :  { %3951 = vst [vmem:[%s7226_s3 + $0x1a0] sm:$0xff] %v3887_v24  ;;  %v3888_v14 = vmax.f32 %v3792_v21, 0.0 }
 0x343   :  { %3954 = vst [vmem:[%s7226_s3 + $0x1b8] sm:$0xff] %v3890_v63 }
 0x344   :  { %3952 = vst [vmem:[%s7226_s3 + $0x1a8] sm:$0xff] %v3888_v14  ;;  %v4442_v10 = vpop.f32.mrb[184].mxu1 }
 0x345   :  { %v3531_v33 = vpop.f32.mrb[120].mxu0  ;;  %v3813_v55 = vadd.f32 %v4597_v51, %v4442_v10  ;;  %v3804_v36 = vpop.f32.mrb[185].mxu1 }
 0x346   :  { %v4601_v38 = vadd.f32 %v4600_v2, %v3531_v33  ;;  %v3533_v23 = vpop.f32.mrb[121].mxu0  ;;  %v3805_v3 = vadd.f32 %v4593_v50, %v3804_v36  ;;  %v4443_v31 = vpop.f32.mrb[186].mxu1  ;;  %v7260_v50 = vld [vmem:[#allocation18_spill] sm:$0xff] }
 0x347   :  { %v3893_v29 = vmax.f32 %v3813_v55, 0.0  ;;  %v3534_v41 = vpop.f32.mrb[122].mxu0  ;;  %v3816_v35 = vadd.f32 %v4599_v37, %v4443_v31  ;;  %v3807_v61 = vpop.f32.mrb[187].mxu1  ;;  %v4606_v44 = vadd.f32 %v7148_v43, %v7260_v50 }
 0x348   :  { %v3891_v11 = vmax.f32 %v3805_v3, 0.0  ;;  %v4603_v26 = vadd.f32 %v4602_v13, %v3534_v41  ;;  %v3536_v52 = vpop.f32.mrb[123].mxu0  ;;  %v3808_v28 = vadd.f32 %v4595_v17, %v3807_v61 }
 0x349   :  { %3957 = vst [vmem:[%s7226_s3 + $0x1d0] sm:$0xff] %v3893_v29  ;;  %v3894_v7 = vmax.f32 %v3816_v35, 0.0 }
 0x34a   :  { %3955 = vst [vmem:[%s7226_s3 + $0x1c0] sm:$0xff] %v3891_v11  ;;  %v3892_v62 = vmax.f32 %v3808_v28, 0.0 }
 0x34b   :  { %3958 = vst [vmem:[%s7226_s3 + $0x1d8] sm:$0xff] %v3894_v7 }
 0x34c   :  { %3956 = vst [vmem:[%s7226_s3 + $0x1c8] sm:$0xff] %v3892_v62  ;;  %v4446_v42 = vpop.f32.mrb[188].mxu1 }
 0x34d   :  { %v3539_v6 = vpop.f32.mrb[124].mxu0  ;;  %v3820_v49 = vpop.f32.mrb[189].mxu1 }
 0x34e   :  { %v4605_v46 = vadd.f32 %v4604_v27, %v3539_v6  ;;  %v3541_v39 = vpop.f32.mrb[125].mxu0  ;;  %v3821_v53 = vadd.f32 %v4601_v38, %v3820_v49  ;;  %v4447_v54 = vpop.f32.mrb[190].mxu1 }
 0x34f   :  { %v3542_v60 = vpop.f32.mrb[126].mxu0  ;;  %v3823_v40 = vpop.f32.mrb[191].mxu1 }
 0x350   :  { %v3829_v58 = vadd.f32 %v4605_v46, %v4446_v42  ;;  %v3895_v17 = vmax.f32 %v3821_v53, 0.0  ;;  %v4607_v47 = vadd.f32 %v4606_v44, %v3542_v60  ;;  %v3544_v57 = vpop.f32.mrb[127].mxu0  ;;  %v3824_v19 = vadd.f32 %v4603_v26, %v3823_v40 }
 0x352   :  { %v3897_v15 = vmax.f32 %v3829_v58, 0.0  ;;  %3959 = vst [vmem:[%s7226_s3 + $0x1e0] sm:$0xff] %v3895_v17  ;;  %v3832_v48 = vadd.f32 %v4607_v47, %v4447_v54  ;;  %v3896_v0 = vmax.f32 %v3824_v19, 0.0 }
 0x354   :  { %3961 = vst [vmem:[%s7226_s3 + $0x1f0] sm:$0xff] %v3897_v15  ;;  %v3898_v43 = vmax.f32 %v3832_v48, 0.0  ;;  %3960 = vst [vmem:[%s7226_s3 + $0x1e8] sm:$0xff] %v3896_v0 }
 0x356   :  { %3962 = vst [vmem:[%s7226_s3 + $0x1f8] sm:$0xff] %v3898_v43 }

</bundles_post_ra>
